<compile_context>
chip_gen: v5e
topology: v5e:2x2
jax: 0.10.0
libtpu: 0.0.40
codegen_flags: <defaults>
</compile_context>

<pallas_src>
import functools
import numpy as np
import jax
import jax.numpy as jnp
from jax import lax
from jax.experimental import pallas as pl
from jax.experimental.pallas import tpu as pltpu


# ---------------------------- in-kernel helpers ----------------------------

def _sigmoid(z):
    # exact identity sigmoid(z) = 0.5*(1 + tanh(z/2)); keeps the transcendental on the EUP.
    return 0.5 * (jnp.tanh(0.5 * z) + 1.0)


def _bilstm_layer(x_bf16, wih_ref, bih_ref, whh_ref, rev_ref,
                  wof_ref, wob_ref, bo_ref, xg_ref, h_ref, *, T, B, H):
    """One fused BidirectionalLSTM layer (nn.LSTM(bidirectional=True) + Linear(2H->out)).

    Lane layout (fixed at param-prep time):
      gate columns of wih/whh/bih : [ i_f,i_b | f_f,f_b | g_f,g_b | o_f,o_b ]   (8H lanes)
      merged state h, c           : [ *_f | *_b ]                               (2H lanes)
    Forward and backward streams share one recurrent dot and one cell per step; the
    backward stream is time-reversed with small permutation matmuls (prologue: inputs,
    epilogue: hidden states) instead of per-step reversed indexing.
    """
    H2, H4 = 2 * H, 4 * H
    rev = rev_ref[...]                                            # [TB, TB] time-block reversal

    # Input projection for BOTH directions in one lane-dense dot; then reverse the backward
    # gate columns in time so the serial loop reads a single row block per step.
    xg = jnp.dot(x_bf16, wih_ref[...], preferred_element_type=jnp.float32) + bih_ref[...]
    xg_ref[:, :H4] = xg[:, :H4]
    xg_ref[:, H4:] = jnp.dot(rev, xg[:, H4:], preferred_element_type=jnp.float32)

    whh = whh_ref[...]                                            # [2H, 8H] block-diagonal
    h = jnp.zeros((B, H2), jnp.float32)                           # [h_f | h_b]
    c = jnp.zeros((B, H2), jnp.float32)                           # [c_f | c_b]

    # TODO(synk): switch to lax.fori_loop(..., unroll=k) once T grows beyond ~32 to bound
    # vreg live ranges; at T<=16 the fully static loop is optimal.
    for t in range(T):
        g = xg_ref[t * B:(t + 1) * B, :] + jnp.dot(
            h.astype(jnp.bfloat16), whh, preferred_element_type=jnp.float32)   # [B, 8H]
        sif = _sigmoid(g[:, 0:2 * H2])                            # [i | f], one 128-lane group
        gg = jnp.tanh(g[:, 2 * H2:3 * H2])                        # g
        oo = _sigmoid(g[:, 3 * H2:4 * H2])                        # o
        c = sif[:, H2:] * c + sif[:, :H2] * gg
        h = oo * jnp.tanh(c)
        h_ref[t * B:(t + 1) * B, :] = h                           # ONE store / step (both dirs)

    # concat([h_fwd(t), h_bwd(t)]) @ W_out  ==  hs @ [Wf;0] + (rev @ hs) @ [0;Wb]
    hs = h_ref[...]
    hs_r = jnp.dot(rev, hs, preferred_element_type=jnp.float32)   # bwd states back to real time
    return (jnp.dot(hs.astype(jnp.bfloat16), wof_ref[...], preferred_element_type=jnp.float32)
            + jnp.dot(hs_r.astype(jnp.bfloat16), wob_ref[...], preferred_element_type=jnp.float32)
            + bo_ref[...])


def _text_recognition_kernel(p_ref, wconv_ref, bconv_ref, rev_ref, btp_ref,
                             wih1_ref, bih1_ref, whh1_ref, wo1f_ref, wo1b_ref, bo1_ref,
                             wih2_ref, bih2_ref, whh2_ref, wo2f_ref, wo2b_ref, bo2_ref,
                             o_ref,
                             feat_ref, xg_ref, h_ref, *, T, B, H, CF, HF):
    # ---- backbone stand-in: block-diag (over Hf) conv3x3/s2 matmul + ReLU ----
    # Column-block tiled (128 lanes per block) to bound vreg pressure; bf16 written
    # directly to VMEM scratch (no wrapper-side casts / HBM round trips).
    p_bf = p_ref[...].astype(jnp.bfloat16)                        # [TB, Hf*K]
    for j in range(HF):
        blk = (jnp.dot(p_bf, wconv_ref[:, j * CF:(j + 1) * CF],
                       preferred_element_type=jnp.float32) + bconv_ref[...])
        feat_ref[:, j * CF:(j + 1) * CF] = jnp.maximum(blk, 0.0).astype(jnp.bfloat16)

    # ---- neck: BiLSTM x2 (permute + AdaptiveAvgPool2d folded into wih1 at prep time) ----
    y1 = _bilstm_layer(feat_ref[...], wih1_ref, bih1_ref, whh1_ref, rev_ref,
                       wo1f_ref, wo1b_ref, bo1_ref, xg_ref, h_ref, T=T, B=B, H=H)
    logits = _bilstm_layer(y1.astype(jnp.bfloat16), wih2_ref, bih2_ref, whh2_ref, rev_ref,
                           wo2f_ref, wo2b_ref, bo2_ref, xg_ref, h_ref, T=T, B=B, H=H)

    # ---- head (CTC, eval): rows -> batch-major via permutation matmul, exact softmax ----
    # Padded class columns carry bias -1e30 at prep time -> probability exactly 0.
    # (.cpu().detach() in the PyTorch post_processing is a host-side no-op.)
    logits_bm = jnp.dot(btp_ref[...], logits, preferred_element_type=jnp.float32)
    m = jnp.max(logits_bm, axis=-1, keepdims=True)
    e = jnp.exp(logits_bm - m)
    o_ref[...] = e / jnp.sum(e, axis=-1, keepdims=True)


# ---------------------------- model forward (wrapper) ----------------------------

def text_recognition_forward(x, prep, *, num_classes):
    B = x.shape[0]
    wf_exp = -(-x.shape[3] // 2)

    # im2col for the conv3x3/stride-2 stand-in, emitted directly in (W, N, H, C) layout so
    # the time-major flattening below is a plain row-major reshape (no transpose op).
    patches = lax.conv_general_dilated_patches(
        x, filter_shape=(3, 3), window_strides=(2, 2), padding='SAME',
        dimension_numbers=('NCHW', 'OIHW', 'WNHC'))
    if patches.shape[0] != wf_exp:          # static-shape guard on spatial-dim ordering
        patches = patches.transpose(2, 1, 0, 3)
    T, _, HF, K = patches.shape
    p2 = patches.reshape(T * B, HF * K)     # rows (w, b), cols (h, k)

    H = prep['lstm1']['whh'].shape[0] // 2
    CF = prep['b_conv'].shape[1]
    ncls_pad = prep['lstm2']['bo'].shape[1]

    vmem = lambda: pl.BlockSpec(memory_space=pltpu.MemorySpace.VMEM)
    kern = functools.partial(_text_recognition_kernel, T=T, B=B, H=H, CF=CF, HF=HF)
    # Total VMEM footprint ~1.2 MiB -> grid-less full residency is fine on v5e/v6e/v7x.
    # TODO(synk): add a T/row tiling grid (or emit_pipeline) if the model is scaled up.
    probs = pl.pallas_call(
        kern,
        out_shape=jax.ShapeDtypeStruct((B * T, ncls_pad), jnp.float32),
        in_specs=[vmem() for _ in range(17)],
        out_specs=vmem(),
        scratch_shapes=[
            pltpu.VMEM((T * B, HF * CF), jnp.bfloat16),   # backbone features (bf16)
            pltpu.VMEM((T * B, 8 * H), jnp.float32),      # gate pre-activations (both dirs)
            pltpu.VMEM((T * B, 2 * H), jnp.float32),      # merged fwd|bwd hidden states
        ],
    )(p2, prep['w_conv'], prep['b_conv'], prep['rev'], prep['btp'],
      prep['lstm1']['wih'], prep['lstm1']['bih'], prep['lstm1']['whh'],
      prep['lstm1']['wo_f'], prep['lstm1']['wo_b'], prep['lstm1']['bo'],
      prep['lstm2']['wih'], prep['lstm2']['bih'], prep['lstm2']['whh'],
      prep['lstm2']['wo_f'], prep['lstm2']['wo_b'], prep['lstm2']['bo'])

    return probs.reshape(B, T, ncls_pad)[:, :, :num_classes]      # [B, T, NCLS]


# ---------------------------- parameter init ----------------------------

def init_params(key, cin, cf, output_size, hidden, num_classes):
    ks = iter(jax.random.split(key, 32))

    def u(shape, scale):
        return jax.random.uniform(next(ks), shape, jnp.float32, -scale, scale)

    params = {}
    k_patch = cin * 9
    sc = 1.0 / np.sqrt(k_patch)
    params['w_conv'] = u((k_patch, cf), sc)      # stand-in conv weight (flattened-patch space)
    params['b_conv'] = u((cf,), sc)

    def lstm_layer(d_in):
        s = 1.0 / np.sqrt(hidden)
        layer = {}
        for d in ('f', 'b'):
            layer[f'wih_{d}'] = u((4 * hidden, d_in), s)     # PyTorch gate order (i, f, g, o)
            layer[f'whh_{d}'] = u((4 * hidden, hidden), s)
            layer[f'bih_{d}'] = u((4 * hidden,), s)
            layer[f'bhh_{d}'] = u((4 * hidden,), s)
        sl = 1.0 / np.sqrt(2 * hidden)
        layer['w_lin'] = u((hidden, 2 * hidden), sl)
        layer['b_lin'] = u((hidden,), sl)
        return layer

    params['lstm1'] = lstm_layer(output_size)
    params['lstm2'] = lstm_layer(hidden)
    sh = 1.0 / np.sqrt(hidden)
    params['w_head'] = u((num_classes, hidden), sh)
    params['b_head'] = u((num_classes,), sh)
    return params


# ---------------------------- kernel-ready param prep ----------------------------

def _merge_gate_cols(w_f, w_b, H):
    # [4H, Din] per direction (PyTorch i,f,g,o row order) -> [Din, 8H] with columns ordered
    # gate-type-major / direction-minor: [i_f,i_b | f_f,f_b | g_f,g_b | o_f,o_b].
    cols = []
    for k in range(4):
        cols.append(w_f[k * H:(k + 1) * H].T)
        cols.append(w_b[k * H:(k + 1) * H].T)
    return jnp.concatenate(cols, axis=1)


def _merge_recurrent_cols(whh_f, whh_b, H):
    # Block-diagonal merged recurrent weight [2H, 8H]: rows 0:H (fwd h) feed fwd gate
    # columns only, rows H:2H (bwd h) feed bwd gate columns only.
    z = jnp.zeros((H, H), jnp.float32)
    cols = []
    for k in range(4):
        cols.append(jnp.concatenate([whh_f[k * H:(k + 1) * H].T, z], axis=0))
        cols.append(jnp.concatenate([z, whh_b[k * H:(k + 1) * H].T], axis=0))
    return jnp.concatenate(cols, axis=1)


def _time_reverse_perm(T, B):
    # row (t*B + b) <- row ((T-1-t)*B + b)
    P = np.zeros((T * B, T * B), np.float32)
    idx = np.arange(T * B)
    t, b = idx // B, idx % B
    P[idx, (T - 1 - t) * B + b] = 1.0
    return jnp.asarray(P)


def _batch_major_perm(T, B):
    # row (b*T + t) <- row (t*B + b)
    P = np.zeros((T * B, T * B), np.float32)
    idx = np.arange(T * B)
    b, t = idx // T, idx % T
    P[idx, t * B + b] = 1.0
    return jnp.asarray(P)


def make_pool_matrix(cf, hf, s_out):
    # permute(0,3,1,2) + AdaptiveAvgPool2d((S,1)).squeeze(3): adaptive bins over channels CF
    # and mean over Hf, expressed as ONE [Hf*CF, S] matrix with 1/Hf folded in.
    P = np.zeros((hf, cf, s_out), np.float32)
    for s in range(s_out):
        start = (s * cf) // s_out
        end = -(-((s + 1) * cf) // s_out)
        P[:, start:end, s] = 1.0 / ((end - start) * hf)
    return jnp.asarray(P.reshape(hf * cf, s_out))


def _prep_layer(p, H, pre=None, head_w=None, head_b=None, ncls_pad=None):
    wih = _merge_gate_cols(p['wih_f'], p['wih_b'], H)                     # [Din, 8H]
    if pre is not None:
        wih = pre @ wih                                                   # fold adaptive pool
    bih = _merge_gate_cols((p['bih_f'] + p['bhh_f'])[:, None],
                           (p['bih_b'] + p['bhh_b'])[:, None], H)         # [1, 8H]
    whh = _merge_recurrent_cols(p['whh_f'], p['whh_b'], H)                # [2H, 8H]

    wf, wb, b = p['w_lin'][:, :H].T, p['w_lin'][:, H:].T, p['b_lin']      # [H, out], [out]
    if head_w is not None:
        # Compose the BiLSTM output Linear with the CTC head Linear (both linear, no act).
        wf, wb = wf @ head_w, wb @ head_w
        b = b @ head_w + head_b
        pad = ncls_pad - b.shape[0]
        wf = jnp.pad(wf, ((0, 0), (0, pad)))
        wb = jnp.pad(wb, ((0, 0), (0, pad)))
        b = jnp.concatenate([b, jnp.full((pad,), -1e30, jnp.float32)])
    # Zero-padded halves [Wf;0] / [0;Wb] so the epilogue needs no lane extracts.
    z = jnp.zeros((H, wf.shape[1]), jnp.float32)
    return dict(
        wih=wih.astype(jnp.bfloat16),
        bih=bih.astype(jnp.float32),
        whh=whh.astype(jnp.bfloat16),
        wo_f=jnp.concatenate([wf, z], axis=0).astype(jnp.bfloat16),       # [2H, out]
        wo_b=jnp.concatenate([z, wb], axis=0).astype(jnp.bfloat16),
        bo=b[None, :].astype(jnp.float32),
    )


def prepare_params(params, *, hf, wf, batch, cf, output_size, hidden, ncls_pad):
    T, B = wf, batch
    prep = {
        # Block-diagonal (over Hf) conv weight so the kernel consumes im2col rows laid out
        # [T*B, Hf*K] directly, with only lane-aligned weight slices inside the kernel.
        'w_conv': jnp.kron(jnp.eye(hf, dtype=jnp.float32),
                           params['w_conv']).astype(jnp.bfloat16),        # [Hf*K, Hf*CF]
        'b_conv': params['b_conv'][None, :].astype(jnp.float32),          # [1, CF]
        'rev': _time_reverse_perm(T, B),                                  # [TB, TB]
        'btp': _batch_major_perm(T, B),                                   # [TB, TB]
    }
    pool = make_pool_matrix(cf, hf, output_size)                          # [Hf*CF, S]
    prep['lstm1'] = _prep_layer(params['lstm1'], hidden, pre=pool)
    prep['lstm2'] = _prep_layer(params['lstm2'], hidden,
                                head_w=params['w_head'].T, head_b=params['b_head'],
                                ncls_pad=ncls_pad)
    return prep


# ---------------------------- main ----------------------------

if __name__ == "__main__":
    B, Cin, Him, Wim = 2, 3, 16, 32      # input image, NCHW
    CF = 128                             # stand-in backbone channels (lane-dense)
    S = 8                                # AdaptiveAvgPool output_size == neck input_size
    HID = 32                             # BiLSTM hidden_size
    NCLS = 16                            # CTC num_classes
    NCLS_PAD = 128                       # lane-padded head width

    Hf, Wf = -(-Him // 2), -(-Wim // 2)  # stride-2 SAME conv stand-in -> feature map size

    key = jax.random.PRNGKey(0)
    kx, kp = jax.random.split(key)
    x = jax.random.normal(kx, (B, Cin, Him, Wim), jnp.float32)
    params = init_params(kp, Cin, CF, S, HID, NCLS)
    prep = prepare_params(params, hf=Hf, wf=Wf, batch=B, cf=CF,
                          output_size=S, hidden=HID, ncls_pad=NCLS_PAD)

    fwd = jax.jit(functools.partial(text_recognition_forward, num_classes=NCLS))
    out = jax.block_until_ready(fwd(x, prep))

    T = Wf                               # sequence length = feature-map width
    assert out.shape == (B, T, NCLS), out.shape
    assert bool(jnp.all(jnp.isfinite(out)))
    assert bool(jnp.allclose(jnp.sum(out, axis=-1), 1.0, atol=1e-3))  # softmax rows sum to 1
    print("KERNEL_OK")
</pallas_src>

<mosaic_0001>
module attributes {stable_mosaic.version = 11 : i64} {
  func.func @_text_recognition_kernel(%arg0: memref<32x216xf32, #tpu.memory_space<vmem>>, %arg1: memref<216x1024xbf16, #tpu.memory_space<vmem>>, %arg2: memref<1x128xf32, #tpu.memory_space<vmem>>, %arg3: memref<32x32xf32, #tpu.memory_space<vmem>>, %arg4: memref<32x32xf32, #tpu.memory_space<vmem>>, %arg5: memref<1024x256xbf16, #tpu.memory_space<vmem>>, %arg6: memref<1x256xf32, #tpu.memory_space<vmem>>, %arg7: memref<64x256xbf16, #tpu.memory_space<vmem>>, %arg8: memref<64x32xbf16, #tpu.memory_space<vmem>>, %arg9: memref<64x32xbf16, #tpu.memory_space<vmem>>, %arg10: memref<1x32xf32, #tpu.memory_space<vmem>>, %arg11: memref<32x256xbf16, #tpu.memory_space<vmem>>, %arg12: memref<1x256xf32, #tpu.memory_space<vmem>>, %arg13: memref<64x256xbf16, #tpu.memory_space<vmem>>, %arg14: memref<64x128xbf16, #tpu.memory_space<vmem>>, %arg15: memref<64x128xbf16, #tpu.memory_space<vmem>>, %arg16: memref<1x128xf32, #tpu.memory_space<vmem>>, %arg17: memref<32x128xf32, #tpu.memory_space<vmem>>, %arg18: memref<32x1024xbf16, #tpu.memory_space<vmem>>, %arg19: memref<32x256xf32, #tpu.memory_space<vmem>>, %arg20: memref<32x64xf32, #tpu.memory_space<vmem>>) attributes {dimension_semantics = [], scalar_prefetch = 0 : i64, scratch_operands = 3 : i64, tpu.core_type = #tpu.core_type<tc>} {
    %c0 = arith.constant 0 : index
    %c0_0 = arith.constant 0 : index
    %0 = vector.load %arg0[%c0, %c0_0] : memref<32x216xf32, #tpu.memory_space<vmem>>, vector<32x216xf32>
    %1 = arith.truncf %0 : vector<32x216xf32> to vector<32x216xbf16>
    %c0_1 = arith.constant 0 : index
    %c0_2 = arith.constant 0 : index
    %2 = vector.load %arg1[%c0_1, %c0_2] : memref<216x1024xbf16, #tpu.memory_space<vmem>>, vector<216x128xbf16>
    %cst = arith.constant dense<0.000000e+00> : vector<32x128xf32>
    %3 = tpu.matmul %1, %2, %cst {dimension_numbers = #tpu.dot_dimension_numbers<[1], [0], [0], [1], [0, 0, 1, 1], [], []>} : vector<32x216xbf16>, vector<216x128xbf16>, vector<32x128xf32> -> vector<32x128xf32>
    %c0_3 = arith.constant 0 : index
    %c0_4 = arith.constant 0 : index
    %4 = vector.load %arg2[%c0_3, %c0_4] : memref<1x128xf32, #tpu.memory_space<vmem>>, vector<1x128xf32>
    %5 = vector.broadcast %4 : vector<1x128xf32> to vector<32x128xf32>
    %6 = arith.addf %3, %5 : vector<32x128xf32>
    %cst_5 = arith.constant 0.000000e+00 : f32
    %7 = vector.broadcast %cst_5 : f32 to vector<32x128xf32>
    %8 = arith.maximumf %6, %7 : vector<32x128xf32>
    %9 = arith.truncf %8 : vector<32x128xf32> to vector<32x128xbf16>
    %c0_6 = arith.constant 0 : index
    %c0_7 = arith.constant 0 : index
    %10 = vector.load %arg18[%c0_6, %c0_7] : memref<32x1024xbf16, #tpu.memory_space<vmem>>, vector<32x128xbf16>
    tpu.vector_store %arg18[%c0_6, %c0_7], %9 {strides = array<i32>} : memref<32x1024xbf16, #tpu.memory_space<vmem>>, vector<32x128xbf16>,
    %c0_8 = arith.constant 0 : index
    %c128 = arith.constant 128 : index
    %11 = vector.load %arg1[%c0_8, %c128] : memref<216x1024xbf16, #tpu.memory_space<vmem>>, vector<216x128xbf16>
    %cst_9 = arith.constant dense<0.000000e+00> : vector<32x128xf32>
    %12 = tpu.matmul %1, %11, %cst_9 {dimension_numbers = #tpu.dot_dimension_numbers<[1], [0], [0], [1], [0, 0, 1, 1], [], []>} : vector<32x216xbf16>, vector<216x128xbf16>, vector<32x128xf32> -> vector<32x128xf32>
    %c0_10 = arith.constant 0 : index
    %c0_11 = arith.constant 0 : index
    %13 = vector.load %arg2[%c0_10, %c0_11] : memref<1x128xf32, #tpu.memory_space<vmem>>, vector<1x128xf32>
    %14 = vector.broadcast %13 : vector<1x128xf32> to vector<32x128xf32>
    %15 = arith.addf %12, %14 : vector<32x128xf32>
    %cst_12 = arith.constant 0.000000e+00 : f32
    %16 = vector.broadcast %cst_12 : f32 to vector<32x128xf32>
    %17 = arith.maximumf %15, %16 : vector<32x128xf32>
    %18 = arith.truncf %17 : vector<32x128xf32> to vector<32x128xbf16>
    %c0_13 = arith.constant 0 : index
    %c128_14 = arith.constant 128 : index
    %19 = vector.load %arg18[%c0_13, %c128_14] : memref<32x1024xbf16, #tpu.memory_space<vmem>>, vector<32x128xbf16>
    tpu.vector_store %arg18[%c0_13, %c128_14], %18 {strides = array<i32>} : memref<32x1024xbf16, #tpu.memory_space<vmem>>, vector<32x128xbf16>,
    %c0_15 = arith.constant 0 : index
    %c256 = arith.constant 256 : index
    %20 = vector.load %arg1[%c0_15, %c256] : memref<216x1024xbf16, #tpu.memory_space<vmem>>, vector<216x128xbf16>
    %cst_16 = arith.constant dense<0.000000e+00> : vector<32x128xf32>
    %21 = tpu.matmul %1, %20, %cst_16 {dimension_numbers = #tpu.dot_dimension_numbers<[1], [0], [0], [1], [0, 0, 1, 1], [], []>} : vector<32x216xbf16>, vector<216x128xbf16>, vector<32x128xf32> -> vector<32x128xf32>
    %c0_17 = arith.constant 0 : index
    %c0_18 = arith.constant 0 : index
    %22 = vector.load %arg2[%c0_17, %c0_18] : memref<1x128xf32, #tpu.memory_space<vmem>>, vector<1x128xf32>
    %23 = vector.broadcast %22 : vector<1x128xf32> to vector<32x128xf32>
    %24 = arith.addf %21, %23 : vector<32x128xf32>
    %cst_19 = arith.constant 0.000000e+00 : f32
    %25 = vector.broadcast %cst_19 : f32 to vector<32x128xf32>
    %26 = arith.maximumf %24, %25 : vector<32x128xf32>
    %27 = arith.truncf %26 : vector<32x128xf32> to vector<32x128xbf16>
    %c0_20 = arith.constant 0 : index
    %c256_21 = arith.constant 256 : index
    %28 = vector.load %arg18[%c0_20, %c256_21] : memref<32x1024xbf16, #tpu.memory_space<vmem>>, vector<32x128xbf16>
    tpu.vector_store %arg18[%c0_20, %c256_21], %27 {strides = array<i32>} : memref<32x1024xbf16, #tpu.memory_space<vmem>>, vector<32x128xbf16>,
    %c0_22 = arith.constant 0 : index
    %c384 = arith.constant 384 : index
    %29 = vector.load %arg1[%c0_22, %c384] : memref<216x1024xbf16, #tpu.memory_space<vmem>>, vector<216x128xbf16>
    %cst_23 = arith.constant dense<0.000000e+00> : vector<32x128xf32>
    %30 = tpu.matmul %1, %29, %cst_23 {dimension_numbers = #tpu.dot_dimension_numbers<[1], [0], [0], [1], [0, 0, 1, 1], [], []>} : vector<32x216xbf16>, vector<216x128xbf16>, vector<32x128xf32> -> vector<32x128xf32>
    %c0_24 = arith.constant 0 : index
    %c0_25 = arith.constant 0 : index
    %31 = vector.load %arg2[%c0_24, %c0_25] : memref<1x128xf32, #tpu.memory_space<vmem>>, vector<1x128xf32>
    %32 = vector.broadcast %31 : vector<1x128xf32> to vector<32x128xf32>
    %33 = arith.addf %30, %32 : vector<32x128xf32>
    %cst_26 = arith.constant 0.000000e+00 : f32
    %34 = vector.broadcast %cst_26 : f32 to vector<32x128xf32>
    %35 = arith.maximumf %33, %34 : vector<32x128xf32>
    %36 = arith.truncf %35 : vector<32x128xf32> to vector<32x128xbf16>
    %c0_27 = arith.constant 0 : index
    %c384_28 = arith.constant 384 : index
    %37 = vector.load %arg18[%c0_27, %c384_28] : memref<32x1024xbf16, #tpu.memory_space<vmem>>, vector<32x128xbf16>
    tpu.vector_store %arg18[%c0_27, %c384_28], %36 {strides = array<i32>} : memref<32x1024xbf16, #tpu.memory_space<vmem>>, vector<32x128xbf16>,
    %c0_29 = arith.constant 0 : index
    %c512 = arith.constant 512 : index
    %38 = vector.load %arg1[%c0_29, %c512] : memref<216x1024xbf16, #tpu.memory_space<vmem>>, vector<216x128xbf16>
    %cst_30 = arith.constant dense<0.000000e+00> : vector<32x128xf32>
    %39 = tpu.matmul %1, %38, %cst_30 {dimension_numbers = #tpu.dot_dimension_numbers<[1], [0], [0], [1], [0, 0, 1, 1], [], []>} : vector<32x216xbf16>, vector<216x128xbf16>, vector<32x128xf32> -> vector<32x128xf32>
    %c0_31 = arith.constant 0 : index
    %c0_32 = arith.constant 0 : index
    %40 = vector.load %arg2[%c0_31, %c0_32] : memref<1x128xf32, #tpu.memory_space<vmem>>, vector<1x128xf32>
    %41 = vector.broadcast %40 : vector<1x128xf32> to vector<32x128xf32>
    %42 = arith.addf %39, %41 : vector<32x128xf32>
    %cst_33 = arith.constant 0.000000e+00 : f32
    %43 = vector.broadcast %cst_33 : f32 to vector<32x128xf32>
    %44 = arith.maximumf %42, %43 : vector<32x128xf32>
    %45 = arith.truncf %44 : vector<32x128xf32> to vector<32x128xbf16>
    %c0_34 = arith.constant 0 : index
    %c512_35 = arith.constant 512 : index
    %46 = vector.load %arg18[%c0_34, %c512_35] : memref<32x1024xbf16, #tpu.memory_space<vmem>>, vector<32x128xbf16>
    tpu.vector_store %arg18[%c0_34, %c512_35], %45 {strides = array<i32>} : memref<32x1024xbf16, #tpu.memory_space<vmem>>, vector<32x128xbf16>,
    %c0_36 = arith.constant 0 : index
    %c640 = arith.constant 640 : index
    %47 = vector.load %arg1[%c0_36, %c640] : memref<216x1024xbf16, #tpu.memory_space<vmem>>, vector<216x128xbf16>
    %cst_37 = arith.constant dense<0.000000e+00> : vector<32x128xf32>
    %48 = tpu.matmul %1, %47, %cst_37 {dimension_numbers = #tpu.dot_dimension_numbers<[1], [0], [0], [1], [0, 0, 1, 1], [], []>} : vector<32x216xbf16>, vector<216x128xbf16>, vector<32x128xf32> -> vector<32x128xf32>
    %c0_38 = arith.constant 0 : index
    %c0_39 = arith.constant 0 : index
    %49 = vector.load %arg2[%c0_38, %c0_39] : memref<1x128xf32, #tpu.memory_space<vmem>>, vector<1x128xf32>
    %50 = vector.broadcast %49 : vector<1x128xf32> to vector<32x128xf32>
    %51 = arith.addf %48, %50 : vector<32x128xf32>
    %cst_40 = arith.constant 0.000000e+00 : f32
    %52 = vector.broadcast %cst_40 : f32 to vector<32x128xf32>
    %53 = arith.maximumf %51, %52 : vector<32x128xf32>
    %54 = arith.truncf %53 : vector<32x128xf32> to vector<32x128xbf16>
    %c0_41 = arith.constant 0 : index
    %c640_42 = arith.constant 640 : index
    %55 = vector.load %arg18[%c0_41, %c640_42] : memref<32x1024xbf16, #tpu.memory_space<vmem>>, vector<32x128xbf16>
    tpu.vector_store %arg18[%c0_41, %c640_42], %54 {strides = array<i32>} : memref<32x1024xbf16, #tpu.memory_space<vmem>>, vector<32x128xbf16>,
    %c0_43 = arith.constant 0 : index
    %c768 = arith.constant 768 : index
    %56 = vector.load %arg1[%c0_43, %c768] : memref<216x1024xbf16, #tpu.memory_space<vmem>>, vector<216x128xbf16>
    %cst_44 = arith.constant dense<0.000000e+00> : vector<32x128xf32>
    %57 = tpu.matmul %1, %56, %cst_44 {dimension_numbers = #tpu.dot_dimension_numbers<[1], [0], [0], [1], [0, 0, 1, 1], [], []>} : vector<32x216xbf16>, vector<216x128xbf16>, vector<32x128xf32> -> vector<32x128xf32>
    %c0_45 = arith.constant 0 : index
    %c0_46 = arith.constant 0 : index
    %58 = vector.load %arg2[%c0_45, %c0_46] : memref<1x128xf32, #tpu.memory_space<vmem>>, vector<1x128xf32>
    %59 = vector.broadcast %58 : vector<1x128xf32> to vector<32x128xf32>
    %60 = arith.addf %57, %59 : vector<32x128xf32>
    %cst_47 = arith.constant 0.000000e+00 : f32
    %61 = vector.broadcast %cst_47 : f32 to vector<32x128xf32>
    %62 = arith.maximumf %60, %61 : vector<32x128xf32>
    %63 = arith.truncf %62 : vector<32x128xf32> to vector<32x128xbf16>
    %c0_48 = arith.constant 0 : index
    %c768_49 = arith.constant 768 : index
    %64 = vector.load %arg18[%c0_48, %c768_49] : memref<32x1024xbf16, #tpu.memory_space<vmem>>, vector<32x128xbf16>
    tpu.vector_store %arg18[%c0_48, %c768_49], %63 {strides = array<i32>} : memref<32x1024xbf16, #tpu.memory_space<vmem>>, vector<32x128xbf16>,
    %c0_50 = arith.constant 0 : index
    %c896 = arith.constant 896 : index
    %65 = vector.load %arg1[%c0_50, %c896] : memref<216x1024xbf16, #tpu.memory_space<vmem>>, vector<216x128xbf16>
    %cst_51 = arith.constant dense<0.000000e+00> : vector<32x128xf32>
    %66 = tpu.matmul %1, %65, %cst_51 {dimension_numbers = #tpu.dot_dimension_numbers<[1], [0], [0], [1], [0, 0, 1, 1], [], []>} : vector<32x216xbf16>, vector<216x128xbf16>, vector<32x128xf32> -> vector<32x128xf32>
    %c0_52 = arith.constant 0 : index
    %c0_53 = arith.constant 0 : index
    %67 = vector.load %arg2[%c0_52, %c0_53] : memref<1x128xf32, #tpu.memory_space<vmem>>, vector<1x128xf32>
    %68 = vector.broadcast %67 : vector<1x128xf32> to vector<32x128xf32>
    %69 = arith.addf %66, %68 : vector<32x128xf32>
    %cst_54 = arith.constant 0.000000e+00 : f32
    %70 = vector.broadcast %cst_54 : f32 to vector<32x128xf32>
    %71 = arith.maximumf %69, %70 : vector<32x128xf32>
    %72 = arith.truncf %71 : vector<32x128xf32> to vector<32x128xbf16>
    %c0_55 = arith.constant 0 : index
    %c896_56 = arith.constant 896 : index
    %73 = vector.load %arg18[%c0_55, %c896_56] : memref<32x1024xbf16, #tpu.memory_space<vmem>>, vector<32x128xbf16>
    tpu.vector_store %arg18[%c0_55, %c896_56], %72 {strides = array<i32>} : memref<32x1024xbf16, #tpu.memory_space<vmem>>, vector<32x128xbf16>,
    %c0_57 = arith.constant 0 : index
    %c0_58 = arith.constant 0 : index
    %74 = vector.load %arg18[%c0_57, %c0_58] : memref<32x1024xbf16, #tpu.memory_space<vmem>>, vector<32x1024xbf16>
    %c0_59 = arith.constant 0 : index
    %c0_60 = arith.constant 0 : index
    %75 = vector.load %arg3[%c0_59, %c0_60] : memref<32x32xf32, #tpu.memory_space<vmem>>, vector<32x32xf32>
    %c0_61 = arith.constant 0 : index
    %c0_62 = arith.constant 0 : index
    %76 = vector.load %arg5[%c0_61, %c0_62] : memref<1024x256xbf16, #tpu.memory_space<vmem>>, vector<1024x256xbf16>
    %cst_63 = arith.constant dense<0.000000e+00> : vector<32x256xf32>
    %77 = tpu.matmul %74, %76, %cst_63 {dimension_numbers = #tpu.dot_dimension_numbers<[1], [0], [0], [1], [0, 0, 1, 1], [], []>} : vector<32x1024xbf16>, vector<1024x256xbf16>, vector<32x256xf32> -> vector<32x256xf32>
    %c0_64 = arith.constant 0 : index
    %c0_65 = arith.constant 0 : index
    %78 = vector.load %arg6[%c0_64, %c0_65] : memref<1x256xf32, #tpu.memory_space<vmem>>, vector<1x256xf32>
    %79 = vector.broadcast %78 : vector<1x256xf32> to vector<32x256xf32>
    %80 = arith.addf %77, %79 : vector<32x256xf32>
    %81 = vector.extract_strided_slice %80 {offsets = [0, 0], sizes = [32, 128], strides = [1, 1]} : vector<32x256xf32> to vector<32x128xf32>
    %c0_66 = arith.constant 0 : index
    %c0_67 = arith.constant 0 : index
    %82 = vector.load %arg19[%c0_66, %c0_67] : memref<32x256xf32, #tpu.memory_space<vmem>>, vector<32x128xf32>
    tpu.vector_store %arg19[%c0_66, %c0_67], %81 {strides = array<i32>} : memref<32x256xf32, #tpu.memory_space<vmem>>, vector<32x128xf32>,
    %83 = vector.extract_strided_slice %80 {offsets = [0, 128], sizes = [32, 128], strides = [1, 1]} : vector<32x256xf32> to vector<32x128xf32>
    %cst_68 = arith.constant dense<0.000000e+00> : vector<32x128xf32>
    %84 = tpu.matmul %75, %83, %cst_68 {dimension_numbers = #tpu.dot_dimension_numbers<[1], [0], [0], [1], [0, 0, 1, 1], [], []>} : vector<32x32xf32>, vector<32x128xf32>, vector<32x128xf32> -> vector<32x128xf32>
    %c0_69 = arith.constant 0 : index
    %c128_70 = arith.constant 128 : index
    %85 = vector.load %arg19[%c0_69, %c128_70] : memref<32x256xf32, #tpu.memory_space<vmem>>, vector<32x128xf32>
    tpu.vector_store %arg19[%c0_69, %c128_70], %84 {strides = array<i32>} : memref<32x256xf32, #tpu.memory_space<vmem>>, vector<32x128xf32>,
    %c0_71 = arith.constant 0 : index
    %c0_72 = arith.constant 0 : index
    %86 = vector.load %arg7[%c0_71, %c0_72] : memref<64x256xbf16, #tpu.memory_space<vmem>>, vector<64x256xbf16>
    %cst_73 = arith.constant 0.000000e+00 : f32
    %87 = vector.broadcast %cst_73 : f32 to vector<2x64xf32>
    %cst_74 = arith.constant 0.000000e+00 : f32
    %88 = vector.broadcast %cst_74 : f32 to vector<2x64xf32>
    %c0_75 = arith.constant 0 : index
    %c0_76 = arith.constant 0 : index
    %89 = vector.load %arg19[%c0_75, %c0_76] : memref<32x256xf32, #tpu.memory_space<vmem>>, vector<2x256xf32>
    %90 = arith.truncf %87 : vector<2x64xf32> to vector<2x64xbf16>
    %cst_77 = arith.constant dense<0.000000e+00> : vector<2x256xf32>
    %91 = tpu.matmul %90, %86, %cst_77 {dimension_numbers = #tpu.dot_dimension_numbers<[1], [0], [0], [1], [0, 0, 1, 1], [], []>} : vector<2x64xbf16>, vector<64x256xbf16>, vector<2x256xf32> -> vector<2x256xf32>
    %92 = arith.addf %89, %91 : vector<2x256xf32>
    %93 = vector.extract_strided_slice %92 {offsets = [0, 0], sizes = [2, 128], strides = [1, 1]} : vector<2x256xf32> to vector<2x128xf32>
    %cst_78 = arith.constant 5.000000e-01 : f32
    %94 = vector.broadcast %cst_78 : f32 to vector<2x128xf32>
    %95 = arith.mulf %94, %93 : vector<2x128xf32>
    %96 = math.tanh %95 : vector<2x128xf32>
    %cst_79 = arith.constant 1.000000e+00 : f32
    %97 = vector.broadcast %cst_79 : f32 to vector<2x128xf32>
    %98 = arith.addf %96, %97 : vector<2x128xf32>
    %cst_80 = arith.constant 5.000000e-01 : f32
    %99 = vector.broadcast %cst_80 : f32 to vector<2x128xf32>
    %100 = arith.mulf %99, %98 : vector<2x128xf32>
    %101 = vector.extract_strided_slice %92 {offsets = [0, 128], sizes = [2, 64], strides = [1, 1]} : vector<2x256xf32> to vector<2x64xf32>
    %102 = math.tanh %101 : vector<2x64xf32>
    %103 = vector.extract_strided_slice %92 {offsets = [0, 192], sizes = [2, 64], strides = [1, 1]} : vector<2x256xf32> to vector<2x64xf32>
    %cst_81 = arith.constant 5.000000e-01 : f32
    %104 = vector.broadcast %cst_81 : f32 to vector<2x64xf32>
    %105 = arith.mulf %104, %103 : vector<2x64xf32>
    %106 = math.tanh %105 : vector<2x64xf32>
    %cst_82 = arith.constant 1.000000e+00 : f32
    %107 = vector.broadcast %cst_82 : f32 to vector<2x64xf32>
    %108 = arith.addf %106, %107 : vector<2x64xf32>
    %cst_83 = arith.constant 5.000000e-01 : f32
    %109 = vector.broadcast %cst_83 : f32 to vector<2x64xf32>
    %110 = arith.mulf %109, %108 : vector<2x64xf32>
    %111 = vector.extract_strided_slice %100 {offsets = [0, 64], sizes = [2, 64], strides = [1, 1]} : vector<2x128xf32> to vector<2x64xf32>
    %112 = arith.mulf %111, %88 : vector<2x64xf32>
    %113 = vector.extract_strided_slice %100 {offsets = [0, 0], sizes = [2, 64], strides = [1, 1]} : vector<2x128xf32> to vector<2x64xf32>
    %114 = arith.mulf %113, %102 : vector<2x64xf32>
    %115 = arith.addf %112, %114 : vector<2x64xf32>
    %116 = math.tanh %115 : vector<2x64xf32>
    %117 = arith.mulf %110, %116 : vector<2x64xf32>
    %c0_84 = arith.constant 0 : index
    %c0_85 = arith.constant 0 : index
    %118 = vector.load %arg20[%c0_84, %c0_85] : memref<32x64xf32, #tpu.memory_space<vmem>>, vector<2x64xf32>
    tpu.vector_store %arg20[%c0_84, %c0_85], %117 {strides = array<i32>} : memref<32x64xf32, #tpu.memory_space<vmem>>, vector<2x64xf32>,
    %c2 = arith.constant 2 : index
    %c0_86 = arith.constant 0 : index
    %119 = vector.load %arg19[%c2, %c0_86] : memref<32x256xf32, #tpu.memory_space<vmem>>, vector<2x256xf32>
    %120 = arith.truncf %117 : vector<2x64xf32> to vector<2x64xbf16>
    %cst_87 = arith.constant dense<0.000000e+00> : vector<2x256xf32>
    %121 = tpu.matmul %120, %86, %cst_87 {dimension_numbers = #tpu.dot_dimension_numbers<[1], [0], [0], [1], [0, 0, 1, 1], [], []>} : vector<2x64xbf16>, vector<64x256xbf16>, vector<2x256xf32> -> vector<2x256xf32>
    %122 = arith.addf %119, %121 : vector<2x256xf32>
    %123 = vector.extract_strided_slice %122 {offsets = [0, 0], sizes = [2, 128], strides = [1, 1]} : vector<2x256xf32> to vector<2x128xf32>
    %cst_88 = arith.constant 5.000000e-01 : f32
    %124 = vector.broadcast %cst_88 : f32 to vector<2x128xf32>
    %125 = arith.mulf %124, %123 : vector<2x128xf32>
    %126 = math.tanh %125 : vector<2x128xf32>
    %cst_89 = arith.constant 1.000000e+00 : f32
    %127 = vector.broadcast %cst_89 : f32 to vector<2x128xf32>
    %128 = arith.addf %126, %127 : vector<2x128xf32>
    %cst_90 = arith.constant 5.000000e-01 : f32
    %129 = vector.broadcast %cst_90 : f32 to vector<2x128xf32>
    %130 = arith.mulf %129, %128 : vector<2x128xf32>
    %131 = vector.extract_strided_slice %122 {offsets = [0, 128], sizes = [2, 64], strides = [1, 1]} : vector<2x256xf32> to vector<2x64xf32>
    %132 = math.tanh %131 : vector<2x64xf32>
    %133 = vector.extract_strided_slice %122 {offsets = [0, 192], sizes = [2, 64], strides = [1, 1]} : vector<2x256xf32> to vector<2x64xf32>
    %cst_91 = arith.constant 5.000000e-01 : f32
    %134 = vector.broadcast %cst_91 : f32 to vector<2x64xf32>
    %135 = arith.mulf %134, %133 : vector<2x64xf32>
    %136 = math.tanh %135 : vector<2x64xf32>
    %cst_92 = arith.constant 1.000000e+00 : f32
    %137 = vector.broadcast %cst_92 : f32 to vector<2x64xf32>
    %138 = arith.addf %136, %137 : vector<2x64xf32>
    %cst_93 = arith.constant 5.000000e-01 : f32
    %139 = vector.broadcast %cst_93 : f32 to vector<2x64xf32>
    %140 = arith.mulf %139, %138 : vector<2x64xf32>
    %141 = vector.extract_strided_slice %130 {offsets = [0, 64], sizes = [2, 64], strides = [1, 1]} : vector<2x128xf32> to vector<2x64xf32>
    %142 = arith.mulf %141, %115 : vector<2x64xf32>
    %143 = vector.extract_strided_slice %130 {offsets = [0, 0], sizes = [2, 64], strides = [1, 1]} : vector<2x128xf32> to vector<2x64xf32>
    %144 = arith.mulf %143, %132 : vector<2x64xf32>
    %145 = arith.addf %142, %144 : vector<2x64xf32>
    %146 = math.tanh %145 : vector<2x64xf32>
    %147 = arith.mulf %140, %146 : vector<2x64xf32>
    %c2_94 = arith.constant 2 : index
    %c0_95 = arith.constant 0 : index
    %148 = vector.load %arg20[%c2_94, %c0_95] : memref<32x64xf32, #tpu.memory_space<vmem>>, vector<2x64xf32>
    tpu.vector_store %arg20[%c2_94, %c0_95], %147 {strides = array<i32>} : memref<32x64xf32, #tpu.memory_space<vmem>>, vector<2x64xf32>,
    %c4 = arith.constant 4 : index
    %c0_96 = arith.constant 0 : index
    %149 = vector.load %arg19[%c4, %c0_96] : memref<32x256xf32, #tpu.memory_space<vmem>>, vector<2x256xf32>
    %150 = arith.truncf %147 : vector<2x64xf32> to vector<2x64xbf16>
    %cst_97 = arith.constant dense<0.000000e+00> : vector<2x256xf32>
    %151 = tpu.matmul %150, %86, %cst_97 {dimension_numbers = #tpu.dot_dimension_numbers<[1], [0], [0], [1], [0, 0, 1, 1], [], []>} : vector<2x64xbf16>, vector<64x256xbf16>, vector<2x256xf32> -> vector<2x256xf32>
    %152 = arith.addf %149, %151 : vector<2x256xf32>
    %153 = vector.extract_strided_slice %152 {offsets = [0, 0], sizes = [2, 128], strides = [1, 1]} : vector<2x256xf32> to vector<2x128xf32>
    %cst_98 = arith.constant 5.000000e-01 : f32
    %154 = vector.broadcast %cst_98 : f32 to vector<2x128xf32>
    %155 = arith.mulf %154, %153 : vector<2x128xf32>
    %156 = math.tanh %155 : vector<2x128xf32>
    %cst_99 = arith.constant 1.000000e+00 : f32
    %157 = vector.broadcast %cst_99 : f32 to vector<2x128xf32>
    %158 = arith.addf %156, %157 : vector<2x128xf32>
    %cst_100 = arith.constant 5.000000e-01 : f32
    %159 = vector.broadcast %cst_100 : f32 to vector<2x128xf32>
    %160 = arith.mulf %159, %158 : vector<2x128xf32>
    %161 = vector.extract_strided_slice %152 {offsets = [0, 128], sizes = [2, 64], strides = [1, 1]} : vector<2x256xf32> to vector<2x64xf32>
    %162 = math.tanh %161 : vector<2x64xf32>
    %163 = vector.extract_strided_slice %152 {offsets = [0, 192], sizes = [2, 64], strides = [1, 1]} : vector<2x256xf32> to vector<2x64xf32>
    %cst_101 = arith.constant 5.000000e-01 : f32
    %164 = vector.broadcast %cst_101 : f32 to vector<2x64xf32>
    %165 = arith.mulf %164, %163 : vector<2x64xf32>
    %166 = math.tanh %165 : vector<2x64xf32>
    %cst_102 = arith.constant 1.000000e+00 : f32
    %167 = vector.broadcast %cst_102 : f32 to vector<2x64xf32>
    %168 = arith.addf %166, %167 : vector<2x64xf32>
    %cst_103 = arith.constant 5.000000e-01 : f32
    %169 = vector.broadcast %cst_103 : f32 to vector<2x64xf32>
    %170 = arith.mulf %169, %168 : vector<2x64xf32>
    %171 = vector.extract_strided_slice %160 {offsets = [0, 64], sizes = [2, 64], strides = [1, 1]} : vector<2x128xf32> to vector<2x64xf32>
    %172 = arith.mulf %171, %145 : vector<2x64xf32>
    %173 = vector.extract_strided_slice %160 {offsets = [0, 0], sizes = [2, 64], strides = [1, 1]} : vector<2x128xf32> to vector<2x64xf32>
    %174 = arith.mulf %173, %162 : vector<2x64xf32>
    %175 = arith.addf %172, %174 : vector<2x64xf32>
    %176 = math.tanh %175 : vector<2x64xf32>
    %177 = arith.mulf %170, %176 : vector<2x64xf32>
    %c4_104 = arith.constant 4 : index
    %c0_105 = arith.constant 0 : index
    %178 = vector.load %arg20[%c4_104, %c0_105] : memref<32x64xf32, #tpu.memory_space<vmem>>, vector<2x64xf32>
    tpu.vector_store %arg20[%c4_104, %c0_105], %177 {strides = array<i32>} : memref<32x64xf32, #tpu.memory_space<vmem>>, vector<2x64xf32>,
    %c6 = arith.constant 6 : index
    %c0_106 = arith.constant 0 : index
    %179 = vector.load %arg19[%c6, %c0_106] : memref<32x256xf32, #tpu.memory_space<vmem>>, vector<2x256xf32>
    %180 = arith.truncf %177 : vector<2x64xf32> to vector<2x64xbf16>
    %cst_107 = arith.constant dense<0.000000e+00> : vector<2x256xf32>
    %181 = tpu.matmul %180, %86, %cst_107 {dimension_numbers = #tpu.dot_dimension_numbers<[1], [0], [0], [1], [0, 0, 1, 1], [], []>} : vector<2x64xbf16>, vector<64x256xbf16>, vector<2x256xf32> -> vector<2x256xf32>
    %182 = arith.addf %179, %181 : vector<2x256xf32>
    %183 = vector.extract_strided_slice %182 {offsets = [0, 0], sizes = [2, 128], strides = [1, 1]} : vector<2x256xf32> to vector<2x128xf32>
    %cst_108 = arith.constant 5.000000e-01 : f32
    %184 = vector.broadcast %cst_108 : f32 to vector<2x128xf32>
    %185 = arith.mulf %184, %183 : vector<2x128xf32>
    %186 = math.tanh %185 : vector<2x128xf32>
    %cst_109 = arith.constant 1.000000e+00 : f32
    %187 = vector.broadcast %cst_109 : f32 to vector<2x128xf32>
    %188 = arith.addf %186, %187 : vector<2x128xf32>
    %cst_110 = arith.constant 5.000000e-01 : f32
    %189 = vector.broadcast %cst_110 : f32 to vector<2x128xf32>
    %190 = arith.mulf %189, %188 : vector<2x128xf32>
    %191 = vector.extract_strided_slice %182 {offsets = [0, 128], sizes = [2, 64], strides = [1, 1]} : vector<2x256xf32> to vector<2x64xf32>
    %192 = math.tanh %191 : vector<2x64xf32>
    %193 = vector.extract_strided_slice %182 {offsets = [0, 192], sizes = [2, 64], strides = [1, 1]} : vector<2x256xf32> to vector<2x64xf32>
    %cst_111 = arith.constant 5.000000e-01 : f32
    %194 = vector.broadcast %cst_111 : f32 to vector<2x64xf32>
    %195 = arith.mulf %194, %193 : vector<2x64xf32>
    %196 = math.tanh %195 : vector<2x64xf32>
    %cst_112 = arith.constant 1.000000e+00 : f32
    %197 = vector.broadcast %cst_112 : f32 to vector<2x64xf32>
    %198 = arith.addf %196, %197 : vector<2x64xf32>
    %cst_113 = arith.constant 5.000000e-01 : f32
    %199 = vector.broadcast %cst_113 : f32 to vector<2x64xf32>
    %200 = arith.mulf %199, %198 : vector<2x64xf32>
    %201 = vector.extract_strided_slice %190 {offsets = [0, 64], sizes = [2, 64], strides = [1, 1]} : vector<2x128xf32> to vector<2x64xf32>
    %202 = arith.mulf %201, %175 : vector<2x64xf32>
    %203 = vector.extract_strided_slice %190 {offsets = [0, 0], sizes = [2, 64], strides = [1, 1]} : vector<2x128xf32> to vector<2x64xf32>
    %204 = arith.mulf %203, %192 : vector<2x64xf32>
    %205 = arith.addf %202, %204 : vector<2x64xf32>
    %206 = math.tanh %205 : vector<2x64xf32>
    %207 = arith.mulf %200, %206 : vector<2x64xf32>
    %c6_114 = arith.constant 6 : index
    %c0_115 = arith.constant 0 : index
    %208 = vector.load %arg20[%c6_114, %c0_115] : memref<32x64xf32, #tpu.memory_space<vmem>>, vector<2x64xf32>
    tpu.vector_store %arg20[%c6_114, %c0_115], %207 {strides = array<i32>} : memref<32x64xf32, #tpu.memory_space<vmem>>, vector<2x64xf32>,
    %c8 = arith.constant 8 : index
    %c0_116 = arith.constant 0 : index
    %209 = vector.load %arg19[%c8, %c0_116] : memref<32x256xf32, #tpu.memory_space<vmem>>, vector<2x256xf32>
    %210 = arith.truncf %207 : vector<2x64xf32> to vector<2x64xbf16>
    %cst_117 = arith.constant dense<0.000000e+00> : vector<2x256xf32>
    %211 = tpu.matmul %210, %86, %cst_117 {dimension_numbers = #tpu.dot_dimension_numbers<[1], [0], [0], [1], [0, 0, 1, 1], [], []>} : vector<2x64xbf16>, vector<64x256xbf16>, vector<2x256xf32> -> vector<2x256xf32>
    %212 = arith.addf %209, %211 : vector<2x256xf32>
    %213 = vector.extract_strided_slice %212 {offsets = [0, 0], sizes = [2, 128], strides = [1, 1]} : vector<2x256xf32> to vector<2x128xf32>
    %cst_118 = arith.constant 5.000000e-01 : f32
    %214 = vector.broadcast %cst_118 : f32 to vector<2x128xf32>
    %215 = arith.mulf %214, %213 : vector<2x128xf32>
    %216 = math.tanh %215 : vector<2x128xf32>
    %cst_119 = arith.constant 1.000000e+00 : f32
    %217 = vector.broadcast %cst_119 : f32 to vector<2x128xf32>
    %218 = arith.addf %216, %217 : vector<2x128xf32>
    %cst_120 = arith.constant 5.000000e-01 : f32
    %219 = vector.broadcast %cst_120 : f32 to vector<2x128xf32>
    %220 = arith.mulf %219, %218 : vector<2x128xf32>
    %221 = vector.extract_strided_slice %212 {offsets = [0, 128], sizes = [2, 64], strides = [1, 1]} : vector<2x256xf32> to vector<2x64xf32>
    %222 = math.tanh %221 : vector<2x64xf32>
    %223 = vector.extract_strided_slice %212 {offsets = [0, 192], sizes = [2, 64], strides = [1, 1]} : vector<2x256xf32> to vector<2x64xf32>
    %cst_121 = arith.constant 5.000000e-01 : f32
    %224 = vector.broadcast %cst_121 : f32 to vector<2x64xf32>
    %225 = arith.mulf %224, %223 : vector<2x64xf32>
    %226 = math.tanh %225 : vector<2x64xf32>
    %cst_122 = arith.constant 1.000000e+00 : f32
    %227 = vector.broadcast %cst_122 : f32 to vector<2x64xf32>
    %228 = arith.addf %226, %227 : vector<2x64xf32>
    %cst_123 = arith.constant 5.000000e-01 : f32
    %229 = vector.broadcast %cst_123 : f32 to vector<2x64xf32>
    %230 = arith.mulf %229, %228 : vector<2x64xf32>
    %231 = vector.extract_strided_slice %220 {offsets = [0, 64], sizes = [2, 64], strides = [1, 1]} : vector<2x128xf32> to vector<2x64xf32>
    %232 = arith.mulf %231, %205 : vector<2x64xf32>
    %233 = vector.extract_strided_slice %220 {offsets = [0, 0], sizes = [2, 64], strides = [1, 1]} : vector<2x128xf32> to vector<2x64xf32>
    %234 = arith.mulf %233, %222 : vector<2x64xf32>
    %235 = arith.addf %232, %234 : vector<2x64xf32>
    %236 = math.tanh %235 : vector<2x64xf32>
    %237 = arith.mulf %230, %236 : vector<2x64xf32>
    %c8_124 = arith.constant 8 : index
    %c0_125 = arith.constant 0 : index
    %238 = vector.load %arg20[%c8_124, %c0_125] : memref<32x64xf32, #tpu.memory_space<vmem>>, vector<2x64xf32>
    tpu.vector_store %arg20[%c8_124, %c0_125], %237 {strides = array<i32>} : memref<32x64xf32, #tpu.memory_space<vmem>>, vector<2x64xf32>,
    %c10 = arith.constant 10 : index
    %c0_126 = arith.constant 0 : index
    %239 = vector.load %arg19[%c10, %c0_126] : memref<32x256xf32, #tpu.memory_space<vmem>>, vector<2x256xf32>
    %240 = arith.truncf %237 : vector<2x64xf32> to vector<2x64xbf16>
    %cst_127 = arith.constant dense<0.000000e+00> : vector<2x256xf32>
    %241 = tpu.matmul %240, %86, %cst_127 {dimension_numbers = #tpu.dot_dimension_numbers<[1], [0], [0], [1], [0, 0, 1, 1], [], []>} : vector<2x64xbf16>, vector<64x256xbf16>, vector<2x256xf32> -> vector<2x256xf32>
    %242 = arith.addf %239, %241 : vector<2x256xf32>
    %243 = vector.extract_strided_slice %242 {offsets = [0, 0], sizes = [2, 128], strides = [1, 1]} : vector<2x256xf32> to vector<2x128xf32>
    %cst_128 = arith.constant 5.000000e-01 : f32
    %244 = vector.broadcast %cst_128 : f32 to vector<2x128xf32>
    %245 = arith.mulf %244, %243 : vector<2x128xf32>
    %246 = math.tanh %245 : vector<2x128xf32>
    %cst_129 = arith.constant 1.000000e+00 : f32
    %247 = vector.broadcast %cst_129 : f32 to vector<2x128xf32>
    %248 = arith.addf %246, %247 : vector<2x128xf32>
    %cst_130 = arith.constant 5.000000e-01 : f32
    %249 = vector.broadcast %cst_130 : f32 to vector<2x128xf32>
    %250 = arith.mulf %249, %248 : vector<2x128xf32>
    %251 = vector.extract_strided_slice %242 {offsets = [0, 128], sizes = [2, 64], strides = [1, 1]} : vector<2x256xf32> to vector<2x64xf32>
    %252 = math.tanh %251 : vector<2x64xf32>
    %253 = vector.extract_strided_slice %242 {offsets = [0, 192], sizes = [2, 64], strides = [1, 1]} : vector<2x256xf32> to vector<2x64xf32>
    %cst_131 = arith.constant 5.000000e-01 : f32
    %254 = vector.broadcast %cst_131 : f32 to vector<2x64xf32>
    %255 = arith.mulf %254, %253 : vector<2x64xf32>
    %256 = math.tanh %255 : vector<2x64xf32>
    %cst_132 = arith.constant 1.000000e+00 : f32
    %257 = vector.broadcast %cst_132 : f32 to vector<2x64xf32>
    %258 = arith.addf %256, %257 : vector<2x64xf32>
    %cst_133 = arith.constant 5.000000e-01 : f32
    %259 = vector.broadcast %cst_133 : f32 to vector<2x64xf32>
    %260 = arith.mulf %259, %258 : vector<2x64xf32>
    %261 = vector.extract_strided_slice %250 {offsets = [0, 64], sizes = [2, 64], strides = [1, 1]} : vector<2x128xf32> to vector<2x64xf32>
    %262 = arith.mulf %261, %235 : vector<2x64xf32>
    %263 = vector.extract_strided_slice %250 {offsets = [0, 0], sizes = [2, 64], strides = [1, 1]} : vector<2x128xf32> to vector<2x64xf32>
    %264 = arith.mulf %263, %252 : vector<2x64xf32>
    %265 = arith.addf %262, %264 : vector<2x64xf32>
    %266 = math.tanh %265 : vector<2x64xf32>
    %267 = arith.mulf %260, %266 : vector<2x64xf32>
    %c10_134 = arith.constant 10 : index
    %c0_135 = arith.constant 0 : index
    %268 = vector.load %arg20[%c10_134, %c0_135] : memref<32x64xf32, #tpu.memory_space<vmem>>, vector<2x64xf32>
    tpu.vector_store %arg20[%c10_134, %c0_135], %267 {strides = array<i32>} : memref<32x64xf32, #tpu.memory_space<vmem>>, vector<2x64xf32>,
    %c12 = arith.constant 12 : index
    %c0_136 = arith.constant 0 : index
    %269 = vector.load %arg19[%c12, %c0_136] : memref<32x256xf32, #tpu.memory_space<vmem>>, vector<2x256xf32>
    %270 = arith.truncf %267 : vector<2x64xf32> to vector<2x64xbf16>
    %cst_137 = arith.constant dense<0.000000e+00> : vector<2x256xf32>
    %271 = tpu.matmul %270, %86, %cst_137 {dimension_numbers = #tpu.dot_dimension_numbers<[1], [0], [0], [1], [0, 0, 1, 1], [], []>} : vector<2x64xbf16>, vector<64x256xbf16>, vector<2x256xf32> -> vector<2x256xf32>
    %272 = arith.addf %269, %271 : vector<2x256xf32>
    %273 = vector.extract_strided_slice %272 {offsets = [0, 0], sizes = [2, 128], strides = [1, 1]} : vector<2x256xf32> to vector<2x128xf32>
    %cst_138 = arith.constant 5.000000e-01 : f32
    %274 = vector.broadcast %cst_138 : f32 to vector<2x128xf32>
    %275 = arith.mulf %274, %273 : vector<2x128xf32>
    %276 = math.tanh %275 : vector<2x128xf32>
    %cst_139 = arith.constant 1.000000e+00 : f32
    %277 = vector.broadcast %cst_139 : f32 to vector<2x128xf32>
    %278 = arith.addf %276, %277 : vector<2x128xf32>
    %cst_140 = arith.constant 5.000000e-01 : f32
    %279 = vector.broadcast %cst_140 : f32 to vector<2x128xf32>
    %280 = arith.mulf %279, %278 : vector<2x128xf32>
    %281 = vector.extract_strided_slice %272 {offsets = [0, 128], sizes = [2, 64], strides = [1, 1]} : vector<2x256xf32> to vector<2x64xf32>
    %282 = math.tanh %281 : vector<2x64xf32>
    %283 = vector.extract_strided_slice %272 {offsets = [0, 192], sizes = [2, 64], strides = [1, 1]} : vector<2x256xf32> to vector<2x64xf32>
    %cst_141 = arith.constant 5.000000e-01 : f32
    %284 = vector.broadcast %cst_141 : f32 to vector<2x64xf32>
    %285 = arith.mulf %284, %283 : vector<2x64xf32>
    %286 = math.tanh %285 : vector<2x64xf32>
    %cst_142 = arith.constant 1.000000e+00 : f32
    %287 = vector.broadcast %cst_142 : f32 to vector<2x64xf32>
    %288 = arith.addf %286, %287 : vector<2x64xf32>
    %cst_143 = arith.constant 5.000000e-01 : f32
    %289 = vector.broadcast %cst_143 : f32 to vector<2x64xf32>
    %290 = arith.mulf %289, %288 : vector<2x64xf32>
    %291 = vector.extract_strided_slice %280 {offsets = [0, 64], sizes = [2, 64], strides = [1, 1]} : vector<2x128xf32> to vector<2x64xf32>
    %292 = arith.mulf %291, %265 : vector<2x64xf32>
    %293 = vector.extract_strided_slice %280 {offsets = [0, 0], sizes = [2, 64], strides = [1, 1]} : vector<2x128xf32> to vector<2x64xf32>
    %294 = arith.mulf %293, %282 : vector<2x64xf32>
    %295 = arith.addf %292, %294 : vector<2x64xf32>
    %296 = math.tanh %295 : vector<2x64xf32>
    %297 = arith.mulf %290, %296 : vector<2x64xf32>
    %c12_144 = arith.constant 12 : index
    %c0_145 = arith.constant 0 : index
    %298 = vector.load %arg20[%c12_144, %c0_145] : memref<32x64xf32, #tpu.memory_space<vmem>>, vector<2x64xf32>
    tpu.vector_store %arg20[%c12_144, %c0_145], %297 {strides = array<i32>} : memref<32x64xf32, #tpu.memory_space<vmem>>, vector<2x64xf32>,
    %c14 = arith.constant 14 : index
    %c0_146 = arith.constant 0 : index
    %299 = vector.load %arg19[%c14, %c0_146] : memref<32x256xf32, #tpu.memory_space<vmem>>, vector<2x256xf32>
    %300 = arith.truncf %297 : vector<2x64xf32> to vector<2x64xbf16>
    %cst_147 = arith.constant dense<0.000000e+00> : vector<2x256xf32>
    %301 = tpu.matmul %300, %86, %cst_147 {dimension_numbers = #tpu.dot_dimension_numbers<[1], [0], [0], [1], [0, 0, 1, 1], [], []>} : vector<2x64xbf16>, vector<64x256xbf16>, vector<2x256xf32> -> vector<2x256xf32>
    %302 = arith.addf %299, %301 : vector<2x256xf32>
    %303 = vector.extract_strided_slice %302 {offsets = [0, 0], sizes = [2, 128], strides = [1, 1]} : vector<2x256xf32> to vector<2x128xf32>
    %cst_148 = arith.constant 5.000000e-01 : f32
    %304 = vector.broadcast %cst_148 : f32 to vector<2x128xf32>
    %305 = arith.mulf %304, %303 : vector<2x128xf32>
    %306 = math.tanh %305 : vector<2x128xf32>
    %cst_149 = arith.constant 1.000000e+00 : f32
    %307 = vector.broadcast %cst_149 : f32 to vector<2x128xf32>
    %308 = arith.addf %306, %307 : vector<2x128xf32>
    %cst_150 = arith.constant 5.000000e-01 : f32
    %309 = vector.broadcast %cst_150 : f32 to vector<2x128xf32>
    %310 = arith.mulf %309, %308 : vector<2x128xf32>
    %311 = vector.extract_strided_slice %302 {offsets = [0, 128], sizes = [2, 64], strides = [1, 1]} : vector<2x256xf32> to vector<2x64xf32>
    %312 = math.tanh %311 : vector<2x64xf32>
    %313 = vector.extract_strided_slice %302 {offsets = [0, 192], sizes = [2, 64], strides = [1, 1]} : vector<2x256xf32> to vector<2x64xf32>
    %cst_151 = arith.constant 5.000000e-01 : f32
    %314 = vector.broadcast %cst_151 : f32 to vector<2x64xf32>
    %315 = arith.mulf %314, %313 : vector<2x64xf32>
    %316 = math.tanh %315 : vector<2x64xf32>
    %cst_152 = arith.constant 1.000000e+00 : f32
    %317 = vector.broadcast %cst_152 : f32 to vector<2x64xf32>
    %318 = arith.addf %316, %317 : vector<2x64xf32>
    %cst_153 = arith.constant 5.000000e-01 : f32
    %319 = vector.broadcast %cst_153 : f32 to vector<2x64xf32>
    %320 = arith.mulf %319, %318 : vector<2x64xf32>
    %321 = vector.extract_strided_slice %310 {offsets = [0, 64], sizes = [2, 64], strides = [1, 1]} : vector<2x128xf32> to vector<2x64xf32>
    %322 = arith.mulf %321, %295 : vector<2x64xf32>
    %323 = vector.extract_strided_slice %310 {offsets = [0, 0], sizes = [2, 64], strides = [1, 1]} : vector<2x128xf32> to vector<2x64xf32>
    %324 = arith.mulf %323, %312 : vector<2x64xf32>
    %325 = arith.addf %322, %324 : vector<2x64xf32>
    %326 = math.tanh %325 : vector<2x64xf32>
    %327 = arith.mulf %320, %326 : vector<2x64xf32>
    %c14_154 = arith.constant 14 : index
    %c0_155 = arith.constant 0 : index
    %328 = vector.load %arg20[%c14_154, %c0_155] : memref<32x64xf32, #tpu.memory_space<vmem>>, vector<2x64xf32>
    tpu.vector_store %arg20[%c14_154, %c0_155], %327 {strides = array<i32>} : memref<32x64xf32, #tpu.memory_space<vmem>>, vector<2x64xf32>,
    %c16 = arith.constant 16 : index
    %c0_156 = arith.constant 0 : index
    %329 = vector.load %arg19[%c16, %c0_156] : memref<32x256xf32, #tpu.memory_space<vmem>>, vector<2x256xf32>
    %330 = arith.truncf %327 : vector<2x64xf32> to vector<2x64xbf16>
    %cst_157 = arith.constant dense<0.000000e+00> : vector<2x256xf32>
    %331 = tpu.matmul %330, %86, %cst_157 {dimension_numbers = #tpu.dot_dimension_numbers<[1], [0], [0], [1], [0, 0, 1, 1], [], []>} : vector<2x64xbf16>, vector<64x256xbf16>, vector<2x256xf32> -> vector<2x256xf32>
    %332 = arith.addf %329, %331 : vector<2x256xf32>
    %333 = vector.extract_strided_slice %332 {offsets = [0, 0], sizes = [2, 128], strides = [1, 1]} : vector<2x256xf32> to vector<2x128xf32>
    %cst_158 = arith.constant 5.000000e-01 : f32
    %334 = vector.broadcast %cst_158 : f32 to vector<2x128xf32>
    %335 = arith.mulf %334, %333 : vector<2x128xf32>
    %336 = math.tanh %335 : vector<2x128xf32>
    %cst_159 = arith.constant 1.000000e+00 : f32
    %337 = vector.broadcast %cst_159 : f32 to vector<2x128xf32>
    %338 = arith.addf %336, %337 : vector<2x128xf32>
    %cst_160 = arith.constant 5.000000e-01 : f32
    %339 = vector.broadcast %cst_160 : f32 to vector<2x128xf32>
    %340 = arith.mulf %339, %338 : vector<2x128xf32>
    %341 = vector.extract_strided_slice %332 {offsets = [0, 128], sizes = [2, 64], strides = [1, 1]} : vector<2x256xf32> to vector<2x64xf32>
    %342 = math.tanh %341 : vector<2x64xf32>
    %343 = vector.extract_strided_slice %332 {offsets = [0, 192], sizes = [2, 64], strides = [1, 1]} : vector<2x256xf32> to vector<2x64xf32>
    %cst_161 = arith.constant 5.000000e-01 : f32
    %344 = vector.broadcast %cst_161 : f32 to vector<2x64xf32>
    %345 = arith.mulf %344, %343 : vector<2x64xf32>
    %346 = math.tanh %345 : vector<2x64xf32>
    %cst_162 = arith.constant 1.000000e+00 : f32
    %347 = vector.broadcast %cst_162 : f32 to vector<2x64xf32>
    %348 = arith.addf %346, %347 : vector<2x64xf32>
    %cst_163 = arith.constant 5.000000e-01 : f32
    %349 = vector.broadcast %cst_163 : f32 to vector<2x64xf32>
    %350 = arith.mulf %349, %348 : vector<2x64xf32>
    %351 = vector.extract_strided_slice %340 {offsets = [0, 64], sizes = [2, 64], strides = [1, 1]} : vector<2x128xf32> to vector<2x64xf32>
    %352 = arith.mulf %351, %325 : vector<2x64xf32>
    %353 = vector.extract_strided_slice %340 {offsets = [0, 0], sizes = [2, 64], strides = [1, 1]} : vector<2x128xf32> to vector<2x64xf32>
    %354 = arith.mulf %353, %342 : vector<2x64xf32>
    %355 = arith.addf %352, %354 : vector<2x64xf32>
    %356 = math.tanh %355 : vector<2x64xf32>
    %357 = arith.mulf %350, %356 : vector<2x64xf32>
    %c16_164 = arith.constant 16 : index
    %c0_165 = arith.constant 0 : index
    %358 = vector.load %arg20[%c16_164, %c0_165] : memref<32x64xf32, #tpu.memory_space<vmem>>, vector<2x64xf32>
    tpu.vector_store %arg20[%c16_164, %c0_165], %357 {strides = array<i32>} : memref<32x64xf32, #tpu.memory_space<vmem>>, vector<2x64xf32>,
    %c18 = arith.constant 18 : index
    %c0_166 = arith.constant 0 : index
    %359 = vector.load %arg19[%c18, %c0_166] : memref<32x256xf32, #tpu.memory_space<vmem>>, vector<2x256xf32>
    %360 = arith.truncf %357 : vector<2x64xf32> to vector<2x64xbf16>
    %cst_167 = arith.constant dense<0.000000e+00> : vector<2x256xf32>
    %361 = tpu.matmul %360, %86, %cst_167 {dimension_numbers = #tpu.dot_dimension_numbers<[1], [0], [0], [1], [0, 0, 1, 1], [], []>} : vector<2x64xbf16>, vector<64x256xbf16>, vector<2x256xf32> -> vector<2x256xf32>
    %362 = arith.addf %359, %361 : vector<2x256xf32>
    %363 = vector.extract_strided_slice %362 {offsets = [0, 0], sizes = [2, 128], strides = [1, 1]} : vector<2x256xf32> to vector<2x128xf32>
    %cst_168 = arith.constant 5.000000e-01 : f32
    %364 = vector.broadcast %cst_168 : f32 to vector<2x128xf32>
    %365 = arith.mulf %364, %363 : vector<2x128xf32>
    %366 = math.tanh %365 : vector<2x128xf32>
    %cst_169 = arith.constant 1.000000e+00 : f32
    %367 = vector.broadcast %cst_169 : f32 to vector<2x128xf32>
    %368 = arith.addf %366, %367 : vector<2x128xf32>
    %cst_170 = arith.constant 5.000000e-01 : f32
    %369 = vector.broadcast %cst_170 : f32 to vector<2x128xf32>
    %370 = arith.mulf %369, %368 : vector<2x128xf32>
    %371 = vector.extract_strided_slice %362 {offsets = [0, 128], sizes = [2, 64], strides = [1, 1]} : vector<2x256xf32> to vector<2x64xf32>
    %372 = math.tanh %371 : vector<2x64xf32>
    %373 = vector.extract_strided_slice %362 {offsets = [0, 192], sizes = [2, 64], strides = [1, 1]} : vector<2x256xf32> to vector<2x64xf32>
    %cst_171 = arith.constant 5.000000e-01 : f32
    %374 = vector.broadcast %cst_171 : f32 to vector<2x64xf32>
    %375 = arith.mulf %374, %373 : vector<2x64xf32>
    %376 = math.tanh %375 : vector<2x64xf32>
    %cst_172 = arith.constant 1.000000e+00 : f32
    %377 = vector.broadcast %cst_172 : f32 to vector<2x64xf32>
    %378 = arith.addf %376, %377 : vector<2x64xf32>
    %cst_173 = arith.constant 5.000000e-01 : f32
    %379 = vector.broadcast %cst_173 : f32 to vector<2x64xf32>
    %380 = arith.mulf %379, %378 : vector<2x64xf32>
    %381 = vector.extract_strided_slice %370 {offsets = [0, 64], sizes = [2, 64], strides = [1, 1]} : vector<2x128xf32> to vector<2x64xf32>
    %382 = arith.mulf %381, %355 : vector<2x64xf32>
    %383 = vector.extract_strided_slice %370 {offsets = [0, 0], sizes = [2, 64], strides = [1, 1]} : vector<2x128xf32> to vector<2x64xf32>
    %384 = arith.mulf %383, %372 : vector<2x64xf32>
    %385 = arith.addf %382, %384 : vector<2x64xf32>
    %386 = math.tanh %385 : vector<2x64xf32>
    %387 = arith.mulf %380, %386 : vector<2x64xf32>
    %c18_174 = arith.constant 18 : index
    %c0_175 = arith.constant 0 : index
    %388 = vector.load %arg20[%c18_174, %c0_175] : memref<32x64xf32, #tpu.memory_space<vmem>>, vector<2x64xf32>
    tpu.vector_store %arg20[%c18_174, %c0_175], %387 {strides = array<i32>} : memref<32x64xf32, #tpu.memory_space<vmem>>, vector<2x64xf32>,
    %c20 = arith.constant 20 : index
    %c0_176 = arith.constant 0 : index
    %389 = vector.load %arg19[%c20, %c0_176] : memref<32x256xf32, #tpu.memory_space<vmem>>, vector<2x256xf32>
    %390 = arith.truncf %387 : vector<2x64xf32> to vector<2x64xbf16>
    %cst_177 = arith.constant dense<0.000000e+00> : vector<2x256xf32>
    %391 = tpu.matmul %390, %86, %cst_177 {dimension_numbers = #tpu.dot_dimension_numbers<[1], [0], [0], [1], [0, 0, 1, 1], [], []>} : vector<2x64xbf16>, vector<64x256xbf16>, vector<2x256xf32> -> vector<2x256xf32>
    %392 = arith.addf %389, %391 : vector<2x256xf32>
    %393 = vector.extract_strided_slice %392 {offsets = [0, 0], sizes = [2, 128], strides = [1, 1]} : vector<2x256xf32> to vector<2x128xf32>
    %cst_178 = arith.constant 5.000000e-01 : f32
    %394 = vector.broadcast %cst_178 : f32 to vector<2x128xf32>
    %395 = arith.mulf %394, %393 : vector<2x128xf32>
    %396 = math.tanh %395 : vector<2x128xf32>
    %cst_179 = arith.constant 1.000000e+00 : f32
    %397 = vector.broadcast %cst_179 : f32 to vector<2x128xf32>
    %398 = arith.addf %396, %397 : vector<2x128xf32>
    %cst_180 = arith.constant 5.000000e-01 : f32
    %399 = vector.broadcast %cst_180 : f32 to vector<2x128xf32>
    %400 = arith.mulf %399, %398 : vector<2x128xf32>
    %401 = vector.extract_strided_slice %392 {offsets = [0, 128], sizes = [2, 64], strides = [1, 1]} : vector<2x256xf32> to vector<2x64xf32>
    %402 = math.tanh %401 : vector<2x64xf32>
    %403 = vector.extract_strided_slice %392 {offsets = [0, 192], sizes = [2, 64], strides = [1, 1]} : vector<2x256xf32> to vector<2x64xf32>
    %cst_181 = arith.constant 5.000000e-01 : f32
    %404 = vector.broadcast %cst_181 : f32 to vector<2x64xf32>
    %405 = arith.mulf %404, %403 : vector<2x64xf32>
    %406 = math.tanh %405 : vector<2x64xf32>
    %cst_182 = arith.constant 1.000000e+00 : f32
    %407 = vector.broadcast %cst_182 : f32 to vector<2x64xf32>
    %408 = arith.addf %406, %407 : vector<2x64xf32>
    %cst_183 = arith.constant 5.000000e-01 : f32
    %409 = vector.broadcast %cst_183 : f32 to vector<2x64xf32>
    %410 = arith.mulf %409, %408 : vector<2x64xf32>
    %411 = vector.extract_strided_slice %400 {offsets = [0, 64], sizes = [2, 64], strides = [1, 1]} : vector<2x128xf32> to vector<2x64xf32>
    %412 = arith.mulf %411, %385 : vector<2x64xf32>
    %413 = vector.extract_strided_slice %400 {offsets = [0, 0], sizes = [2, 64], strides = [1, 1]} : vector<2x128xf32> to vector<2x64xf32>
    %414 = arith.mulf %413, %402 : vector<2x64xf32>
    %415 = arith.addf %412, %414 : vector<2x64xf32>
    %416 = math.tanh %415 : vector<2x64xf32>
    %417 = arith.mulf %410, %416 : vector<2x64xf32>
    %c20_184 = arith.constant 20 : index
    %c0_185 = arith.constant 0 : index
    %418 = vector.load %arg20[%c20_184, %c0_185] : memref<32x64xf32, #tpu.memory_space<vmem>>, vector<2x64xf32>
    tpu.vector_store %arg20[%c20_184, %c0_185], %417 {strides = array<i32>} : memref<32x64xf32, #tpu.memory_space<vmem>>, vector<2x64xf32>,
    %c22 = arith.constant 22 : index
    %c0_186 = arith.constant 0 : index
    %419 = vector.load %arg19[%c22, %c0_186] : memref<32x256xf32, #tpu.memory_space<vmem>>, vector<2x256xf32>
    %420 = arith.truncf %417 : vector<2x64xf32> to vector<2x64xbf16>
    %cst_187 = arith.constant dense<0.000000e+00> : vector<2x256xf32>
    %421 = tpu.matmul %420, %86, %cst_187 {dimension_numbers = #tpu.dot_dimension_numbers<[1], [0], [0], [1], [0, 0, 1, 1], [], []>} : vector<2x64xbf16>, vector<64x256xbf16>, vector<2x256xf32> -> vector<2x256xf32>
    %422 = arith.addf %419, %421 : vector<2x256xf32>
    %423 = vector.extract_strided_slice %422 {offsets = [0, 0], sizes = [2, 128], strides = [1, 1]} : vector<2x256xf32> to vector<2x128xf32>
    %cst_188 = arith.constant 5.000000e-01 : f32
    %424 = vector.broadcast %cst_188 : f32 to vector<2x128xf32>
    %425 = arith.mulf %424, %423 : vector<2x128xf32>
    %426 = math.tanh %425 : vector<2x128xf32>
    %cst_189 = arith.constant 1.000000e+00 : f32
    %427 = vector.broadcast %cst_189 : f32 to vector<2x128xf32>
    %428 = arith.addf %426, %427 : vector<2x128xf32>
    %cst_190 = arith.constant 5.000000e-01 : f32
    %429 = vector.broadcast %cst_190 : f32 to vector<2x128xf32>
    %430 = arith.mulf %429, %428 : vector<2x128xf32>
    %431 = vector.extract_strided_slice %422 {offsets = [0, 128], sizes = [2, 64], strides = [1, 1]} : vector<2x256xf32> to vector<2x64xf32>
    %432 = math.tanh %431 : vector<2x64xf32>
    %433 = vector.extract_strided_slice %422 {offsets = [0, 192], sizes = [2, 64], strides = [1, 1]} : vector<2x256xf32> to vector<2x64xf32>
    %cst_191 = arith.constant 5.000000e-01 : f32
    %434 = vector.broadcast %cst_191 : f32 to vector<2x64xf32>
    %435 = arith.mulf %434, %433 : vector<2x64xf32>
    %436 = math.tanh %435 : vector<2x64xf32>
    %cst_192 = arith.constant 1.000000e+00 : f32
    %437 = vector.broadcast %cst_192 : f32 to vector<2x64xf32>
    %438 = arith.addf %436, %437 : vector<2x64xf32>
    %cst_193 = arith.constant 5.000000e-01 : f32
    %439 = vector.broadcast %cst_193 : f32 to vector<2x64xf32>
    %440 = arith.mulf %439, %438 : vector<2x64xf32>
    %441 = vector.extract_strided_slice %430 {offsets = [0, 64], sizes = [2, 64], strides = [1, 1]} : vector<2x128xf32> to vector<2x64xf32>
    %442 = arith.mulf %441, %415 : vector<2x64xf32>
    %443 = vector.extract_strided_slice %430 {offsets = [0, 0], sizes = [2, 64], strides = [1, 1]} : vector<2x128xf32> to vector<2x64xf32>
    %444 = arith.mulf %443, %432 : vector<2x64xf32>
    %445 = arith.addf %442, %444 : vector<2x64xf32>
    %446 = math.tanh %445 : vector<2x64xf32>
    %447 = arith.mulf %440, %446 : vector<2x64xf32>
    %c22_194 = arith.constant 22 : index
    %c0_195 = arith.constant 0 : index
    %448 = vector.load %arg20[%c22_194, %c0_195] : memref<32x64xf32, #tpu.memory_space<vmem>>, vector<2x64xf32>
    tpu.vector_store %arg20[%c22_194, %c0_195], %447 {strides = array<i32>} : memref<32x64xf32, #tpu.memory_space<vmem>>, vector<2x64xf32>,
    %c24 = arith.constant 24 : index
    %c0_196 = arith.constant 0 : index
    %449 = vector.load %arg19[%c24, %c0_196] : memref<32x256xf32, #tpu.memory_space<vmem>>, vector<2x256xf32>
    %450 = arith.truncf %447 : vector<2x64xf32> to vector<2x64xbf16>
    %cst_197 = arith.constant dense<0.000000e+00> : vector<2x256xf32>
    %451 = tpu.matmul %450, %86, %cst_197 {dimension_numbers = #tpu.dot_dimension_numbers<[1], [0], [0], [1], [0, 0, 1, 1], [], []>} : vector<2x64xbf16>, vector<64x256xbf16>, vector<2x256xf32> -> vector<2x256xf32>
    %452 = arith.addf %449, %451 : vector<2x256xf32>
    %453 = vector.extract_strided_slice %452 {offsets = [0, 0], sizes = [2, 128], strides = [1, 1]} : vector<2x256xf32> to vector<2x128xf32>
    %cst_198 = arith.constant 5.000000e-01 : f32
    %454 = vector.broadcast %cst_198 : f32 to vector<2x128xf32>
    %455 = arith.mulf %454, %453 : vector<2x128xf32>
    %456 = math.tanh %455 : vector<2x128xf32>
    %cst_199 = arith.constant 1.000000e+00 : f32
    %457 = vector.broadcast %cst_199 : f32 to vector<2x128xf32>
    %458 = arith.addf %456, %457 : vector<2x128xf32>
    %cst_200 = arith.constant 5.000000e-01 : f32
    %459 = vector.broadcast %cst_200 : f32 to vector<2x128xf32>
    %460 = arith.mulf %459, %458 : vector<2x128xf32>
    %461 = vector.extract_strided_slice %452 {offsets = [0, 128], sizes = [2, 64], strides = [1, 1]} : vector<2x256xf32> to vector<2x64xf32>
    %462 = math.tanh %461 : vector<2x64xf32>
    %463 = vector.extract_strided_slice %452 {offsets = [0, 192], sizes = [2, 64], strides = [1, 1]} : vector<2x256xf32> to vector<2x64xf32>
    %cst_201 = arith.constant 5.000000e-01 : f32
    %464 = vector.broadcast %cst_201 : f32 to vector<2x64xf32>
    %465 = arith.mulf %464, %463 : vector<2x64xf32>
    %466 = math.tanh %465 : vector<2x64xf32>
    %cst_202 = arith.constant 1.000000e+00 : f32
    %467 = vector.broadcast %cst_202 : f32 to vector<2x64xf32>
    %468 = arith.addf %466, %467 : vector<2x64xf32>
    %cst_203 = arith.constant 5.000000e-01 : f32
    %469 = vector.broadcast %cst_203 : f32 to vector<2x64xf32>
    %470 = arith.mulf %469, %468 : vector<2x64xf32>
    %471 = vector.extract_strided_slice %460 {offsets = [0, 64], sizes = [2, 64], strides = [1, 1]} : vector<2x128xf32> to vector<2x64xf32>
    %472 = arith.mulf %471, %445 : vector<2x64xf32>
    %473 = vector.extract_strided_slice %460 {offsets = [0, 0], sizes = [2, 64], strides = [1, 1]} : vector<2x128xf32> to vector<2x64xf32>
    %474 = arith.mulf %473, %462 : vector<2x64xf32>
    %475 = arith.addf %472, %474 : vector<2x64xf32>
    %476 = math.tanh %475 : vector<2x64xf32>
    %477 = arith.mulf %470, %476 : vector<2x64xf32>
    %c24_204 = arith.constant 24 : index
    %c0_205 = arith.constant 0 : index
    %478 = vector.load %arg20[%c24_204, %c0_205] : memref<32x64xf32, #tpu.memory_space<vmem>>, vector<2x64xf32>
    tpu.vector_store %arg20[%c24_204, %c0_205], %477 {strides = array<i32>} : memref<32x64xf32, #tpu.memory_space<vmem>>, vector<2x64xf32>,
    %c26 = arith.constant 26 : index
    %c0_206 = arith.constant 0 : index
    %479 = vector.load %arg19[%c26, %c0_206] : memref<32x256xf32, #tpu.memory_space<vmem>>, vector<2x256xf32>
    %480 = arith.truncf %477 : vector<2x64xf32> to vector<2x64xbf16>
    %cst_207 = arith.constant dense<0.000000e+00> : vector<2x256xf32>
    %481 = tpu.matmul %480, %86, %cst_207 {dimension_numbers = #tpu.dot_dimension_numbers<[1], [0], [0], [1], [0, 0, 1, 1], [], []>} : vector<2x64xbf16>, vector<64x256xbf16>, vector<2x256xf32> -> vector<2x256xf32>
    %482 = arith.addf %479, %481 : vector<2x256xf32>
    %483 = vector.extract_strided_slice %482 {offsets = [0, 0], sizes = [2, 128], strides = [1, 1]} : vector<2x256xf32> to vector<2x128xf32>
    %cst_208 = arith.constant 5.000000e-01 : f32
    %484 = vector.broadcast %cst_208 : f32 to vector<2x128xf32>
    %485 = arith.mulf %484, %483 : vector<2x128xf32>
    %486 = math.tanh %485 : vector<2x128xf32>
    %cst_209 = arith.constant 1.000000e+00 : f32
    %487 = vector.broadcast %cst_209 : f32 to vector<2x128xf32>
    %488 = arith.addf %486, %487 : vector<2x128xf32>
    %cst_210 = arith.constant 5.000000e-01 : f32
    %489 = vector.broadcast %cst_210 : f32 to vector<2x128xf32>
    %490 = arith.mulf %489, %488 : vector<2x128xf32>
    %491 = vector.extract_strided_slice %482 {offsets = [0, 128], sizes = [2, 64], strides = [1, 1]} : vector<2x256xf32> to vector<2x64xf32>
    %492 = math.tanh %491 : vector<2x64xf32>
    %493 = vector.extract_strided_slice %482 {offsets = [0, 192], sizes = [2, 64], strides = [1, 1]} : vector<2x256xf32> to vector<2x64xf32>
    %cst_211 = arith.constant 5.000000e-01 : f32
    %494 = vector.broadcast %cst_211 : f32 to vector<2x64xf32>
    %495 = arith.mulf %494, %493 : vector<2x64xf32>
    %496 = math.tanh %495 : vector<2x64xf32>
    %cst_212 = arith.constant 1.000000e+00 : f32
    %497 = vector.broadcast %cst_212 : f32 to vector<2x64xf32>
    %498 = arith.addf %496, %497 : vector<2x64xf32>
    %cst_213 = arith.constant 5.000000e-01 : f32
    %499 = vector.broadcast %cst_213 : f32 to vector<2x64xf32>
    %500 = arith.mulf %499, %498 : vector<2x64xf32>
    %501 = vector.extract_strided_slice %490 {offsets = [0, 64], sizes = [2, 64], strides = [1, 1]} : vector<2x128xf32> to vector<2x64xf32>
    %502 = arith.mulf %501, %475 : vector<2x64xf32>
    %503 = vector.extract_strided_slice %490 {offsets = [0, 0], sizes = [2, 64], strides = [1, 1]} : vector<2x128xf32> to vector<2x64xf32>
    %504 = arith.mulf %503, %492 : vector<2x64xf32>
    %505 = arith.addf %502, %504 : vector<2x64xf32>
    %506 = math.tanh %505 : vector<2x64xf32>
    %507 = arith.mulf %500, %506 : vector<2x64xf32>
    %c26_214 = arith.constant 26 : index
    %c0_215 = arith.constant 0 : index
    %508 = vector.load %arg20[%c26_214, %c0_215] : memref<32x64xf32, #tpu.memory_space<vmem>>, vector<2x64xf32>
    tpu.vector_store %arg20[%c26_214, %c0_215], %507 {strides = array<i32>} : memref<32x64xf32, #tpu.memory_space<vmem>>, vector<2x64xf32>,
    %c28 = arith.constant 28 : index
    %c0_216 = arith.constant 0 : index
    %509 = vector.load %arg19[%c28, %c0_216] : memref<32x256xf32, #tpu.memory_space<vmem>>, vector<2x256xf32>
    %510 = arith.truncf %507 : vector<2x64xf32> to vector<2x64xbf16>
    %cst_217 = arith.constant dense<0.000000e+00> : vector<2x256xf32>
    %511 = tpu.matmul %510, %86, %cst_217 {dimension_numbers = #tpu.dot_dimension_numbers<[1], [0], [0], [1], [0, 0, 1, 1], [], []>} : vector<2x64xbf16>, vector<64x256xbf16>, vector<2x256xf32> -> vector<2x256xf32>
    %512 = arith.addf %509, %511 : vector<2x256xf32>
    %513 = vector.extract_strided_slice %512 {offsets = [0, 0], sizes = [2, 128], strides = [1, 1]} : vector<2x256xf32> to vector<2x128xf32>
    %cst_218 = arith.constant 5.000000e-01 : f32
    %514 = vector.broadcast %cst_218 : f32 to vector<2x128xf32>
    %515 = arith.mulf %514, %513 : vector<2x128xf32>
    %516 = math.tanh %515 : vector<2x128xf32>
    %cst_219 = arith.constant 1.000000e+00 : f32
    %517 = vector.broadcast %cst_219 : f32 to vector<2x128xf32>
    %518 = arith.addf %516, %517 : vector<2x128xf32>
    %cst_220 = arith.constant 5.000000e-01 : f32
    %519 = vector.broadcast %cst_220 : f32 to vector<2x128xf32>
    %520 = arith.mulf %519, %518 : vector<2x128xf32>
    %521 = vector.extract_strided_slice %512 {offsets = [0, 128], sizes = [2, 64], strides = [1, 1]} : vector<2x256xf32> to vector<2x64xf32>
    %522 = math.tanh %521 : vector<2x64xf32>
    %523 = vector.extract_strided_slice %512 {offsets = [0, 192], sizes = [2, 64], strides = [1, 1]} : vector<2x256xf32> to vector<2x64xf32>
    %cst_221 = arith.constant 5.000000e-01 : f32
    %524 = vector.broadcast %cst_221 : f32 to vector<2x64xf32>
    %525 = arith.mulf %524, %523 : vector<2x64xf32>
    %526 = math.tanh %525 : vector<2x64xf32>
    %cst_222 = arith.constant 1.000000e+00 : f32
    %527 = vector.broadcast %cst_222 : f32 to vector<2x64xf32>
    %528 = arith.addf %526, %527 : vector<2x64xf32>
    %cst_223 = arith.constant 5.000000e-01 : f32
    %529 = vector.broadcast %cst_223 : f32 to vector<2x64xf32>
    %530 = arith.mulf %529, %528 : vector<2x64xf32>
    %531 = vector.extract_strided_slice %520 {offsets = [0, 64], sizes = [2, 64], strides = [1, 1]} : vector<2x128xf32> to vector<2x64xf32>
    %532 = arith.mulf %531, %505 : vector<2x64xf32>
    %533 = vector.extract_strided_slice %520 {offsets = [0, 0], sizes = [2, 64], strides = [1, 1]} : vector<2x128xf32> to vector<2x64xf32>
    %534 = arith.mulf %533, %522 : vector<2x64xf32>
    %535 = arith.addf %532, %534 : vector<2x64xf32>
    %536 = math.tanh %535 : vector<2x64xf32>
    %537 = arith.mulf %530, %536 : vector<2x64xf32>
    %c28_224 = arith.constant 28 : index
    %c0_225 = arith.constant 0 : index
    %538 = vector.load %arg20[%c28_224, %c0_225] : memref<32x64xf32, #tpu.memory_space<vmem>>, vector<2x64xf32>
    tpu.vector_store %arg20[%c28_224, %c0_225], %537 {strides = array<i32>} : memref<32x64xf32, #tpu.memory_space<vmem>>, vector<2x64xf32>,
    %c30 = arith.constant 30 : index
    %c0_226 = arith.constant 0 : index
    %539 = vector.load %arg19[%c30, %c0_226] : memref<32x256xf32, #tpu.memory_space<vmem>>, vector<2x256xf32>
    %540 = arith.truncf %537 : vector<2x64xf32> to vector<2x64xbf16>
    %cst_227 = arith.constant dense<0.000000e+00> : vector<2x256xf32>
    %541 = tpu.matmul %540, %86, %cst_227 {dimension_numbers = #tpu.dot_dimension_numbers<[1], [0], [0], [1], [0, 0, 1, 1], [], []>} : vector<2x64xbf16>, vector<64x256xbf16>, vector<2x256xf32> -> vector<2x256xf32>
    %542 = arith.addf %539, %541 : vector<2x256xf32>
    %543 = vector.extract_strided_slice %542 {offsets = [0, 0], sizes = [2, 128], strides = [1, 1]} : vector<2x256xf32> to vector<2x128xf32>
    %cst_228 = arith.constant 5.000000e-01 : f32
    %544 = vector.broadcast %cst_228 : f32 to vector<2x128xf32>
    %545 = arith.mulf %544, %543 : vector<2x128xf32>
    %546 = math.tanh %545 : vector<2x128xf32>
    %cst_229 = arith.constant 1.000000e+00 : f32
    %547 = vector.broadcast %cst_229 : f32 to vector<2x128xf32>
    %548 = arith.addf %546, %547 : vector<2x128xf32>
    %cst_230 = arith.constant 5.000000e-01 : f32
    %549 = vector.broadcast %cst_230 : f32 to vector<2x128xf32>
    %550 = arith.mulf %549, %548 : vector<2x128xf32>
    %551 = vector.extract_strided_slice %542 {offsets = [0, 128], sizes = [2, 64], strides = [1, 1]} : vector<2x256xf32> to vector<2x64xf32>
    %552 = math.tanh %551 : vector<2x64xf32>
    %553 = vector.extract_strided_slice %542 {offsets = [0, 192], sizes = [2, 64], strides = [1, 1]} : vector<2x256xf32> to vector<2x64xf32>
    %cst_231 = arith.constant 5.000000e-01 : f32
    %554 = vector.broadcast %cst_231 : f32 to vector<2x64xf32>
    %555 = arith.mulf %554, %553 : vector<2x64xf32>
    %556 = math.tanh %555 : vector<2x64xf32>
    %cst_232 = arith.constant 1.000000e+00 : f32
    %557 = vector.broadcast %cst_232 : f32 to vector<2x64xf32>
    %558 = arith.addf %556, %557 : vector<2x64xf32>
    %cst_233 = arith.constant 5.000000e-01 : f32
    %559 = vector.broadcast %cst_233 : f32 to vector<2x64xf32>
    %560 = arith.mulf %559, %558 : vector<2x64xf32>
    %561 = vector.extract_strided_slice %550 {offsets = [0, 64], sizes = [2, 64], strides = [1, 1]} : vector<2x128xf32> to vector<2x64xf32>
    %562 = arith.mulf %561, %535 : vector<2x64xf32>
    %563 = vector.extract_strided_slice %550 {offsets = [0, 0], sizes = [2, 64], strides = [1, 1]} : vector<2x128xf32> to vector<2x64xf32>
    %564 = arith.mulf %563, %552 : vector<2x64xf32>
    %565 = arith.addf %562, %564 : vector<2x64xf32>
    %566 = math.tanh %565 : vector<2x64xf32>
    %567 = arith.mulf %560, %566 : vector<2x64xf32>
    %c30_234 = arith.constant 30 : index
    %c0_235 = arith.constant 0 : index
    %568 = vector.load %arg20[%c30_234, %c0_235] : memref<32x64xf32, #tpu.memory_space<vmem>>, vector<2x64xf32>
    tpu.vector_store %arg20[%c30_234, %c0_235], %567 {strides = array<i32>} : memref<32x64xf32, #tpu.memory_space<vmem>>, vector<2x64xf32>,
    %c0_236 = arith.constant 0 : index
    %c0_237 = arith.constant 0 : index
    %569 = vector.load %arg20[%c0_236, %c0_237] : memref<32x64xf32, #tpu.memory_space<vmem>>, vector<32x64xf32>
    %cst_238 = arith.constant dense<0.000000e+00> : vector<32x64xf32>
    %570 = tpu.matmul %75, %569, %cst_238 {dimension_numbers = #tpu.dot_dimension_numbers<[1], [0], [0], [1], [0, 0, 1, 1], [], []>} : vector<32x32xf32>, vector<32x64xf32>, vector<32x64xf32> -> vector<32x64xf32>
    %571 = arith.truncf %569 : vector<32x64xf32> to vector<32x64xbf16>
    %c0_239 = arith.constant 0 : index
    %c0_240 = arith.constant 0 : index
    %572 = vector.load %arg8[%c0_239, %c0_240] : memref<64x32xbf16, #tpu.memory_space<vmem>>, vector<64x32xbf16>
    %cst_241 = arith.constant dense<0.000000e+00> : vector<32x32xf32>
    %573 = tpu.matmul %571, %572, %cst_241 {dimension_numbers = #tpu.dot_dimension_numbers<[1], [0], [0], [1], [0, 0, 1, 1], [], []>} : vector<32x64xbf16>, vector<64x32xbf16>, vector<32x32xf32> -> vector<32x32xf32>
    %574 = arith.truncf %570 : vector<32x64xf32> to vector<32x64xbf16>
    %c0_242 = arith.constant 0 : index
    %c0_243 = arith.constant 0 : index
    %575 = vector.load %arg9[%c0_242, %c0_243] : memref<64x32xbf16, #tpu.memory_space<vmem>>, vector<64x32xbf16>
    %cst_244 = arith.constant dense<0.000000e+00> : vector<32x32xf32>
    %576 = tpu.matmul %574, %575, %cst_244 {dimension_numbers = #tpu.dot_dimension_numbers<[1], [0], [0], [1], [0, 0, 1, 1], [], []>} : vector<32x64xbf16>, vector<64x32xbf16>, vector<32x32xf32> -> vector<32x32xf32>
    %577 = arith.addf %573, %576 : vector<32x32xf32>
    %c0_245 = arith.constant 0 : index
    %c0_246 = arith.constant 0 : index
    %578 = vector.load %arg10[%c0_245, %c0_246] : memref<1x32xf32, #tpu.memory_space<vmem>>, vector<1x32xf32>
    %579 = vector.broadcast %578 : vector<1x32xf32> to vector<32x32xf32>
    %580 = arith.addf %577, %579 : vector<32x32xf32>
    %581 = arith.truncf %580 : vector<32x32xf32> to vector<32x32xbf16>
    %c0_247 = arith.constant 0 : index
    %c0_248 = arith.constant 0 : index
    %582 = vector.load %arg3[%c0_247, %c0_248] : memref<32x32xf32, #tpu.memory_space<vmem>>, vector<32x32xf32>
    %c0_249 = arith.constant 0 : index
    %c0_250 = arith.constant 0 : index
    %583 = vector.load %arg11[%c0_249, %c0_250] : memref<32x256xbf16, #tpu.memory_space<vmem>>, vector<32x256xbf16>
    %cst_251 = arith.constant dense<0.000000e+00> : vector<32x256xf32>
    %584 = tpu.matmul %581, %583, %cst_251 {dimension_numbers = #tpu.dot_dimension_numbers<[1], [0], [0], [1], [0, 0, 1, 1], [], []>} : vector<32x32xbf16>, vector<32x256xbf16>, vector<32x256xf32> -> vector<32x256xf32>
    %c0_252 = arith.constant 0 : index
    %c0_253 = arith.constant 0 : index
    %585 = vector.load %arg12[%c0_252, %c0_253] : memref<1x256xf32, #tpu.memory_space<vmem>>, vector<1x256xf32>
    %586 = vector.broadcast %585 : vector<1x256xf32> to vector<32x256xf32>
    %587 = arith.addf %584, %586 : vector<32x256xf32>
    %588 = vector.extract_strided_slice %587 {offsets = [0, 0], sizes = [32, 128], strides = [1, 1]} : vector<32x256xf32> to vector<32x128xf32>
    %c0_254 = arith.constant 0 : index
    %c0_255 = arith.constant 0 : index
    %589 = vector.load %arg19[%c0_254, %c0_255] : memref<32x256xf32, #tpu.memory_space<vmem>>, vector<32x128xf32>
    tpu.vector_store %arg19[%c0_254, %c0_255], %588 {strides = array<i32>} : memref<32x256xf32, #tpu.memory_space<vmem>>, vector<32x128xf32>,
    %590 = vector.extract_strided_slice %587 {offsets = [0, 128], sizes = [32, 128], strides = [1, 1]} : vector<32x256xf32> to vector<32x128xf32>
    %cst_256 = arith.constant dense<0.000000e+00> : vector<32x128xf32>
    %591 = tpu.matmul %582, %590, %cst_256 {dimension_numbers = #tpu.dot_dimension_numbers<[1], [0], [0], [1], [0, 0, 1, 1], [], []>} : vector<32x32xf32>, vector<32x128xf32>, vector<32x128xf32> -> vector<32x128xf32>
    %c0_257 = arith.constant 0 : index
    %c128_258 = arith.constant 128 : index
    %592 = vector.load %arg19[%c0_257, %c128_258] : memref<32x256xf32, #tpu.memory_space<vmem>>, vector<32x128xf32>
    tpu.vector_store %arg19[%c0_257, %c128_258], %591 {strides = array<i32>} : memref<32x256xf32, #tpu.memory_space<vmem>>, vector<32x128xf32>,
    %c0_259 = arith.constant 0 : index
    %c0_260 = arith.constant 0 : index
    %593 = vector.load %arg13[%c0_259, %c0_260] : memref<64x256xbf16, #tpu.memory_space<vmem>>, vector<64x256xbf16>
    %cst_261 = arith.constant 0.000000e+00 : f32
    %594 = vector.broadcast %cst_261 : f32 to vector<2x64xf32>
    %cst_262 = arith.constant 0.000000e+00 : f32
    %595 = vector.broadcast %cst_262 : f32 to vector<2x64xf32>
    %c0_263 = arith.constant 0 : index
    %c0_264 = arith.constant 0 : index
    %596 = vector.load %arg19[%c0_263, %c0_264] : memref<32x256xf32, #tpu.memory_space<vmem>>, vector<2x256xf32>
    %597 = arith.truncf %594 : vector<2x64xf32> to vector<2x64xbf16>
    %cst_265 = arith.constant dense<0.000000e+00> : vector<2x256xf32>
    %598 = tpu.matmul %597, %593, %cst_265 {dimension_numbers = #tpu.dot_dimension_numbers<[1], [0], [0], [1], [0, 0, 1, 1], [], []>} : vector<2x64xbf16>, vector<64x256xbf16>, vector<2x256xf32> -> vector<2x256xf32>
    %599 = arith.addf %596, %598 : vector<2x256xf32>
    %600 = vector.extract_strided_slice %599 {offsets = [0, 0], sizes = [2, 128], strides = [1, 1]} : vector<2x256xf32> to vector<2x128xf32>
    %cst_266 = arith.constant 5.000000e-01 : f32
    %601 = vector.broadcast %cst_266 : f32 to vector<2x128xf32>
    %602 = arith.mulf %601, %600 : vector<2x128xf32>
    %603 = math.tanh %602 : vector<2x128xf32>
    %cst_267 = arith.constant 1.000000e+00 : f32
    %604 = vector.broadcast %cst_267 : f32 to vector<2x128xf32>
    %605 = arith.addf %603, %604 : vector<2x128xf32>
    %cst_268 = arith.constant 5.000000e-01 : f32
    %606 = vector.broadcast %cst_268 : f32 to vector<2x128xf32>
    %607 = arith.mulf %606, %605 : vector<2x128xf32>
    %608 = vector.extract_strided_slice %599 {offsets = [0, 128], sizes = [2, 64], strides = [1, 1]} : vector<2x256xf32> to vector<2x64xf32>
    %609 = math.tanh %608 : vector<2x64xf32>
    %610 = vector.extract_strided_slice %599 {offsets = [0, 192], sizes = [2, 64], strides = [1, 1]} : vector<2x256xf32> to vector<2x64xf32>
    %cst_269 = arith.constant 5.000000e-01 : f32
    %611 = vector.broadcast %cst_269 : f32 to vector<2x64xf32>
    %612 = arith.mulf %611, %610 : vector<2x64xf32>
    %613 = math.tanh %612 : vector<2x64xf32>
    %cst_270 = arith.constant 1.000000e+00 : f32
    %614 = vector.broadcast %cst_270 : f32 to vector<2x64xf32>
    %615 = arith.addf %613, %614 : vector<2x64xf32>
    %cst_271 = arith.constant 5.000000e-01 : f32
    %616 = vector.broadcast %cst_271 : f32 to vector<2x64xf32>
    %617 = arith.mulf %616, %615 : vector<2x64xf32>
    %618 = vector.extract_strided_slice %607 {offsets = [0, 64], sizes = [2, 64], strides = [1, 1]} : vector<2x128xf32> to vector<2x64xf32>
    %619 = arith.mulf %618, %595 : vector<2x64xf32>
    %620 = vector.extract_strided_slice %607 {offsets = [0, 0], sizes = [2, 64], strides = [1, 1]} : vector<2x128xf32> to vector<2x64xf32>
    %621 = arith.mulf %620, %609 : vector<2x64xf32>
    %622 = arith.addf %619, %621 : vector<2x64xf32>
    %623 = math.tanh %622 : vector<2x64xf32>
    %624 = arith.mulf %617, %623 : vector<2x64xf32>
    %c0_272 = arith.constant 0 : index
    %c0_273 = arith.constant 0 : index
    %625 = vector.load %arg20[%c0_272, %c0_273] : memref<32x64xf32, #tpu.memory_space<vmem>>, vector<2x64xf32>
    tpu.vector_store %arg20[%c0_272, %c0_273], %624 {strides = array<i32>} : memref<32x64xf32, #tpu.memory_space<vmem>>, vector<2x64xf32>,
    %c2_274 = arith.constant 2 : index
    %c0_275 = arith.constant 0 : index
    %626 = vector.load %arg19[%c2_274, %c0_275] : memref<32x256xf32, #tpu.memory_space<vmem>>, vector<2x256xf32>
    %627 = arith.truncf %624 : vector<2x64xf32> to vector<2x64xbf16>
    %cst_276 = arith.constant dense<0.000000e+00> : vector<2x256xf32>
    %628 = tpu.matmul %627, %593, %cst_276 {dimension_numbers = #tpu.dot_dimension_numbers<[1], [0], [0], [1], [0, 0, 1, 1], [], []>} : vector<2x64xbf16>, vector<64x256xbf16>, vector<2x256xf32> -> vector<2x256xf32>
    %629 = arith.addf %626, %628 : vector<2x256xf32>
    %630 = vector.extract_strided_slice %629 {offsets = [0, 0], sizes = [2, 128], strides = [1, 1]} : vector<2x256xf32> to vector<2x128xf32>
    %cst_277 = arith.constant 5.000000e-01 : f32
    %631 = vector.broadcast %cst_277 : f32 to vector<2x128xf32>
    %632 = arith.mulf %631, %630 : vector<2x128xf32>
    %633 = math.tanh %632 : vector<2x128xf32>
    %cst_278 = arith.constant 1.000000e+00 : f32
    %634 = vector.broadcast %cst_278 : f32 to vector<2x128xf32>
    %635 = arith.addf %633, %634 : vector<2x128xf32>
    %cst_279 = arith.constant 5.000000e-01 : f32
    %636 = vector.broadcast %cst_279 : f32 to vector<2x128xf32>
    %637 = arith.mulf %636, %635 : vector<2x128xf32>
    %638 = vector.extract_strided_slice %629 {offsets = [0, 128], sizes = [2, 64], strides = [1, 1]} : vector<2x256xf32> to vector<2x64xf32>
    %639 = math.tanh %638 : vector<2x64xf32>
    %640 = vector.extract_strided_slice %629 {offsets = [0, 192], sizes = [2, 64], strides = [1, 1]} : vector<2x256xf32> to vector<2x64xf32>
    %cst_280 = arith.constant 5.000000e-01 : f32
    %641 = vector.broadcast %cst_280 : f32 to vector<2x64xf32>
    %642 = arith.mulf %641, %640 : vector<2x64xf32>
    %643 = math.tanh %642 : vector<2x64xf32>
    %cst_281 = arith.constant 1.000000e+00 : f32
    %644 = vector.broadcast %cst_281 : f32 to vector<2x64xf32>
    %645 = arith.addf %643, %644 : vector<2x64xf32>
    %cst_282 = arith.constant 5.000000e-01 : f32
    %646 = vector.broadcast %cst_282 : f32 to vector<2x64xf32>
    %647 = arith.mulf %646, %645 : vector<2x64xf32>
    %648 = vector.extract_strided_slice %637 {offsets = [0, 64], sizes = [2, 64], strides = [1, 1]} : vector<2x128xf32> to vector<2x64xf32>
    %649 = arith.mulf %648, %622 : vector<2x64xf32>
    %650 = vector.extract_strided_slice %637 {offsets = [0, 0], sizes = [2, 64], strides = [1, 1]} : vector<2x128xf32> to vector<2x64xf32>
    %651 = arith.mulf %650, %639 : vector<2x64xf32>
    %652 = arith.addf %649, %651 : vector<2x64xf32>
    %653 = math.tanh %652 : vector<2x64xf32>
    %654 = arith.mulf %647, %653 : vector<2x64xf32>
    %c2_283 = arith.constant 2 : index
    %c0_284 = arith.constant 0 : index
    %655 = vector.load %arg20[%c2_283, %c0_284] : memref<32x64xf32, #tpu.memory_space<vmem>>, vector<2x64xf32>
    tpu.vector_store %arg20[%c2_283, %c0_284], %654 {strides = array<i32>} : memref<32x64xf32, #tpu.memory_space<vmem>>, vector<2x64xf32>,
    %c4_285 = arith.constant 4 : index
    %c0_286 = arith.constant 0 : index
    %656 = vector.load %arg19[%c4_285, %c0_286] : memref<32x256xf32, #tpu.memory_space<vmem>>, vector<2x256xf32>
    %657 = arith.truncf %654 : vector<2x64xf32> to vector<2x64xbf16>
    %cst_287 = arith.constant dense<0.000000e+00> : vector<2x256xf32>
    %658 = tpu.matmul %657, %593, %cst_287 {dimension_numbers = #tpu.dot_dimension_numbers<[1], [0], [0], [1], [0, 0, 1, 1], [], []>} : vector<2x64xbf16>, vector<64x256xbf16>, vector<2x256xf32> -> vector<2x256xf32>
    %659 = arith.addf %656, %658 : vector<2x256xf32>
    %660 = vector.extract_strided_slice %659 {offsets = [0, 0], sizes = [2, 128], strides = [1, 1]} : vector<2x256xf32> to vector<2x128xf32>
    %cst_288 = arith.constant 5.000000e-01 : f32
    %661 = vector.broadcast %cst_288 : f32 to vector<2x128xf32>
    %662 = arith.mulf %661, %660 : vector<2x128xf32>
    %663 = math.tanh %662 : vector<2x128xf32>
    %cst_289 = arith.constant 1.000000e+00 : f32
    %664 = vector.broadcast %cst_289 : f32 to vector<2x128xf32>
    %665 = arith.addf %663, %664 : vector<2x128xf32>
    %cst_290 = arith.constant 5.000000e-01 : f32
    %666 = vector.broadcast %cst_290 : f32 to vector<2x128xf32>
    %667 = arith.mulf %666, %665 : vector<2x128xf32>
    %668 = vector.extract_strided_slice %659 {offsets = [0, 128], sizes = [2, 64], strides = [1, 1]} : vector<2x256xf32> to vector<2x64xf32>
    %669 = math.tanh %668 : vector<2x64xf32>
    %670 = vector.extract_strided_slice %659 {offsets = [0, 192], sizes = [2, 64], strides = [1, 1]} : vector<2x256xf32> to vector<2x64xf32>
    %cst_291 = arith.constant 5.000000e-01 : f32
    %671 = vector.broadcast %cst_291 : f32 to vector<2x64xf32>
    %672 = arith.mulf %671, %670 : vector<2x64xf32>
    %673 = math.tanh %672 : vector<2x64xf32>
    %cst_292 = arith.constant 1.000000e+00 : f32
    %674 = vector.broadcast %cst_292 : f32 to vector<2x64xf32>
    %675 = arith.addf %673, %674 : vector<2x64xf32>
    %cst_293 = arith.constant 5.000000e-01 : f32
    %676 = vector.broadcast %cst_293 : f32 to vector<2x64xf32>
    %677 = arith.mulf %676, %675 : vector<2x64xf32>
    %678 = vector.extract_strided_slice %667 {offsets = [0, 64], sizes = [2, 64], strides = [1, 1]} : vector<2x128xf32> to vector<2x64xf32>
    %679 = arith.mulf %678, %652 : vector<2x64xf32>
    %680 = vector.extract_strided_slice %667 {offsets = [0, 0], sizes = [2, 64], strides = [1, 1]} : vector<2x128xf32> to vector<2x64xf32>
    %681 = arith.mulf %680, %669 : vector<2x64xf32>
    %682 = arith.addf %679, %681 : vector<2x64xf32>
    %683 = math.tanh %682 : vector<2x64xf32>
    %684 = arith.mulf %677, %683 : vector<2x64xf32>
    %c4_294 = arith.constant 4 : index
    %c0_295 = arith.constant 0 : index
    %685 = vector.load %arg20[%c4_294, %c0_295] : memref<32x64xf32, #tpu.memory_space<vmem>>, vector<2x64xf32>
    tpu.vector_store %arg20[%c4_294, %c0_295], %684 {strides = array<i32>} : memref<32x64xf32, #tpu.memory_space<vmem>>, vector<2x64xf32>,
    %c6_296 = arith.constant 6 : index
    %c0_297 = arith.constant 0 : index
    %686 = vector.load %arg19[%c6_296, %c0_297] : memref<32x256xf32, #tpu.memory_space<vmem>>, vector<2x256xf32>
    %687 = arith.truncf %684 : vector<2x64xf32> to vector<2x64xbf16>
    %cst_298 = arith.constant dense<0.000000e+00> : vector<2x256xf32>
    %688 = tpu.matmul %687, %593, %cst_298 {dimension_numbers = #tpu.dot_dimension_numbers<[1], [0], [0], [1], [0, 0, 1, 1], [], []>} : vector<2x64xbf16>, vector<64x256xbf16>, vector<2x256xf32> -> vector<2x256xf32>
    %689 = arith.addf %686, %688 : vector<2x256xf32>
    %690 = vector.extract_strided_slice %689 {offsets = [0, 0], sizes = [2, 128], strides = [1, 1]} : vector<2x256xf32> to vector<2x128xf32>
    %cst_299 = arith.constant 5.000000e-01 : f32
    %691 = vector.broadcast %cst_299 : f32 to vector<2x128xf32>
    %692 = arith.mulf %691, %690 : vector<2x128xf32>
    %693 = math.tanh %692 : vector<2x128xf32>
    %cst_300 = arith.constant 1.000000e+00 : f32
    %694 = vector.broadcast %cst_300 : f32 to vector<2x128xf32>
    %695 = arith.addf %693, %694 : vector<2x128xf32>
    %cst_301 = arith.constant 5.000000e-01 : f32
    %696 = vector.broadcast %cst_301 : f32 to vector<2x128xf32>
    %697 = arith.mulf %696, %695 : vector<2x128xf32>
    %698 = vector.extract_strided_slice %689 {offsets = [0, 128], sizes = [2, 64], strides = [1, 1]} : vector<2x256xf32> to vector<2x64xf32>
    %699 = math.tanh %698 : vector<2x64xf32>
    %700 = vector.extract_strided_slice %689 {offsets = [0, 192], sizes = [2, 64], strides = [1, 1]} : vector<2x256xf32> to vector<2x64xf32>
    %cst_302 = arith.constant 5.000000e-01 : f32
    %701 = vector.broadcast %cst_302 : f32 to vector<2x64xf32>
    %702 = arith.mulf %701, %700 : vector<2x64xf32>
    %703 = math.tanh %702 : vector<2x64xf32>
    %cst_303 = arith.constant 1.000000e+00 : f32
    %704 = vector.broadcast %cst_303 : f32 to vector<2x64xf32>
    %705 = arith.addf %703, %704 : vector<2x64xf32>
    %cst_304 = arith.constant 5.000000e-01 : f32
    %706 = vector.broadcast %cst_304 : f32 to vector<2x64xf32>
    %707 = arith.mulf %706, %705 : vector<2x64xf32>
    %708 = vector.extract_strided_slice %697 {offsets = [0, 64], sizes = [2, 64], strides = [1, 1]} : vector<2x128xf32> to vector<2x64xf32>
    %709 = arith.mulf %708, %682 : vector<2x64xf32>
    %710 = vector.extract_strided_slice %697 {offsets = [0, 0], sizes = [2, 64], strides = [1, 1]} : vector<2x128xf32> to vector<2x64xf32>
    %711 = arith.mulf %710, %699 : vector<2x64xf32>
    %712 = arith.addf %709, %711 : vector<2x64xf32>
    %713 = math.tanh %712 : vector<2x64xf32>
    %714 = arith.mulf %707, %713 : vector<2x64xf32>
    %c6_305 = arith.constant 6 : index
    %c0_306 = arith.constant 0 : index
    %715 = vector.load %arg20[%c6_305, %c0_306] : memref<32x64xf32, #tpu.memory_space<vmem>>, vector<2x64xf32>
    tpu.vector_store %arg20[%c6_305, %c0_306], %714 {strides = array<i32>} : memref<32x64xf32, #tpu.memory_space<vmem>>, vector<2x64xf32>,
    %c8_307 = arith.constant 8 : index
    %c0_308 = arith.constant 0 : index
    %716 = vector.load %arg19[%c8_307, %c0_308] : memref<32x256xf32, #tpu.memory_space<vmem>>, vector<2x256xf32>
    %717 = arith.truncf %714 : vector<2x64xf32> to vector<2x64xbf16>
    %cst_309 = arith.constant dense<0.000000e+00> : vector<2x256xf32>
    %718 = tpu.matmul %717, %593, %cst_309 {dimension_numbers = #tpu.dot_dimension_numbers<[1], [0], [0], [1], [0, 0, 1, 1], [], []>} : vector<2x64xbf16>, vector<64x256xbf16>, vector<2x256xf32> -> vector<2x256xf32>
    %719 = arith.addf %716, %718 : vector<2x256xf32>
    %720 = vector.extract_strided_slice %719 {offsets = [0, 0], sizes = [2, 128], strides = [1, 1]} : vector<2x256xf32> to vector<2x128xf32>
    %cst_310 = arith.constant 5.000000e-01 : f32
    %721 = vector.broadcast %cst_310 : f32 to vector<2x128xf32>
    %722 = arith.mulf %721, %720 : vector<2x128xf32>
    %723 = math.tanh %722 : vector<2x128xf32>
    %cst_311 = arith.constant 1.000000e+00 : f32
    %724 = vector.broadcast %cst_311 : f32 to vector<2x128xf32>
    %725 = arith.addf %723, %724 : vector<2x128xf32>
    %cst_312 = arith.constant 5.000000e-01 : f32
    %726 = vector.broadcast %cst_312 : f32 to vector<2x128xf32>
    %727 = arith.mulf %726, %725 : vector<2x128xf32>
    %728 = vector.extract_strided_slice %719 {offsets = [0, 128], sizes = [2, 64], strides = [1, 1]} : vector<2x256xf32> to vector<2x64xf32>
    %729 = math.tanh %728 : vector<2x64xf32>
    %730 = vector.extract_strided_slice %719 {offsets = [0, 192], sizes = [2, 64], strides = [1, 1]} : vector<2x256xf32> to vector<2x64xf32>
    %cst_313 = arith.constant 5.000000e-01 : f32
    %731 = vector.broadcast %cst_313 : f32 to vector<2x64xf32>
    %732 = arith.mulf %731, %730 : vector<2x64xf32>
    %733 = math.tanh %732 : vector<2x64xf32>
    %cst_314 = arith.constant 1.000000e+00 : f32
    %734 = vector.broadcast %cst_314 : f32 to vector<2x64xf32>
    %735 = arith.addf %733, %734 : vector<2x64xf32>
    %cst_315 = arith.constant 5.000000e-01 : f32
    %736 = vector.broadcast %cst_315 : f32 to vector<2x64xf32>
    %737 = arith.mulf %736, %735 : vector<2x64xf32>
    %738 = vector.extract_strided_slice %727 {offsets = [0, 64], sizes = [2, 64], strides = [1, 1]} : vector<2x128xf32> to vector<2x64xf32>
    %739 = arith.mulf %738, %712 : vector<2x64xf32>
    %740 = vector.extract_strided_slice %727 {offsets = [0, 0], sizes = [2, 64], strides = [1, 1]} : vector<2x128xf32> to vector<2x64xf32>
    %741 = arith.mulf %740, %729 : vector<2x64xf32>
    %742 = arith.addf %739, %741 : vector<2x64xf32>
    %743 = math.tanh %742 : vector<2x64xf32>
    %744 = arith.mulf %737, %743 : vector<2x64xf32>
    %c8_316 = arith.constant 8 : index
    %c0_317 = arith.constant 0 : index
    %745 = vector.load %arg20[%c8_316, %c0_317] : memref<32x64xf32, #tpu.memory_space<vmem>>, vector<2x64xf32>
    tpu.vector_store %arg20[%c8_316, %c0_317], %744 {strides = array<i32>} : memref<32x64xf32, #tpu.memory_space<vmem>>, vector<2x64xf32>,
    %c10_318 = arith.constant 10 : index
    %c0_319 = arith.constant 0 : index
    %746 = vector.load %arg19[%c10_318, %c0_319] : memref<32x256xf32, #tpu.memory_space<vmem>>, vector<2x256xf32>
    %747 = arith.truncf %744 : vector<2x64xf32> to vector<2x64xbf16>
    %cst_320 = arith.constant dense<0.000000e+00> : vector<2x256xf32>
    %748 = tpu.matmul %747, %593, %cst_320 {dimension_numbers = #tpu.dot_dimension_numbers<[1], [0], [0], [1], [0, 0, 1, 1], [], []>} : vector<2x64xbf16>, vector<64x256xbf16>, vector<2x256xf32> -> vector<2x256xf32>
    %749 = arith.addf %746, %748 : vector<2x256xf32>
    %750 = vector.extract_strided_slice %749 {offsets = [0, 0], sizes = [2, 128], strides = [1, 1]} : vector<2x256xf32> to vector<2x128xf32>
    %cst_321 = arith.constant 5.000000e-01 : f32
    %751 = vector.broadcast %cst_321 : f32 to vector<2x128xf32>
    %752 = arith.mulf %751, %750 : vector<2x128xf32>
    %753 = math.tanh %752 : vector<2x128xf32>
    %cst_322 = arith.constant 1.000000e+00 : f32
    %754 = vector.broadcast %cst_322 : f32 to vector<2x128xf32>
    %755 = arith.addf %753, %754 : vector<2x128xf32>
    %cst_323 = arith.constant 5.000000e-01 : f32
    %756 = vector.broadcast %cst_323 : f32 to vector<2x128xf32>
    %757 = arith.mulf %756, %755 : vector<2x128xf32>
    %758 = vector.extract_strided_slice %749 {offsets = [0, 128], sizes = [2, 64], strides = [1, 1]} : vector<2x256xf32> to vector<2x64xf32>
    %759 = math.tanh %758 : vector<2x64xf32>
    %760 = vector.extract_strided_slice %749 {offsets = [0, 192], sizes = [2, 64], strides = [1, 1]} : vector<2x256xf32> to vector<2x64xf32>
    %cst_324 = arith.constant 5.000000e-01 : f32
    %761 = vector.broadcast %cst_324 : f32 to vector<2x64xf32>
    %762 = arith.mulf %761, %760 : vector<2x64xf32>
    %763 = math.tanh %762 : vector<2x64xf32>
    %cst_325 = arith.constant 1.000000e+00 : f32
    %764 = vector.broadcast %cst_325 : f32 to vector<2x64xf32>
    %765 = arith.addf %763, %764 : vector<2x64xf32>
    %cst_326 = arith.constant 5.000000e-01 : f32
    %766 = vector.broadcast %cst_326 : f32 to vector<2x64xf32>
    %767 = arith.mulf %766, %765 : vector<2x64xf32>
    %768 = vector.extract_strided_slice %757 {offsets = [0, 64], sizes = [2, 64], strides = [1, 1]} : vector<2x128xf32> to vector<2x64xf32>
    %769 = arith.mulf %768, %742 : vector<2x64xf32>
    %770 = vector.extract_strided_slice %757 {offsets = [0, 0], sizes = [2, 64], strides = [1, 1]} : vector<2x128xf32> to vector<2x64xf32>
    %771 = arith.mulf %770, %759 : vector<2x64xf32>
    %772 = arith.addf %769, %771 : vector<2x64xf32>
    %773 = math.tanh %772 : vector<2x64xf32>
    %774 = arith.mulf %767, %773 : vector<2x64xf32>
    %c10_327 = arith.constant 10 : index
    %c0_328 = arith.constant 0 : index
    %775 = vector.load %arg20[%c10_327, %c0_328] : memref<32x64xf32, #tpu.memory_space<vmem>>, vector<2x64xf32>
    tpu.vector_store %arg20[%c10_327, %c0_328], %774 {strides = array<i32>} : memref<32x64xf32, #tpu.memory_space<vmem>>, vector<2x64xf32>,
    %c12_329 = arith.constant 12 : index
    %c0_330 = arith.constant 0 : index
    %776 = vector.load %arg19[%c12_329, %c0_330] : memref<32x256xf32, #tpu.memory_space<vmem>>, vector<2x256xf32>
    %777 = arith.truncf %774 : vector<2x64xf32> to vector<2x64xbf16>
    %cst_331 = arith.constant dense<0.000000e+00> : vector<2x256xf32>
    %778 = tpu.matmul %777, %593, %cst_331 {dimension_numbers = #tpu.dot_dimension_numbers<[1], [0], [0], [1], [0, 0, 1, 1], [], []>} : vector<2x64xbf16>, vector<64x256xbf16>, vector<2x256xf32> -> vector<2x256xf32>
    %779 = arith.addf %776, %778 : vector<2x256xf32>
    %780 = vector.extract_strided_slice %779 {offsets = [0, 0], sizes = [2, 128], strides = [1, 1]} : vector<2x256xf32> to vector<2x128xf32>
    %cst_332 = arith.constant 5.000000e-01 : f32
    %781 = vector.broadcast %cst_332 : f32 to vector<2x128xf32>
    %782 = arith.mulf %781, %780 : vector<2x128xf32>
    %783 = math.tanh %782 : vector<2x128xf32>
    %cst_333 = arith.constant 1.000000e+00 : f32
    %784 = vector.broadcast %cst_333 : f32 to vector<2x128xf32>
    %785 = arith.addf %783, %784 : vector<2x128xf32>
    %cst_334 = arith.constant 5.000000e-01 : f32
    %786 = vector.broadcast %cst_334 : f32 to vector<2x128xf32>
    %787 = arith.mulf %786, %785 : vector<2x128xf32>
    %788 = vector.extract_strided_slice %779 {offsets = [0, 128], sizes = [2, 64], strides = [1, 1]} : vector<2x256xf32> to vector<2x64xf32>
    %789 = math.tanh %788 : vector<2x64xf32>
    %790 = vector.extract_strided_slice %779 {offsets = [0, 192], sizes = [2, 64], strides = [1, 1]} : vector<2x256xf32> to vector<2x64xf32>
    %cst_335 = arith.constant 5.000000e-01 : f32
    %791 = vector.broadcast %cst_335 : f32 to vector<2x64xf32>
    %792 = arith.mulf %791, %790 : vector<2x64xf32>
    %793 = math.tanh %792 : vector<2x64xf32>
    %cst_336 = arith.constant 1.000000e+00 : f32
    %794 = vector.broadcast %cst_336 : f32 to vector<2x64xf32>
    %795 = arith.addf %793, %794 : vector<2x64xf32>
    %cst_337 = arith.constant 5.000000e-01 : f32
    %796 = vector.broadcast %cst_337 : f32 to vector<2x64xf32>
    %797 = arith.mulf %796, %795 : vector<2x64xf32>
    %798 = vector.extract_strided_slice %787 {offsets = [0, 64], sizes = [2, 64], strides = [1, 1]} : vector<2x128xf32> to vector<2x64xf32>
    %799 = arith.mulf %798, %772 : vector<2x64xf32>
    %800 = vector.extract_strided_slice %787 {offsets = [0, 0], sizes = [2, 64], strides = [1, 1]} : vector<2x128xf32> to vector<2x64xf32>
    %801 = arith.mulf %800, %789 : vector<2x64xf32>
    %802 = arith.addf %799, %801 : vector<2x64xf32>
    %803 = math.tanh %802 : vector<2x64xf32>
    %804 = arith.mulf %797, %803 : vector<2x64xf32>
    %c12_338 = arith.constant 12 : index
    %c0_339 = arith.constant 0 : index
    %805 = vector.load %arg20[%c12_338, %c0_339] : memref<32x64xf32, #tpu.memory_space<vmem>>, vector<2x64xf32>
    tpu.vector_store %arg20[%c12_338, %c0_339], %804 {strides = array<i32>} : memref<32x64xf32, #tpu.memory_space<vmem>>, vector<2x64xf32>,
    %c14_340 = arith.constant 14 : index
    %c0_341 = arith.constant 0 : index
    %806 = vector.load %arg19[%c14_340, %c0_341] : memref<32x256xf32, #tpu.memory_space<vmem>>, vector<2x256xf32>
    %807 = arith.truncf %804 : vector<2x64xf32> to vector<2x64xbf16>
    %cst_342 = arith.constant dense<0.000000e+00> : vector<2x256xf32>
    %808 = tpu.matmul %807, %593, %cst_342 {dimension_numbers = #tpu.dot_dimension_numbers<[1], [0], [0], [1], [0, 0, 1, 1], [], []>} : vector<2x64xbf16>, vector<64x256xbf16>, vector<2x256xf32> -> vector<2x256xf32>
    %809 = arith.addf %806, %808 : vector<2x256xf32>
    %810 = vector.extract_strided_slice %809 {offsets = [0, 0], sizes = [2, 128], strides = [1, 1]} : vector<2x256xf32> to vector<2x128xf32>
    %cst_343 = arith.constant 5.000000e-01 : f32
    %811 = vector.broadcast %cst_343 : f32 to vector<2x128xf32>
    %812 = arith.mulf %811, %810 : vector<2x128xf32>
    %813 = math.tanh %812 : vector<2x128xf32>
    %cst_344 = arith.constant 1.000000e+00 : f32
    %814 = vector.broadcast %cst_344 : f32 to vector<2x128xf32>
    %815 = arith.addf %813, %814 : vector<2x128xf32>
    %cst_345 = arith.constant 5.000000e-01 : f32
    %816 = vector.broadcast %cst_345 : f32 to vector<2x128xf32>
    %817 = arith.mulf %816, %815 : vector<2x128xf32>
    %818 = vector.extract_strided_slice %809 {offsets = [0, 128], sizes = [2, 64], strides = [1, 1]} : vector<2x256xf32> to vector<2x64xf32>
    %819 = math.tanh %818 : vector<2x64xf32>
    %820 = vector.extract_strided_slice %809 {offsets = [0, 192], sizes = [2, 64], strides = [1, 1]} : vector<2x256xf32> to vector<2x64xf32>
    %cst_346 = arith.constant 5.000000e-01 : f32
    %821 = vector.broadcast %cst_346 : f32 to vector<2x64xf32>
    %822 = arith.mulf %821, %820 : vector<2x64xf32>
    %823 = math.tanh %822 : vector<2x64xf32>
    %cst_347 = arith.constant 1.000000e+00 : f32
    %824 = vector.broadcast %cst_347 : f32 to vector<2x64xf32>
    %825 = arith.addf %823, %824 : vector<2x64xf32>
    %cst_348 = arith.constant 5.000000e-01 : f32
    %826 = vector.broadcast %cst_348 : f32 to vector<2x64xf32>
    %827 = arith.mulf %826, %825 : vector<2x64xf32>
    %828 = vector.extract_strided_slice %817 {offsets = [0, 64], sizes = [2, 64], strides = [1, 1]} : vector<2x128xf32> to vector<2x64xf32>
    %829 = arith.mulf %828, %802 : vector<2x64xf32>
    %830 = vector.extract_strided_slice %817 {offsets = [0, 0], sizes = [2, 64], strides = [1, 1]} : vector<2x128xf32> to vector<2x64xf32>
    %831 = arith.mulf %830, %819 : vector<2x64xf32>
    %832 = arith.addf %829, %831 : vector<2x64xf32>
    %833 = math.tanh %832 : vector<2x64xf32>
    %834 = arith.mulf %827, %833 : vector<2x64xf32>
    %c14_349 = arith.constant 14 : index
    %c0_350 = arith.constant 0 : index
    %835 = vector.load %arg20[%c14_349, %c0_350] : memref<32x64xf32, #tpu.memory_space<vmem>>, vector<2x64xf32>
    tpu.vector_store %arg20[%c14_349, %c0_350], %834 {strides = array<i32>} : memref<32x64xf32, #tpu.memory_space<vmem>>, vector<2x64xf32>,
    %c16_351 = arith.constant 16 : index
    %c0_352 = arith.constant 0 : index
    %836 = vector.load %arg19[%c16_351, %c0_352] : memref<32x256xf32, #tpu.memory_space<vmem>>, vector<2x256xf32>
    %837 = arith.truncf %834 : vector<2x64xf32> to vector<2x64xbf16>
    %cst_353 = arith.constant dense<0.000000e+00> : vector<2x256xf32>
    %838 = tpu.matmul %837, %593, %cst_353 {dimension_numbers = #tpu.dot_dimension_numbers<[1], [0], [0], [1], [0, 0, 1, 1], [], []>} : vector<2x64xbf16>, vector<64x256xbf16>, vector<2x256xf32> -> vector<2x256xf32>
    %839 = arith.addf %836, %838 : vector<2x256xf32>
    %840 = vector.extract_strided_slice %839 {offsets = [0, 0], sizes = [2, 128], strides = [1, 1]} : vector<2x256xf32> to vector<2x128xf32>
    %cst_354 = arith.constant 5.000000e-01 : f32
    %841 = vector.broadcast %cst_354 : f32 to vector<2x128xf32>
    %842 = arith.mulf %841, %840 : vector<2x128xf32>
    %843 = math.tanh %842 : vector<2x128xf32>
    %cst_355 = arith.constant 1.000000e+00 : f32
    %844 = vector.broadcast %cst_355 : f32 to vector<2x128xf32>
    %845 = arith.addf %843, %844 : vector<2x128xf32>
    %cst_356 = arith.constant 5.000000e-01 : f32
    %846 = vector.broadcast %cst_356 : f32 to vector<2x128xf32>
    %847 = arith.mulf %846, %845 : vector<2x128xf32>
    %848 = vector.extract_strided_slice %839 {offsets = [0, 128], sizes = [2, 64], strides = [1, 1]} : vector<2x256xf32> to vector<2x64xf32>
    %849 = math.tanh %848 : vector<2x64xf32>
    %850 = vector.extract_strided_slice %839 {offsets = [0, 192], sizes = [2, 64], strides = [1, 1]} : vector<2x256xf32> to vector<2x64xf32>
    %cst_357 = arith.constant 5.000000e-01 : f32
    %851 = vector.broadcast %cst_357 : f32 to vector<2x64xf32>
    %852 = arith.mulf %851, %850 : vector<2x64xf32>
    %853 = math.tanh %852 : vector<2x64xf32>
    %cst_358 = arith.constant 1.000000e+00 : f32
    %854 = vector.broadcast %cst_358 : f32 to vector<2x64xf32>
    %855 = arith.addf %853, %854 : vector<2x64xf32>
    %cst_359 = arith.constant 5.000000e-01 : f32
    %856 = vector.broadcast %cst_359 : f32 to vector<2x64xf32>
    %857 = arith.mulf %856, %855 : vector<2x64xf32>
    %858 = vector.extract_strided_slice %847 {offsets = [0, 64], sizes = [2, 64], strides = [1, 1]} : vector<2x128xf32> to vector<2x64xf32>
    %859 = arith.mulf %858, %832 : vector<2x64xf32>
    %860 = vector.extract_strided_slice %847 {offsets = [0, 0], sizes = [2, 64], strides = [1, 1]} : vector<2x128xf32> to vector<2x64xf32>
    %861 = arith.mulf %860, %849 : vector<2x64xf32>
    %862 = arith.addf %859, %861 : vector<2x64xf32>
    %863 = math.tanh %862 : vector<2x64xf32>
    %864 = arith.mulf %857, %863 : vector<2x64xf32>
    %c16_360 = arith.constant 16 : index
    %c0_361 = arith.constant 0 : index
    %865 = vector.load %arg20[%c16_360, %c0_361] : memref<32x64xf32, #tpu.memory_space<vmem>>, vector<2x64xf32>
    tpu.vector_store %arg20[%c16_360, %c0_361], %864 {strides = array<i32>} : memref<32x64xf32, #tpu.memory_space<vmem>>, vector<2x64xf32>,
    %c18_362 = arith.constant 18 : index
    %c0_363 = arith.constant 0 : index
    %866 = vector.load %arg19[%c18_362, %c0_363] : memref<32x256xf32, #tpu.memory_space<vmem>>, vector<2x256xf32>
    %867 = arith.truncf %864 : vector<2x64xf32> to vector<2x64xbf16>
    %cst_364 = arith.constant dense<0.000000e+00> : vector<2x256xf32>
    %868 = tpu.matmul %867, %593, %cst_364 {dimension_numbers = #tpu.dot_dimension_numbers<[1], [0], [0], [1], [0, 0, 1, 1], [], []>} : vector<2x64xbf16>, vector<64x256xbf16>, vector<2x256xf32> -> vector<2x256xf32>
    %869 = arith.addf %866, %868 : vector<2x256xf32>
    %870 = vector.extract_strided_slice %869 {offsets = [0, 0], sizes = [2, 128], strides = [1, 1]} : vector<2x256xf32> to vector<2x128xf32>
    %cst_365 = arith.constant 5.000000e-01 : f32
    %871 = vector.broadcast %cst_365 : f32 to vector<2x128xf32>
    %872 = arith.mulf %871, %870 : vector<2x128xf32>
    %873 = math.tanh %872 : vector<2x128xf32>
    %cst_366 = arith.constant 1.000000e+00 : f32
    %874 = vector.broadcast %cst_366 : f32 to vector<2x128xf32>
    %875 = arith.addf %873, %874 : vector<2x128xf32>
    %cst_367 = arith.constant 5.000000e-01 : f32
    %876 = vector.broadcast %cst_367 : f32 to vector<2x128xf32>
    %877 = arith.mulf %876, %875 : vector<2x128xf32>
    %878 = vector.extract_strided_slice %869 {offsets = [0, 128], sizes = [2, 64], strides = [1, 1]} : vector<2x256xf32> to vector<2x64xf32>
    %879 = math.tanh %878 : vector<2x64xf32>
    %880 = vector.extract_strided_slice %869 {offsets = [0, 192], sizes = [2, 64], strides = [1, 1]} : vector<2x256xf32> to vector<2x64xf32>
    %cst_368 = arith.constant 5.000000e-01 : f32
    %881 = vector.broadcast %cst_368 : f32 to vector<2x64xf32>
    %882 = arith.mulf %881, %880 : vector<2x64xf32>
    %883 = math.tanh %882 : vector<2x64xf32>
    %cst_369 = arith.constant 1.000000e+00 : f32
    %884 = vector.broadcast %cst_369 : f32 to vector<2x64xf32>
    %885 = arith.addf %883, %884 : vector<2x64xf32>
    %cst_370 = arith.constant 5.000000e-01 : f32
    %886 = vector.broadcast %cst_370 : f32 to vector<2x64xf32>
    %887 = arith.mulf %886, %885 : vector<2x64xf32>
    %888 = vector.extract_strided_slice %877 {offsets = [0, 64], sizes = [2, 64], strides = [1, 1]} : vector<2x128xf32> to vector<2x64xf32>
    %889 = arith.mulf %888, %862 : vector<2x64xf32>
    %890 = vector.extract_strided_slice %877 {offsets = [0, 0], sizes = [2, 64], strides = [1, 1]} : vector<2x128xf32> to vector<2x64xf32>
    %891 = arith.mulf %890, %879 : vector<2x64xf32>
    %892 = arith.addf %889, %891 : vector<2x64xf32>
    %893 = math.tanh %892 : vector<2x64xf32>
    %894 = arith.mulf %887, %893 : vector<2x64xf32>
    %c18_371 = arith.constant 18 : index
    %c0_372 = arith.constant 0 : index
    %895 = vector.load %arg20[%c18_371, %c0_372] : memref<32x64xf32, #tpu.memory_space<vmem>>, vector<2x64xf32>
    tpu.vector_store %arg20[%c18_371, %c0_372], %894 {strides = array<i32>} : memref<32x64xf32, #tpu.memory_space<vmem>>, vector<2x64xf32>,
    %c20_373 = arith.constant 20 : index
    %c0_374 = arith.constant 0 : index
    %896 = vector.load %arg19[%c20_373, %c0_374] : memref<32x256xf32, #tpu.memory_space<vmem>>, vector<2x256xf32>
    %897 = arith.truncf %894 : vector<2x64xf32> to vector<2x64xbf16>
    %cst_375 = arith.constant dense<0.000000e+00> : vector<2x256xf32>
    %898 = tpu.matmul %897, %593, %cst_375 {dimension_numbers = #tpu.dot_dimension_numbers<[1], [0], [0], [1], [0, 0, 1, 1], [], []>} : vector<2x64xbf16>, vector<64x256xbf16>, vector<2x256xf32> -> vector<2x256xf32>
    %899 = arith.addf %896, %898 : vector<2x256xf32>
    %900 = vector.extract_strided_slice %899 {offsets = [0, 0], sizes = [2, 128], strides = [1, 1]} : vector<2x256xf32> to vector<2x128xf32>
    %cst_376 = arith.constant 5.000000e-01 : f32
    %901 = vector.broadcast %cst_376 : f32 to vector<2x128xf32>
    %902 = arith.mulf %901, %900 : vector<2x128xf32>
    %903 = math.tanh %902 : vector<2x128xf32>
    %cst_377 = arith.constant 1.000000e+00 : f32
    %904 = vector.broadcast %cst_377 : f32 to vector<2x128xf32>
    %905 = arith.addf %903, %904 : vector<2x128xf32>
    %cst_378 = arith.constant 5.000000e-01 : f32
    %906 = vector.broadcast %cst_378 : f32 to vector<2x128xf32>
    %907 = arith.mulf %906, %905 : vector<2x128xf32>
    %908 = vector.extract_strided_slice %899 {offsets = [0, 128], sizes = [2, 64], strides = [1, 1]} : vector<2x256xf32> to vector<2x64xf32>
    %909 = math.tanh %908 : vector<2x64xf32>
    %910 = vector.extract_strided_slice %899 {offsets = [0, 192], sizes = [2, 64], strides = [1, 1]} : vector<2x256xf32> to vector<2x64xf32>
    %cst_379 = arith.constant 5.000000e-01 : f32
    %911 = vector.broadcast %cst_379 : f32 to vector<2x64xf32>
    %912 = arith.mulf %911, %910 : vector<2x64xf32>
    %913 = math.tanh %912 : vector<2x64xf32>
    %cst_380 = arith.constant 1.000000e+00 : f32
    %914 = vector.broadcast %cst_380 : f32 to vector<2x64xf32>
    %915 = arith.addf %913, %914 : vector<2x64xf32>
    %cst_381 = arith.constant 5.000000e-01 : f32
    %916 = vector.broadcast %cst_381 : f32 to vector<2x64xf32>
    %917 = arith.mulf %916, %915 : vector<2x64xf32>
    %918 = vector.extract_strided_slice %907 {offsets = [0, 64], sizes = [2, 64], strides = [1, 1]} : vector<2x128xf32> to vector<2x64xf32>
    %919 = arith.mulf %918, %892 : vector<2x64xf32>
    %920 = vector.extract_strided_slice %907 {offsets = [0, 0], sizes = [2, 64], strides = [1, 1]} : vector<2x128xf32> to vector<2x64xf32>
    %921 = arith.mulf %920, %909 : vector<2x64xf32>
    %922 = arith.addf %919, %921 : vector<2x64xf32>
    %923 = math.tanh %922 : vector<2x64xf32>
    %924 = arith.mulf %917, %923 : vector<2x64xf32>
    %c20_382 = arith.constant 20 : index
    %c0_383 = arith.constant 0 : index
    %925 = vector.load %arg20[%c20_382, %c0_383] : memref<32x64xf32, #tpu.memory_space<vmem>>, vector<2x64xf32>
    tpu.vector_store %arg20[%c20_382, %c0_383], %924 {strides = array<i32>} : memref<32x64xf32, #tpu.memory_space<vmem>>, vector<2x64xf32>,
    %c22_384 = arith.constant 22 : index
    %c0_385 = arith.constant 0 : index
    %926 = vector.load %arg19[%c22_384, %c0_385] : memref<32x256xf32, #tpu.memory_space<vmem>>, vector<2x256xf32>
    %927 = arith.truncf %924 : vector<2x64xf32> to vector<2x64xbf16>
    %cst_386 = arith.constant dense<0.000000e+00> : vector<2x256xf32>
    %928 = tpu.matmul %927, %593, %cst_386 {dimension_numbers = #tpu.dot_dimension_numbers<[1], [0], [0], [1], [0, 0, 1, 1], [], []>} : vector<2x64xbf16>, vector<64x256xbf16>, vector<2x256xf32> -> vector<2x256xf32>
    %929 = arith.addf %926, %928 : vector<2x256xf32>
    %930 = vector.extract_strided_slice %929 {offsets = [0, 0], sizes = [2, 128], strides = [1, 1]} : vector<2x256xf32> to vector<2x128xf32>
    %cst_387 = arith.constant 5.000000e-01 : f32
    %931 = vector.broadcast %cst_387 : f32 to vector<2x128xf32>
    %932 = arith.mulf %931, %930 : vector<2x128xf32>
    %933 = math.tanh %932 : vector<2x128xf32>
    %cst_388 = arith.constant 1.000000e+00 : f32
    %934 = vector.broadcast %cst_388 : f32 to vector<2x128xf32>
    %935 = arith.addf %933, %934 : vector<2x128xf32>
    %cst_389 = arith.constant 5.000000e-01 : f32
    %936 = vector.broadcast %cst_389 : f32 to vector<2x128xf32>
    %937 = arith.mulf %936, %935 : vector<2x128xf32>
    %938 = vector.extract_strided_slice %929 {offsets = [0, 128], sizes = [2, 64], strides = [1, 1]} : vector<2x256xf32> to vector<2x64xf32>
    %939 = math.tanh %938 : vector<2x64xf32>
    %940 = vector.extract_strided_slice %929 {offsets = [0, 192], sizes = [2, 64], strides = [1, 1]} : vector<2x256xf32> to vector<2x64xf32>
    %cst_390 = arith.constant 5.000000e-01 : f32
    %941 = vector.broadcast %cst_390 : f32 to vector<2x64xf32>
    %942 = arith.mulf %941, %940 : vector<2x64xf32>
    %943 = math.tanh %942 : vector<2x64xf32>
    %cst_391 = arith.constant 1.000000e+00 : f32
    %944 = vector.broadcast %cst_391 : f32 to vector<2x64xf32>
    %945 = arith.addf %943, %944 : vector<2x64xf32>
    %cst_392 = arith.constant 5.000000e-01 : f32
    %946 = vector.broadcast %cst_392 : f32 to vector<2x64xf32>
    %947 = arith.mulf %946, %945 : vector<2x64xf32>
    %948 = vector.extract_strided_slice %937 {offsets = [0, 64], sizes = [2, 64], strides = [1, 1]} : vector<2x128xf32> to vector<2x64xf32>
    %949 = arith.mulf %948, %922 : vector<2x64xf32>
    %950 = vector.extract_strided_slice %937 {offsets = [0, 0], sizes = [2, 64], strides = [1, 1]} : vector<2x128xf32> to vector<2x64xf32>
    %951 = arith.mulf %950, %939 : vector<2x64xf32>
    %952 = arith.addf %949, %951 : vector<2x64xf32>
    %953 = math.tanh %952 : vector<2x64xf32>
    %954 = arith.mulf %947, %953 : vector<2x64xf32>
    %c22_393 = arith.constant 22 : index
    %c0_394 = arith.constant 0 : index
    %955 = vector.load %arg20[%c22_393, %c0_394] : memref<32x64xf32, #tpu.memory_space<vmem>>, vector<2x64xf32>
    tpu.vector_store %arg20[%c22_393, %c0_394], %954 {strides = array<i32>} : memref<32x64xf32, #tpu.memory_space<vmem>>, vector<2x64xf32>,
    %c24_395 = arith.constant 24 : index
    %c0_396 = arith.constant 0 : index
    %956 = vector.load %arg19[%c24_395, %c0_396] : memref<32x256xf32, #tpu.memory_space<vmem>>, vector<2x256xf32>
    %957 = arith.truncf %954 : vector<2x64xf32> to vector<2x64xbf16>
    %cst_397 = arith.constant dense<0.000000e+00> : vector<2x256xf32>
    %958 = tpu.matmul %957, %593, %cst_397 {dimension_numbers = #tpu.dot_dimension_numbers<[1], [0], [0], [1], [0, 0, 1, 1], [], []>} : vector<2x64xbf16>, vector<64x256xbf16>, vector<2x256xf32> -> vector<2x256xf32>
    %959 = arith.addf %956, %958 : vector<2x256xf32>
    %960 = vector.extract_strided_slice %959 {offsets = [0, 0], sizes = [2, 128], strides = [1, 1]} : vector<2x256xf32> to vector<2x128xf32>
    %cst_398 = arith.constant 5.000000e-01 : f32
    %961 = vector.broadcast %cst_398 : f32 to vector<2x128xf32>
    %962 = arith.mulf %961, %960 : vector<2x128xf32>
    %963 = math.tanh %962 : vector<2x128xf32>
    %cst_399 = arith.constant 1.000000e+00 : f32
    %964 = vector.broadcast %cst_399 : f32 to vector<2x128xf32>
    %965 = arith.addf %963, %964 : vector<2x128xf32>
    %cst_400 = arith.constant 5.000000e-01 : f32
    %966 = vector.broadcast %cst_400 : f32 to vector<2x128xf32>
    %967 = arith.mulf %966, %965 : vector<2x128xf32>
    %968 = vector.extract_strided_slice %959 {offsets = [0, 128], sizes = [2, 64], strides = [1, 1]} : vector<2x256xf32> to vector<2x64xf32>
    %969 = math.tanh %968 : vector<2x64xf32>
    %970 = vector.extract_strided_slice %959 {offsets = [0, 192], sizes = [2, 64], strides = [1, 1]} : vector<2x256xf32> to vector<2x64xf32>
    %cst_401 = arith.constant 5.000000e-01 : f32
    %971 = vector.broadcast %cst_401 : f32 to vector<2x64xf32>
    %972 = arith.mulf %971, %970 : vector<2x64xf32>
    %973 = math.tanh %972 : vector<2x64xf32>
    %cst_402 = arith.constant 1.000000e+00 : f32
    %974 = vector.broadcast %cst_402 : f32 to vector<2x64xf32>
    %975 = arith.addf %973, %974 : vector<2x64xf32>
    %cst_403 = arith.constant 5.000000e-01 : f32
    %976 = vector.broadcast %cst_403 : f32 to vector<2x64xf32>
    %977 = arith.mulf %976, %975 : vector<2x64xf32>
    %978 = vector.extract_strided_slice %967 {offsets = [0, 64], sizes = [2, 64], strides = [1, 1]} : vector<2x128xf32> to vector<2x64xf32>
    %979 = arith.mulf %978, %952 : vector<2x64xf32>
    %980 = vector.extract_strided_slice %967 {offsets = [0, 0], sizes = [2, 64], strides = [1, 1]} : vector<2x128xf32> to vector<2x64xf32>
    %981 = arith.mulf %980, %969 : vector<2x64xf32>
    %982 = arith.addf %979, %981 : vector<2x64xf32>
    %983 = math.tanh %982 : vector<2x64xf32>
    %984 = arith.mulf %977, %983 : vector<2x64xf32>
    %c24_404 = arith.constant 24 : index
    %c0_405 = arith.constant 0 : index
    %985 = vector.load %arg20[%c24_404, %c0_405] : memref<32x64xf32, #tpu.memory_space<vmem>>, vector<2x64xf32>
    tpu.vector_store %arg20[%c24_404, %c0_405], %984 {strides = array<i32>} : memref<32x64xf32, #tpu.memory_space<vmem>>, vector<2x64xf32>,
    %c26_406 = arith.constant 26 : index
    %c0_407 = arith.constant 0 : index
    %986 = vector.load %arg19[%c26_406, %c0_407] : memref<32x256xf32, #tpu.memory_space<vmem>>, vector<2x256xf32>
    %987 = arith.truncf %984 : vector<2x64xf32> to vector<2x64xbf16>
    %cst_408 = arith.constant dense<0.000000e+00> : vector<2x256xf32>
    %988 = tpu.matmul %987, %593, %cst_408 {dimension_numbers = #tpu.dot_dimension_numbers<[1], [0], [0], [1], [0, 0, 1, 1], [], []>} : vector<2x64xbf16>, vector<64x256xbf16>, vector<2x256xf32> -> vector<2x256xf32>
    %989 = arith.addf %986, %988 : vector<2x256xf32>
    %990 = vector.extract_strided_slice %989 {offsets = [0, 0], sizes = [2, 128], strides = [1, 1]} : vector<2x256xf32> to vector<2x128xf32>
    %cst_409 = arith.constant 5.000000e-01 : f32
    %991 = vector.broadcast %cst_409 : f32 to vector<2x128xf32>
    %992 = arith.mulf %991, %990 : vector<2x128xf32>
    %993 = math.tanh %992 : vector<2x128xf32>
    %cst_410 = arith.constant 1.000000e+00 : f32
    %994 = vector.broadcast %cst_410 : f32 to vector<2x128xf32>
    %995 = arith.addf %993, %994 : vector<2x128xf32>
    %cst_411 = arith.constant 5.000000e-01 : f32
    %996 = vector.broadcast %cst_411 : f32 to vector<2x128xf32>
    %997 = arith.mulf %996, %995 : vector<2x128xf32>
    %998 = vector.extract_strided_slice %989 {offsets = [0, 128], sizes = [2, 64], strides = [1, 1]} : vector<2x256xf32> to vector<2x64xf32>
    %999 = math.tanh %998 : vector<2x64xf32>
    %1000 = vector.extract_strided_slice %989 {offsets = [0, 192], sizes = [2, 64], strides = [1, 1]} : vector<2x256xf32> to vector<2x64xf32>
    %cst_412 = arith.constant 5.000000e-01 : f32
    %1001 = vector.broadcast %cst_412 : f32 to vector<2x64xf32>
    %1002 = arith.mulf %1001, %1000 : vector<2x64xf32>
    %1003 = math.tanh %1002 : vector<2x64xf32>
    %cst_413 = arith.constant 1.000000e+00 : f32
    %1004 = vector.broadcast %cst_413 : f32 to vector<2x64xf32>
    %1005 = arith.addf %1003, %1004 : vector<2x64xf32>
    %cst_414 = arith.constant 5.000000e-01 : f32
    %1006 = vector.broadcast %cst_414 : f32 to vector<2x64xf32>
    %1007 = arith.mulf %1006, %1005 : vector<2x64xf32>
    %1008 = vector.extract_strided_slice %997 {offsets = [0, 64], sizes = [2, 64], strides = [1, 1]} : vector<2x128xf32> to vector<2x64xf32>
    %1009 = arith.mulf %1008, %982 : vector<2x64xf32>
    %1010 = vector.extract_strided_slice %997 {offsets = [0, 0], sizes = [2, 64], strides = [1, 1]} : vector<2x128xf32> to vector<2x64xf32>
    %1011 = arith.mulf %1010, %999 : vector<2x64xf32>
    %1012 = arith.addf %1009, %1011 : vector<2x64xf32>
    %1013 = math.tanh %1012 : vector<2x64xf32>
    %1014 = arith.mulf %1007, %1013 : vector<2x64xf32>
    %c26_415 = arith.constant 26 : index
    %c0_416 = arith.constant 0 : index
    %1015 = vector.load %arg20[%c26_415, %c0_416] : memref<32x64xf32, #tpu.memory_space<vmem>>, vector<2x64xf32>
    tpu.vector_store %arg20[%c26_415, %c0_416], %1014 {strides = array<i32>} : memref<32x64xf32, #tpu.memory_space<vmem>>, vector<2x64xf32>,
    %c28_417 = arith.constant 28 : index
    %c0_418 = arith.constant 0 : index
    %1016 = vector.load %arg19[%c28_417, %c0_418] : memref<32x256xf32, #tpu.memory_space<vmem>>, vector<2x256xf32>
    %1017 = arith.truncf %1014 : vector<2x64xf32> to vector<2x64xbf16>
    %cst_419 = arith.constant dense<0.000000e+00> : vector<2x256xf32>
    %1018 = tpu.matmul %1017, %593, %cst_419 {dimension_numbers = #tpu.dot_dimension_numbers<[1], [0], [0], [1], [0, 0, 1, 1], [], []>} : vector<2x64xbf16>, vector<64x256xbf16>, vector<2x256xf32> -> vector<2x256xf32>
    %1019 = arith.addf %1016, %1018 : vector<2x256xf32>
    %1020 = vector.extract_strided_slice %1019 {offsets = [0, 0], sizes = [2, 128], strides = [1, 1]} : vector<2x256xf32> to vector<2x128xf32>
    %cst_420 = arith.constant 5.000000e-01 : f32
    %1021 = vector.broadcast %cst_420 : f32 to vector<2x128xf32>
    %1022 = arith.mulf %1021, %1020 : vector<2x128xf32>
    %1023 = math.tanh %1022 : vector<2x128xf32>
    %cst_421 = arith.constant 1.000000e+00 : f32
    %1024 = vector.broadcast %cst_421 : f32 to vector<2x128xf32>
    %1025 = arith.addf %1023, %1024 : vector<2x128xf32>
    %cst_422 = arith.constant 5.000000e-01 : f32
    %1026 = vector.broadcast %cst_422 : f32 to vector<2x128xf32>
    %1027 = arith.mulf %1026, %1025 : vector<2x128xf32>
    %1028 = vector.extract_strided_slice %1019 {offsets = [0, 128], sizes = [2, 64], strides = [1, 1]} : vector<2x256xf32> to vector<2x64xf32>
    %1029 = math.tanh %1028 : vector<2x64xf32>
    %1030 = vector.extract_strided_slice %1019 {offsets = [0, 192], sizes = [2, 64], strides = [1, 1]} : vector<2x256xf32> to vector<2x64xf32>
    %cst_423 = arith.constant 5.000000e-01 : f32
    %1031 = vector.broadcast %cst_423 : f32 to vector<2x64xf32>
    %1032 = arith.mulf %1031, %1030 : vector<2x64xf32>
    %1033 = math.tanh %1032 : vector<2x64xf32>
    %cst_424 = arith.constant 1.000000e+00 : f32
    %1034 = vector.broadcast %cst_424 : f32 to vector<2x64xf32>
    %1035 = arith.addf %1033, %1034 : vector<2x64xf32>
    %cst_425 = arith.constant 5.000000e-01 : f32
    %1036 = vector.broadcast %cst_425 : f32 to vector<2x64xf32>
    %1037 = arith.mulf %1036, %1035 : vector<2x64xf32>
    %1038 = vector.extract_strided_slice %1027 {offsets = [0, 64], sizes = [2, 64], strides = [1, 1]} : vector<2x128xf32> to vector<2x64xf32>
    %1039 = arith.mulf %1038, %1012 : vector<2x64xf32>
    %1040 = vector.extract_strided_slice %1027 {offsets = [0, 0], sizes = [2, 64], strides = [1, 1]} : vector<2x128xf32> to vector<2x64xf32>
    %1041 = arith.mulf %1040, %1029 : vector<2x64xf32>
    %1042 = arith.addf %1039, %1041 : vector<2x64xf32>
    %1043 = math.tanh %1042 : vector<2x64xf32>
    %1044 = arith.mulf %1037, %1043 : vector<2x64xf32>
    %c28_426 = arith.constant 28 : index
    %c0_427 = arith.constant 0 : index
    %1045 = vector.load %arg20[%c28_426, %c0_427] : memref<32x64xf32, #tpu.memory_space<vmem>>, vector<2x64xf32>
    tpu.vector_store %arg20[%c28_426, %c0_427], %1044 {strides = array<i32>} : memref<32x64xf32, #tpu.memory_space<vmem>>, vector<2x64xf32>,
    %c30_428 = arith.constant 30 : index
    %c0_429 = arith.constant 0 : index
    %1046 = vector.load %arg19[%c30_428, %c0_429] : memref<32x256xf32, #tpu.memory_space<vmem>>, vector<2x256xf32>
    %1047 = arith.truncf %1044 : vector<2x64xf32> to vector<2x64xbf16>
    %cst_430 = arith.constant dense<0.000000e+00> : vector<2x256xf32>
    %1048 = tpu.matmul %1047, %593, %cst_430 {dimension_numbers = #tpu.dot_dimension_numbers<[1], [0], [0], [1], [0, 0, 1, 1], [], []>} : vector<2x64xbf16>, vector<64x256xbf16>, vector<2x256xf32> -> vector<2x256xf32>
    %1049 = arith.addf %1046, %1048 : vector<2x256xf32>
    %1050 = vector.extract_strided_slice %1049 {offsets = [0, 0], sizes = [2, 128], strides = [1, 1]} : vector<2x256xf32> to vector<2x128xf32>
    %cst_431 = arith.constant 5.000000e-01 : f32
    %1051 = vector.broadcast %cst_431 : f32 to vector<2x128xf32>
    %1052 = arith.mulf %1051, %1050 : vector<2x128xf32>
    %1053 = math.tanh %1052 : vector<2x128xf32>
    %cst_432 = arith.constant 1.000000e+00 : f32
    %1054 = vector.broadcast %cst_432 : f32 to vector<2x128xf32>
    %1055 = arith.addf %1053, %1054 : vector<2x128xf32>
    %cst_433 = arith.constant 5.000000e-01 : f32
    %1056 = vector.broadcast %cst_433 : f32 to vector<2x128xf32>
    %1057 = arith.mulf %1056, %1055 : vector<2x128xf32>
    %1058 = vector.extract_strided_slice %1049 {offsets = [0, 128], sizes = [2, 64], strides = [1, 1]} : vector<2x256xf32> to vector<2x64xf32>
    %1059 = math.tanh %1058 : vector<2x64xf32>
    %1060 = vector.extract_strided_slice %1049 {offsets = [0, 192], sizes = [2, 64], strides = [1, 1]} : vector<2x256xf32> to vector<2x64xf32>
    %cst_434 = arith.constant 5.000000e-01 : f32
    %1061 = vector.broadcast %cst_434 : f32 to vector<2x64xf32>
    %1062 = arith.mulf %1061, %1060 : vector<2x64xf32>
    %1063 = math.tanh %1062 : vector<2x64xf32>
    %cst_435 = arith.constant 1.000000e+00 : f32
    %1064 = vector.broadcast %cst_435 : f32 to vector<2x64xf32>
    %1065 = arith.addf %1063, %1064 : vector<2x64xf32>
    %cst_436 = arith.constant 5.000000e-01 : f32
    %1066 = vector.broadcast %cst_436 : f32 to vector<2x64xf32>
    %1067 = arith.mulf %1066, %1065 : vector<2x64xf32>
    %1068 = vector.extract_strided_slice %1057 {offsets = [0, 64], sizes = [2, 64], strides = [1, 1]} : vector<2x128xf32> to vector<2x64xf32>
    %1069 = arith.mulf %1068, %1042 : vector<2x64xf32>
    %1070 = vector.extract_strided_slice %1057 {offsets = [0, 0], sizes = [2, 64], strides = [1, 1]} : vector<2x128xf32> to vector<2x64xf32>
    %1071 = arith.mulf %1070, %1059 : vector<2x64xf32>
    %1072 = arith.addf %1069, %1071 : vector<2x64xf32>
    %1073 = math.tanh %1072 : vector<2x64xf32>
    %1074 = arith.mulf %1067, %1073 : vector<2x64xf32>
    %c30_437 = arith.constant 30 : index
    %c0_438 = arith.constant 0 : index
    %1075 = vector.load %arg20[%c30_437, %c0_438] : memref<32x64xf32, #tpu.memory_space<vmem>>, vector<2x64xf32>
    tpu.vector_store %arg20[%c30_437, %c0_438], %1074 {strides = array<i32>} : memref<32x64xf32, #tpu.memory_space<vmem>>, vector<2x64xf32>,
    %c0_439 = arith.constant 0 : index
    %c0_440 = arith.constant 0 : index
    %1076 = vector.load %arg20[%c0_439, %c0_440] : memref<32x64xf32, #tpu.memory_space<vmem>>, vector<32x64xf32>
    %cst_441 = arith.constant dense<0.000000e+00> : vector<32x64xf32>
    %1077 = tpu.matmul %582, %1076, %cst_441 {dimension_numbers = #tpu.dot_dimension_numbers<[1], [0], [0], [1], [0, 0, 1, 1], [], []>} : vector<32x32xf32>, vector<32x64xf32>, vector<32x64xf32> -> vector<32x64xf32>
    %1078 = arith.truncf %1076 : vector<32x64xf32> to vector<32x64xbf16>
    %c0_442 = arith.constant 0 : index
    %c0_443 = arith.constant 0 : index
    %1079 = vector.load %arg14[%c0_442, %c0_443] : memref<64x128xbf16, #tpu.memory_space<vmem>>, vector<64x128xbf16>
    %cst_444 = arith.constant dense<0.000000e+00> : vector<32x128xf32>
    %1080 = tpu.matmul %1078, %1079, %cst_444 {dimension_numbers = #tpu.dot_dimension_numbers<[1], [0], [0], [1], [0, 0, 1, 1], [], []>} : vector<32x64xbf16>, vector<64x128xbf16>, vector<32x128xf32> -> vector<32x128xf32>
    %1081 = arith.truncf %1077 : vector<32x64xf32> to vector<32x64xbf16>
    %c0_445 = arith.constant 0 : index
    %c0_446 = arith.constant 0 : index
    %1082 = vector.load %arg15[%c0_445, %c0_446] : memref<64x128xbf16, #tpu.memory_space<vmem>>, vector<64x128xbf16>
    %cst_447 = arith.constant dense<0.000000e+00> : vector<32x128xf32>
    %1083 = tpu.matmul %1081, %1082, %cst_447 {dimension_numbers = #tpu.dot_dimension_numbers<[1], [0], [0], [1], [0, 0, 1, 1], [], []>} : vector<32x64xbf16>, vector<64x128xbf16>, vector<32x128xf32> -> vector<32x128xf32>
    %1084 = arith.addf %1080, %1083 : vector<32x128xf32>
    %c0_448 = arith.constant 0 : index
    %c0_449 = arith.constant 0 : index
    %1085 = vector.load %arg16[%c0_448, %c0_449] : memref<1x128xf32, #tpu.memory_space<vmem>>, vector<1x128xf32>
    %1086 = vector.broadcast %1085 : vector<1x128xf32> to vector<32x128xf32>
    %1087 = arith.addf %1084, %1086 : vector<32x128xf32>
    %c0_450 = arith.constant 0 : index
    %c0_451 = arith.constant 0 : index
    %1088 = vector.load %arg4[%c0_450, %c0_451] : memref<32x32xf32, #tpu.memory_space<vmem>>, vector<32x32xf32>
    %cst_452 = arith.constant dense<0.000000e+00> : vector<32x128xf32>
    %1089 = tpu.matmul %1088, %1087, %cst_452 {dimension_numbers = #tpu.dot_dimension_numbers<[1], [0], [0], [1], [0, 0, 1, 1], [], []>} : vector<32x32xf32>, vector<32x128xf32>, vector<32x128xf32> -> vector<32x128xf32>
    %cst_453 = arith.constant dense<0xFF800000> : vector<32xf32>
    %1090 = vector.multi_reduction <maximumf>, %1089, %cst_453 [1] : vector<32x128xf32> to vector<32xf32>
    %1091 = vector.shape_cast %1090 : vector<32xf32> to vector<32x1xf32>
    %1092 = vector.broadcast %1091 : vector<32x1xf32> to vector<32x128xf32>
    %1093 = arith.subf %1089, %1092 : vector<32x128xf32>
    %1094 = math.exp %1093 : vector<32x128xf32>
    %cst_454 = arith.constant dense<0.000000e+00> : vector<32xf32>
    %1095 = vector.multi_reduction <add>, %1094, %cst_454 [1] : vector<32x128xf32> to vector<32xf32>
    %1096 = vector.shape_cast %1095 : vector<32xf32> to vector<32x1xf32>
    %1097 = vector.broadcast %1096 : vector<32x1xf32> to vector<32x128xf32>
    %1098 = arith.divf %1094, %1097 : vector<32x128xf32>
    %c0_455 = arith.constant 0 : index
    %c0_456 = arith.constant 0 : index
    %1099 = vector.load %arg17[%c0_455, %c0_456] : memref<32x128xf32, #tpu.memory_space<vmem>>, vector<32x128xf32>
    tpu.vector_store %arg17[%c0_455, %c0_456], %1098 {strides = array<i32>} : memref<32x128xf32, #tpu.memory_space<vmem>>, vector<32x128xf32>,
    return
  }
}

</mosaic_0001>

<bundles_post_ra>
// kernel: text_recognition_forward.1
= control target key start
LH: loop header
LB: loop body
LE: loop exit
PB: predicated region body
PF: predicated region fallthrough
CT: control target
= control target key end

     0   :  { %s9437_s0 = inlined_call_operand.vmem [shape: f32[32,216], index: 0, kind: input, shape index: {}]   ;;  %s9438_s1 = inlined_call_operand.hbm [shape: bf16[216,1024], index: 1, kind: input, shape index: {}]   ;;  %s9439_s2 = inlined_call_operand.vmem [shape: f32[1,128], index: 2, kind: input, shape index: {}]   ;;  %s9440_s3 = inlined_call_operand.vmem [shape: f32[32,32], index: 3, kind: input, shape index: {}]   ;;  %s9441_s4 = inlined_call_operand.vmem [shape: f32[32,32], index: 4, kind: input, shape index: {}]   ;;  %s9442_s5 = inlined_call_operand.vmem [shape: bf16[1024,256], index: 5, kind: input, shape index: {}]   ;;  %s9443_s6 = inlined_call_operand.vmem [shape: f32[1,256], index: 6, kind: input, shape index: {}]   ;;  %s9444_s7 = inlined_call_operand.vmem [shape: bf16[64,256], index: 7, kind: input, shape index: {}]   ;;  %s9445_s8 = inlined_call_operand.vmem [shape: bf16[64,32], index: 8, kind: input, shape index: {}]   ;;  %s9446_s9 = inlined_call_operand.vmem [shape: bf16[64,32], index: 9, kind: input, shape index: {}]   ;;  %s9447_s10 = inlined_call_operand.vmem [shape: f32[1,32], index: 10, kind: input, shape index: {}]   ;;  %s9448_s11 = inlined_call_operand.vmem [shape: bf16[32,256], index: 11, kind: input, shape index: {}]   ;;  %s9449_s12 = inlined_call_operand.vmem [shape: f32[1,256], index: 12, kind: input, shape index: {}]   ;;  %s9450_s13 = inlined_call_operand.vmem [shape: bf16[64,256], index: 13, kind: input, shape index: {}]   ;;  %s9451_s14 = inlined_call_operand.vmem [shape: bf16[64,128], index: 14, kind: input, shape index: {}]   ;;  %s9452_s15 = inlined_call_operand.vmem [shape: bf16[64,128], index: 15, kind: input, shape index: {}]   ;;  %s9453_s16 = inlined_call_operand.vmem [shape: f32[1,128], index: 16, kind: input, shape index: {}]   ;;  %s9454_s17 = inlined_call_operand.hbm [shape: f32[32,128], index: 17, kind: output, shape index: {}]  }
   0x1   :  { %9456 = sst [smem:[#allocation11_spill]] %s9437_s0 }
   0x2   :  { %9457 = sst [smem:[#allocation12_spill]] %s9438_s1 }
   0x3   :  { %22 = vsyncpa [#allocation6], 0 }
   0x4   :  { %23 = vsyncpa [#allocation7], 0  ;;  %s9458_s26 = sld [smem:[#allocation12_spill]]  ;;  %s7389_s28 = smov [#allocation5]  }
   0x5   :  { %s32_s29 = sshll.u32 %s7389_s28, 4  ;;  %s7390_s0 = smov 512   ;;  %s33_s29 = int_to_ptr.vmem [resolvable:$true] %s32_s29 }
   0x6   :  { %s7391_s30 = smov 32  }
   0xa   :  { %s30_s27 = sshll.u32 %s9458_s26, 4  ;;  %s31_s27 = int_to_ptr.hbm [resolvable:$true] %s30_s27 }
   0xb   :  { %38 = dma.hbm_to_vmem [thread:$0]  %s31_s27, 13824, %s33_s29, [#allocation6], %s7390_s0, %s7390_s0, %s7391_s30  }
   0xc   :  { %7385 = dma.done.wait [#allocation6], 13824  }
   0xd   :  { %7386 = vsyncadd [#allocation6], 4294953472  ;;  %v5541_v0 = vld [vmem:[#allocation5 + $0x1c0] sm:$0xf]  ;;  %v5595_v2 = vld [vmem:[#allocation5 + $0x1c4] sm:$0xf] }
   0xe   :  { %v6762_v1 = vld [vmem:[#allocation5 + $0x1dc] sm:$0xf0]  ;;  %v6775_v4 = vld [vmem:[#allocation5 + $0x1e0] sm:$0xf0]  ;;  %vm205_vm0 = vcmask 1043456   ;;  %s9459_s1 = sld [smem:[#allocation11_spill]] }
   0xf   :  { %v5542_v3 = vor.u32 %v6762_v1, %v5541_v0  ;;  %v7490_v5 = vld [vmem:[#allocation5 + $0x344] sm:$0xff]   ;;  %v5537_v6 = vld [vmem:[#allocation5 + $0x180] sm:$0xf]  ;;  %v5596_v7 = vor.u32 %v6775_v4, %v5595_v2  ;;  %vm198_vm1 = vcmask 719872   ;;  %vm2596_vm2 = vcmask 261120   ;;  %s7393_s26 = smov 64  }
  0x10   :  { %v343_v8 = vunpack.c.l.b16 %v7490_v5  ;;  %v6761_v9 = vld [vmem:[#allocation5 + $0x19c] sm:$0xf0]  ;;  %v5591_v10 = vld [vmem:[#allocation5 + $0x184] sm:$0xf]  ;;  %v508_v62 = vunpack.c.h.b16 %v7490_v5  ;;  %vm2692_vm3 = vcmask 523264   ;;  %vm2746_vm4 = vcmask 517120  }
  0x11   :  { %v6774_v11 = vld [vmem:[#allocation5 + $0x1a0] sm:$0xf0]  ;;  %209 = vmatpush.bf16.msra.mxu0 %v5542_v3  ;;  %v5538_v12 = vor.u32 %v6761_v9, %v5537_v6  ;;  %v112_v13 = vld [vmem:[#allocation5 + $0x340] sm:$0xf]  ;;  %374 = vmatpush.bf16.msra.mxu2 %v5596_v7  ;;  %vm2887_vm5 = vcmask 521220   ;;  %vm2816_vm6 = vcmask 519170  }
  0x12   :  { %v5615_v14 = vld [vmem:[#allocation5 + $0x304] sm:$0xf]  ;;  %v357_v15 = vpack.c.b16 %v343_v8, %v343_v8  ;;  %v5592_v16 = vor.u32 %v6774_v11, %v5591_v10  ;;  %v170_v17 = vunpack.c.l.b16 %v112_v13  ;;  %v5533_v19 = vld [vmem:[#allocation5 + $0x140] sm:$0xf]  ;;  %vm2958_vm7 = vcmask 523270   ;;  %s5498_s22 = sshll.u32 %s9454_s17, 4  ;;  %s5499_s22 = int_to_ptr.hbm [resolvable:$true] %s5498_s22 }
  0x13   :  { %v6780_v18 = vld [vmem:[#allocation5 + $0x320] sm:$0xf0]  ;;  %v6760_v20 = vld [vmem:[#allocation5 + $0x15c] sm:$0xf0] }
  0x14   :  { %v5587_v21 = vld [vmem:[#allocation5 + $0x144] sm:$0xf]  ;;  %v372_v23 = vsel %vm205_vm0, %v357_v15, 0  ;;  %v184_v24 = vpack.c.b16 %v170_v17, %v170_v17  ;;  %v5561_v25 = vld [vmem:[#allocation5 + $0x300] sm:$0xf]  ;;  %v5616_v27 = vor.u32 %v6780_v18, %v5615_v14  ;;  %v5534_v28 = vor.u32 %v6760_v20, %v5533_v19  ;;  %v75_v5 = vld [vmem:[%s9459_s1 + $0x8] sm:$0xff] }
  0x15   :  { %v6773_v22 = vld [vmem:[#allocation5 + $0x160] sm:$0xf0]  ;;  %v6767_v26 = vld [vmem:[#allocation5 + $0x31c] sm:$0xf0]  ;;  %395 = vmatpush.bf16.msra.mxu3 %v372_v23  ;;  %210 = vmatpush.bf16.msra.mxu0 %v5538_v12  ;;  %v522_v12 = vpack.c.b16 %v508_v62, %v508_v62  ;;  %v77_v13 = vld [vmem:[%s9459_s1 + $0x18] sm:$0xff] }
  0x16   :  { %v5611_v29 = vld [vmem:[#allocation5 + $0x2c4] sm:$0xf]  ;;  %375 = vmatpush.bf16.msra.mxu2 %v5592_v16  ;;  %v207_v31 = vsel %vm205_vm0, %v184_v24, 0  ;;  %v5588_v32 = vor.u32 %v6773_v22, %v5587_v21  ;;  %v5529_v33 = vld [vmem:[#allocation5 + $0x100] sm:$0xf]  ;;  %v5562_v35 = vor.u32 %v6767_v26, %v5561_v25  ;;  %v7502_v24 = vld [vmem:[#allocation5 + $0x34c] sm:$0xff]  }
  0x17   :  { %v6779_v30 = vld [vmem:[#allocation5 + $0x2e0] sm:$0xf0]  ;;  %v6759_v34 = vld [vmem:[#allocation5 + $0x11c] sm:$0xf0]  ;;  %230 = vmatpush.bf16.msra.mxu1 %v207_v31  ;;  %v5649_v19 = vld [vmem:[#allocation5 + $0x1c8] sm:$0xf]  ;;  %v7509_v31 = vpack.c.bf16 %v77_v13, %v75_v5 }
  0x18   :  { %v5583_v36 = vld [vmem:[#allocation5 + $0x104] sm:$0xf]  ;;  %v5557_v38 = vld [vmem:[#allocation5 + $0x2c0] sm:$0xf]  ;;  %v5612_v40 = vor.u32 %v6779_v30, %v5611_v29  ;;  %v5530_v41 = vor.u32 %v6759_v34, %v5529_v33  ;;  %v6788_v20 = vld [vmem:[#allocation5 + $0x1e4] sm:$0xf0]  ;;  %v673_v30 = vunpack.c.l.b16 %v7502_v24 }
  0x19   :  { %v6772_v37 = vld [vmem:[#allocation5 + $0x120] sm:$0xf0]  ;;  %v6766_v39 = vld [vmem:[#allocation5 + $0x2dc] sm:$0xf0]  ;;  %396 = vmatpush.bf16.msra.mxu3 %v5616_v27  ;;  %211 = vmatpush.bf16.msra.mxu0 %v5534_v28  ;;  %v5703_v28 = vld [vmem:[#allocation5 + $0x1cc] sm:$0xf] }
  0x1a   :  { %v5607_v42 = vld [vmem:[#allocation5 + $0x284] sm:$0xf]  ;;  %376 = vmatpush.bf16.msra.mxu2 %v5588_v32  ;;  %v5584_v43 = vor.u32 %v6772_v37, %v5583_v36  ;;  %v5525_v45 = vld [vmem:[#allocation5 + $0xc0] sm:$0xf]  ;;  %v5558_v47 = vor.u32 %v6766_v39, %v5557_v38  ;;  %v537_v29 = vsel %vm205_vm0, %v522_v12, 0  ;;  %v5650_v32 = vor.u32 %v6788_v20, %v5649_v19  ;;  %v76_v37 = vld [vmem:[%s9459_s1 + $0x10] sm:$0xff] }
  0x1b   :  { %v6778_v44 = vld [vmem:[#allocation5 + $0x2a0] sm:$0xf0]  ;;  %v6758_v46 = vld [vmem:[#allocation5 + $0xdc] sm:$0xf0]  ;;  %231 = vmatpush.bf16.msra.mxu1 %v5562_v35  ;;  %v6801_v33 = vld [vmem:[#allocation5 + $0x1e8] sm:$0xf0] }
  0x1c   :  { %v5579_v48 = vld [vmem:[#allocation5 + $0xc4] sm:$0xf]  ;;  %v5553_v50 = vld [vmem:[#allocation5 + $0x280] sm:$0xf]  ;;  %v5608_v52 = vor.u32 %v6778_v44, %v5607_v42  ;;  %v5526_v53 = vor.u32 %v6758_v46, %v5525_v45  ;;  %v5669_v34 = vld [vmem:[#allocation5 + $0x308] sm:$0xf]  ;;  %v687_v44 = vpack.c.b16 %v673_v30, %v673_v30 }
  0x1d   :  { %v6771_v49 = vld [vmem:[#allocation5 + $0xe0] sm:$0xf0]  ;;  %v6765_v51 = vld [vmem:[#allocation5 + $0x29c] sm:$0xf0]  ;;  %397 = vmatpush.bf16.msra.mxu3 %v5612_v40  ;;  %212 = vmatpush.bf16.msra.mxu0 %v5530_v41  ;;  %v6793_v35 = vld [vmem:[#allocation5 + $0x324] sm:$0xf0]  ;;  %v5704_v41 = vor.u32 %v6801_v33, %v5703_v28 }
  0x1e   :  { %v5603_v54 = vld [vmem:[#allocation5 + $0x244] sm:$0xf]  ;;  %377 = vmatpush.bf16.msra.mxu2 %v5584_v43  ;;  %v5580_v55 = vor.u32 %v6771_v49, %v5579_v48  ;;  %v5521_v57 = vld [vmem:[#allocation5 + $0x80] sm:$0xf]  ;;  %v5554_v59 = vor.u32 %v6765_v51, %v5553_v50  ;;  %v5645_v38 = vld [vmem:[#allocation5 + $0x188] sm:$0xf]  ;;  %v5670_v43 = vor.u32 %v6793_v35, %v5669_v34 }
  0x1f   :  { %v6777_v56 = vld [vmem:[#allocation5 + $0x260] sm:$0xf0]  ;;  %v6757_v58 = vld [vmem:[#allocation5 + $0x9c] sm:$0xf0]  ;;  %232 = vmatpush.bf16.msra.mxu1 %v5558_v47  ;;  %v6787_v39 = vld [vmem:[#allocation5 + $0x1a4] sm:$0xf0] }
  0x20   :  { %v5575_v60 = vld [vmem:[#allocation5 + $0x84] sm:$0xf]  ;;  %v5549_v63 = vld [vmem:[#allocation5 + $0x240] sm:$0xf]  ;;  %v5604_v1 = vor.u32 %v6777_v56, %v5603_v54  ;;  %v5522_v2 = vor.u32 %v6757_v58, %v5521_v57  ;;  %v5699_v42 = vld [vmem:[#allocation5 + $0x18c] sm:$0xf]  ;;  %v5646_v46 = vor.u32 %v6787_v39, %v5645_v38 }
  0x21   :  { %v6770_v61 = vld [vmem:[#allocation5 + $0xa0] sm:$0xf0]  ;;  %v6764_v0 = vld [vmem:[#allocation5 + $0x25c] sm:$0xf0]  ;;  %398 = vmatpush.bf16.msra.mxu3 %v5608_v52  ;;  %213 = vmatpush.bf16.msra.mxu0 %v5526_v53  ;;  %v6800_v47 = vld [vmem:[#allocation5 + $0x1a8] sm:$0xf0] }
  0x22   :  { %v5599_v3 = vld [vmem:[#allocation5 + $0x204] sm:$0xf]  ;;  %378 = vmatpush.bf16.msra.mxu2 %v5580_v55  ;;  %v5576_v4 = vor.u32 %v6770_v61, %v5575_v60  ;;  %v5517_v7 = vld [vmem:[#allocation5 + $0x40] sm:$0xf]  ;;  %v5550_v9 = vor.u32 %v6764_v0, %v5549_v63  ;;  %v5665_v48 = vld [vmem:[#allocation5 + $0x2c8] sm:$0xf]  ;;  %v5700_v53 = vor.u32 %v6800_v47, %v5699_v42 }
  0x23   :  { %v6776_v6 = vld [vmem:[#allocation5 + $0x220] sm:$0xf0]  ;;  %v6756_v8 = vld [vmem:[#allocation5 + $0x5c] sm:$0xf0]  ;;  %233 = vmatpush.bf16.msra.mxu1 %v5554_v59  ;;  %v6792_v49 = vld [vmem:[#allocation5 + $0x2e4] sm:$0xf0] }
  0x24   :  { %v5571_v10 = vld [vmem:[#allocation5 + $0x44] sm:$0xf]  ;;  %v5545_v14 = vld [vmem:[#allocation5 + $0x200] sm:$0xf]  ;;  %v5600_v16 = vor.u32 %v6776_v6, %v5599_v3  ;;  %v5518_v17 = vor.u32 %v6756_v8, %v5517_v7  ;;  %v5641_v50 = vld [vmem:[#allocation5 + $0x148] sm:$0xf]  ;;  %v5666_v55 = vor.u32 %v6792_v49, %v5665_v48 }
  0x25   :  { %v6769_v11 = vld [vmem:[#allocation5 + $0x60] sm:$0xf0]  ;;  %v6763_v15 = vld [vmem:[#allocation5 + $0x21c] sm:$0xf0]  ;;  %399 = vmatpush.bf16.msra.mxu3 %v5604_v1  ;;  %214 = vmatpush.bf16.msra.mxu0 %v5522_v2  ;;  %v6786_v51 = vld [vmem:[#allocation5 + $0x164] sm:$0xf0] }
  0x26   :  { %v5513_v18 = vld [vmem:[#allocation5] sm:$0xf]  ;;  %379 = vmatpush.bf16.msra.mxu2 %v5576_v4  ;;  %v5572_v21 = vor.u32 %v6769_v11, %v5571_v10  ;;  %v5567_v23 = vld [vmem:[#allocation5 + $0x4] sm:$0xf]  ;;  %v5546_v25 = vor.u32 %v6763_v15, %v5545_v14  ;;  %v5695_v52 = vld [vmem:[#allocation5 + $0x14c] sm:$0xf]  ;;  %v5642_v58 = vor.u32 %v6786_v51, %v5641_v50 }
  0x27   :  { %v6755_v22 = vld [vmem:[#allocation5 + $0x1c] sm:$0xf0]  ;;  %234 = vmatpush.bf16.msra.mxu1 %v5550_v9  ;;  %v6768_v26 = vld [vmem:[#allocation5 + $0x20] sm:$0xf0]  ;;  %v702_v54 = vsel %vm205_vm0, %v687_v44, 0  ;;  %v79_v2 = vld [vmem:[%s9459_s1 + $0x28] sm:$0xff] }
  0x28   :  { %v74_v27 = vld [vmem:[%s9459_s1] sm:$0xff]  ;;  %v5514_v36 = vor.u32 %v6755_v22, %v5513_v18  ;;  %v5568_v40 = vor.u32 %v6768_v26, %v5567_v23  ;;  %v5723_v56 = vld [vmem:[#allocation5 + $0x30c] sm:$0xf]  ;;  %v5661_v60 = vld [vmem:[#allocation5 + $0x288] sm:$0xf] }
  0x29   :  { %400 = vmatpush.bf16.msra.mxu3 %v5600_v16  ;;  %215 = vmatpush.bf16.msra.mxu0 %v5518_v17  ;;  %v7516_v45 = vpack.c.bf16 %v76_v37, %v74_v27  ;;  %v6806_v57 = vld [vmem:[#allocation5 + $0x328] sm:$0xf0]  ;;  %v6791_v61 = vld [vmem:[#allocation5 + $0x2a4] sm:$0xf0]  ;;  %v81_v5 = vld [vmem:[%s9459_s1 + $0x38] sm:$0xff]  ;;  %v838_v16 = vunpack.c.h.b16 %v7502_v24 }
  0x2a   :  { %380 = vmatpush.bf16.msra.mxu2 %v5572_v21  ;;  %v6799_v59 = vld [vmem:[#allocation5 + $0x168] sm:$0xf0]  ;;  %v5637_v62 = vld [vmem:[#allocation5 + $0x108] sm:$0xf]  ;;  %v5724_v0 = vor.u32 %v6806_v57, %v5723_v56  ;;  %v5662_v4 = vor.u32 %v6791_v61, %v5661_v60  ;;  %v78_v18 = vld [vmem:[%s9459_s1 + $0x20] sm:$0xff] }
  0x2b   :  { %235 = vmatpush.bf16.msra.mxu1 %v5546_v25  ;;  %v6785_v63 = vld [vmem:[#allocation5 + $0x124] sm:$0xf0]  ;;  %v5696_v1 = vor.u32 %v6799_v59, %v5695_v52  ;;  %v5691_v3 = vld [vmem:[#allocation5 + $0x10c] sm:$0xf]  ;;  %v80_v19 = vld [vmem:[%s9459_s1 + $0x30] sm:$0xff]  ;;  %v7536_v25 = vpack.c.bf16 %v81_v5, %v79_v2  ;;  %v852_v33 = vpack.c.b16 %v838_v16, %v838_v16 }
  0x2c   :  { %5617 = vmatmul.msk.bf16.vlgmr.msra.gmra.mxu3 %vm198_vm1, %v7509_v31  ;;  %v5719_v6 = vld [vmem:[#allocation5 + $0x2cc] sm:$0xf]  ;;  %v5638_v8 = vor.u32 %v6785_v63, %v5637_v62  ;;  %v5657_v10 = vld [vmem:[#allocation5 + $0x248] sm:$0xf]  ;;  %v7538_v30 = vld [vmem:[#allocation5 + $0x354] sm:$0xff]   ;;  %v7542_v39 = vpack.c.bf16 %v80_v19, %v78_v18 }
  0x2d   :  { %560 = vmatpush.bf16.msrb.mxu3 %v537_v29  ;;  %216 = vmatpush.bf16.msra.mxu0 %v5514_v36  ;;  %v6805_v7 = vld [vmem:[#allocation5 + $0x2e8] sm:$0xf0]  ;;  %v6790_v11 = vld [vmem:[#allocation5 + $0x264] sm:$0xf0]  ;;  %v1003_v44 = vunpack.c.l.b16 %v7538_v30  ;;  %v867_v47 = vsel %vm205_vm0, %v852_v33, 0 }
  0x2e   :  { %381 = vmatpush.bf16.msra.mxu2 %v5568_v40  ;;  %5563 = vmatmul.msk.bf16.vlgmr.msra.gmra.mxu1 %vm198_vm1, %v7509_v31  ;;  %v6798_v9 = vld [vmem:[#allocation5 + $0x128] sm:$0xf0]  ;;  %v5633_v12 = vld [vmem:[#allocation5 + $0xc8] sm:$0xf]  ;;  %v5720_v15 = vor.u32 %v6805_v7, %v5719_v6  ;;  %v5658_v21 = vor.u32 %v6790_v11, %v5657_v10  ;;  %v5777_v48 = vld [vmem:[#allocation5 + $0x310] sm:$0xf] }
  0x2f   :  { %539 = vmatpush.bf16.msrb.mxu1 %v5650_v32  ;;  %v6784_v13 = vld [vmem:[#allocation5 + $0xe4] sm:$0xf0]  ;;  %v5687_v14 = vld [vmem:[#allocation5 + $0xcc] sm:$0xf]  ;;  %v5692_v17 = vor.u32 %v6798_v9, %v5691_v3  ;;  %v6819_v49 = vld [vmem:[#allocation5 + $0x32c] sm:$0xf0]  ;;  %v1017_v56 = vpack.c.b16 %v1003_v44, %v1003_v44 }
  0x30   :  { %217 = vmatmul.bf16.vlgmr.msra.gmra.mxu0 %v7516_v45  ;;  %v6797_v20 = vld [vmem:[#allocation5 + $0xe8] sm:$0xf0]  ;;  %v5634_v26 = vor.u32 %v6784_v13, %v5633_v12  ;;  %v5629_v24 = vld [vmem:[#allocation5 + $0x88] sm:$0xf]  ;;  %v5757_v59 = vld [vmem:[#allocation5 + $0x1d0] sm:$0xf]  ;;  %v5778_v60 = vor.u32 %v6819_v49, %v5777_v48  ;;  %v1168_v49 = vunpack.c.h.b16 %v7538_v30 }
  0x31   :  { %704 = vmatpush.bf16.msrb.mxu0 %v5704_v41  ;;  %561 = vmatpush.bf16.msrb.mxu3 %v5670_v43  ;;  %v5715_v22 = vld [vmem:[#allocation5 + $0x28c] sm:$0xf]  ;;  %v5653_v27 = vld [vmem:[#allocation5 + $0x208] sm:$0xf]  ;;  %v5688_v34 = vor.u32 %v6797_v20, %v5687_v14  ;;  %v6814_v63 = vld [vmem:[#allocation5 + $0x1ec] sm:$0xf0] }
  0x32   :  { %382 = vmatmul.bf16.vlgmr.msra.gmra.mxu2 %v7516_v45  ;;  %v6804_v23 = vld [vmem:[#allocation5 + $0x2a8] sm:$0xf0]  ;;  %v6789_v28 = vld [vmem:[#allocation5 + $0x224] sm:$0xf0]  ;;  %v6827_v6 = vld [vmem:[#allocation5 + $0x1f0] sm:$0xf0]  ;;  %v5758_v11 = vor.u32 %v6814_v63, %v5757_v59 }
  0x33   :  { %540 = vmatpush.bf16.msrb.mxu1 %v5646_v46  ;;  %725 = vmatpush.bf16.msrb.mxu2 %v702_v54  ;;  %v6783_v29 = vld [vmem:[#allocation5 + $0xa4] sm:$0xf0]  ;;  %v5716_v32 = vor.u32 %v6804_v23, %v5715_v22  ;;  %v5683_v35 = vld [vmem:[#allocation5 + $0x8c] sm:$0xf]  ;;  %v5654_v36 = vor.u32 %v6789_v28, %v5653_v27  ;;  %v5831_v9 = vld [vmem:[#allocation5 + $0x314] sm:$0xf] }
  0x34   :  { %v5711_v37 = vld [vmem:[#allocation5 + $0x24c] sm:$0xf]  ;;  %v5630_v40 = vor.u32 %v6783_v29, %v5629_v24  ;;  %v5625_v42 = vld [vmem:[#allocation5 + $0x48] sm:$0xf]  ;;  %v6832_v10 = vld [vmem:[#allocation5 + $0x330] sm:$0xf0] }
  0x35   :  { %705 = vmatpush.bf16.msrb.mxu0 %v5700_v53  ;;  %562 = vmatpush.bf16.msrb.mxu3 %v5666_v55  ;;  %v6803_v38 = vld [vmem:[#allocation5 + $0x268] sm:$0xf0]  ;;  %v6782_v43 = vld [vmem:[#allocation5 + $0x64] sm:$0xf0]  ;;  %v5753_v5 = vld [vmem:[#allocation5 + $0x190] sm:$0xf] }
  0x36   :  { %v6796_v41 = vld [vmem:[#allocation5 + $0xa8] sm:$0xf0]  ;;  %v5712_v46 = vor.u32 %v6803_v38, %v5711_v37  ;;  %v5626_v53 = vor.u32 %v6782_v43, %v5625_v42  ;;  %v5621_v57 = vld [vmem:[#allocation5 + $0x8] sm:$0xf]  ;;  %v6813_v12 = vld [vmem:[#allocation5 + $0x1ac] sm:$0xf0] }
  0x37   :  { %541 = vmatpush.bf16.msrb.mxu1 %v5642_v58  ;;  %726 = vmatpush.bf16.msrb.mxu2 %v5724_v0  ;;  %v5684_v50 = vor.u32 %v6796_v41, %v5683_v35  ;;  %v5707_v51 = vld [vmem:[#allocation5 + $0x20c] sm:$0xf]  ;;  %v6781_v58 = vld [vmem:[#allocation5 + $0x24] sm:$0xf0]  ;;  %v5773_v0 = vld [vmem:[#allocation5 + $0x2d0] sm:$0xf] }
  0x38   :  { %v6802_v52 = vld [vmem:[#allocation5 + $0x228] sm:$0xf0]  ;;  %v5622_v7 = vor.u32 %v6781_v58, %v5621_v57  ;;  %v5769_v14 = vld [vmem:[#allocation5 + $0x290] sm:$0xf]  ;;  %v5827_v19 = vld [vmem:[#allocation5 + $0x2d4] sm:$0xf]  ;;  %v1182_v57 = vpack.c.b16 %v1168_v49, %v1168_v49 }
  0x39   :  { %706 = vmatpush.bf16.msrb.mxu0 %v5696_v1  ;;  %563 = vmatpush.bf16.msrb.mxu3 %v5662_v4  ;;  %v5679_v54 = vld [vmem:[#allocation5 + $0x4c] sm:$0xf]  ;;  %v5708_v62 = vor.u32 %v6802_v52, %v5707_v51  ;;  %v6818_v1 = vld [vmem:[#allocation5 + $0x2ec] sm:$0xf0]  ;;  %v5811_v4 = vld [vmem:[#allocation5 + $0x1d4] sm:$0xf] }
  0x3a   :  { %v6795_v55 = vld [vmem:[#allocation5 + $0x68] sm:$0xf0]  ;;  %v5774_v13 = vor.u32 %v6818_v1, %v5773_v0  ;;  %v5812_v18 = vor.u32 %v6827_v6, %v5811_v4  ;;  %v6831_v20 = vld [vmem:[#allocation5 + $0x2f0] sm:$0xf0]  ;;  %v5749_v24 = vld [vmem:[#allocation5 + $0x150] sm:$0xf] }
  0x3b   :  { %542 = vmatpush.bf16.msrb.mxu1 %v5638_v8  ;;  %727 = vmatpush.bf16.msrb.mxu2 %v5720_v15  ;;  %v5675_v61 = vld [vmem:[#allocation5 + $0xc] sm:$0xf]  ;;  %v5680_v2 = vor.u32 %v6795_v55, %v5679_v54  ;;  %v1032_v8 = vsel %vm205_vm0, %v1017_v56, 0  ;;  %v6817_v15 = vld [vmem:[#allocation5 + $0x2ac] sm:$0xf0]  ;;  %v5828_v28 = vor.u32 %v6831_v20, %v5827_v19  ;;  %v1197_v30 = vsel %vm205_vm0, %v1182_v57, 0 }
  0x3c   :  { %5618 = vmatmul.msk.bf16.gmra.mxu3 %vm198_vm1, %v7536_v25  ;;  %v6794_v3 = vld [vmem:[#allocation5 + $0x28] sm:$0xf0]  ;;  %v5770_v22 = vor.u32 %v6817_v15, %v5769_v14  ;;  %v5807_v23 = vld [vmem:[#allocation5 + $0x194] sm:$0xf]  ;;  %v6812_v27 = vld [vmem:[#allocation5 + $0x16c] sm:$0xf0] }
  0x3d   :  { %707 = vmatpush.bf16.msrb.mxu0 %v5692_v17  ;;  %564 = vmatpush.bf16.msrb.mxu3 %v5658_v21  ;;  %v5676_v16 = vor.u32 %v6794_v3, %v5675_v61  ;;  %v5832_v17 = vor.u32 %v6832_v10, %v5831_v9  ;;  %v5754_v21 = vor.u32 %v6813_v12, %v5753_v5  ;;  %v5765_v29 = vld [vmem:[#allocation5 + $0x250] sm:$0xf]  ;;  %v5823_v33 = vld [vmem:[#allocation5 + $0x294] sm:$0xf]  ;;  %v5885_v61 = vld [vmem:[#allocation5 + $0x318] sm:$0xf] }
  0x3e   :  { %5564 = vmatmul.msk.bf16.gmra.mxu1 %vm198_vm1, %v7536_v25  ;;  %v5803_v37 = vld [vmem:[#allocation5 + $0x154] sm:$0xf]  ;;  %v6811_v42 = vld [vmem:[#allocation5 + $0x12c] sm:$0xf0]  ;;  %v1275_v63 = vld [vmem:[#allocation5 + $0x35c] sm:$0xf] }
  0x3f   :  { %543 = vmatpush.bf16.msrb.mxu1 %v5634_v26  ;;  %728 = vmatpush.bf16.msrb.mxu2 %v5716_v32  ;;  %v6826_v26 = vld [vmem:[#allocation5 + $0x1b0] sm:$0xf0]  ;;  %v6816_v32 = vld [vmem:[#allocation5 + $0x26c] sm:$0xf0]  ;;  %v1333_v1 = vunpack.c.l.b16 %v1275_v63  ;;  %v5881_v14 = vld [vmem:[#allocation5 + $0x2d8] sm:$0xf] }
  0x40   :  { %222 = vmatmul.bf16.gmra.mxu0 %v7542_v39  ;;  %v5808_v35 = vor.u32 %v6826_v26, %v5807_v23  ;;  %v6825_v38 = vld [vmem:[#allocation5 + $0x170] sm:$0xf0]  ;;  %v5766_v41 = vor.u32 %v6816_v32, %v5765_v29  ;;  %v5761_v44 = vld [vmem:[#allocation5 + $0x210] sm:$0xf]  ;;  %v5939_v20 = vld [vmem:[#allocation5 + $0x31c] sm:$0xf] }
  0x41   :  { %708 = vmatpush.bf16.msrb.mxu0 %v5688_v34  ;;  %565 = vmatpush.bf16.msrb.mxu3 %v5654_v36  ;;  %v6830_v34 = vld [vmem:[#allocation5 + $0x2b0] sm:$0xf0]  ;;  %v5750_v36 = vor.u32 %v6812_v27, %v5749_v24  ;;  %v5741_v54 = vld [vmem:[#allocation5 + $0xd0] sm:$0xf]  ;;  %v5877_v27 = vld [vmem:[#allocation5 + $0x298] sm:$0xf] }
  0x42   :  { %387 = vmatmul.bf16.gmra.mxu2 %v7542_v39  ;;  %v5824_v43 = vor.u32 %v6830_v34, %v5823_v33  ;;  %v6829_v48 = vld [vmem:[#allocation5 + $0x270] sm:$0xf0]  ;;  %v6810_v55 = vld [vmem:[#allocation5 + $0xec] sm:$0xf0]  ;;  %v6843_v33 = vld [vmem:[#allocation5 + $0x2b4] sm:$0xf0] }
  0x43   :  { %544 = vmatpush.bf16.msrb.mxu1 %v5630_v40  ;;  %729 = vmatpush.bf16.msrb.mxu2 %v5712_v46  ;;  %v5745_v40 = vld [vmem:[#allocation5 + $0x110] sm:$0xf]  ;;  %v5799_v51 = vld [vmem:[#allocation5 + $0x114] sm:$0xf]  ;;  %v6853_v49 = vld [vmem:[#allocation5 + $0x1f8] sm:$0xf0] }
  0x44   :  { %v6815_v46 = vld [vmem:[#allocation5 + $0x22c] sm:$0xf0]  ;;  %v5746_v52 = vor.u32 %v6811_v42, %v5745_v40  ;;  %v5815_v59 = vld [vmem:[#allocation5 + $0x214] sm:$0xf]  ;;  %v5865_v40 = vld [vmem:[#allocation5 + $0x1d8] sm:$0xf] }
  0x45   :  { %890 = vmatpush.bf16.msra.mxu3 %v867_v47  ;;  %709 = vmatpush.bf16.msrb.mxu0 %v5684_v50  ;;  %v5819_v47 = vld [vmem:[#allocation5 + $0x254] sm:$0xf]  ;;  %v5804_v50 = vor.u32 %v6825_v38, %v5803_v37  ;;  %v5762_v56 = vor.u32 %v6815_v46, %v5761_v44  ;;  %v5737_v9 = vld [vmem:[#allocation5 + $0x90] sm:$0xf]  ;;  %v6857_v37 = vld [vmem:[#allocation5 + $0x2f8] sm:$0xf0] }
  0x46   :  { %v5820_v58 = vor.u32 %v6829_v48, %v5819_v47  ;;  %v5795_v3 = vld [vmem:[#allocation5 + $0xd4] sm:$0xf]  ;;  %v6809_v10 = vld [vmem:[#allocation5 + $0xac] sm:$0xf0]  ;;  %v5919_v46 = vld [vmem:[#allocation5 + $0x1dc] sm:$0xf] }
  0x47   :  { %545 = vmatpush.bf16.msrb.mxu1 %v5626_v53  ;;  %730 = vmatpush.bf16.msrb.mxu2 %v5708_v62  ;;  %v6824_v53 = vld [vmem:[#allocation5 + $0x130] sm:$0xf0]  ;;  %v6845_v62 = vld [vmem:[#allocation5 + $0x334] sm:$0xf0]  ;;  %v5738_v15 = vor.u32 %v6809_v10, %v5737_v9  ;;  %v5729_v29 = vld [vmem:[#allocation5 + $0x10] sm:$0xf] }
  0x48   :  { %v5800_v0 = vor.u32 %v6824_v53, %v5799_v51  ;;  %v6823_v4 = vld [vmem:[#allocation5 + $0xf0] sm:$0xf0]  ;;  %v6807_v32 = vld [vmem:[#allocation5 + $0x2c] sm:$0xf0]  ;;  %v6842_v47 = vld [vmem:[#allocation5 + $0x274] sm:$0xf0] }
  0x49   :  { %891 = vmatpush.bf16.msra.mxu3 %v5778_v60  ;;  %710 = vmatpush.bf16.msrb.mxu0 %v5680_v2  ;;  %v6828_v60 = vld [vmem:[#allocation5 + $0x230] sm:$0xf0]  ;;  %v5742_v2 = vor.u32 %v6810_v55, %v5741_v54  ;;  %v5730_v48 = vor.u32 %v6807_v32, %v5729_v29  ;;  %v5931_v51 = vld [vmem:[#allocation5 + $0x29c] sm:$0xf]  ;;  %v5869_v55 = vld [vmem:[#allocation5 + $0x218] sm:$0xf] }
  0x4a   :  { %v5816_v6 = vor.u32 %v6828_v60, %v5815_v59  ;;  %v5791_v12 = vld [vmem:[#allocation5 + $0x94] sm:$0xf]  ;;  %v6839_v59 = vld [vmem:[#allocation5 + $0x1b4] sm:$0xf0]  ;;  %v5920_v60 = vor.u32 %v6853_v49, %v5919_v46  ;;  %v6852_v63 = vld [vmem:[#allocation5 + $0x1b8] sm:$0xf0] }
  0x4b   :  { %1055 = vmatpush.bf16.msra.mxu2 %v1032_v8  ;;  %546 = vmatpush.bf16.msrb.mxu1 %v5622_v7  ;;  %v5886_v7 = vor.u32 %v6845_v62, %v5885_v61  ;;  %v1347_v8 = vpack.c.b16 %v1333_v1, %v1333_v1  ;;  %v5787_v26 = vld [vmem:[#allocation5 + $0x54] sm:$0xf]  ;;  %v5927_v61 = vld [vmem:[#allocation5 + $0x25c] sm:$0xf] }
  0x4c   :  { %5671 = vmatmul.msk.bf16.vlgmr.msrb.gmra.mxu3 %vm198_vm1, %v7509_v31  ;;  %v6821_v24 = vld [vmem:[#allocation5 + $0x70] sm:$0xf0]  ;;  %v5915_v62 = vld [vmem:[#allocation5 + $0x19c] sm:$0xf] }
  0x4d   :  { %892 = vmatpush.bf16.msra.mxu3 %v5774_v13  ;;  %711 = vmatpush.bf16.msrb.mxu0 %v5676_v16  ;;  %v1362_v5 = vsel %vm205_vm0, %v1347_v8, 0  ;;  %v6822_v13 = vld [vmem:[#allocation5 + $0xb0] sm:$0xf0]  ;;  %v5733_v16 = vld [vmem:[#allocation5 + $0x50] sm:$0xf]  ;;  %v5788_v38 = vor.u32 %v6821_v24, %v5787_v26 }
  0x4e   :  { %547 = vmatmul.bf16.vlgmr.msrb.gmra.mxu1 %v7516_v45  ;;  %v5783_v34 = vld [vmem:[#allocation5 + $0x14] sm:$0xf]  ;;  %v6851_v8 = vld [vmem:[#allocation5 + $0x178] sm:$0xf0]  ;;  %v5845_v26 = vld [vmem:[#allocation5 + $0x98] sm:$0xf] }
  0x4f   :  { %869 = vmatpush.bf16.msra.mxu1 %v5758_v11  ;;  %1056 = vmatpush.bf16.msra.mxu2 %v5832_v17  ;;  %v5796_v11 = vor.u32 %v6823_v4, %v5795_v3  ;;  %v6844_v17 = vld [vmem:[#allocation5 + $0x2f4] sm:$0xf0]  ;;  %v6820_v44 = vld [vmem:[#allocation5 + $0x30] sm:$0xf0]  ;;  %v5923_v9 = vld [vmem:[#allocation5 + $0x21c] sm:$0xf] }
  0x50   :  { %712 = vmatmul.bf16.vlgmr.msrb.gmra.mxu0 %v7516_v45  ;;  %v5882_v19 = vor.u32 %v6844_v17, %v5881_v14  ;;  %v5784_v57 = vor.u32 %v6820_v44, %v5783_v34  ;;  %v6838_v3 = vld [vmem:[#allocation5 + $0x174] sm:$0xf0]  ;;  %v6848_v29 = vld [vmem:[#allocation5 + $0xb8] sm:$0xf0] }
  0x51   :  { %1034 = vmatpush.bf16.msra.mxu0 %v5812_v18  ;;  %893 = vmatpush.bf16.msra.mxu3 %v5770_v22  ;;  %v6808_v18 = vld [vmem:[#allocation5 + $0x6c] sm:$0xf0]  ;;  %v5792_v22 = vor.u32 %v6822_v13, %v5791_v12  ;;  %v6837_v12 = vld [vmem:[#allocation5 + $0x134] sm:$0xf0]  ;;  %v6846_v44 = vld [vmem:[#allocation5 + $0x38] sm:$0xf0] }
  0x52   :  { %5725 = vmatmul.msk.bf16.vlgmr.msrb.gmra.mxu2 %vm198_vm1, %v7509_v31  ;;  %v6835_v24 = vld [vmem:[#allocation5 + $0xb4] sm:$0xf0] }
  0x53   :  { %870 = vmatpush.bf16.msra.mxu1 %v5754_v21  ;;  %1057 = vmatpush.bf16.msra.mxu2 %v5828_v28  ;;  %v6858_v21 = vld [vmem:[#allocation5 + $0x338] sm:$0xf0]  ;;  %v5734_v28 = vor.u32 %v6808_v18, %v5733_v16  ;;  %v5849_v18 = vld [vmem:[#allocation5 + $0xd8] sm:$0xf]  ;;  %v5846_v32 = vor.u32 %v6835_v24, %v5845_v26  ;;  %v6193_v26 = vld [vmem:[%s9442_s5 + $0x170] sm:$0xf] }
  0x54   :  { %v5940_v23 = vor.u32 %v6858_v21, %v5939_v20  ;;  %v6850_v16 = vld [vmem:[#allocation5 + $0x138] sm:$0xf0]  ;;  %v6834_v34 = vld [vmem:[#allocation5 + $0x74] sm:$0xf0] }
  0x55   :  { %1035 = vmatpush.bf16.msra.mxu0 %v5808_v35  ;;  %894 = vmatpush.bf16.msra.mxu3 %v5766_v41  ;;  %v5878_v35 = vor.u32 %v6843_v33, %v5877_v27  ;;  %v6840_v41 = vld [vmem:[#allocation5 + $0x1f4] sm:$0xf0]  ;;  %v5903_v21 = vld [vmem:[#allocation5 + $0xdc] sm:$0xf] }
  0x56   :  { %v5866_v53 = vor.u32 %v6840_v41, %v5865_v40  ;;  %v5841_v33 = vld [vmem:[#allocation5 + $0x58] sm:$0xf] }
  0x57   :  { %871 = vmatpush.bf16.msra.mxu1 %v5750_v36  ;;  %1058 = vmatpush.bf16.msra.mxu2 %v5824_v43  ;;  %v5935_v36 = vld [vmem:[#allocation5 + $0x2dc] sm:$0xf]  ;;  %v5873_v43 = vld [vmem:[#allocation5 + $0x258] sm:$0xf] }
  0x58   :  { %v5936_v42 = vor.u32 %v6857_v37, %v5935_v36  ;;  %v5895_v36 = vld [vmem:[#allocation5 + $0x5c] sm:$0xf]  ;;  %v5837_v40 = vld [vmem:[#allocation5 + $0x18] sm:$0xf] }
  0x59   :  { %1036 = vmatpush.bf16.msra.mxu0 %v5804_v50  ;;  %895 = vmatpush.bf16.msra.mxu3 %v5762_v56  ;;  %v5874_v50 = vor.u32 %v6842_v47, %v5873_v43  ;;  %v6841_v56 = vld [vmem:[#allocation5 + $0x234] sm:$0xf0]  ;;  %v6847_v37 = vld [vmem:[#allocation5 + $0x78] sm:$0xf0]  ;;  %v6065_v47 = vld [vmem:[%s9442_s5 + $0x70] sm:$0xf] }
  0x5a   :  { %v6833_v41 = vld [vmem:[#allocation5 + $0x34] sm:$0xf0]  ;;  %v5891_v43 = vld [vmem:[#allocation5 + $0x1c] sm:$0xf] }
  0x5b   :  { %872 = vmatpush.bf16.msra.mxu1 %v5746_v52  ;;  %1059 = vmatpush.bf16.msra.mxu2 %v5820_v58  ;;  %v6856_v52 = vld [vmem:[#allocation5 + $0x2b8] sm:$0xf0]  ;;  %v5861_v58 = vld [vmem:[#allocation5 + $0x198] sm:$0xf]  ;;  %v5838_v46 = vor.u32 %v6833_v41, %v5837_v40  ;;  %v5892_v49 = vor.u32 %v6846_v44, %v5891_v43  ;;  %v6177_v44 = vld [vmem:[%s9442_s5 + $0x150] sm:$0xf] }
  0x5c   :  { %5672 = vmatmul.msk.bf16.gmra.mxu3 %vm198_vm1, %v7536_v25  ;;  %v5932_v54 = vor.u32 %v6856_v52, %v5931_v51  ;;  %v5862_v1 = vor.u32 %v6839_v59, %v5861_v58  ;;  %v6057_v51 = vld [vmem:[%s9442_s5 + $0x60] sm:$0xf]  ;;  %v6888_v52 = vld [vmem:[%s9442_s5 + $0x64] sm:$0xf0]  ;;  %v6886_v58 = vld [vmem:[%s9442_s5 + $0x54] sm:$0xf0] }
  0x5d   :  { %1220 = vmatpush.bf16.msrb.mxu3 %v1197_v30  ;;  %1037 = vmatpush.bf16.msra.mxu0 %v5800_v0  ;;  %v6855_v30 = vld [vmem:[#allocation5 + $0x278] sm:$0xf0]  ;;  %v5870_v0 = vor.u32 %v6841_v56, %v5869_v55  ;;  %v6906_v55 = vld [vmem:[%s9442_s5 + $0xf4] sm:$0xf0] }
  0x5e   :  { %552 = vmatmul.bf16.gmra.mxu1 %v7542_v39  ;;  %v5928_v4 = vor.u32 %v6855_v30, %v5927_v61  ;;  %v6904_v61 = vld [vmem:[%s9442_s5 + $0xe4] sm:$0xf0]  ;;  %v6922_v24 = vld [vmem:[%s9442_s5 + $0x174] sm:$0xf0] }
  0x5f   :  { %873 = vmatpush.bf16.msra.mxu1 %v5742_v2  ;;  %1060 = vmatpush.bf16.msra.mxu2 %v5816_v6  ;;  %v5857_v2 = vld [vmem:[#allocation5 + $0x158] sm:$0xf]  ;;  %v5916_v6 = vor.u32 %v6852_v63, %v5915_v62  ;;  %v6041_v62 = vld [vmem:[%s9442_s5 + $0x40] sm:$0xf]  ;;  %v6113_v63 = vld [vmem:[%s9442_s5 + $0xd0] sm:$0xf] }
  0x60   :  { %717 = vmatmul.bf16.gmra.mxu0 %v7542_v39  ;;  %v5858_v10 = vor.u32 %v6838_v3, %v5857_v2  ;;  %v6033_v2 = vld [vmem:[%s9442_s5 + $0x30] sm:$0xf]  ;;  %v6882_v3 = vld [vmem:[%s9442_s5 + $0x34] sm:$0xf0] }
  0x61   :  { %1221 = vmatpush.bf16.msrb.mxu3 %v5886_v7  ;;  %1038 = vmatpush.bf16.msra.mxu0 %v5796_v11  ;;  %v5911_v7 = vld [vmem:[#allocation5 + $0x15c] sm:$0xf]  ;;  %v6938_v40 = vld [vmem:[%s9442_s5 + $0x1f4] sm:$0xf0] }
  0x62   :  { %5726 = vmatmul.msk.bf16.gmra.mxu2 %vm198_vm1, %v7536_v25  ;;  %v6854_v11 = vld [vmem:[#allocation5 + $0x238] sm:$0xf0]  ;;  %v5912_v13 = vor.u32 %v6851_v8, %v5911_v7  ;;  %v6900_v7 = vld [vmem:[%s9442_s5 + $0xc4] sm:$0xf0] }
  0x63   :  { %1385 = vmatpush.bf16.msrb.mxu2 %v1362_v5  ;;  %874 = vmatpush.bf16.msra.mxu1 %v5738_v15  ;;  %v5853_v5 = vld [vmem:[#allocation5 + $0x118] sm:$0xf]  ;;  %v5924_v14 = vor.u32 %v6854_v11, %v5923_v9  ;;  %v5907_v15 = vld [vmem:[#allocation5 + $0x11c] sm:$0xf]  ;;  %v6025_v9 = vld [vmem:[%s9442_s5 + $0x20] sm:$0xf] }
  0x64   :  { %v5854_v17 = vor.u32 %v6837_v12, %v5853_v5  ;;  %v5908_v20 = vor.u32 %v6850_v16, %v5907_v15  ;;  %v6097_v5 = vld [vmem:[%s9442_s5 + $0xb0] sm:$0xf]  ;;  %v6898_v12 = vld [vmem:[%s9442_s5 + $0xb4] sm:$0xf0] }
  0x65   :  { %1222 = vmatpush.bf16.msrb.mxu3 %v5882_v19  ;;  %1039 = vmatpush.bf16.msra.mxu0 %v5792_v22  ;;  %v6836_v19 = vld [vmem:[#allocation5 + $0xf4] sm:$0xf0]  ;;  %v6849_v22 = vld [vmem:[#allocation5 + $0xf8] sm:$0xf0] }
  0x66   :  { %v5904_v27 = vor.u32 %v6849_v22, %v5903_v21  ;;  %v6878_v15 = vld [vmem:[%s9442_s5 + $0x14] sm:$0xf0]  ;;  %v6081_v21 = vld [vmem:[%s9442_s5 + $0x90] sm:$0xf] }
  0x67   :  { %1386 = vmatpush.bf16.msrb.mxu2 %v5940_v23  ;;  %875 = vmatpush.bf16.msra.mxu1 %v5734_v28  ;;  %v5850_v23 = vor.u32 %v6836_v19, %v5849_v18  ;;  %v5899_v28 = vld [vmem:[#allocation5 + $0x9c] sm:$0xf]  ;;  %v6896_v18 = vld [vmem:[%s9442_s5 + $0xa4] sm:$0xf0]  ;;  %v6894_v22 = vld [vmem:[%s9442_s5 + $0x94] sm:$0xf0] }
  0x69   :  { %1223 = vmatpush.bf16.msrb.mxu3 %v5878_v35  ;;  %1040 = vmatpush.bf16.msra.mxu0 %v5788_v38  ;;  %v5900_v35 = vor.u32 %v6848_v29, %v5899_v28  ;;  %v5842_v38 = vor.u32 %v6834_v34, %v5841_v33  ;;  %v6073_v28 = vld [vmem:[%s9442_s5 + $0x80] sm:$0xf]  ;;  %v6892_v29 = vld [vmem:[%s9442_s5 + $0x84] sm:$0xf0] }
  0x6a   :  { %v6074_v33 = vor.u32 %v6892_v29, %v6073_v28  ;;  %v6185_v34 = vld [vmem:[%s9442_s5 + $0x160] sm:$0xf]  ;;  %v6928_v29 = vld [vmem:[%s9442_s5 + $0x1a4] sm:$0xf0] }
  0x6b   :  { %1387 = vmatpush.bf16.msrb.mxu2 %v5936_v42  ;;  %876 = vmatpush.bf16.msra.mxu1 %v5730_v48  ;;  %v5896_v42 = vor.u32 %v6847_v37, %v5895_v36  ;;  %v6890_v48 = vld [vmem:[%s9442_s5 + $0x74] sm:$0xf0]  ;;  %v6217_v28 = vld [vmem:[%s9442_s5 + $0x1a0] sm:$0xf] }
  0x6c   :  { %5779 = vmatmul.msk.bf16.vlgmr.msra.gmra.mxu3 %vm198_vm1, %v7509_v31 }
  0x6d   :  { %1224 = vmatpush.bf16.msrb.mxu3 %v5874_v50  ;;  %1041 = vmatpush.bf16.msra.mxu0 %v5784_v57  ;;  %v6066_v50 = vor.u32 %v6890_v48, %v6065_v47  ;;  %v6049_v57 = vld [vmem:[%s9442_s5 + $0x50] sm:$0xf] }
  0x6e   :  { %877 = vmatmul.bf16.vlgmr.msra.gmra.mxu1 %v7516_v45  ;;  %v6050_v59 = vor.u32 %v6886_v58, %v6049_v57 }
  0x6f   :  { %1199 = vmatpush.bf16.msrb.mxu1 %v5866_v53  ;;  %1388 = vmatpush.bf16.msrb.mxu2 %v5932_v54  ;;  %v6058_v53 = vor.u32 %v6888_v52, %v6057_v51  ;;  %v6129_v54 = vld [vmem:[%s9442_s5 + $0xf0] sm:$0xf] }
  0x70   :  { %1042 = vmatmul.bf16.vlgmr.msra.gmra.mxu0 %v7516_v45  ;;  %v6130_v56 = vor.u32 %v6906_v55, %v6129_v54  ;;  %v6169_v55 = vld [vmem:[%s9442_s5 + $0x140] sm:$0xf] }
  0x71   :  { %1364 = vmatpush.bf16.msrb.mxu0 %v5920_v60  ;;  %1225 = vmatpush.bf16.msrb.mxu3 %v5870_v0  ;;  %v6121_v60 = vld [vmem:[%s9442_s5 + $0xe0] sm:$0xf]  ;;  %v6902_v0 = vld [vmem:[%s9442_s5 + $0xd4] sm:$0xf0] }
  0x72   :  { %5833 = vmatmul.msk.bf16.vlgmr.msra.gmra.mxu2 %vm198_vm1, %v7509_v31  ;;  %v6122_v30 = vor.u32 %v6904_v61, %v6121_v60  ;;  %v6934_v60 = vld [vmem:[%s9442_s5 + $0x1d4] sm:$0xf0] }
  0x73   :  { %1200 = vmatpush.bf16.msrb.mxu1 %v5862_v1  ;;  %1389 = vmatpush.bf16.msrb.mxu2 %v5928_v4  ;;  %v6114_v1 = vor.u32 %v6902_v0, %v6113_v63  ;;  %v6034_v4 = vor.u32 %v6882_v3, %v6033_v2  ;;  %v6161_v0 = vld [vmem:[%s9442_s5 + $0x130] sm:$0xf] }
  0x75   :  { %1365 = vmatpush.bf16.msrb.mxu0 %v5916_v6  ;;  %2307 = vmatpush.bf16.msra.mxu3 %v6130_v56  ;;  %v6105_v6 = vld [vmem:[%s9442_s5 + $0xc0] sm:$0xf]  ;;  %v6916_v56 = vld [vmem:[%s9442_s5 + $0x144] sm:$0xf0] }
  0x76   :  { %v6106_v8 = vor.u32 %v6900_v7, %v6105_v6  ;;  %v6170_v58 = vor.u32 %v6916_v56, %v6169_v55  ;;  %v6233_v6 = vld [vmem:[%s9442_s5 + $0x1c0] sm:$0xf]  ;;  %v6932_v7 = vld [vmem:[%s9442_s5 + $0x1c4] sm:$0xf0]  ;;  %v6321_v56 = vld [vmem:[%s9442_s5 + $0x270] sm:$0xf] }
  0x77   :  { %1201 = vmatpush.bf16.msrb.mxu1 %v5858_v10  ;;  %1390 = vmatpush.bf16.msrb.mxu2 %v5924_v14  ;;  %v6880_v10 = vld [vmem:[%s9442_s5 + $0x24] sm:$0xf0]  ;;  %v6017_v14 = vld [vmem:[%s9442_s5 + $0x10] sm:$0xf] }
  0x78   :  { %v6026_v11 = vor.u32 %v6880_v10, %v6025_v9  ;;  %v6018_v16 = vor.u32 %v6878_v15, %v6017_v14  ;;  %v6234_v9 = vor.u32 %v6932_v7, %v6233_v6  ;;  %v6385_v6 = vld [vmem:[%s9442_s5 + $0x2f0] sm:$0xf]  ;;  %v6970_v7 = vld [vmem:[%s9442_s5 + $0x2f4] sm:$0xf0] }
  0x79   :  { %1366 = vmatpush.bf16.msrb.mxu0 %v5912_v13  ;;  %2308 = vmatpush.bf16.msra.mxu3 %v6122_v30  ;;  %v6098_v13 = vor.u32 %v6898_v12, %v6097_v5  ;;  %v6153_v5 = vld [vmem:[%s9442_s5 + $0x120] sm:$0xf]  ;;  %v6912_v12 = vld [vmem:[%s9442_s5 + $0x124] sm:$0xf0] }
  0x7a   :  { %v6154_v15 = vor.u32 %v6912_v12, %v6153_v5  ;;  %v6386_v12 = vor.u32 %v6970_v7, %v6385_v6 }
  0x7b   :  { %1202 = vmatpush.bf16.msrb.mxu1 %v5854_v17  ;;  %v6089_v17 = vld [vmem:[%s9442_s5 + $0xa0] sm:$0xf] }
  0x7c   :  { %5780 = vmatmul.msk.bf16.gmra.mxu3 %vm198_vm1, %v7536_v25  ;;  %v6090_v19 = vor.u32 %v6896_v18, %v6089_v17  ;;  %v6930_v17 = vld [vmem:[%s9442_s5 + $0x1b4] sm:$0xf0] }
  0x7d   :  { %1367 = vmatpush.bf16.msrb.mxu0 %v5908_v20  ;;  %2309 = vmatpush.bf16.msra.mxu3 %v6114_v1  ;;  %v6009_v20 = vld [vmem:[%s9442_s5] sm:$0xf]  ;;  %v6914_v1 = vld [vmem:[%s9442_s5 + $0x134] sm:$0xf0] }
  0x7e   :  { %882 = vmatmul.bf16.gmra.mxu1 %v7542_v39 }
  0x7f   :  { %1203 = vmatpush.bf16.msrb.mxu1 %v5850_v23  ;;  %v6082_v23 = vor.u32 %v6894_v22, %v6081_v21  ;;  %v6145_v22 = vld [vmem:[%s9442_s5 + $0x110] sm:$0xf] }
  0x80   :  { %1047 = vmatmul.bf16.gmra.mxu0 %v7542_v39 }
  0x81   :  { %1368 = vmatpush.bf16.msrb.mxu0 %v5904_v27  ;;  %2310 = vmatpush.bf16.msra.mxu3 %v6106_v8  ;;  %v6194_v27 = vor.u32 %v6922_v24, %v6193_v26 }
  0x82   :  { %5834 = vmatmul.msk.bf16.gmra.mxu2 %vm198_vm1, %v7536_v25 }
  0x83   :  { %1204 = vmatpush.bf16.msrb.mxu1 %v5846_v32  ;;  %v7695_v32 = vld [vmem:[%s9439_s2] ss:$0 sm:$0xff] }
  0x85   :  { %1369 = vmatpush.bf16.msrb.mxu0 %v5900_v35  ;;  %2311 = vmatpush.bf16.msra.mxu3 %v6098_v13  ;;  %v6920_v35 = vld [vmem:[%s9442_s5 + $0x164] sm:$0xf0] }
  0x86   :  { %v6186_v37 = vor.u32 %v6920_v35, %v6185_v34  ;;  %v6218_v34 = vor.u32 %v6928_v29, %v6217_v28  ;;  %v6948_v28 = vld [vmem:[%s9442_s5 + $0x244] sm:$0xf0] }
  0x87   :  { %1205 = vmatpush.bf16.msrb.mxu1 %v5842_v38  ;;  %v6257_v38 = vld [vmem:[%s9442_s5 + $0x1f0] sm:$0xf] }
  0x88   :  { %v6258_v41 = vor.u32 %v6938_v40, %v6257_v38  ;;  %v6908_v38 = vld [vmem:[%s9442_s5 + $0x104] sm:$0xf0] }
  0x89   :  { %1370 = vmatpush.bf16.msrb.mxu0 %v5896_v42  ;;  %2312 = vmatpush.bf16.msra.mxu3 %v6090_v19 }
  0x8a   :  { %2345 = vmatpush.bf16.msra.mxu2 %v6258_v41 }
  0x8b   :  { %1206 = vmatpush.bf16.msrb.mxu1 %v5838_v46  ;;  %v6918_v46 = vld [vmem:[%s9442_s5 + $0x154] sm:$0xf0] }
  0x8c   :  { %5887 = vmatmul.msk.bf16.vlgmr.msrb.gmra.mxu3 %vm198_vm1, %v7509_v31  ;;  %v6178_v48 = vor.u32 %v6918_v46, %v6177_v44  ;;  %v6926_v44 = vld [vmem:[%s9442_s5 + $0x194] sm:$0xf0] }
  0x8d   :  { %1371 = vmatpush.bf16.msrb.mxu0 %v5892_v49  ;;  %2313 = vmatpush.bf16.msra.mxu3 %v6082_v23  ;;  %v6249_v49 = vld [vmem:[%s9442_s5 + $0x1e0] sm:$0xf]  ;;  %v6910_v23 = vld [vmem:[%s9442_s5 + $0x114] sm:$0xf0] }
  0x8e   :  { %1207 = vmatmul.bf16.vlgmr.msrb.gmra.mxu1 %v7516_v45 }
  0x8f   :  { %2288 = vmatpush.bf16.msra.mxu1 %v6066_v50  ;;  %v6936_v50 = vld [vmem:[%s9442_s5 + $0x1e4] sm:$0xf0] }
  0x90   :  { %1372 = vmatmul.bf16.vlgmr.msrb.gmra.mxu0 %v7516_v45  ;;  %v6884_v45 = vld [vmem:[%s9442_s5 + $0x44] sm:$0xf0]  ;;  %v6250_v52 = vor.u32 %v6936_v50, %v6249_v49 }
  0x91   :  { %2326 = vmatpush.bf16.msra.mxu0 %v6194_v27  ;;  %2314 = vmatpush.bf16.msra.mxu3 %v6074_v33  ;;  %v6146_v27 = vor.u32 %v6910_v23, %v6145_v22 }
  0x92   :  { %5941 = vmatmul.msk.bf16.vlgmr.msrb.gmra.mxu2 %vm198_vm1, %v7509_v31  ;;  %v6042_v31 = vor.u32 %v6884_v45, %v6041_v62 }
  0x93   :  { %2289 = vmatpush.bf16.msra.mxu1 %v6058_v53  ;;  %v7725_v53 = vld [vmem:[%s9439_s2] ss:$0 sm:$0xff]  ;;  %2346 = vmatpush.bf16.msra.mxu2 %v6250_v52 }
  0x95   :  { %2327 = vmatpush.bf16.msra.mxu0 %v6186_v37  ;;  %v6137_v37 = vld [vmem:[%s9442_s5 + $0x100] sm:$0xf]  ;;  %2383 = vmatpush.bf16.msrb.mxu3 %v6386_v12 }
  0x97   :  { %2290 = vmatpush.bf16.msra.mxu1 %v6050_v59  ;;  %v6241_v59 = vld [vmem:[%s9442_s5 + $0x1d0] sm:$0xf] }
  0x98   :  { %v6242_v62 = vor.u32 %v6934_v60, %v6241_v59 }
  0x99   :  { %2328 = vmatpush.bf16.msra.mxu0 %v6178_v48 }
  0x9a   :  { %2347 = vmatpush.bf16.msra.mxu2 %v6242_v62  ;;  %v7811_v62 = vld [vmem:[%s9439_s2] ss:$0 sm:$0xff] }
  0x9b   :  { %2291 = vmatpush.bf16.msra.mxu1 %v6042_v31 }
  0x9c   :  { %5888 = vmatmul.msk.bf16.gmra.mxu3 %vm198_vm1, %v7536_v25 }
  0x9d   :  { %2329 = vmatpush.bf16.msra.mxu0 %v6170_v58 }
  0x9e   :  { %1212 = vmatmul.bf16.gmra.mxu1 %v7542_v39  ;;  %2348 = vmatpush.bf16.msra.mxu2 %v6234_v9 }
  0x9f   :  { %2292 = vmatpush.bf16.msra.mxu1 %v6034_v4  ;;  %v6162_v4 = vor.u32 %v6914_v1, %v6161_v0  ;;  %v6313_v0 = vld [vmem:[%s9442_s5 + $0x260] sm:$0xf]  ;;  %v6952_v1 = vld [vmem:[%s9442_s5 + $0x264] sm:$0xf0] }
  0xa0   :  { %1377 = vmatmul.bf16.gmra.mxu0 %v7542_v39  ;;  %v6876_v39 = vld [vmem:[%s9442_s5 + $0x4] sm:$0xf0] }
  0xa1   :  { %2330 = vmatpush.bf16.msra.mxu0 %v6162_v4  ;;  %v6314_v4 = vor.u32 %v6952_v1, %v6313_v0  ;;  %v6962_v0 = vld [vmem:[%s9442_s5 + $0x2b4] sm:$0xf0] }
  0xa2   :  { %5942 = vmatmul.msk.bf16.gmra.mxu2 %vm198_vm1, %v7536_v25  ;;  %v6010_v25 = vor.u32 %v6876_v39, %v6009_v20 }
  0xa3   :  { %2293 = vmatpush.bf16.msra.mxu1 %v6026_v11 }
  0xa5   :  { %2331 = vmatpush.bf16.msra.mxu0 %v6154_v15 }
  0xa7   :  { %2294 = vmatpush.bf16.msra.mxu1 %v6018_v16  ;;  %v6225_v16 = vld [vmem:[%s9442_s5 + $0x1b0] sm:$0xf] }
  0xa8   :  { %v6226_v20 = vor.u32 %v6930_v17, %v6225_v16  ;;  %v6305_v17 = vld [vmem:[%s9442_s5 + $0x250] sm:$0xf] }
  0xa9   :  { %2332 = vmatpush.bf16.msra.mxu0 %v6146_v27  ;;  %v6297_v27 = vld [vmem:[%s9442_s5 + $0x240] sm:$0xf] }
  0xaa   :  { %2349 = vmatpush.bf16.msra.mxu2 %v6226_v20 }
  0xab   :  { %2295 = vmatpush.bf16.msra.mxu1 %v6010_v25  ;;  %v237_v36 = vpop.f32.mrf.mxu1 }
  0xad   :  { %v218_v42 = vpop.f32.mrf.mxu0 }
  0xae   :  { %v219_v43 = vadd.f32 %v7695_v32, %v218_v42  ;;  %2350 = vmatpush.bf16.msra.mxu2 %v6218_v34  ;;  %v6138_v42 = vor.u32 %v6908_v38, %v6137_v37  ;;  %v6298_v34 = vor.u32 %v6948_v28, %v6297_v27 }
  0xaf   :  { %v402_v47 = vpop.f32.mrf.mxu3 }
  0xb0   :  { %v238_v51 = vadd.f32 %v237_v36, %v219_v43  ;;  %v6209_v43 = vld [vmem:[%s9442_s5 + $0x190] sm:$0xf]  ;;  %2333 = vmatpush.bf16.msra.mxu0 %v6138_v42 }
  0xb1   :  { %v6210_v48 = vor.u32 %v6926_v44, %v6209_v43 }
  0xb2   :  { %v247_v54 = vmax.f32 %v238_v51, 0.0 }
  0xb3   :  { %v239_v57 = vpop.f32.mrf.mxu1  ;;  %2351 = vmatpush.bf16.msra.mxu2 %v6210_v48  ;;  %v6289_v48 = vld [vmem:[%s9442_s5 + $0x230] sm:$0xf] }
  0xb4   :  { %v251_v61 = vpack.c.bf16 %v247_v54, %v247_v54 }
  0xb5   :  { %v383_v30 = vpop.f32.mrf.mxu2  ;;  %v220_v31 = vpop.f32.mrf.mxu0 }
  0xb6   :  { %v384_v45 = vadd.f32 %v7725_v53, %v383_v30  ;;  %255 = vst [vmem:[#allocation2] sm:$0xf] %v251_v61  ;;  %v221_v63 = vadd.f32 %v7695_v32, %v220_v31  ;;  %v6201_v61 = vld [vmem:[%s9442_s5 + $0x180] sm:$0xf] }
  0xb7   :  { %v404_v3 = vpop.f32.mrf.mxu3 }
  0xb8   :  { %v403_v2 = vadd.f32 %v402_v47, %v384_v45  ;;  %v240_v8 = vadd.f32 %v239_v57, %v221_v63  ;;  %v6954_v57 = vld [vmem:[%s9442_s5 + $0x274] sm:$0xf0] }
  0xb9   :  { %v6322_v60 = vor.u32 %v6954_v57, %v6321_v56  ;;  %v6964_v56 = vld [vmem:[%s9442_s5 + $0x2c4] sm:$0xf0] }
  0xba   :  { %v412_v10 = vmax.f32 %v403_v2, 0.0  ;;  %v248_v11 = vmax.f32 %v240_v8, 0.0 }
  0xbb   :  { %v242_v14 = vpop.f32.mrf.mxu1  ;;  %2364 = vmatpush.bf16.msrb.mxu1 %v6322_v60 }
  0xbc   :  { %v416_v13 = vpack.c.bf16 %v412_v10, %v412_v10  ;;  %v252_v18 = vpack.c.bf16 %v248_v11, %v248_v11 }
  0xbd   :  { %v385_v19 = vpop.f32.mrf.mxu2  ;;  %v223_v25 = vpop.f32.mrf.mxu0  ;;  %v5945_v51 = vld [vmem:[#allocation2] sm:$0xf] }
  0xbe   :  { %420 = vst [vmem:[#allocation2 + $0x4] sm:$0xf] %v416_v13  ;;  %v386_v39 = vadd.f32 %v7725_v53, %v385_v19  ;;  %v224_v21 = vadd.f32 %v7695_v32, %v223_v25  ;;  %v6968_v25 = vld [vmem:[%s9442_s5 + $0x2e4] sm:$0xf0] }
  0xbf   :  { %256 = vst [vmem:[#allocation2 + $0x20] sm:$0xf] %v252_v18  ;;  %v407_v24 = vpop.f32.mrf.mxu3  ;;  %2365 = vmatpush.bf16.msrb.mxu1 %v6314_v4  ;;  %v6950_v18 = vld [vmem:[%s9442_s5 + $0x254] sm:$0xf0] }
  0xc0   :  { %v405_v26 = vadd.f32 %v404_v3, %v386_v39  ;;  %v243_v33 = vadd.f32 %v242_v14, %v224_v21  ;;  %v7830_v14 = vld [vmem:[%s9439_s2] ss:$0 sm:$0xff]  ;;  %v6306_v20 = vor.u32 %v6950_v18, %v6305_v17  ;;  %v6960_v18 = vld [vmem:[%s9442_s5 + $0x2a4] sm:$0xf0] }
  0xc1   :  { %v6377_v39 = vld [vmem:[%s9442_s5 + $0x2e0] sm:$0xf] }
  0xc2   :  { %v413_v35 = vmax.f32 %v405_v26, 0.0  ;;  %v249_v36 = vmax.f32 %v243_v33, 0.0  ;;  %v6378_v22 = vor.u32 %v6968_v25, %v6377_v39  ;;  %v6345_v17 = vld [vmem:[%s9442_s5 + $0x2a0] sm:$0xf] }
  0xc3   :  { %v244_v41 = vpop.f32.mrf.mxu1  ;;  %2366 = vmatpush.bf16.msrb.mxu1 %v6306_v20 }
  0xc4   :  { %v417_v40 = vpack.c.bf16 %v413_v35, %v413_v35  ;;  %v253_v46 = vpack.c.bf16 %v249_v36, %v249_v36  ;;  %2384 = vmatpush.bf16.msrb.mxu3 %v6378_v22  ;;  %v6369_v35 = vld [vmem:[%s9442_s5 + $0x2d0] sm:$0xf]  ;;  %v6966_v36 = vld [vmem:[%s9442_s5 + $0x2d4] sm:$0xf0]  ;;  %v6265_v22 = vld [vmem:[%s9442_s5 + $0x200] sm:$0xf] }
  0xc5   :  { %v388_v47 = vpop.f32.mrf.mxu2  ;;  %v225_v50 = vpop.f32.mrf.mxu0  ;;  %v6859_v11 = vld [vmem:[#allocation2 + $0x4] sm:$0xf] }
  0xc6   :  { %421 = vst [vmem:[#allocation2 + $0x24] sm:$0xf] %v417_v40  ;;  %v389_v49 = vadd.f32 %v7725_v53, %v388_v47  ;;  %v6863_v52 = vld [vmem:[#allocation2 + $0x1c] sm:$0xf0]  ;;  %v226_v54 = vadd.f32 %v7695_v32, %v225_v50  ;;  %v6924_v32 = vld [vmem:[%s9442_s5 + $0x184] sm:$0xf0] }
  0xc7   :  { %257 = vst [vmem:[#allocation2 + $0x40] sm:$0xf] %v253_v46  ;;  %v7793_v55 = vor.u32 %v6863_v52, %v5945_v51  ;;  %v409_v59 = vpop.f32.mrf.mxu3  ;;  %v6202_v45 = vor.u32 %v6924_v32, %v6201_v61  ;;  %2367 = vmatpush.bf16.msrb.mxu1 %v6298_v34  ;;  %v6281_v61 = vld [vmem:[%s9442_s5 + $0x220] sm:$0xf]  ;;  %v6944_v32 = vld [vmem:[%s9442_s5 + $0x224] sm:$0xf0] }
  0xc8   :  { %v408_v58 = vadd.f32 %v407_v24, %v389_v49  ;;  %v245_v30 = vadd.f32 %v244_v41, %v226_v54  ;;  %v6370_v41 = vor.u32 %v6966_v36, %v6369_v35  ;;  %v6946_v49 = vld [vmem:[%s9442_s5 + $0x234] sm:$0xf0]  ;;  %v6361_v54 = vld [vmem:[%s9442_s5 + $0x2c0] sm:$0xf] }
  0xc9   :  { %2296 = vmatmul.bf16.vlgmr.msra.gmra.mxu1 %v7793_v55  ;;  %2352 = vmatpush.bf16.msra.mxu2 %v6202_v45  ;;  %v6290_v52 = vor.u32 %v6946_v49, %v6289_v48  ;;  %v6958_v34 = vld [vmem:[%s9442_s5 + $0x294] sm:$0xf0]  ;;  %v6067_v48 = vld [vmem:[%s9442_s5 + $0x78] sm:$0xf0] }
  0xca   :  { %v414_v31 = vmax.f32 %v408_v58, 0.0  ;;  %v250_v63 = vmax.f32 %v245_v30, 0.0  ;;  %2385 = vmatpush.bf16.msrb.mxu3 %v6370_v41  ;;  %v6362_v58 = vor.u32 %v6964_v56, %v6361_v54  ;;  %v6449_v41 = vld [vmem:[%s9442_s5 + $0x370] sm:$0xf]  ;;  %v6956_v54 = vld [vmem:[%s9442_s5 + $0x284] sm:$0xf0] }
  0xcb   :  { %v548_v3 = vpop.f32.mrf.mxu1  ;;  %2368 = vmatpush.bf16.msrb.mxu1 %v6290_v52  ;;  %v6329_v52 = vld [vmem:[%s9442_s5 + $0x280] sm:$0xf] }
  0xcc   :  { %v418_v2 = vpack.c.bf16 %v414_v31, %v414_v31  ;;  %v254_v8 = vpack.c.bf16 %v250_v63, %v250_v63  ;;  %v549_v10 = vadd.f32 %v7811_v62, %v548_v3  ;;  %v6282_v31 = vor.u32 %v6944_v32, %v6281_v61  ;;  %v6353_v63 = vld [vmem:[%s9442_s5 + $0x2b0] sm:$0xf]  ;;  %v6441_v61 = vld [vmem:[%s9442_s5 + $0x360] sm:$0xf] }
  0xcd   :  { %v390_v9 = vpop.f32.mrf.mxu2  ;;  %v5947_v5 = vld [vmem:[#allocation2 + $0x20] sm:$0xf0]  ;;  %v713_v15 = vpop.f32.mrf.mxu0  ;;  %v6354_v7 = vor.u32 %v6962_v0, %v6353_v63 }
  0xce   :  { %422 = vst [vmem:[#allocation2 + $0x44] sm:$0xf] %v418_v2  ;;  %v391_v13 = vadd.f32 %v7725_v53, %v390_v9  ;;  %v7832_v16 = vor.u32 %v6859_v11, %v5947_v5  ;;  %v714_v26 = vadd.f32 %v7830_v14, %v713_v15  ;;  %v5977_v44 = vld [vmem:[#allocation2 + $0x40] sm:$0xf]  ;;  %2386 = vmatpush.bf16.msrb.mxu3 %v6362_v58  ;;  %v6273_v11 = vld [vmem:[%s9442_s5 + $0x210] sm:$0xf] }
  0xcf   :  { %258 = vst [vmem:[#allocation2 + $0x60] sm:$0xf] %v254_v8  ;;  %v567_v19 = vpop.f32.mrf.mxu3  ;;  %2369 = vmatpush.bf16.msrb.mxu1 %v6282_v31  ;;  %v6942_v5 = vld [vmem:[%s9442_s5 + $0x214] sm:$0xf0]  ;;  %v6330_v58 = vor.u32 %v6956_v54, %v6329_v52  ;;  %v6984_v31 = vld [vmem:[%s9442_s5 + $0x364] sm:$0xf0] }
  0xd0   :  { %v410_v53 = vadd.f32 %v409_v59, %v391_v13  ;;  %2315 = vmatmul.bf16.vlgmr.msra.gmra.mxu3 %v7832_v16  ;;  %v568_v21 = vadd.f32 %v567_v19, %v549_v10  ;;  %v6274_v15 = vor.u32 %v6942_v5, %v6273_v11  ;;  %v6346_v19 = vor.u32 %v6960_v18, %v6345_v17  ;;  %v6887_v63 = vld [vmem:[%s9442_s5 + $0x64] sm:$0xf]  ;;  %v6433_v17 = vld [vmem:[%s9442_s5 + $0x350] sm:$0xf]  ;;  %v6982_v18 = vld [vmem:[%s9442_s5 + $0x354] sm:$0xf0] }
  0xd2   :  { %v415_v23 = vmax.f32 %v410_v53, 0.0  ;;  %v577_v24 = vmax.f32 %v568_v21, 0.0  ;;  %2387 = vmatpush.bf16.msrb.mxu3 %v6354_v7 }
  0xd3   :  { %v550_v33 = vpop.f32.mrf.mxu1  ;;  %2370 = vmatpush.bf16.msrb.mxu1 %v6274_v15 }
  0xd4   :  { %v419_v29 = vpack.c.bf16 %v415_v23, %v415_v23  ;;  %v581_v37 = vpack.c.bf16 %v577_v24, %v577_v24  ;;  %v551_v40 = vadd.f32 %v7811_v62, %v550_v33  ;;  %v6337_v24 = vld [vmem:[%s9442_s5 + $0x290] sm:$0xf] }
  0xd5   :  { %v732_v38 = vpop.f32.mrf.mxu2  ;;  %v715_v43 = vpop.f32.mrf.mxu0  ;;  %v6867_v4 = vld [vmem:[#allocation2 + $0x44] sm:$0xf] }
  0xd6   :  { %423 = vst [vmem:[#allocation2 + $0x64] sm:$0xf] %v419_v29  ;;  %v733_v42 = vadd.f32 %v732_v38, %v714_v26  ;;  %v6871_v46 = vld [vmem:[#allocation2 + $0x5c] sm:$0xf0]  ;;  %v716_v30 = vadd.f32 %v7830_v14, %v715_v43  ;;  %2388 = vmatpush.bf16.msrb.mxu3 %v6346_v19  ;;  %v6940_v26 = vld [vmem:[%s9442_s5 + $0x204] sm:$0xf0]  ;;  %v6338_v38 = vor.u32 %v6958_v34, %v6337_v24 }
  0xd7   :  { %585 = vst [vmem:[#allocation2 + $0x8] sm:$0xf] %v581_v37  ;;  %v7861_v47 = vor.u32 %v6871_v46, %v5977_v44  ;;  %v569_v51 = vpop.f32.mrf.mxu3  ;;  %v6266_v33 = vor.u32 %v6940_v26, %v6265_v22  ;;  %v6889_v46 = vld [vmem:[%s9442_s5 + $0x74] sm:$0xf]  ;;  %v7000_v26 = vld [vmem:[%s9442_s5 + $0x3e4] sm:$0xf0] }
  0xd8   :  { %v742_v50 = vmax.f32 %v733_v42, 0.0  ;;  %v570_v57 = vadd.f32 %v569_v51, %v551_v40  ;;  %v6070_v51 = vor.u32 %v6889_v46, %v6067_v48  ;;  %v6903_v24 = vld [vmem:[%s9442_s5 + $0xe4] sm:$0xf]  ;;  %v6043_v48 = vld [vmem:[%s9442_s5 + $0x48] sm:$0xf0] }
  0xd9   :  { %2301 = vmatmul.bf16.gmra.mxu1 %v7861_v47  ;;  %v6883_v46 = vld [vmem:[%s9442_s5 + $0x44] sm:$0xf] }
  0xda   :  { %v746_v59 = vpack.c.bf16 %v742_v50, %v742_v50  ;;  %v578_v60 = vmax.f32 %v570_v57, 0.0  ;;  %2371 = vmatpush.bf16.msrb.mxu1 %v6266_v33  ;;  %2389 = vmatpush.bf16.msrb.mxu3 %v6338_v38  ;;  %v7937_v50 = vld [vmem:[%s9439_s2] ss:$0 sm:$0xff]  ;;  %v6123_v33 = vld [vmem:[%s9442_s5 + $0xe8] sm:$0xf0] }
  0xdb   :  { %v553_v45 = vpop.f32.mrf.mxu1 }
  0xdc   :  { %750 = vst [vmem:[#allocation2 + $0xc] sm:$0xf] %v746_v59  ;;  %v582_v1 = vpack.c.bf16 %v578_v60, %v578_v60  ;;  %v554_v3 = vadd.f32 %v7811_v62, %v553_v45 }
  0xdd   :  { %v734_v2 = vpop.f32.mrf.mxu2  ;;  %v5979_v6 = vld [vmem:[#allocation2 + $0x60] sm:$0xf0]  ;;  %v718_v9 = vpop.f32.mrf.mxu0 }
  0xde   :  { %v735_v8 = vadd.f32 %v734_v2, %v716_v30  ;;  %v7890_v10 = vor.u32 %v6867_v4, %v5979_v6  ;;  %586 = vst [vmem:[#allocation2 + $0x28] sm:$0xf] %v582_v1  ;;  %v719_v39 = vadd.f32 %v7830_v14, %v718_v9  ;;  %v5953_v21 = vld [vmem:[#allocation2 + $0x8] sm:$0xf]  ;;  %2440 = vmatpush.bf16.msra.mxu1 %v6070_v51  ;;  %v6513_v4 = vld [vmem:[%s9442_s5 + $0x3f0] sm:$0xf] }
  0xdf   :  { %v572_v13 = vpop.f32.mrf.mxu3  ;;  %2390 = vmatpush.bf16.msrb.mxu3 %v6330_v58  ;;  %v7002_v6 = vld [vmem:[%s9442_s5 + $0x3f4] sm:$0xf0]  ;;  %v6901_v58 = vld [vmem:[%s9442_s5 + $0xd4] sm:$0xf] }
  0xe0   :  { %v743_v12 = vmax.f32 %v735_v8, 0.0  ;;  %2320 = vmatmul.bf16.gmra.mxu3 %v7890_v10  ;;  %v573_v53 = vadd.f32 %v572_v13, %v554_v3  ;;  %v6442_v3 = vor.u32 %v6984_v31, %v6441_v61  ;;  %v7971_v8 = vld [vmem:[%s9439_s2] ss:$0 sm:$0xff]  ;;  %v6514_v5 = vor.u32 %v7002_v6, %v6513_v4  ;;  %v6131_v13 = vld [vmem:[%s9442_s5 + $0xf8] sm:$0xf0] }
  0xe1   :  { %v6115_v61 = vld [vmem:[%s9442_s5 + $0xd8] sm:$0xf0]  ;;  %v6489_v4 = vld [vmem:[%s9442_s5 + $0x3c0] sm:$0xf]  ;;  %v6996_v6 = vld [vmem:[%s9442_s5 + $0x3c4] sm:$0xf0] }
  0xe2   :  { %v747_v20 = vpack.c.bf16 %v743_v12, %v743_v12  ;;  %v579_v25 = vmax.f32 %v573_v53, 0.0  ;;  %v6905_v12 = vld [vmem:[%s9442_s5 + $0xf4] sm:$0xf]  ;;  %2421 = vmatpush.bf16.msrb.mxu2 %v6514_v5  ;;  %v6490_v5 = vor.u32 %v6996_v6, %v6489_v4 }
  0xe3   :  { %v555_v23 = vpop.f32.mrf.mxu1  ;;  %v6860_v57 = vld [vmem:[#allocation2 + $0xc] sm:$0xf]  ;;  %v6134_v15 = vor.u32 %v6905_v12, %v6131_v13  ;;  %v6899_v12 = vld [vmem:[%s9442_s5 + $0xc4] sm:$0xf] }
  0xe4   :  { %751 = vst [vmem:[#allocation2 + $0x2c] sm:$0xf] %v747_v20  ;;  %v583_v27 = vpack.c.bf16 %v579_v25, %v579_v25  ;;  %v556_v29 = vadd.f32 %v7811_v62, %v555_v23  ;;  %v6986_v62 = vld [vmem:[%s9442_s5 + $0x374] sm:$0xf0]  ;;  %v6434_v20 = vor.u32 %v6982_v18, %v6433_v17  ;;  %v6051_v25 = vld [vmem:[%s9442_s5 + $0x58] sm:$0xf0] }
  0xe5   :  { %v737_v28 = vpop.f32.mrf.mxu2  ;;  %v720_v36 = vpop.f32.mrf.mxu0  ;;  %v6864_v37 = vld [vmem:[#allocation2 + $0x24] sm:$0xf0]  ;;  %v6450_v44 = vor.u32 %v6986_v62, %v6449_v41  ;;  %2459 = vmatpush.bf16.msra.mxu3 %v6134_v15  ;;  %v6505_v23 = vld [vmem:[%s9442_s5 + $0x3e0] sm:$0xf]  ;;  %v6107_v13 = vld [vmem:[%s9442_s5 + $0xc8] sm:$0xf0] }
  0xe6   :  { %v738_v35 = vadd.f32 %v737_v28, %v719_v39  ;;  %587 = vst [vmem:[#allocation2 + $0x48] sm:$0xf] %v583_v27  ;;  %v7919_v40 = vor.u32 %v6864_v37, %v5953_v21  ;;  %v721_v32 = vadd.f32 %v7830_v14, %v720_v36  ;;  %v6059_v14 = vld [vmem:[%s9442_s5 + $0x68] sm:$0xf0]  ;;  %v6885_v39 = vld [vmem:[%s9442_s5 + $0x54] sm:$0xf]  ;;  %v6110_v18 = vor.u32 %v6899_v12, %v6107_v13 }
  0xe7   :  { %v574_v43 = vpop.f32.mrf.mxu3  ;;  %2402 = vmatpush.bf16.msrb.mxu0 %v6450_v44  ;;  %v6062_v11 = vor.u32 %v6887_v63, %v6059_v14  ;;  %v6054_v22 = vor.u32 %v6885_v39, %v6051_v25  ;;  %v6425_v36 = vld [vmem:[%s9442_s5 + $0x340] sm:$0xf]  ;;  %v6980_v41 = vld [vmem:[%s9442_s5 + $0x344] sm:$0xf0]  ;;  %v6118_v63 = vor.u32 %v6901_v58, %v6115_v61  ;;  %v6035_v14 = vld [vmem:[%s9442_s5 + $0x38] sm:$0xf0] }
  0xe8   :  { %v744_v42 = vmax.f32 %v738_v35, 0.0  ;;  %v575_v49 = vadd.f32 %v574_v43, %v556_v29  ;;  %2334 = vmatmul.bf16.vlgmr.msra.gmra.mxu0 %v7919_v40  ;;  %v6506_v29 = vor.u32 %v7000_v26, %v6505_v23  ;;  %v6126_v35 = vor.u32 %v6903_v24, %v6123_v33  ;;  %v6976_v25 = vld [vmem:[%s9442_s5 + $0x324] sm:$0xf0] }
  0xe9   :  { %2441 = vmatpush.bf16.msra.mxu1 %v6062_v11  ;;  %v6426_v44 = vor.u32 %v6980_v41, %v6425_v36 }
  0xea   :  { %v748_v56 = vpack.c.bf16 %v744_v42, %v744_v42  ;;  %v580_v59 = vmax.f32 %v575_v49, 0.0  ;;  %2422 = vmatpush.bf16.msrb.mxu2 %v6506_v29  ;;  %2460 = vmatpush.bf16.msra.mxu3 %v6126_v35  ;;  %v6497_v49 = vld [vmem:[%s9442_s5 + $0x3d0] sm:$0xf]  ;;  %v6994_v29 = vld [vmem:[%s9442_s5 + $0x3b4] sm:$0xf0] }
  0xeb   :  { %v5955_v60 = vld [vmem:[#allocation2 + $0x28] sm:$0xf0]  ;;  %v878_v30 = vpop.f32.mrf.mxu1  ;;  %2403 = vmatpush.bf16.msrb.mxu0 %v6442_v3 }
  0xec   :  { %752 = vst [vmem:[#allocation2 + $0x4c] sm:$0xf] %v748_v56  ;;  %v7949_v45 = vor.u32 %v6860_v57, %v5955_v60  ;;  %v584_v0 = vpack.c.bf16 %v580_v59, %v580_v59  ;;  %v879_v2 = vadd.f32 %v7937_v50, %v878_v30  ;;  %v6046_v56 = vor.u32 %v6883_v46, %v6043_v48  ;;  %v6998_v57 = vld [vmem:[%s9442_s5 + $0x3d4] sm:$0xf0]  ;;  %v6877_v48 = vld [vmem:[%s9442_s5 + $0x14] sm:$0xf] }
  0xed   :  { %v739_v1 = vpop.f32.mrf.mxu2  ;;  %v1043_v9 = vpop.f32.mrf.mxu0  ;;  %v5985_v38 = vld [vmem:[#allocation2 + $0x48] sm:$0xf]  ;;  %2442 = vmatpush.bf16.msra.mxu1 %v6054_v22  ;;  %v6498_v60 = vor.u32 %v6998_v57, %v6497_v49  ;;  %v6019_v49 = vld [vmem:[%s9442_s5 + $0x18] sm:$0xf0]  ;;  %v6895_v57 = vld [vmem:[%s9442_s5 + $0xa4] sm:$0xf] }
  0xee   :  { %v740_v7 = vadd.f32 %v739_v1, %v721_v32  ;;  %2353 = vmatmul.bf16.vlgmr.msra.gmra.mxu2 %v7949_v45  ;;  %588 = vst [vmem:[#allocation2 + $0x68] sm:$0xf] %v584_v0  ;;  %v1044_v28 = vadd.f32 %v7971_v8, %v1043_v9  ;;  %v6417_v32 = vld [vmem:[%s9442_s5 + $0x330] sm:$0xf]  ;;  %v6978_v0 = vld [vmem:[%s9442_s5 + $0x334] sm:$0xf0]  ;;  %2461 = vmatpush.bf16.msra.mxu3 %v6118_v63 }
  0xef   :  { %v897_v19 = vpop.f32.mrf.mxu3  ;;  %2404 = vmatpush.bf16.msrb.mxu0 %v6434_v20  ;;  %v6881_v1 = vld [vmem:[%s9442_s5 + $0x34] sm:$0xf]  ;;  %2423 = vmatpush.bf16.msrb.mxu2 %v6498_v60  ;;  %v6418_v3 = vor.u32 %v6978_v0, %v6417_v32  ;;  %v6091_v32 = vld [vmem:[%s9442_s5 + $0xa8] sm:$0xf0]  ;;  %v6393_v0 = vld [vmem:[%s9442_s5 + $0x300] sm:$0xf] }
  0xf0   :  { %v745_v53 = vmax.f32 %v740_v7, 0.0  ;;  %v898_v21 = vadd.f32 %v897_v19, %v879_v2  ;;  %v6038_v11 = vor.u32 %v6881_v1, %v6035_v14  ;;  %v6094_v63 = vor.u32 %v6895_v57, %v6091_v32  ;;  %v6259_v32 = vld [vmem:[%s9442_s5 + $0x1f8] sm:$0xf0] }
  0xf1   :  { %2443 = vmatpush.bf16.msra.mxu1 %v6046_v56  ;;  %v6992_v56 = vld [vmem:[%s9442_s5 + $0x3a4] sm:$0xf0] }
  0xf2   :  { %v749_v27 = vpack.c.bf16 %v745_v53, %v745_v53  ;;  %v907_v34 = vmax.f32 %v898_v21, 0.0  ;;  %v6409_v53 = vld [vmem:[%s9442_s5 + $0x320] sm:$0xf]  ;;  %v6879_v21 = vld [vmem:[%s9442_s5 + $0x24] sm:$0xf]  ;;  %2462 = vmatpush.bf16.msra.mxu3 %v6110_v18 }
  0xf3   :  { %v880_v37 = vpop.f32.mrf.mxu1  ;;  %2405 = vmatpush.bf16.msrb.mxu0 %v6426_v44  ;;  %v6868_v9 = vld [vmem:[#allocation2 + $0x4c] sm:$0xf]  ;;  %2424 = vmatpush.bf16.msrb.mxu2 %v6490_v5  ;;  %v6410_v24 = vor.u32 %v6976_v25, %v6409_v53  ;;  %v6990_v5 = vld [vmem:[%s9442_s5 + $0x394] sm:$0xf0]  ;;  %v6893_v18 = vld [vmem:[%s9442_s5 + $0x94] sm:$0xf] }
  0xf4   :  { %753 = vst [vmem:[#allocation2 + $0x6c] sm:$0xf] %v749_v27  ;;  %v911_v62 = vpack.c.bf16 %v907_v34, %v907_v34  ;;  %v881_v43 = vadd.f32 %v7937_v50, %v880_v37  ;;  %v6027_v27 = vld [vmem:[%s9442_s5 + $0x28] sm:$0xf0]  ;;  %v6897_v37 = vld [vmem:[%s9442_s5 + $0xb4] sm:$0xf] }
  0xf5   :  { %v1062_v42 = vpop.f32.mrf.mxu2  ;;  %v1045_v52 = vpop.f32.mrf.mxu0  ;;  %v6872_v54 = vld [vmem:[#allocation2 + $0x64] sm:$0xf0]  ;;  %2444 = vmatpush.bf16.msra.mxu1 %v6038_v11  ;;  %v6030_v35 = vor.u32 %v6879_v21, %v6027_v27  ;;  %v6465_v11 = vld [vmem:[%s9442_s5 + $0x390] sm:$0xf]  ;;  %v6083_v53 = vld [vmem:[%s9442_s5 + $0x98] sm:$0xf0] }
  0xf6   :  { %v1063_v51 = vadd.f32 %v1062_v42, %v1044_v28  ;;  %915 = vst [vmem:[#allocation2 + $0x10] sm:$0xf] %v911_v62  ;;  %v8026_v59 = vor.u32 %v6872_v54, %v5985_v38  ;;  %v1046_v19 = vadd.f32 %v7971_v8, %v1045_v52  ;;  %v6481_v28 = vld [vmem:[%s9442_s5 + $0x3b0] sm:$0xf]  ;;  %v6099_v38 = vld [vmem:[%s9442_s5 + $0xb8] sm:$0xf0]  ;;  %v6022_v52 = vor.u32 %v6877_v48, %v6019_v49 }
  0xf7   :  { %v899_v31 = vpop.f32.mrf.mxu3  ;;  %2406 = vmatpush.bf16.msrb.mxu0 %v6418_v3  ;;  %v6482_v36 = vor.u32 %v6994_v29, %v6481_v28  ;;  %v6102_v41 = vor.u32 %v6897_v37, %v6099_v38  ;;  %v6401_v62 = vld [vmem:[%s9442_s5 + $0x310] sm:$0xf]  ;;  %v6974_v42 = vld [vmem:[%s9442_s5 + $0x314] sm:$0xf0]  ;;  %v6473_v54 = vld [vmem:[%s9442_s5 + $0x3a0] sm:$0xf]  ;;  %v6086_v25 = vor.u32 %v6893_v18, %v6083_v53 }
  0xf8   :  { %v1072_v30 = vmax.f32 %v1063_v51, 0.0  ;;  %v900_v2 = vadd.f32 %v899_v31, %v881_v43  ;;  %2339 = vmatmul.bf16.gmra.mxu0 %v8026_v59  ;;  %v6402_v46 = vor.u32 %v6974_v42, %v6401_v62  ;;  %v6474_v61 = vor.u32 %v6992_v56, %v6473_v54  ;;  %v6875_v3 = vld [vmem:[%s9442_s5 + $0x4] sm:$0xf]  ;;  %v6921_v21 = vld [vmem:[%s9442_s5 + $0x174] sm:$0xf] }
  0xf9   :  { %2445 = vmatpush.bf16.msra.mxu1 %v6030_v35  ;;  %2425 = vmatpush.bf16.msrb.mxu2 %v6482_v36  ;;  %v6953_v27 = vld [vmem:[%s9442_s5 + $0x274] sm:$0xf]  ;;  %v6323_v28 = vld [vmem:[%s9442_s5 + $0x278] sm:$0xf0]  ;;  %v6988_v35 = vld [vmem:[%s9442_s5 + $0x384] sm:$0xf0] }
  0xfa   :  { %v1076_v7 = vpack.c.bf16 %v1072_v30, %v1072_v30  ;;  %v908_v15 = vmax.f32 %v900_v2, 0.0  ;;  %2463 = vmatpush.bf16.msra.mxu3 %v6102_v41  ;;  %v6972_v2 = vld [vmem:[%s9442_s5 + $0x304] sm:$0xf0]  ;;  %v6891_v36 = vld [vmem:[%s9442_s5 + $0x84] sm:$0xf] }
  0xfb   :  { %v5987_v17 = vld [vmem:[#allocation2 + $0x68] sm:$0xf0]  ;;  %v883_v20 = vpop.f32.mrf.mxu1  ;;  %2407 = vmatpush.bf16.msrb.mxu0 %v6410_v24  ;;  %v6951_v54 = vld [vmem:[%s9442_s5 + $0x264] sm:$0xf] }
  0xfc   :  { %1080 = vst [vmem:[#allocation2 + $0x14] sm:$0xf] %v1076_v7  ;;  %v8060_v39 = vor.u32 %v6868_v9, %v5987_v17  ;;  %v912_v22 = vpack.c.bf16 %v908_v15, %v908_v15  ;;  %v884_v26 = vadd.f32 %v7937_v50, %v883_v20  ;;  %v6394_v7 = vor.u32 %v6972_v2, %v6393_v0  ;;  %v6011_v9 = vld [vmem:[%s9442_s5 + $0x8] sm:$0xf0]  ;;  %v8140_v20 = vld [vmem:[%s9439_s2] ss:$0 sm:$0xff] }
  0xfd   :  { %v1064_v23 = vpop.f32.mrf.mxu2  ;;  %v1048_v34 = vpop.f32.mrf.mxu0  ;;  %v5961_v31 = vld [vmem:[#allocation2 + $0x10] sm:$0xf]  ;;  %2446 = vmatpush.bf16.msra.mxu1 %v6022_v52  ;;  %2426 = vmatpush.bf16.msrb.mxu2 %v6474_v61  ;;  %v6014_v17 = vor.u32 %v6875_v3, %v6011_v9  ;;  %v6075_v62 = vld [vmem:[%s9442_s5 + $0x88] sm:$0xf0]  ;;  %v6937_v61 = vld [vmem:[%s9442_s5 + $0x1f4] sm:$0xf] }
  0xfe   :  { %v1065_v33 = vadd.f32 %v1064_v23, %v1046_v19  ;;  %2358 = vmatmul.bf16.gmra.mxu2 %v8060_v39  ;;  %916 = vst [vmem:[#allocation2 + $0x30] sm:$0xf] %v912_v22  ;;  %v1049_v60 = vadd.f32 %v7971_v8, %v1048_v34  ;;  %2464 = vmatpush.bf16.msra.mxu3 %v6094_v63  ;;  %v6195_v22 = vld [vmem:[%s9442_s5 + $0x178] sm:$0xf0]  ;;  %v6457_v34 = vld [vmem:[%s9442_s5 + $0x380] sm:$0xf] }
  0xff   :  { %v902_v44 = vpop.f32.mrf.mxu3  ;;  %2408 = vmatpush.bf16.msrb.mxu0 %v6402_v46  ;;  %v6198_v24 = vor.u32 %v6921_v21, %v6195_v22  ;;  %v6458_v41 = vor.u32 %v6988_v35, %v6457_v34  ;;  %v6919_v46 = vld [vmem:[%s9442_s5 + $0x164] sm:$0xf]  ;;  %v6187_v52 = vld [vmem:[%s9442_s5 + $0x168] sm:$0xf0]  ;;  %v6969_v2 = vld [vmem:[%s9442_s5 + $0x2f4] sm:$0xf] }
 0x100   :  { %v1073_v43 = vmax.f32 %v1065_v33, 0.0  ;;  %v903_v51 = vadd.f32 %v902_v44, %v884_v26  ;;  %v6326_v33 = vor.u32 %v6953_v27, %v6323_v28  ;;  %v6078_v44 = vor.u32 %v6891_v36, %v6075_v62  ;;  %v6387_v3 = vld [vmem:[%s9442_s5 + $0x2f8] sm:$0xf0]  ;;  %v6967_v18 = vld [vmem:[%s9442_s5 + $0x2e4] sm:$0xf] }
 0x101   :  { %2447 = vmatpush.bf16.msra.mxu1 %v6014_v17  ;;  %v6935_v17 = vld [vmem:[%s9442_s5 + $0x1e4] sm:$0xf]  ;;  %v6379_v22 = vld [vmem:[%s9442_s5 + $0x2e8] sm:$0xf0]  ;;  %v6243_v62 = vld [vmem:[%s9442_s5 + $0x1d8] sm:$0xf0] }
 0x102   :  { %v1077_v58 = vpack.c.bf16 %v1073_v43, %v1073_v43  ;;  %v909_v30 = vmax.f32 %v903_v51, 0.0  ;;  %2465 = vmatpush.bf16.msra.mxu3 %v6086_v25  ;;  %v6915_v27 = vld [vmem:[%s9442_s5 + $0x144] sm:$0xf] }
 0x103   :  { %v885_v1 = vpop.f32.mrf.mxu1  ;;  %2409 = vmatpush.bf16.msrb.mxu0 %v6394_v7  ;;  %v6861_v38 = vld [vmem:[#allocation2 + $0x14] sm:$0xf] }
 0x104   :  { %1081 = vst [vmem:[#allocation2 + $0x34] sm:$0xf] %v1077_v58  ;;  %v913_v14 = vpack.c.bf16 %v909_v30, %v909_v30  ;;  %v886_v6 = vadd.f32 %v7937_v50, %v885_v1  ;;  %v6466_v50 = vor.u32 %v6990_v5, %v6465_v11  ;;  %v6262_v1 = vor.u32 %v6937_v61, %v6259_v32  ;;  %v6949_v5 = vld [vmem:[%s9442_s5 + $0x254] sm:$0xf] }
 0x105   :  { %v1067_v4 = vpop.f32.mrf.mxu2  ;;  %v1050_v13 = vpop.f32.mrf.mxu0  ;;  %v6865_v15 = vld [vmem:[#allocation2 + $0x2c] sm:$0xf0]  ;;  %v6945_v32 = vld [vmem:[%s9442_s5 + $0x234] sm:$0xf] }
 0x106   :  { %v1068_v12 = vadd.f32 %v1067_v4, %v1049_v60  ;;  %917 = vst [vmem:[#allocation2 + $0x50] sm:$0xf] %v913_v14  ;;  %v8135_v19 = vor.u32 %v6865_v15, %v5961_v31  ;;  %2427 = vmatpush.bf16.msrb.mxu2 %v6466_v50  ;;  %v1051_v48 = vadd.f32 %v7971_v8, %v1050_v13  ;;  %v6315_v8 = vld [vmem:[%s9442_s5 + $0x268] sm:$0xf0]  ;;  %v8193_v31 = vld [vmem:[%s9439_s2] ss:$0 sm:$0xff] }
 0x107   :  { %v904_v26 = vpop.f32.mrf.mxu3  ;;  %2478 = vmatpush.bf16.msra.mxu0 %v6198_v24  ;;  %v6190_v60 = vor.u32 %v6919_v46, %v6187_v52  ;;  %v6318_v0 = vor.u32 %v6951_v54, %v6315_v8  ;;  %2466 = vmatpush.bf16.msra.mxu3 %v6078_v44  ;;  %v6390_v14 = vor.u32 %v6969_v2, %v6387_v3  ;;  %v6917_v4 = vld [vmem:[%s9442_s5 + $0x154] sm:$0xf]  ;;  %v6251_v50 = vld [vmem:[%s9442_s5 + $0x1e8] sm:$0xf0]  ;;  %v6371_v52 = vld [vmem:[%s9442_s5 + $0x2d8] sm:$0xf0] }
 0x108   :  { %v1074_v23 = vmax.f32 %v1068_v12, 0.0  ;;  %v905_v29 = vadd.f32 %v904_v26, %v886_v6  ;;  %2372 = vmatmul.bf16.vlgmr.msrb.gmra.mxu1 %v8135_v19  ;;  %v6179_v6 = vld [vmem:[%s9442_s5 + $0x158] sm:$0xf0]  ;;  %v6254_v21 = vor.u32 %v6935_v17, %v6251_v50  ;;  %v6382_v24 = vor.u32 %v6967_v18, %v6379_v22  ;;  %v6235_v2 = vld [vmem:[%s9442_s5 + $0x1c8] sm:$0xf0] }
 0x109   :  { %2516 = vmatpush.bf16.msrb.mxu1 %v6326_v33  ;;  %v6182_v11 = vor.u32 %v6917_v4, %v6179_v6  ;;  %v6307_v12 = vld [vmem:[%s9442_s5 + $0x258] sm:$0xf0]  ;;  %v6947_v33 = vld [vmem:[%s9442_s5 + $0x244] sm:$0xf]  ;;  %v6155_v50 = vld [vmem:[%s9442_s5 + $0x128] sm:$0xf0] }
 0x10a   :  { %v1078_v37 = vpack.c.bf16 %v1074_v23, %v1074_v23  ;;  %v910_v42 = vmax.f32 %v905_v29, 0.0  ;;  %2428 = vmatpush.bf16.msrb.mxu2 %v6458_v41  ;;  %v6310_v15 = vor.u32 %v6949_v5, %v6307_v12  ;;  %v6171_v29 = vld [vmem:[%s9442_s5 + $0x148] sm:$0xf0]  ;;  %v6933_v41 = vld [vmem:[%s9442_s5 + $0x1d4] sm:$0xf] }
 0x10b   :  { %v5963_v43 = vld [vmem:[#allocation2 + $0x30] sm:$0xf0]  ;;  %v1208_v49 = vpop.f32.mrf.mxu1  ;;  %2479 = vmatpush.bf16.msra.mxu0 %v6190_v60  ;;  %v6963_v3 = vld [vmem:[%s9442_s5 + $0x2c4] sm:$0xf] }
 0x10c   :  { %1082 = vst [vmem:[#allocation2 + $0x54] sm:$0xf] %v1078_v37  ;;  %v8171_v51 = vor.u32 %v6861_v38, %v5963_v43  ;;  %v914_v56 = vpack.c.bf16 %v910_v42, %v910_v42  ;;  %v1209_v58 = vadd.f32 %v8140_v20, %v1208_v49  ;;  %v6174_v37 = vor.u32 %v6915_v27, %v6171_v29  ;;  %v6299_v38 = vld [vmem:[%s9442_s5 + $0x248] sm:$0xf0]  ;;  %v6965_v49 = vld [vmem:[%s9442_s5 + $0x2d4] sm:$0xf] }
 0x10d   :  { %v1069_v57 = vpop.f32.mrf.mxu2  ;;  %v1373_v63 = vpop.f32.mrf.mxu0  ;;  %2517 = vmatpush.bf16.msrb.mxu1 %v6318_v0  ;;  %v5993_v26 = vld [vmem:[#allocation2 + $0x50] sm:$0xf]  ;;  %v6302_v46 = vor.u32 %v6947_v33, %v6299_v38  ;;  %v6911_v12 = vld [vmem:[%s9442_s5 + $0x124] sm:$0xf]  ;;  %v6961_v33 = vld [vmem:[%s9442_s5 + $0x2b4] sm:$0xf] }
 0x10e   :  { %v1070_v30 = vadd.f32 %v1069_v57, %v1051_v48  ;;  %2391 = vmatmul.bf16.vlgmr.msrb.gmra.mxu3 %v8171_v51  ;;  %918 = vst [vmem:[#allocation2 + $0x70] sm:$0xf] %v914_v56  ;;  %2497 = vmatpush.bf16.msra.mxu2 %v6262_v1  ;;  %v1374_v25 = vadd.f32 %v8193_v31, %v1373_v63  ;;  %v6913_v57 = vld [vmem:[%s9442_s5 + $0x134] sm:$0xf]  ;;  %v6931_v1 = vld [vmem:[%s9442_s5 + $0x1c4] sm:$0xf] }
 0x10f   :  { %v1227_v9 = vpop.f32.mrf.mxu3  ;;  %2535 = vmatpush.bf16.msrb.mxu3 %v6390_v14  ;;  %2480 = vmatpush.bf16.msra.mxu0 %v6182_v11  ;;  %v6246_v48 = vor.u32 %v6933_v41, %v6243_v62  ;;  %v6374_v56 = vor.u32 %v6965_v49, %v6371_v52  ;;  %v6238_v6 = vor.u32 %v6931_v1, %v6235_v2  ;;  %v6943_v18 = vld [vmem:[%s9442_s5 + $0x224] sm:$0xf]  ;;  %v6147_v38 = vld [vmem:[%s9442_s5 + $0x118] sm:$0xf0]  ;;  %v6219_v52 = vld [vmem:[%s9442_s5 + $0x1a8] sm:$0xf0] }
 0x110   :  { %v1075_v7 = vmax.f32 %v1070_v30, 0.0  ;;  %v1228_v13 = vadd.f32 %v1227_v9, %v1209_v58  ;;  %v6163_v58 = vld [vmem:[%s9442_s5 + $0x138] sm:$0xf0]  ;;  %v6158_v22 = vor.u32 %v6911_v12, %v6155_v50  ;;  %v6927_v49 = vld [vmem:[%s9442_s5 + $0x1a4] sm:$0xf] }
 0x111   :  { %2518 = vmatpush.bf16.msrb.mxu1 %v6310_v15  ;;  %v6166_v61 = vor.u32 %v6913_v57, %v6163_v58  ;;  %v6291_v30 = vld [vmem:[%s9442_s5 + $0x238] sm:$0xf0]  ;;  %v6939_v1 = vld [vmem:[%s9442_s5 + $0x204] sm:$0xf]  ;;  %v6957_v50 = vld [vmem:[%s9442_s5 + $0x294] sm:$0xf] }
 0x112   :  { %v1079_v53 = vpack.c.bf16 %v1075_v7, %v1075_v7  ;;  %v1237_v23 = vmax.f32 %v1228_v13, 0.0  ;;  %2498 = vmatpush.bf16.msra.mxu2 %v6254_v21  ;;  %v6294_v0 = vor.u32 %v6945_v32, %v6291_v30  ;;  %v6363_v7 = vld [vmem:[%s9442_s5 + $0x2c8] sm:$0xf0] }
 0x113   :  { %v1210_v28 = vpop.f32.mrf.mxu1  ;;  %2536 = vmatpush.bf16.msrb.mxu3 %v6382_v24  ;;  %2481 = vmatpush.bf16.msra.mxu0 %v6174_v37  ;;  %v6869_v4 = vld [vmem:[#allocation2 + $0x54] sm:$0xf]  ;;  %v6366_v5 = vor.u32 %v6963_v3, %v6363_v7  ;;  %v6227_v24 = vld [vmem:[%s9442_s5 + $0x1b8] sm:$0xf0]  ;;  %v6139_v32 = vld [vmem:[%s9442_s5 + $0x108] sm:$0xf0] }
 0x114   :  { %1083 = vst [vmem:[#allocation2 + $0x74] sm:$0xf] %v1079_v53  ;;  %v1241_v34 = vpack.c.bf16 %v1237_v23, %v1237_v23  ;;  %v1211_v36 = vadd.f32 %v8140_v20, %v1210_v28  ;;  %v6283_v23 = vld [vmem:[%s9442_s5 + $0x228] sm:$0xf0]  ;;  %v6909_v37 = vld [vmem:[%s9442_s5 + $0x114] sm:$0xf] }
 0x115   :  { %v1392_v35 = vpop.f32.mrf.mxu2  ;;  %v1375_v43 = vpop.f32.mrf.mxu0  ;;  %v6873_v44 = vld [vmem:[#allocation2 + $0x6c] sm:$0xf0]  ;;  %2519 = vmatpush.bf16.msrb.mxu1 %v6302_v46  ;;  %v6286_v28 = vor.u32 %v6943_v18, %v6283_v23 }
 0x116   :  { %v1393_v42 = vadd.f32 %v1392_v35, %v1374_v25  ;;  %1245 = vst [vmem:[#allocation2 + $0x18] sm:$0xf] %v1241_v34  ;;  %v8251_v54 = vor.u32 %v6873_v44, %v5993_v26  ;;  %2499 = vmatpush.bf16.msra.mxu2 %v6246_v48  ;;  %v1376_v13 = vadd.f32 %v8193_v31, %v1375_v43  ;;  %v6929_v26 = vld [vmem:[%s9442_s5 + $0x1b4] sm:$0xf]  ;;  %v6355_v34 = vld [vmem:[%s9442_s5 + $0x2b8] sm:$0xf0] }
 0x117   :  { %v1229_v8 = vpop.f32.mrf.mxu3  ;;  %2537 = vmatpush.bf16.msrb.mxu3 %v6374_v56  ;;  %2482 = vmatpush.bf16.msra.mxu0 %v6166_v61  ;;  %v6230_v29 = vor.u32 %v6929_v26, %v6227_v24  ;;  %v6941_v43 = vld [vmem:[%s9442_s5 + $0x214] sm:$0xf]  ;;  %v6275_v44 = vld [vmem:[%s9442_s5 + $0x218] sm:$0xf0]  ;;  %v6959_v56 = vld [vmem:[%s9442_s5 + $0x2a4] sm:$0xf] }
 0x118   :  { %v1402_v60 = vmax.f32 %v1393_v42, 0.0  ;;  %v1230_v63 = vadd.f32 %v1229_v8, %v1211_v36  ;;  %2377 = vmatmul.bf16.gmra.mxu1 %v8251_v54  ;;  %v6358_v36 = vor.u32 %v6961_v33, %v6355_v34  ;;  %v6150_v42 = vor.u32 %v6909_v37, %v6147_v38  ;;  %v6347_v8 = vld [vmem:[%s9442_s5 + $0x2a8] sm:$0xf0]  ;;  %v6907_v61 = vld [vmem:[%s9442_s5 + $0x104] sm:$0xf] }
 0x119   :  { %2520 = vmatpush.bf16.msrb.mxu1 %v6294_v0  ;;  %v6278_v48 = vor.u32 %v6941_v43, %v6275_v44  ;;  %v6142_v0 = vor.u32 %v6907_v61, %v6139_v32  ;;  %v6923_v24 = vld [vmem:[%s9442_s5 + $0x184] sm:$0xf]  ;;  %v6443_v44 = vld [vmem:[%s9442_s5 + $0x368] sm:$0xf0] }
 0x11a   :  { %v1406_v14 = vpack.c.bf16 %v1402_v60, %v1402_v60  ;;  %v1238_v9 = vmax.f32 %v1230_v63, 0.0  ;;  %2500 = vmatpush.bf16.msra.mxu2 %v6238_v6  ;;  %v6222_v60 = vor.u32 %v6927_v49, %v6219_v52  ;;  %v6350_v63 = vor.u32 %v6959_v56, %v6347_v8  ;;  %v6955_v34 = vld [vmem:[%s9442_s5 + $0x284] sm:$0xf]  ;;  %v6515_v56 = vld [vmem:[%s9442_s5 + $0x3f8] sm:$0xf0] }
 0x11b   :  { %v5995_v11 = vld [vmem:[#allocation2 + $0x70] sm:$0xf0]  ;;  %v1213_v15 = vpop.f32.mrf.mxu1  ;;  %2538 = vmatpush.bf16.msrb.mxu3 %v6366_v5  ;;  %2483 = vmatpush.bf16.msra.mxu0 %v6158_v22  ;;  %v6211_v5 = vld [vmem:[%s9442_s5 + $0x198] sm:$0xf0]  ;;  %v6999_v32 = vld [vmem:[%s9442_s5 + $0x3e4] sm:$0xf] }
 0x11c   :  { %1410 = vst [vmem:[#allocation2 + $0x1c] sm:$0xf] %v1406_v14  ;;  %v8282_v17 = vor.u32 %v6869_v4, %v5995_v11  ;;  %v1242_v53 = vpack.c.bf16 %v1238_v9, %v1238_v9  ;;  %v1214_v21 = vadd.f32 %v8140_v20, %v1213_v15  ;;  %v6267_v14 = vld [vmem:[%s9442_s5 + $0x208] sm:$0xf0]  ;;  %v6925_v11 = vld [vmem:[%s9442_s5 + $0x194] sm:$0xf] }
 0x11d   :  { %v1394_v25 = vpop.f32.mrf.mxu2  ;;  %v1378_v35 = vpop.f32.mrf.mxu0  ;;  %2521 = vmatpush.bf16.msrb.mxu1 %v6286_v28  ;;  %v5969_v3 = vld [vmem:[#allocation2 + $0x18] sm:$0xf]  ;;  %v6270_v9 = vor.u32 %v6939_v1, %v6267_v14  ;;  %v6214_v15 = vor.u32 %v6925_v11, %v6211_v5  ;;  %v6979_v1 = vld [vmem:[%s9442_s5 + $0x344] sm:$0xf]  ;;  %v6997_v14 = vld [vmem:[%s9442_s5 + $0x3d4] sm:$0xf] }
 0x11e   :  { %v1395_v27 = vadd.f32 %v1394_v25, %v1376_v13  ;;  %2396 = vmatmul.bf16.gmra.mxu3 %v8282_v17  ;;  %1246 = vst [vmem:[#allocation2 + $0x38] sm:$0xf] %v1242_v53  ;;  %2501 = vmatpush.bf16.msra.mxu2 %v6230_v29  ;;  %v1379_v58 = vadd.f32 %v8193_v31, %v1378_v35  ;;  %v6985_v25 = vld [vmem:[%s9442_s5 + $0x374] sm:$0xf]  ;;  %v6331_v35 = vld [vmem:[%s9442_s5 + $0x288] sm:$0xf0] }
 0x11f   :  { %v1232_v62 = vpop.f32.mrf.mxu3  ;;  %2539 = vmatpush.bf16.msrb.mxu3 %v6358_v36  ;;  %2484 = vmatpush.bf16.msra.mxu0 %v6150_v42  ;;  %v6977_v11 = vld [vmem:[%s9442_s5 + $0x334] sm:$0xf]  ;;  %v6419_v5 = vld [vmem:[%s9442_s5 + $0x338] sm:$0xf0] }
 0x120   :  { %v1403_v41 = vmax.f32 %v1395_v27, 0.0  ;;  %v1233_v46 = vadd.f32 %v1232_v62, %v1214_v21  ;;  %v6451_v21 = vld [vmem:[%s9442_s5 + $0x378] sm:$0xf0]  ;;  %v6203_v27 = vld [vmem:[%s9442_s5 + $0x188] sm:$0xf0]  ;;  %v6334_v62 = vor.u32 %v6955_v34, %v6331_v35 }
 0x121   :  { %2522 = vmatpush.bf16.msrb.mxu1 %v6278_v48  ;;  %v6454_v26 = vor.u32 %v6985_v25, %v6451_v21  ;;  %v6206_v33 = vor.u32 %v6923_v24, %v6203_v27  ;;  %v6975_v25 = vld [vmem:[%s9442_s5 + $0x324] sm:$0xf]  ;;  %v6411_v21 = vld [vmem:[%s9442_s5 + $0x328] sm:$0xf0]  ;;  %v6549_v24 = vld [vmem:[%s9444_s7 + $0x30] sm:$0xf] }
 0x122   :  { %v1407_v57 = vpack.c.bf16 %v1403_v41, %v1403_v41  ;;  %v1239_v30 = vmax.f32 %v1233_v46, 0.0  ;;  %2502 = vmatpush.bf16.msra.mxu2 %v6222_v60  ;;  %v7001_v46 = vld [vmem:[%s9442_s5 + $0x3f4] sm:$0xf]  ;;  %v6435_v60 = vld [vmem:[%s9442_s5 + $0x358] sm:$0xf0] }
 0x123   :  { %v1215_v2 = vpop.f32.mrf.mxu1  ;;  %2540 = vmatpush.bf16.msrb.mxu3 %v6350_v63  ;;  %2485 = vmatpush.bf16.msra.mxu0 %v6142_v0  ;;  %v6862_v37 = vld [vmem:[#allocation2 + $0x1c] sm:$0xf] }
 0x124   :  { %1411 = vst [vmem:[#allocation2 + $0x3c] sm:$0xf] %v1407_v57  ;;  %v1243_v4 = vpack.c.bf16 %v1239_v30, %v1239_v30  ;;  %v1216_v7 = vadd.f32 %v8140_v20, %v1215_v2  ;;  %v6339_v20 = vld [vmem:[%s9442_s5 + $0x298] sm:$0xf0]  ;;  %v6427_v2 = vld [vmem:[%s9442_s5 + $0x348] sm:$0xf0] }
 0x125   :  { %v1397_v6 = vpop.f32.mrf.mxu2  ;;  %v6866_v13 = vld [vmem:[#allocation2 + $0x34] sm:$0xf0]  ;;  %v6342_v53 = vor.u32 %v6957_v50, %v6339_v20  ;;  %2523 = vmatpush.bf16.msrb.mxu1 %v6270_v9  ;;  %v1380_v28 = vpop.f32.mrf.mxu0  ;;  %v6403_v34 = vld [vmem:[%s9442_s5 + $0x318] sm:$0xf0] }
 0x126   :  { %v1398_v12 = vadd.f32 %v1397_v6, %v1379_v58  ;;  %1247 = vst [vmem:[#allocation2 + $0x58] sm:$0xf] %v1243_v4  ;;  %v8357_v18 = vor.u32 %v6866_v13, %v5969_v3  ;;  %2503 = vmatpush.bf16.msra.mxu2 %v6214_v15  ;;  %v1381_v42 = vadd.f32 %v8193_v31, %v1380_v28  ;;  %v6981_v58 = vld [vmem:[%s9442_s5 + $0x354] sm:$0xf]  ;;  %v6499_v4 = vld [vmem:[%s9442_s5 + $0x3d8] sm:$0xf0] }
 0x127   :  { %v1234_v23 = vpop.f32.mrf.mxu3  ;;  %2541 = vmatpush.bf16.msrb.mxu3 %v6342_v53  ;;  %v6518_v31 = vor.u32 %v7001_v46, %v6515_v56  ;;  %v6438_v61 = vor.u32 %v6981_v58, %v6435_v60  ;;  %v6430_v3 = vor.u32 %v6979_v1, %v6427_v2  ;;  %v6502_v6 = vor.u32 %v6997_v14, %v6499_v4  ;;  %v6995_v13 = vld [vmem:[%s9442_s5 + $0x3c4] sm:$0xf]  ;;  %v6491_v15 = vld [vmem:[%s9442_s5 + $0x3c8] sm:$0xf0]  ;;  %v7010_v28 = vld [vmem:[%s9444_s7 + $0x34] sm:$0xf0] }
 0x128   :  { %v1404_v22 = vmax.f32 %v1398_v12, 0.0  ;;  %v1235_v29 = vadd.f32 %v1234_v23, %v1216_v7  ;;  %2410 = vmatmul.bf16.vlgmr.msrb.gmra.mxu0 %v8357_v18  ;;  %2448 = vmatmul.bf16.vlgmr.msra.gmra.mxu1 %v7793_v55  ;;  %v6983_v55 = vld [vmem:[%s9442_s5 + $0x364] sm:$0xf]  ;;  %v6422_v12 = vor.u32 %v6977_v11, %v6419_v5  ;;  %v6494_v50 = vor.u32 %v6995_v13, %v6491_v15  ;;  %v6989_v46 = vld [vmem:[%s9442_s5 + $0x394] sm:$0xf] }
 0x129   :  { %2554 = vmatpush.bf16.msrb.mxu0 %v6454_v26  ;;  %v6446_v52 = vor.u32 %v6983_v55, %v6443_v44  ;;  %v6414_v23 = vor.u32 %v6975_v25, %v6411_v21  ;;  %v6483_v26 = vld [vmem:[%s9442_s5 + $0x3b8] sm:$0xf0]  ;;  %v6971_v55 = vld [vmem:[%s9442_s5 + $0x304] sm:$0xf]  ;;  %v7006_v56 = vld [vmem:[%s9444_s7 + $0x14] sm:$0xf0] }
 0x12a   :  { %v1408_v36 = vpack.c.bf16 %v1404_v22, %v1404_v22  ;;  %v1240_v38 = vmax.f32 %v1235_v29, 0.0  ;;  %2504 = vmatpush.bf16.msra.mxu2 %v6206_v33  ;;  %v8458_v29 = vor.u32 %v7010_v28, %v6549_v24  ;;  %v6973_v33 = vld [vmem:[%s9442_s5 + $0x314] sm:$0xf]  ;;  %v6459_v58 = vld [vmem:[%s9442_s5 + $0x388] sm:$0xf0] }
 0x12b   :  { %v5971_v41 = vld [vmem:[#allocation2 + $0x38] sm:$0xf0]  ;;  %2542 = vmatpush.bf16.msrb.mxu3 %v6334_v62  ;;  %v6406_v35 = vor.u32 %v6973_v33, %v6403_v34  ;;  %v6525_v60 = vld [vmem:[%s9444_s7] sm:$0xf] }
 0x12c   :  { %1412 = vst [vmem:[#allocation2 + $0x5c] sm:$0xf] %v1408_v36  ;;  %v8383_v43 = vor.u32 %v6862_v37, %v5971_v41  ;;  %v1244_v48 = vpack.c.bf16 %v1240_v38, %v1240_v38  ;;  %v6991_v36 = vld [vmem:[%s9442_s5 + $0x3a4] sm:$0xf]  ;;  %v6541_v37 = vld [vmem:[%s9444_s7 + $0x20] sm:$0xf] }
 0x12d   :  { %v1399_v49 = vpop.f32.mrf.mxu2  ;;  %2555 = vmatpush.bf16.msrb.mxu0 %v6446_v52  ;;  %v6001_v0 = vld [vmem:[#allocation2 + $0x58] sm:$0xf]  ;;  %v7008_v41 = vld [vmem:[%s9444_s7 + $0x24] sm:$0xf0]  ;;  %v8538_v4 = vld [vmem:[%s9443_s6] sm:$0x3] }
 0x12e   :  { %v1400_v57 = vadd.f32 %v1399_v49, %v1381_v42  ;;  %2429 = vmatmul.bf16.vlgmr.msrb.gmra.mxu2 %v8383_v43  ;;  %2467 = vmatmul.bf16.vlgmr.msra.gmra.mxu3 %v7832_v16  ;;  %1248 = vst [vmem:[#allocation2 + $0x78] sm:$0xf] %v1244_v48  ;;  %v6507_v16 = vld [vmem:[%s9442_s5 + $0x3e8] sm:$0xf0]  ;;  %v8479_v62 = vor.u32 %v7008_v41, %v6541_v37  ;;  %v6467_v48 = vld [vmem:[%s9442_s5 + $0x398] sm:$0xf0] }
 0x12f   :  { %2573 = vmatpush.bf16.msrb.mxu2 %v6518_v31  ;;  %v6510_v30 = vor.u32 %v6999_v32, %v6507_v16  ;;  %2700 = vmatpush.bf16.msra.mxu3 %v8458_v29  ;;  %v6395_v42 = vld [vmem:[%s9442_s5 + $0x308] sm:$0xf0]  ;;  %v6533_v49 = vld [vmem:[%s9444_s7 + $0x10] sm:$0xf]  ;;  %v6470_v52 = vor.u32 %v6989_v46, %v6467_v48  ;;  %v6987_v31 = vld [vmem:[%s9442_s5 + $0x384] sm:$0xf] }
 0x130   :  { %v1405_v8 = vmax.f32 %v1400_v57, 0.0  ;;  %v6398_v44 = vor.u32 %v6971_v55, %v6395_v42  ;;  %v8500_v57 = vor.u32 %v7006_v56, %v6533_v49 }
 0x131   :  { %2556 = vmatpush.bf16.msrb.mxu0 %v6438_v61  ;;  %v7004_v61 = vld [vmem:[%s9444_s7 + $0x4] sm:$0xf0] }
 0x132   :  { %v1409_v63 = vpack.c.bf16 %v1405_v8, %v1405_v8  ;;  %v6462_v8 = vor.u32 %v6987_v31, %v6459_v58  ;;  %v8517_v32 = vor.u32 %v7004_v61, %v6525_v60 }
 0x133   :  { %2574 = vmatpush.bf16.msrb.mxu2 %v6510_v30  ;;  %v6870_v20 = vld [vmem:[#allocation2 + $0x5c] sm:$0xf]  ;;  %2701 = vmatpush.bf16.msra.mxu3 %v8479_v62 }
 0x134   :  { %1413 = vst [vmem:[#allocation2 + $0x7c] sm:$0xf] %v1409_v63 }
 0x135   :  { %v6874_v7 = vld [vmem:[#allocation2 + $0x74] sm:$0xf0]  ;;  %2557 = vmatpush.bf16.msrb.mxu0 %v6430_v3 }
 0x136   :  { %v8420_v9 = vor.u32 %v6874_v7, %v6001_v0 }
 0x137   :  { %2575 = vmatpush.bf16.msrb.mxu2 %v6502_v6  ;;  %2702 = vmatpush.bf16.msra.mxu3 %v8500_v57 }
 0x138   :  { %2415 = vmatmul.bf16.gmra.mxu0 %v8420_v9  ;;  %2453 = vmatmul.bf16.gmra.mxu1 %v7861_v47  ;;  %v6993_v47 = vld [vmem:[%s9442_s5 + $0x3b4] sm:$0xf] }
 0x139   :  { %2558 = vmatpush.bf16.msrb.mxu0 %v6422_v12  ;;  %v6486_v27 = vor.u32 %v6993_v47, %v6483_v26 }
 0x13b   :  { %v6003_v53 = vld [vmem:[#allocation2 + $0x78] sm:$0xf0]  ;;  %2576 = vmatpush.bf16.msrb.mxu2 %v6494_v50  ;;  %2703 = vmatpush.bf16.msra.mxu3 %v8517_v32 }
 0x13c   :  { %v8442_v22 = vor.u32 %v6870_v20, %v6003_v53 }
 0x13d   :  { %2559 = vmatpush.bf16.msrb.mxu0 %v6414_v23 }
 0x13e   :  { %2434 = vmatmul.bf16.gmra.mxu2 %v8442_v22  ;;  %2472 = vmatmul.bf16.gmra.mxu3 %v7890_v10  ;;  %v6475_v10 = vld [vmem:[%s9442_s5 + $0x3a8] sm:$0xf0] }
 0x13f   :  { %2577 = vmatpush.bf16.msrb.mxu2 %v6486_v27  ;;  %v6478_v38 = vor.u32 %v6991_v36, %v6475_v10 }
 0x141   :  { %2560 = vmatpush.bf16.msrb.mxu0 %v6406_v35 }
 0x143   :  { %2578 = vmatpush.bf16.msrb.mxu2 %v6478_v38 }
 0x145   :  { %2561 = vmatpush.bf16.msrb.mxu0 %v6398_v44 }
 0x147   :  { %2579 = vmatpush.bf16.msrb.mxu2 %v6470_v52 }
 0x148   :  { %2486 = vmatmul.bf16.vlgmr.msra.gmra.mxu0 %v7919_v40  ;;  %2524 = vmatmul.bf16.vlgmr.msrb.gmra.mxu1 %v8135_v19  ;;  %v7392_v19 = vmov 0  }
 0x14b   :  { %2580 = vmatpush.bf16.msrb.mxu2 %v6462_v8 }
 0x14e   :  { %2505 = vmatmul.bf16.vlgmr.msra.gmra.mxu2 %v7949_v45  ;;  %2543 = vmatmul.bf16.vlgmr.msrb.gmra.mxu3 %v8171_v51  ;;  %v2297_v45 = vpop.f32.mrf.mxu1 }
 0x14f   :  { %2761 = vmatpush.bf16.msra.mxu2 %v8458_v29 }
 0x153   :  { %2762 = vmatpush.bf16.msra.mxu2 %v8479_v62  ;;  %v2316_v40 = vpop.f32.mrf.mxu3 }
 0x156   :  { %v2299_v16 = vpop.f32.mrf.mxu1 }
 0x157   :  { %2763 = vmatpush.bf16.msra.mxu2 %v8500_v57 }
 0x158   :  { %2491 = vmatmul.bf16.gmra.mxu0 %v8026_v59  ;;  %2529 = vmatmul.bf16.gmra.mxu1 %v8251_v54 }
 0x15b   :  { %2764 = vmatpush.bf16.msra.mxu2 %v8517_v32  ;;  %v2318_v51 = vpop.f32.mrf.mxu3 }
 0x15e   :  { %2510 = vmatmul.bf16.gmra.mxu2 %v8060_v39  ;;  %2548 = vmatmul.bf16.gmra.mxu3 %v8282_v17  ;;  %v2302_v54 = vpop.f32.mrf.mxu1 }
 0x163   :  { %v2321_v59 = vpop.f32.mrf.mxu3 }
 0x165   :  { %v2335_v39 = vpop.f32.mrf.mxu0 }
 0x166   :  { %v2304_v17 = vpop.f32.mrf.mxu1 }
 0x168   :  { %2562 = vmatmul.bf16.vlgmr.msrb.gmra.mxu0 %v8357_v18 }
 0x16b   :  { %v2323_v30 = vpop.f32.mrf.mxu3 }
 0x16d   :  { %v2337_v63 = vpop.f32.mrf.mxu0 }
 0x16e   :  { %2581 = vmatmul.bf16.vlgmr.msrb.gmra.mxu2 %v8383_v43  ;;  %2704 = vmatmul.bf16.vlgmr.msra.gmra.mxu3 %v7392_v19 }
 0x171   :  { %v2354_v18 = vpop.f32.mrf.mxu2 }
 0x175   :  { %v2340_v2 = vpop.f32.mrf.mxu0 }
 0x178   :  { %2567 = vmatmul.bf16.gmra.mxu0 %v8420_v9  ;;  %v1564_v9 = vperm.slane %v8538_v4, 0 }
 0x179   :  { %v2356_v43 = vpop.f32.mrf.mxu2 }
 0x17a   :  { %v2298_v5 = vadd.f32 %v2297_v45, %v1564_v9  ;;  %v2300_v21 = vadd.f32 %v2299_v16, %v1564_v9  ;;  %v2303_v10 = vadd.f32 %v2302_v54, %v1564_v9  ;;  %v2305_v31 = vadd.f32 %v2304_v17, %v1564_v9 }
 0x17c   :  { %v2317_v12 = vadd.f32 %v2316_v40, %v2298_v5  ;;  %v2319_v23 = vadd.f32 %v2318_v51, %v2300_v21  ;;  %v2322_v38 = vadd.f32 %v2321_v59, %v2303_v10  ;;  %v2324_v60 = vadd.f32 %v2323_v30, %v2305_v31  ;;  %v6543_v21 = vld [vmem:[%s9444_s7 + $0x28] sm:$0xf0] }
 0x17d   :  { %v2342_v6 = vpop.f32.mrf.mxu0  ;;  %v6527_v10 = vld [vmem:[%s9444_s7 + $0x8] sm:$0xf0] }
 0x17e   :  { %2586 = vmatmul.bf16.gmra.mxu2 %v8442_v22  ;;  %v2336_v50 = vadd.f32 %v2335_v39, %v2317_v12  ;;  %v2338_v24 = vadd.f32 %v2337_v63, %v2319_v23  ;;  %v2341_v42 = vadd.f32 %v2340_v2, %v2322_v38  ;;  %v2343_v40 = vadd.f32 %v2342_v6, %v2324_v60 }
 0x180   :  { %v2355_v25 = vadd.f32 %v2354_v18, %v2336_v50  ;;  %v2357_v35 = vadd.f32 %v2356_v43, %v2338_v24  ;;  %v7009_v50 = vld [vmem:[%s9444_s7 + $0x34] sm:$0xf] }
 0x181   :  { %v2359_v7 = vpop.f32.mrf.mxu2 }
 0x182   :  { %v2360_v49 = vadd.f32 %v2359_v7, %v2341_v42  ;;  %v1565_v42 = vperm.slane %v8538_v4, 1 }
 0x185   :  { %v2373_v1 = vpop.f32.mrf.mxu1 }
 0x186   :  { %v2374_v22 = vadd.f32 %v2373_v1, %v2355_v25  ;;  %v7007_v25 = vld [vmem:[%s9444_s7 + $0x24] sm:$0xf] }
 0x187   :  { %v8582_v23 = vor.u32 %v7007_v25, %v6543_v21 }
 0x189   :  { %v2361_v20 = vpop.f32.mrf.mxu2 }
 0x18a   :  { %v2362_v59 = vadd.f32 %v2361_v20, %v2343_v40  ;;  %v6551_v20 = vld [vmem:[%s9444_s7 + $0x38] sm:$0xf0] }
 0x18d   :  { %v2375_v14 = vpop.f32.mrf.mxu1 }
 0x18e   :  { %v2376_v37 = vadd.f32 %v2375_v14, %v2357_v35 }
 0x191   :  { %v2392_v0 = vpop.f32.mrf.mxu3 }
 0x192   :  { %v2393_v47 = vadd.f32 %v2392_v0, %v2374_v22 }
 0x195   :  { %v2378_v13 = vpop.f32.mrf.mxu1 }
 0x196   :  { %v2379_v58 = vadd.f32 %v2378_v13, %v2360_v49 }
 0x199   :  { %v2394_v3 = vpop.f32.mrf.mxu3 }
 0x19a   :  { %v2395_v41 = vadd.f32 %v2394_v3, %v2376_v37 }
 0x19d   :  { %v2380_v27 = vpop.f32.mrf.mxu1 }
 0x19e   :  { %v2381_v39 = vadd.f32 %v2380_v27, %v2362_v59  ;;  %v7005_v27 = vld [vmem:[%s9444_s7 + $0x14] sm:$0xf] }
 0x1a1   :  { %v2397_v11 = vpop.f32.mrf.mxu3 }
 0x1a2   :  { %v2398_v8 = vadd.f32 %v2397_v11, %v2379_v58 }
 0x1a5   :  { %v2411_v15 = vpop.f32.mrf.mxu0  ;;  %v8545_v52 = vpop.f32.mrf.mxu1 }
 0x1a6   :  { %v2412_v28 = vadd.f32 %v2411_v15, %v2393_v47  ;;  %v2450_v4 = vadd.f32 %v8545_v52, %v1565_v42 }
 0x1a9   :  { %v2399_v53 = vpop.f32.mrf.mxu3 }
 0x1aa   :  { %v2400_v18 = vadd.f32 %v2399_v53, %v2381_v39  ;;  %v8571_v53 = vor.u32 %v7009_v50, %v6551_v20 }
 0x1ac   :  { %2713 = vmatpush.bf16.msra.mxu0 %v8571_v53  ;;  %2774 = vmatpush.bf16.msrb.mxu3 %v8571_v53 }
 0x1ad   :  { %v2413_v26 = vpop.f32.mrf.mxu0  ;;  %v8549_v63 = vpop.f32.mrf.mxu1  ;;  %2845 = vmatpush.bf16.msrb.mxu2 %v8571_v53 }
 0x1ae   :  { %v2414_v44 = vadd.f32 %v2413_v26, %v2395_v41 }
 0x1b0   :  { %2714 = vmatpush.bf16.msra.mxu0 %v8582_v23  ;;  %2775 = vmatpush.bf16.msrb.mxu3 %v8582_v23 }
 0x1b1   :  { %v2430_v33 = vpop.f32.mrf.mxu2  ;;  %v8541_v34 = vpop.f32.mrf.mxu3  ;;  %2846 = vmatpush.bf16.msrb.mxu2 %v8582_v23 }
 0x1b2   :  { %v2431_v36 = vadd.f32 %v2430_v33, %v2412_v28  ;;  %v6535_v28 = vld [vmem:[%s9444_s7 + $0x18] sm:$0xf0] }
 0x1b3   :  { %v8597_v33 = vor.u32 %v7005_v27, %v6535_v28 }
 0x1b4   :  { %2592 = vst [vmem:[#allocation3 + $0x28] sm:$0xff] %v2431_v36  ;;  %v7003_v36 = vld [vmem:[%s9444_s7 + $0x4] sm:$0xf] }
 0x1b5   :  { %v2416_v55 = vpop.f32.mrf.mxu0  ;;  %v2454_v43 = vpop.f32.mrf.mxu1  ;;  %2715 = vmatpush.bf16.msra.mxu0 %v8597_v33  ;;  %2776 = vmatpush.bf16.msrb.mxu3 %v8597_v33  ;;  %v8608_v37 = vor.u32 %v7003_v36, %v6527_v10 }
 0x1b6   :  { %v2417_v45 = vadd.f32 %v2416_v55, %v2398_v8  ;;  %2847 = vmatpush.bf16.msrb.mxu2 %v8597_v33  ;;  %v2455_v31 = vadd.f32 %v2454_v43, %v1565_v42  ;;  %v2452_v8 = vadd.f32 %v8549_v63, %v1565_v42 }
 0x1b9   :  { %v2432_v46 = vpop.f32.mrf.mxu2  ;;  %v8543_v48 = vpop.f32.mrf.mxu3  ;;  %2716 = vmatpush.bf16.msra.mxu0 %v8608_v37  ;;  %2777 = vmatpush.bf16.msrb.mxu3 %v8608_v37 }
 0x1ba   :  { %v2433_v56 = vadd.f32 %v2432_v46, %v2414_v44  ;;  %2848 = vmatpush.bf16.msrb.mxu2 %v8608_v37 }
 0x1bc   :  { %2593 = vst [vmem:[#allocation3] sm:$0xff] %v2433_v56  ;;  %2717 = vmatmul.bf16.vlgmr.msra.gmra.mxu0 %v7392_v19 }
 0x1bd   :  { %v2418_v61 = vpop.f32.mrf.mxu0  ;;  %v2456_v9 = vpop.f32.mrf.mxu1  ;;  %2832 = vmatpush.bf16.msrb.mxu0 %v8458_v29  ;;  %2916 = vmatpush.bf16.msra.mxu3 %v8571_v53 }
 0x1be   :  { %v2419_v17 = vadd.f32 %v2418_v61, %v2400_v18  ;;  %v2457_v46 = vadd.f32 %v2456_v9, %v1565_v42 }
 0x1c1   :  { %v2435_v51 = vpop.f32.mrf.mxu2  ;;  %v8547_v16 = vpop.f32.mrf.mxu3  ;;  %2833 = vmatpush.bf16.msrb.mxu0 %v8479_v62  ;;  %2917 = vmatpush.bf16.msra.mxu3 %v8582_v23 }
 0x1c2   :  { %v2436_v54 = vadd.f32 %v2435_v51, %v2417_v45  ;;  %v2474_v61 = vadd.f32 %v8547_v16, %v2455_v31  ;;  %v2471_v45 = vadd.f32 %v8543_v48, %v2452_v8 }
 0x1c4   :  { %2594 = vst [vmem:[#allocation3 + $0x30] sm:$0xff] %v2436_v54  ;;  %v2469_v54 = vadd.f32 %v8541_v34, %v2450_v4 }
 0x1c5   :  { %v8551_v0 = vpop.f32.mrf.mxu0  ;;  %v8579_v22 = vpop.f32.mrf.mxu1  ;;  %2834 = vmatpush.bf16.msrb.mxu0 %v8500_v57  ;;  %2918 = vmatpush.bf16.msra.mxu3 %v8597_v33 }
 0x1c9   :  { %v2437_v1 = vpop.f32.mrf.mxu2  ;;  %v2475_v2 = vpop.f32.mrf.mxu3  ;;  %2835 = vmatpush.bf16.msrb.mxu0 %v8517_v32  ;;  %2919 = vmatpush.bf16.msra.mxu3 %v8608_v37 }
 0x1ca   :  { %v2438_v30 = vadd.f32 %v2437_v1, %v2419_v17  ;;  %v2476_v58 = vadd.f32 %v2475_v2, %v2457_v46  ;;  %v2488_v17 = vadd.f32 %v8551_v0, %v2469_v54 }
 0x1cc   :  { %2595 = vst [vmem:[#allocation3 + $0x20] sm:$0xff] %v2438_v30 }
 0x1cd   :  { %v8553_v3 = vpop.f32.mrf.mxu0  ;;  %v2527_v35 = vpop.f32.mrf.mxu1  ;;  %2974 = vmatpush.bf16.msra.mxu0 %v8458_v29 }
 0x1ce   :  { %v2490_v39 = vadd.f32 %v8553_v3, %v2471_v45 }
 0x1d1   :  { %v8555_v14 = vpop.f32.mrf.mxu2  ;;  %v8557_v6 = vpop.f32.mrf.mxu3  ;;  %2975 = vmatpush.bf16.msra.mxu0 %v8479_v62 }
 0x1d2   :  { %v2507_v48 = vadd.f32 %v8555_v14, %v2488_v17 }
 0x1d4   :  { %v2526_v34 = vadd.f32 %v8579_v22, %v2507_v48 }
 0x1d5   :  { %v2492_v7 = vpop.f32.mrf.mxu0  ;;  %v2530_v44 = vpop.f32.mrf.mxu1  ;;  %2976 = vmatpush.bf16.msra.mxu0 %v8500_v57 }
 0x1d6   :  { %v2493_v51 = vadd.f32 %v2492_v7, %v2474_v61  ;;  %v2545_v14 = vadd.f32 %v8557_v6, %v2526_v34 }
 0x1d9   :  { %v8559_v11 = vpop.f32.mrf.mxu2  ;;  %v8561_v5 = vpop.f32.mrf.mxu3  ;;  %2977 = vmatpush.bf16.msra.mxu0 %v8517_v32 }
 0x1da   :  { %v2509_v52 = vadd.f32 %v8559_v11, %v2490_v39 }
 0x1dc   :  { %v2528_v43 = vadd.f32 %v2527_v35, %v2509_v52 }
 0x1dd   :  { %v2494_v12 = vpop.f32.mrf.mxu0  ;;  %v2532_v18 = vpop.f32.mrf.mxu1 }
 0x1de   :  { %v2495_v40 = vadd.f32 %v2494_v12, %v2476_v58  ;;  %v2547_v0 = vadd.f32 %v8561_v5, %v2528_v43 }
 0x1e1   :  { %v2511_v13 = vpop.f32.mrf.mxu2  ;;  %v8563_v15 = vpop.f32.mrf.mxu3 }
 0x1e2   :  { %v2512_v63 = vadd.f32 %v2511_v13, %v2493_v51 }
 0x1e4   :  { %v2531_v2 = vadd.f32 %v2530_v44, %v2512_v63 }
 0x1e5   :  { %v8586_v47 = vpop.f32.mrf.mxu0 }
 0x1e6   :  { %v2550_v3 = vadd.f32 %v8563_v15, %v2531_v2  ;;  %v2564_v25 = vadd.f32 %v8586_v47, %v2545_v14  ;;  %v1430_v15 = vld [vmem:[%s9440_s3] sm:$0xff]  ;;  %v2650_v47 = vld [vmem:[#allocation3 + $0x28] sm:$0x3] }
 0x1e9   :  { %v2513_v26 = vpop.f32.mrf.mxu2  ;;  %v2551_v24 = vpop.f32.mrf.mxu3 }
 0x1ea   :  { %v2514_v59 = vadd.f32 %v2513_v26, %v2495_v40 }
 0x1ec   :  { %v2533_v1 = vadd.f32 %v2532_v18, %v2514_v59  ;;  %v2748_v59 = vld [vmem:[#allocation3 + $0x28] sm:$0xc] }
 0x1ed   :  { %v2565_v38 = vpop.f32.mrf.mxu0 }
 0x1ee   :  { %v2552_v7 = vadd.f32 %v2551_v24, %v2533_v1  ;;  %v2566_v50 = vadd.f32 %v2565_v38, %v2547_v0 }
 0x1f1   :  { %v2582_v41 = vpop.f32.mrf.mxu2  ;;  %v8612_v55 = vpop.f32.mrf.mxu3 }
 0x1f2   :  { %v2583_v22 = vadd.f32 %v2582_v41, %v2564_v25  ;;  %v2722_v26 = vadd.f32 %v8612_v55, %v2650_v47 }
 0x1f4   :  { %v2724_v24 = vmul.f32 0.5, %v2722_v26 }
 0x1f5   :  { %v2568_v60 = vpop.f32.mrf.mxu0 }
 0x1f6   :  { %v2569_v11 = vadd.f32 %v2568_v60, %v2550_v3  ;;  %7057 = vtanh.f32 %v2724_v24 }
 0x1f9   :  { %v2584_v49 = vpop.f32.mrf.mxu2  ;;  %v2707_v56 = vpop.f32.mrf.mxu3 }
 0x1fa   :  { %v2585_v21 = vadd.f32 %v2584_v49, %v2566_v50 }
 0x1fc   :  { %v7058_v35 = vpop.eup %7057 }
 0x1fd   :  { %v2570_v30 = vpop.f32.mrf.mxu0  ;;  %v2726_v10 = vadd.f32 1.0, %v7058_v35 }
 0x1fe   :  { %v2571_v9 = vadd.f32 %v2570_v30, %v2552_v7 }
 0x1ff   :  { %v2727_v38 = vmul.f32 0.5, %v2726_v10 }
 0x201   :  { %v2587_v16 = vpop.f32.mrf.mxu2  ;;  %v2733_v46 = vmul.f32 0.0, %v2727_v38 }
 0x202   :  { %v2588_v20 = vadd.f32 %v2587_v16, %v2569_v11 }
 0x209   :  { %v2589_v12 = vpop.f32.mrf.mxu2 }
 0x20a   :  { %v2590_v13 = vadd.f32 %v2589_v12, %v2571_v9 }
 0x20c   :  { %2621 = vmatpush.msra.mxu1 %v2590_v13 }
 0x20e   :  { %2622 = vmatpush.msra.mxu1 %v2588_v20 }
 0x210   :  { %2623 = vmatpush.msra.mxu1 %v2585_v21 }
 0x212   :  { %2624 = vmatpush.msra.mxu1 %v2583_v22 }
 0x213   :  { %6519 = vmatmul.msk.f32.vlgmr.msra.gmra.mxu1 %vm2596_vm2, %v1430_v15 }
 0x214   :  { %2903 = vmatpush.bf16.msrb.mxu1 %v8458_v29 }
 0x218   :  { %2904 = vmatpush.bf16.msrb.mxu1 %v8479_v62 }
 0x21c   :  { %2905 = vmatpush.bf16.msrb.mxu1 %v8500_v57 }
 0x220   :  { %2906 = vmatpush.bf16.msrb.mxu1 %v8517_v32 }
 0x224   :  { %3037 = vmatpush.bf16.msra.mxu1 %v8458_v29 }
 0x228   :  { %3038 = vmatpush.bf16.msra.mxu1 %v8479_v62 }
 0x22c   :  { %3039 = vmatpush.bf16.msra.mxu1 %v8500_v57 }
 0x230   :  { %3040 = vmatpush.bf16.msra.mxu1 %v8517_v32 }
 0x239   :  { %v2718_v6 = vpop.f32.mrf.mxu0 }
 0x241   :  { %v2720_v5 = vpop.f32.mrf.mxu0 }
 0x290   :  { %v2626_v27 = vpop.f32.mrf.mxu1 }
 0x291   :  { %2638 = vst [vmem:[#allocation3 + $0x10] sm:$0xff] %v2626_v27 }
 0x298   :  { %v2651_v28 = vld [vmem:[#allocation3 + $0x10] sm:$0x3]  ;;  %v2749_v18 = vld [vmem:[#allocation3 + $0x10] sm:$0xc]  ;;  %v2819_v27 = vld [vmem:[#allocation3 + $0x10] sm:$0x30] }
 0x299   :  { %v2723_v36 = vadd.f32 %v2718_v6, %v2651_v28  ;;  %v2818_v6 = vld [vmem:[#allocation3 + $0x28] sm:$0x30] }
 0x29b   :  { %7059 = vtanh.f32 %v2723_v36  ;;  %v2729_v44 = vmul.f32 0.5, %v2723_v36 }
 0x29d   :  { %7061 = vtanh.f32 %v2729_v44 }
 0x2a1   :  { %v7060_v41 = vpop.eup %7059 }
 0x2a2   :  { %v2734_v42 = vmul.f32 %v7060_v41, %v2727_v38 }
 0x2a3   :  { %v7062_v55 = vpop.eup %7061 }
 0x2a4   :  { %2736 = vrot.lane.b32.xlu0 %v2734_v42, %s7393_s26  ;;  %v2731_v31 = vadd.f32 1.0, %v7062_v55  ;;  %v1431_v55 = vld [vmem:[%s9440_s3 + $0x8] sm:$0xff] }
 0x2a5   :  { %6520 = vmatmul.msk.f32.gmra.mxu1 %vm2596_vm2, %v1431_v55 }
 0x2a6   :  { %v2732_v58 = vmul.f32 0.5, %v2731_v31 }
 0x316   :  { %v2737_v49 = vpop.permute.xlu0 %2736 }
 0x317   :  { %v2739_v56 = vadd.f32 %v2737_v49, %v2733_v46 }
 0x319   :  { %7063 = vtanh.f32 %v2739_v56  ;;  %v2801_v2 = vrot.slane %v2739_v56, 6  ;;  %v1432_v56 = vld [vmem:[%s9440_s3 + $0x10] sm:$0xff] }
 0x31a   :  { %6521 = vmatmul.msk.f32.gmra.mxu1 %vm2596_vm2, %v1432_v56 }
 0x31f   :  { %v7064_v60 = vpop.eup %7063 }
 0x320   :  { %v8657_v8 = vmul.f32 %v7064_v60, %v2732_v58  ;;  %v1433_v58 = vld [vmem:[%s9440_s3 + $0x18] sm:$0xff] }
 0x322   :  { %v2750_v61 = vpack.c.bf16 %v8657_v8, %v8657_v8  ;;  %6522 = vmatmul.msk.f32.gmra.mxu1 %vm2596_vm2, %v1433_v58 }
 0x324   :  { %2752 = vrot.lane.b32.xlu0 %v2750_v61, %s7393_s26 }
 0x396   :  { %v2753_v40 = vpop.permute.xlu0 %2752 }
 0x397   :  { %6555 = vmatmul.msk.bf16.vlgmr.msra.gmra.mxu2 %vm2692_vm3, %v2753_v40  ;;  %6556 = vmatmul.msk.bf16.vlgmr.msrb.gmra.mxu3 %vm2692_vm3, %v2753_v40 }
 0x398   :  { %2987 = vmatpush.bf16.msra.mxu2 %v8571_v53  ;;  %3050 = vmatpush.bf16.msrb.mxu3 %v8571_v53 }
 0x39c   :  { %2988 = vmatpush.bf16.msra.mxu2 %v8582_v23  ;;  %3051 = vmatpush.bf16.msrb.mxu3 %v8582_v23 }
 0x3a0   :  { %2989 = vmatpush.bf16.msra.mxu2 %v8597_v33  ;;  %3052 = vmatpush.bf16.msrb.mxu3 %v8597_v33 }
 0x3a4   :  { %2990 = vmatpush.bf16.msra.mxu2 %v8608_v37  ;;  %3053 = vmatpush.bf16.msrb.mxu3 %v8608_v37 }
 0x41a   :  { %v2766_v4 = vpop.f32.mrf.mxu2  ;;  %v2779_v45 = vpop.f32.mrf.mxu3 }
 0x41b   :  { %v2785_v51 = vrot.slane %v2766_v4, 6  ;;  %v2786_v39 = vrot.slane %v2779_v45, 6 }
 0x41d   :  { %v2789_v54 = vadd.f32 %v2785_v51, %v2748_v59  ;;  %v2790_v16 = vadd.f32 %v2786_v39, %v2749_v18  ;;  %v2629_v18 = vpop.f32.mrf.mxu1 }
 0x41e   :  { %2639 = vst [vmem:[#allocation3 + $0x8] sm:$0xff] %v2629_v18 }
 0x41f   :  { %v2791_v63 = vmul.f32 0.5, %v2789_v54  ;;  %v2796_v3 = vmul.f32 0.5, %v2790_v16 }
 0x421   :  { %7065 = vtanh.f32 %v2791_v63 }
 0x422   :  { %v2768_v17 = vpop.f32.mrf.mxu2  ;;  %v2781_v52 = vpop.f32.mrf.mxu3  ;;  %7067 = vtanh.f32 %v2790_v16 }
 0x423   :  { %7069 = vtanh.f32 %v2796_v3 }
 0x425   :  { %v2632_v16 = vpop.f32.mrf.mxu1 }
 0x426   :  { %2640 = vst [vmem:[#allocation3 + $0x18] sm:$0xff] %v2632_v16 }
 0x427   :  { %v7066_v1 = vpop.eup %7065 }
 0x428   :  { %v2793_v48 = vadd.f32 1.0, %v7066_v1  ;;  %v7068_v43 = vpop.eup %7067 }
 0x429   :  { %v7070_v12 = vpop.eup %7069 }
 0x42a   :  { %v2794_v30 = vmul.f32 0.5, %v2793_v48  ;;  %v2798_v11 = vadd.f32 1.0, %v7070_v12  ;;  %v2889_v48 = vld [vmem:[#allocation3 + $0x28] sm:$0xc0] }
 0x42c   :  { %v2804_v7 = vmul.f32 %v7068_v43, %v2794_v30  ;;  %v2803_v34 = vmul.f32 %v2801_v2, %v2794_v30  ;;  %v2799_v13 = vmul.f32 0.5, %v2798_v11 }
 0x42d   :  { %v2635_v17 = vpop.f32.mrf.mxu1 }
 0x42e   :  { %2806 = vrot.lane.b32.xlu1 %v2804_v7, %s7393_s26  ;;  %2641 = vst [vmem:[#allocation3 + $0x38] sm:$0xff] %v2635_v17 }
 0x4a0   :  { %v2807_v9 = vpop.permute.xlu1 %2806 }
 0x4a1   :  { %v2809_v0 = vadd.f32 %v2807_v9, %v2803_v34  ;;  %v2890_v34 = vld [vmem:[#allocation3 + $0x10] sm:$0xc0] }
 0x4a3   :  { %7071 = vtanh.f32 %v2809_v0  ;;  %v2872_v41 = vrot.slane %v2809_v0, 6 }
 0x4a9   :  { %v7072_v14 = vpop.eup %7071 }
 0x4aa   :  { %v8673_v50 = vmul.f32 %v7072_v14, %v2799_v13 }
 0x4ac   :  { %v2820_v20 = vpack.c.bf16 %v8673_v50, %v8673_v50 }
 0x4ae   :  { %v2822_v25 = vrot.slane %v2820_v20, 1 }
 0x4b0   :  { %2823 = vrot.lane.b32.xlu1 %v2822_v25, %s7393_s26 }
 0x522   :  { %v2824_v21 = vpop.permute.xlu1 %2823 }
 0x523   :  { %6557 = vmatmul.msk.bf16.vlgmr.msrb.gmra.mxu0 %vm2692_vm3, %v2824_v21  ;;  %6558 = vmatmul.msk.bf16.vlgmr.msrb.gmra.mxu2 %vm2692_vm3, %v2824_v21 }
 0x524   :  { %3107 = vmatpush.bf16.msrb.mxu0 %v8458_v29  ;;  %3120 = vmatpush.bf16.msrb.mxu2 %v8571_v53 }
 0x528   :  { %3108 = vmatpush.bf16.msrb.mxu0 %v8479_v62  ;;  %3121 = vmatpush.bf16.msrb.mxu2 %v8582_v23 }
 0x52c   :  { %3109 = vmatpush.bf16.msrb.mxu0 %v8500_v57  ;;  %3122 = vmatpush.bf16.msrb.mxu2 %v8597_v33 }
 0x530   :  { %3110 = vmatpush.bf16.msrb.mxu0 %v8517_v32  ;;  %3123 = vmatpush.bf16.msrb.mxu2 %v8608_v37 }
 0x5a0   :  { %v2837_v22 = vpop.f32.mrf.mxu0 }
 0x5a1   :  { %v2856_v15 = vrot.slane %v2837_v22, 4 }
 0x5a3   :  { %v2860_v5 = vadd.f32 %v2856_v15, %v2818_v6 }
 0x5a5   :  { %v2862_v47 = vmul.f32 0.5, %v2860_v5 }
 0x5a6   :  { %v2850_v26 = vpop.f32.mrf.mxu2 }
 0x5a7   :  { %7073 = vtanh.f32 %v2862_v47  ;;  %v2857_v24 = vrot.slane %v2850_v26, 4 }
 0x5a8   :  { %v2839_v28 = vpop.f32.mrf.mxu0 }
 0x5a9   :  { %v2861_v35 = vadd.f32 %v2857_v24, %v2819_v27 }
 0x5ab   :  { %7075 = vtanh.f32 %v2861_v35  ;;  %v2867_v31 = vmul.f32 0.5, %v2861_v35 }
 0x5ad   :  { %v7074_v36 = vpop.eup %7073  ;;  %7077 = vtanh.f32 %v2867_v31 }
 0x5ae   :  { %v2852_v10 = vpop.f32.mrf.mxu2  ;;  %v2864_v38 = vadd.f32 1.0, %v7074_v36 }
 0x5af   :  { %v2960_v10 = vld [vmem:[#allocation3] sm:$0x3] }
 0x5b0   :  { %v2865_v42 = vmul.f32 0.5, %v2864_v38 }
 0x5b1   :  { %v7076_v44 = vpop.eup %7075 }
 0x5b2   :  { %v2875_v46 = vmul.f32 %v7076_v44, %v2865_v42  ;;  %v2874_v49 = vmul.f32 %v2872_v41, %v2865_v42  ;;  %v2961_v44 = vld [vmem:[#allocation3 + $0x8] sm:$0x3] }
 0x5b3   :  { %v7078_v61 = vpop.eup %7077 }
 0x5b4   :  { %2877 = vrot.lane.b32.xlu2 %v2875_v46, %s7393_s26  ;;  %v2869_v4 = vadd.f32 1.0, %v7078_v61 }
 0x5b6   :  { %v2870_v45 = vmul.f32 0.5, %v2869_v4 }
 0x60e   :  { %v2878_v60 = vpop.permute.xlu2 %2877 }
 0x60f   :  { %v2880_v40 = vadd.f32 %v2878_v60, %v2874_v49 }
 0x611   :  { %7079 = vtanh.f32 %v2880_v40  ;;  %v2943_v13 = vrot.slane %v2880_v40, 6 }
 0x617   :  { %v7080_v51 = vpop.eup %7079 }
 0x618   :  { %v8701_v59 = vmul.f32 %v7080_v51, %v2870_v45 }
 0x61a   :  { %v2891_v54 = vpack.c.bf16 %v8701_v59, %v8701_v59 }
 0x61c   :  { %v2893_v39 = vrot.slane %v2891_v54, 2 }
 0x61e   :  { %2894 = vrot.lane.b32.xlu2 %v2893_v39, %s7393_s26 }
 0x678   :  { %v2895_v63 = vpop.permute.xlu2 %2894 }
 0x679   :  { %6559 = vmatmul.msk.bf16.vlgmr.msrb.gmra.mxu1 %vm2692_vm3, %v2895_v63  ;;  %6560 = vmatmul.msk.bf16.vlgmr.msra.gmra.mxu3 %vm2692_vm3, %v2895_v63 }
 0x67a   :  { %3177 = vmatpush.bf16.msrb.mxu1 %v8458_v29  ;;  %3190 = vmatpush.bf16.msra.mxu3 %v8571_v53 }
 0x67e   :  { %3178 = vmatpush.bf16.msrb.mxu1 %v8479_v62  ;;  %3191 = vmatpush.bf16.msra.mxu3 %v8582_v23 }
 0x682   :  { %3179 = vmatpush.bf16.msrb.mxu1 %v8500_v57  ;;  %3192 = vmatpush.bf16.msra.mxu3 %v8597_v33 }
 0x686   :  { %3180 = vmatpush.bf16.msrb.mxu1 %v8517_v32  ;;  %3193 = vmatpush.bf16.msra.mxu3 %v8608_v37 }
 0x6f6   :  { %v2908_v52 = vpop.f32.mrf.mxu1 }
 0x6f7   :  { %v2927_v1 = vrot.slane %v2908_v52, 2 }
 0x6f9   :  { %v2931_v2 = vadd.f32 %v2927_v1, %v2889_v48 }
 0x6fb   :  { %v2933_v30 = vmul.f32 0.5, %v2931_v2 }
 0x6fc   :  { %v2921_v43 = vpop.f32.mrf.mxu3 }
 0x6fd   :  { %7081 = vtanh.f32 %v2933_v30  ;;  %v2928_v7 = vrot.slane %v2921_v43, 2  ;;  %v3024_v43 = vld [vmem:[#allocation3] sm:$0xc] }
 0x6fe   :  { %v2910_v3 = vpop.f32.mrf.mxu1 }
 0x6ff   :  { %v2932_v9 = vadd.f32 %v2928_v7, %v2890_v34 }
 0x701   :  { %7083 = vtanh.f32 %v2932_v9  ;;  %v2938_v22 = vmul.f32 0.5, %v2932_v9 }
 0x703   :  { %v7082_v12 = vpop.eup %7081  ;;  %7085 = vtanh.f32 %v2938_v22 }
 0x704   :  { %v2935_v0 = vadd.f32 1.0, %v7082_v12  ;;  %v2923_v11 = vpop.f32.mrf.mxu3  ;;  %v3025_v12 = vld [vmem:[#allocation3 + $0x8] sm:$0xc] }
 0x706   :  { %v2936_v14 = vmul.f32 0.5, %v2935_v0 }
 0x707   :  { %v7084_v20 = vpop.eup %7083 }
 0x708   :  { %v2946_v25 = vmul.f32 %v7084_v20, %v2936_v14  ;;  %v2945_v21 = vmul.f32 %v2943_v13, %v2936_v14 }
 0x709   :  { %v7086_v6 = vpop.eup %7085 }
 0x70a   :  { %2948 = vrot.lane.b32.xlu0 %v2946_v25, %s7393_s26  ;;  %v2940_v47 = vadd.f32 1.0, %v7086_v6 }
 0x70c   :  { %v2941_v26 = vmul.f32 0.5, %v2940_v47 }
 0x77c   :  { %v2949_v15 = vpop.permute.xlu0 %2948 }
 0x77d   :  { %v2951_v5 = vadd.f32 %v2949_v15, %v2945_v21 }
 0x77f   :  { %7087 = vtanh.f32 %v2951_v5  ;;  %v3008_v58 = vrot.slane %v2951_v5, 6 }
 0x785   :  { %v7088_v24 = vpop.eup %7087 }
 0x786   :  { %v8717_v27 = vmul.f32 %v7088_v24, %v2941_v26 }
 0x788   :  { %v2962_v28 = vpack.c.bf16 %v8717_v27, %v8717_v27 }
 0x78a   :  { %v2964_v35 = vrot.slane %v2962_v28, 3 }
 0x78c   :  { %2965 = vrot.lane.b32.xlu1 %v2964_v35, %s7393_s26 }
 0x7fe   :  { %v2966_v36 = vpop.permute.xlu1 %2965 }
 0x7ff   :  { %6561 = vmatmul.msk.bf16.vlgmr.msra.gmra.mxu0 %vm2692_vm3, %v2966_v36  ;;  %6562 = vmatmul.msk.bf16.vlgmr.msra.gmra.mxu2 %vm2692_vm3, %v2966_v36 }
 0x800   :  { %3247 = vmatpush.bf16.msra.mxu0 %v8458_v29  ;;  %3260 = vmatpush.bf16.msra.mxu2 %v8571_v53 }
 0x804   :  { %3248 = vmatpush.bf16.msra.mxu0 %v8479_v62  ;;  %3261 = vmatpush.bf16.msra.mxu2 %v8582_v23 }
 0x808   :  { %3249 = vmatpush.bf16.msra.mxu0 %v8500_v57  ;;  %3262 = vmatpush.bf16.msra.mxu2 %v8597_v33 }
 0x80c   :  { %3250 = vmatpush.bf16.msra.mxu0 %v8517_v32  ;;  %3263 = vmatpush.bf16.msra.mxu2 %v8608_v37 }
 0x87c   :  { %v2979_v38 = vpop.f32.mrf.mxu0 }
 0x87d   :  { %v2996_v41 = vadd.f32 %v2979_v38, %v2960_v10 }
 0x87f   :  { %v2998_v42 = vmul.f32 0.5, %v2996_v41 }
 0x881   :  { %7089 = vtanh.f32 %v2998_v42 }
 0x882   :  { %v2992_v46 = vpop.f32.mrf.mxu2 }
 0x883   :  { %v2997_v49 = vadd.f32 %v2992_v46, %v2961_v44 }
 0x884   :  { %v2981_v55 = vpop.f32.mrf.mxu0 }
 0x885   :  { %7091 = vtanh.f32 %v2997_v49  ;;  %v3003_v51 = vmul.f32 0.5, %v2997_v49  ;;  %v3093_v49 = vld [vmem:[#allocation3] sm:$0x30] }
 0x887   :  { %v7090_v56 = vpop.eup %7089  ;;  %7093 = vtanh.f32 %v3003_v51 }
 0x888   :  { %v3000_v31 = vadd.f32 1.0, %v7090_v56 }
 0x88a   :  { %v3001_v60 = vmul.f32 0.5, %v3000_v31  ;;  %v2994_v61 = vpop.f32.mrf.mxu2 }
 0x88b   :  { %v7092_v40 = vpop.eup %7091 }
 0x88c   :  { %v3011_v4 = vmul.f32 %v7092_v40, %v3001_v60  ;;  %v3010_v45 = vmul.f32 %v3008_v58, %v3001_v60  ;;  %v3094_v60 = vld [vmem:[#allocation3 + $0x8] sm:$0x30] }
 0x88d   :  { %v7094_v39 = vpop.eup %7093 }
 0x88e   :  { %3013 = vrot.lane.b32.xlu2 %v3011_v4, %s7393_s26  ;;  %v3005_v18 = vadd.f32 1.0, %v7094_v39 }
 0x890   :  { %v3006_v16 = vmul.f32 0.5, %v3005_v18 }
 0x8e8   :  { %v3014_v54 = vpop.permute.xlu2 %3013 }
 0x8e9   :  { %v3016_v63 = vadd.f32 %v3014_v54, %v3010_v45 }
 0x8eb   :  { %7095 = vtanh.f32 %v3016_v63  ;;  %v3077_v25 = vrot.slane %v3016_v63, 6 }
 0x8f1   :  { %v7096_v17 = vpop.eup %7095 }
 0x8f2   :  { %v8733_v52 = vmul.f32 %v7096_v17, %v3006_v16 }
 0x8f4   :  { %v3026_v1 = vpack.c.bf16 %v8733_v52, %v8733_v52 }
 0x8f6   :  { %3028 = vrot.lane.b32.xlu0 %v3026_v1, %s7393_s26 }
 0x968   :  { %v3029_v48 = vpop.permute.xlu0 %3028 }
 0x969   :  { %6563 = vmatmul.msk.bf16.vlgmr.msra.gmra.mxu1 %vm2692_vm3, %v3029_v48  ;;  %6564 = vmatmul.msk.bf16.vlgmr.msrb.gmra.mxu3 %vm2692_vm3, %v3029_v48 }
 0x96a   :  { %3310 = vmatpush.bf16.msra.mxu1 %v8458_v29  ;;  %3323 = vmatpush.bf16.msrb.mxu3 %v8571_v53 }
 0x96e   :  { %3311 = vmatpush.bf16.msra.mxu1 %v8479_v62  ;;  %3324 = vmatpush.bf16.msrb.mxu3 %v8582_v23 }
 0x972   :  { %3312 = vmatpush.bf16.msra.mxu1 %v8500_v57  ;;  %3325 = vmatpush.bf16.msrb.mxu3 %v8597_v33 }
 0x976   :  { %3313 = vmatpush.bf16.msra.mxu1 %v8517_v32  ;;  %3326 = vmatpush.bf16.msrb.mxu3 %v8608_v37 }
 0x9e6   :  { %v3042_v2 = vpop.f32.mrf.mxu1 }
 0x9e7   :  { %v3061_v30 = vrot.slane %v3042_v2, 6 }
 0x9e9   :  { %v3065_v7 = vadd.f32 %v3061_v30, %v3024_v43 }
 0x9eb   :  { %v3067_v34 = vmul.f32 0.5, %v3065_v7 }
 0x9ec   :  { %v3055_v3 = vpop.f32.mrf.mxu3 }
 0x9ed   :  { %7097 = vtanh.f32 %v3067_v34  ;;  %v3062_v9 = vrot.slane %v3055_v3, 6 }
 0x9ee   :  { %v3044_v0 = vpop.f32.mrf.mxu1 }
 0x9ef   :  { %v3066_v11 = vadd.f32 %v3062_v9, %v3025_v12 }
 0x9f1   :  { %7099 = vtanh.f32 %v3066_v11  ;;  %v3072_v5 = vmul.f32 0.5, %v3066_v11 }
 0x9f3   :  { %v7098_v13 = vpop.eup %7097  ;;  %7101 = vtanh.f32 %v3072_v5 }
 0x9f4   :  { %v3069_v14 = vadd.f32 1.0, %v7098_v13  ;;  %v3057_v20 = vpop.f32.mrf.mxu3  ;;  %v3163_v13 = vld [vmem:[#allocation3] sm:$0xc0] }
 0x9f6   :  { %v3070_v21 = vmul.f32 0.5, %v3069_v14 }
 0x9f7   :  { %v7100_v22 = vpop.eup %7099 }
 0x9f8   :  { %v3080_v15 = vmul.f32 %v7100_v22, %v3070_v21  ;;  %v3079_v6 = vmul.f32 %v3077_v25, %v3070_v21  ;;  %v3164_v22 = vld [vmem:[#allocation3 + $0x8] sm:$0xc0] }
 0x9f9   :  { %v7102_v26 = vpop.eup %7101 }
 0x9fa   :  { %3082 = vrot.lane.b32.xlu1 %v3080_v15, %s7393_s26  ;;  %v3074_v28 = vadd.f32 1.0, %v7102_v26 }
 0x9fc   :  { %v3075_v35 = vmul.f32 0.5, %v3074_v28 }
 0xa6c   :  { %v3083_v47 = vpop.permute.xlu1 %3082 }
 0xa6d   :  { %v3085_v24 = vadd.f32 %v3083_v47, %v3079_v6 }
 0xa6f   :  { %7103 = vtanh.f32 %v3085_v24  ;;  %v3147_v54 = vrot.slane %v3085_v24, 6 }
 0xa75   :  { %v7104_v36 = vpop.eup %7103 }
 0xa76   :  { %v8749_v10 = vmul.f32 %v7104_v36, %v3075_v35 }
 0xa78   :  { %v3095_v38 = vpack.c.bf16 %v8749_v10, %v8749_v10 }
 0xa7a   :  { %v3097_v41 = vrot.slane %v3095_v38, 1 }
 0xa7c   :  { %3098 = vrot.lane.b32.xlu2 %v3097_v41, %s7393_s26 }
 0xad6   :  { %v3099_v42 = vpop.permute.xlu2 %3098 }
 0xad7   :  { %6565 = vmatmul.msk.bf16.vlgmr.msrb.gmra.mxu0 %vm2692_vm3, %v3099_v42  ;;  %6566 = vmatmul.msk.bf16.vlgmr.msrb.gmra.mxu2 %vm2692_vm3, %v3099_v42 }
 0xad8   :  { %3380 = vmatpush.bf16.msrb.mxu0 %v8458_v29  ;;  %3393 = vmatpush.bf16.msrb.mxu2 %v8571_v53 }
 0xadc   :  { %3381 = vmatpush.bf16.msrb.mxu0 %v8479_v62  ;;  %3394 = vmatpush.bf16.msrb.mxu2 %v8582_v23 }
 0xae0   :  { %3382 = vmatpush.bf16.msrb.mxu0 %v8500_v57  ;;  %3395 = vmatpush.bf16.msrb.mxu2 %v8597_v33 }
 0xae4   :  { %3383 = vmatpush.bf16.msrb.mxu0 %v8517_v32  ;;  %3396 = vmatpush.bf16.msrb.mxu2 %v8608_v37 }
 0xb54   :  { %v3112_v44 = vpop.f32.mrf.mxu0 }
 0xb55   :  { %v3131_v46 = vrot.slane %v3112_v44, 4 }
 0xb57   :  { %v3135_v55 = vadd.f32 %v3131_v46, %v3093_v49 }
 0xb59   :  { %v3137_v56 = vmul.f32 0.5, %v3135_v55 }
 0xb5a   :  { %v3125_v31 = vpop.f32.mrf.mxu2 }
 0xb5b   :  { %7105 = vtanh.f32 %v3137_v56  ;;  %v3132_v58 = vrot.slane %v3125_v31, 4 }
 0xb5c   :  { %v3114_v61 = vpop.f32.mrf.mxu0 }
 0xb5d   :  { %v3136_v40 = vadd.f32 %v3132_v58, %v3094_v60 }
 0xb5f   :  { %7107 = vtanh.f32 %v3136_v40  ;;  %v3142_v17 = vmul.f32 0.5, %v3136_v40  ;;  %v3233_v40 = vld [vmem:[#allocation3 + $0x30] sm:$0x3] }
 0xb61   :  { %v7106_v4 = vpop.eup %7105  ;;  %7109 = vtanh.f32 %v3142_v17 }
 0xb62   :  { %v3139_v45 = vadd.f32 1.0, %v7106_v4  ;;  %v3127_v51 = vpop.f32.mrf.mxu2 }
 0xb64   :  { %v3140_v39 = vmul.f32 0.5, %v3139_v45 }
 0xb65   :  { %v7108_v63 = vpop.eup %7107 }
 0xb66   :  { %v3150_v18 = vmul.f32 %v7108_v63, %v3140_v39  ;;  %v3149_v16 = vmul.f32 %v3147_v54, %v3140_v39  ;;  %v3234_v54 = vld [vmem:[#allocation3 + $0x18] sm:$0x3] }
 0xb67   :  { %v7110_v48 = vpop.eup %7109 }
 0xb68   :  { %3152 = vrot.lane.b32.xlu0 %v3150_v18, %s7393_s26  ;;  %v3144_v30 = vadd.f32 1.0, %v7110_v48 }
 0xb6a   :  { %v3145_v43 = vmul.f32 0.5, %v3144_v30 }
 0xbda   :  { %v3153_v1 = vpop.permute.xlu0 %3152 }
 0xbdb   :  { %v3155_v2 = vadd.f32 %v3153_v1, %v3149_v16 }
 0xbdd   :  { %7111 = vtanh.f32 %v3155_v2  ;;  %v3217_v24 = vrot.slane %v3155_v2, 6 }
 0xbe3   :  { %v7112_v7 = vpop.eup %7111 }
 0xbe4   :  { %v8765_v34 = vmul.f32 %v7112_v7, %v3145_v43 }
 0xbe6   :  { %v3165_v3 = vpack.c.bf16 %v8765_v34, %v8765_v34 }
 0xbe8   :  { %v3167_v9 = vrot.slane %v3165_v3, 2 }
 0xbea   :  { %3168 = vrot.lane.b32.xlu1 %v3167_v9, %s7393_s26 }
 0xc5c   :  { %v3169_v12 = vpop.permute.xlu1 %3168 }
 0xc5d   :  { %6567 = vmatmul.msk.bf16.vlgmr.msrb.gmra.mxu1 %vm2692_vm3, %v3169_v12  ;;  %6568 = vmatmul.msk.bf16.vlgmr.msra.gmra.mxu3 %vm2692_vm3, %v3169_v12 }
 0xc5e   :  { %3450 = vmatpush.bf16.msrb.mxu1 %v8458_v29  ;;  %3463 = vmatpush.bf16.msra.mxu3 %v8571_v53 }
 0xc62   :  { %3451 = vmatpush.bf16.msrb.mxu1 %v8479_v62  ;;  %3464 = vmatpush.bf16.msra.mxu3 %v8582_v23 }
 0xc66   :  { %3452 = vmatpush.bf16.msrb.mxu1 %v8500_v57  ;;  %3465 = vmatpush.bf16.msra.mxu3 %v8597_v33 }
 0xc6a   :  { %3453 = vmatpush.bf16.msrb.mxu1 %v8517_v32  ;;  %3466 = vmatpush.bf16.msra.mxu3 %v8608_v37 }
 0xcda   :  { %v3182_v0 = vpop.f32.mrf.mxu1 }
 0xcdb   :  { %v3201_v11 = vrot.slane %v3182_v0, 2 }
 0xcdd   :  { %v3205_v14 = vadd.f32 %v3201_v11, %v3163_v13 }
 0xcdf   :  { %v3207_v20 = vmul.f32 0.5, %v3205_v14 }
 0xce0   :  { %v3195_v25 = vpop.f32.mrf.mxu3 }
 0xce1   :  { %7113 = vtanh.f32 %v3207_v20  ;;  %v3202_v21 = vrot.slane %v3195_v25, 2 }
 0xce2   :  { %v3184_v15 = vpop.f32.mrf.mxu1 }
 0xce3   :  { %v3206_v6 = vadd.f32 %v3202_v21, %v3164_v22 }
 0xce5   :  { %7115 = vtanh.f32 %v3206_v6  ;;  %v3212_v41 = vmul.f32 0.5, %v3206_v6  ;;  %v3297_v6 = vld [vmem:[#allocation3 + $0x30] sm:$0xc] }
 0xce7   :  { %v7114_v5 = vpop.eup %7113  ;;  %7117 = vtanh.f32 %v3212_v41 }
 0xce8   :  { %v3209_v47 = vadd.f32 1.0, %v7114_v5  ;;  %v3197_v26 = vpop.f32.mrf.mxu3 }
 0xcea   :  { %v3210_v28 = vmul.f32 0.5, %v3209_v47 }
 0xceb   :  { %v7116_v35 = vpop.eup %7115 }
 0xcec   :  { %v3220_v36 = vmul.f32 %v7116_v35, %v3210_v28  ;;  %v3219_v38 = vmul.f32 %v3217_v24, %v3210_v28  ;;  %v3298_v28 = vld [vmem:[#allocation3 + $0x18] sm:$0xc] }
 0xced   :  { %v7118_v44 = vpop.eup %7117 }
 0xcee   :  { %3222 = vrot.lane.b32.xlu2 %v3220_v36, %s7393_s26  ;;  %v3214_v49 = vadd.f32 1.0, %v7118_v44 }
 0xcf0   :  { %v3215_v55 = vmul.f32 0.5, %v3214_v49 }
 0xd48   :  { %v3223_v42 = vpop.permute.xlu2 %3222 }
 0xd49   :  { %v3225_v46 = vadd.f32 %v3223_v42, %v3219_v38 }
 0xd4b   :  { %7119 = vtanh.f32 %v3225_v46  ;;  %v3281_v1 = vrot.slane %v3225_v46, 6 }
 0xd51   :  { %v7120_v56 = vpop.eup %7119 }
 0xd52   :  { %v8781_v31 = vmul.f32 %v7120_v56, %v3215_v55 }
 0xd54   :  { %v3235_v58 = vpack.c.bf16 %v8781_v31, %v8781_v31 }
 0xd56   :  { %v3237_v60 = vrot.slane %v3235_v58, 3 }
 0xd58   :  { %3238 = vrot.lane.b32.xlu0 %v3237_v60, %s7393_s26 }
 0xdca   :  { %v3239_v61 = vpop.permute.xlu0 %3238 }
 0xdcb   :  { %6569 = vmatmul.msk.bf16.vlgmr.msra.gmra.mxu0 %vm2692_vm3, %v3239_v61  ;;  %6570 = vmatmul.msk.bf16.vlgmr.msra.gmra.mxu2 %vm2692_vm3, %v3239_v61 }
 0xdcc   :  { %3520 = vmatpush.bf16.msra.mxu0 %v8458_v29  ;;  %3533 = vmatpush.bf16.msra.mxu2 %v8571_v53 }
 0xdd0   :  { %3521 = vmatpush.bf16.msra.mxu0 %v8479_v62  ;;  %3534 = vmatpush.bf16.msra.mxu2 %v8582_v23 }
 0xdd4   :  { %3522 = vmatpush.bf16.msra.mxu0 %v8500_v57  ;;  %3535 = vmatpush.bf16.msra.mxu2 %v8597_v33 }
 0xdd8   :  { %3523 = vmatpush.bf16.msra.mxu0 %v8517_v32  ;;  %3536 = vmatpush.bf16.msra.mxu2 %v8608_v37 }
 0xe48   :  { %v3252_v4 = vpop.f32.mrf.mxu0 }
 0xe49   :  { %v3269_v45 = vadd.f32 %v3252_v4, %v3233_v40 }
 0xe4b   :  { %v3271_v51 = vmul.f32 0.5, %v3269_v45 }
 0xe4d   :  { %7121 = vtanh.f32 %v3271_v51 }
 0xe4e   :  { %v3265_v39 = vpop.f32.mrf.mxu2 }
 0xe4f   :  { %v3270_v63 = vadd.f32 %v3265_v39, %v3234_v54 }
 0xe50   :  { %v3254_v18 = vpop.f32.mrf.mxu0 }
 0xe51   :  { %7123 = vtanh.f32 %v3270_v63  ;;  %v3276_v3 = vmul.f32 0.5, %v3270_v63 }
 0xe53   :  { %v7122_v16 = vpop.eup %7121  ;;  %7125 = vtanh.f32 %v3276_v3 }
 0xe54   :  { %v3273_v17 = vadd.f32 1.0, %v7122_v16 }
 0xe56   :  { %v3274_v48 = vmul.f32 0.5, %v3273_v17  ;;  %v3267_v2 = vpop.f32.mrf.mxu2 }
 0xe57   :  { %v7124_v30 = vpop.eup %7123 }
 0xe58   :  { %v3284_v43 = vmul.f32 %v7124_v30, %v3274_v48  ;;  %v3283_v7 = vmul.f32 %v3281_v1, %v3274_v48  ;;  %v3366_v1 = vld [vmem:[#allocation3 + $0x30] sm:$0x30] }
 0xe59   :  { %v7126_v12 = vpop.eup %7125 }
 0xe5a   :  { %3286 = vrot.lane.b32.xlu1 %v3284_v43, %s7393_s26  ;;  %v3278_v11 = vadd.f32 1.0, %v7126_v12 }
 0xe5c   :  { %v3279_v13 = vmul.f32 0.5, %v3278_v11 }
 0xecc   :  { %v3287_v9 = vpop.permute.xlu1 %3286 }
 0xecd   :  { %v3289_v0 = vadd.f32 %v3287_v9, %v3283_v7  ;;  %v3367_v7 = vld [vmem:[#allocation3 + $0x18] sm:$0x30] }
 0xecf   :  { %7127 = vtanh.f32 %v3289_v0  ;;  %v3350_v44 = vrot.slane %v3289_v0, 6 }
 0xed5   :  { %v7128_v14 = vpop.eup %7127 }
 0xed6   :  { %v8797_v20 = vmul.f32 %v7128_v14, %v3279_v13 }
 0xed8   :  { %v3299_v25 = vpack.c.bf16 %v8797_v20, %v8797_v20 }
 0xeda   :  { %3301 = vrot.lane.b32.xlu2 %v3299_v25, %s7393_s26 }
 0xf34   :  { %v3302_v21 = vpop.permute.xlu2 %3301 }
 0xf35   :  { %6571 = vmatmul.msk.bf16.vlgmr.msra.gmra.mxu1 %vm2692_vm3, %v3302_v21  ;;  %6572 = vmatmul.msk.bf16.vlgmr.msrb.gmra.mxu3 %vm2692_vm3, %v3302_v21 }
 0xf36   :  { %3583 = vmatpush.bf16.msra.mxu1 %v8458_v29  ;;  %3596 = vmatpush.bf16.msrb.mxu3 %v8571_v53 }
 0xf3a   :  { %3584 = vmatpush.bf16.msra.mxu1 %v8479_v62  ;;  %3597 = vmatpush.bf16.msrb.mxu3 %v8582_v23 }
 0xf3e   :  { %3585 = vmatpush.bf16.msra.mxu1 %v8500_v57  ;;  %3598 = vmatpush.bf16.msrb.mxu3 %v8597_v33 }
 0xf42   :  { %3586 = vmatpush.bf16.msra.mxu1 %v8517_v32  ;;  %3599 = vmatpush.bf16.msrb.mxu3 %v8608_v37 }
 0xfb2   :  { %v3315_v22 = vpop.f32.mrf.mxu1 }
 0xfb3   :  { %v3334_v15 = vrot.slane %v3315_v22, 6 }
 0xfb5   :  { %v3338_v5 = vadd.f32 %v3334_v15, %v3297_v6 }
 0xfb7   :  { %v3340_v47 = vmul.f32 0.5, %v3338_v5 }
 0xfb8   :  { %v3328_v26 = vpop.f32.mrf.mxu3 }
 0xfb9   :  { %7129 = vtanh.f32 %v3340_v47  ;;  %v3335_v24 = vrot.slane %v3328_v26, 6 }
 0xfba   :  { %v3317_v35 = vpop.f32.mrf.mxu1 }
 0xfbb   :  { %v3339_v36 = vadd.f32 %v3335_v24, %v3298_v28 }
 0xfbd   :  { %7131 = vtanh.f32 %v3339_v36  ;;  %v3345_v58 = vmul.f32 0.5, %v3339_v36 }
 0xfbf   :  { %v7130_v38 = vpop.eup %7129  ;;  %7133 = vtanh.f32 %v3345_v58 }
 0xfc0   :  { %v3342_v41 = vadd.f32 1.0, %v7130_v38  ;;  %v3330_v42 = vpop.f32.mrf.mxu3 }
 0xfc2   :  { %v3343_v46 = vmul.f32 0.5, %v3342_v41 }
 0xfc3   :  { %v7132_v49 = vpop.eup %7131 }
 0xfc4   :  { %v3353_v55 = vmul.f32 %v7132_v49, %v3343_v46  ;;  %v3352_v56 = vmul.f32 %v3350_v44, %v3343_v46  ;;  %v3436_v46 = vld [vmem:[#allocation3 + $0x30] sm:$0xc0] }
 0xfc5   :  { %v7134_v61 = vpop.eup %7133 }
 0xfc6   :  { %3355 = vrot.lane.b32.xlu0 %v3353_v55, %s7393_s26  ;;  %v3347_v4 = vadd.f32 1.0, %v7134_v61 }
 0xfc8   :  { %v3348_v45 = vmul.f32 0.5, %v3347_v4 }
0x1038   :  { %v3356_v60 = vpop.permute.xlu0 %3355 }
0x1039   :  { %v3358_v40 = vadd.f32 %v3356_v60, %v3352_v56  ;;  %v3437_v56 = vld [vmem:[#allocation3 + $0x18] sm:$0xc0] }
0x103b   :  { %7135 = vtanh.f32 %v3358_v40  ;;  %v3420_v13 = vrot.slane %v3358_v40, 6 }
0x1041   :  { %v7136_v51 = vpop.eup %7135 }
0x1042   :  { %v8813_v54 = vmul.f32 %v7136_v51, %v3348_v45 }
0x1044   :  { %v3368_v39 = vpack.c.bf16 %v8813_v54, %v8813_v54 }
0x1046   :  { %v3370_v63 = vrot.slane %v3368_v39, 1 }
0x1048   :  { %3371 = vrot.lane.b32.xlu1 %v3370_v63, %s7393_s26 }
0x10ba   :  { %v3372_v18 = vpop.permute.xlu1 %3371 }
0x10bb   :  { %6573 = vmatmul.msk.bf16.vlgmr.msrb.gmra.mxu0 %vm2692_vm3, %v3372_v18  ;;  %6574 = vmatmul.msk.bf16.vlgmr.msrb.gmra.mxu2 %vm2692_vm3, %v3372_v18 }
0x10bc   :  { %3653 = vmatpush.bf16.msrb.mxu0 %v8458_v29  ;;  %3666 = vmatpush.bf16.msrb.mxu2 %v8571_v53 }
0x10c0   :  { %3654 = vmatpush.bf16.msrb.mxu0 %v8479_v62  ;;  %3667 = vmatpush.bf16.msrb.mxu2 %v8582_v23 }
0x10c4   :  { %3655 = vmatpush.bf16.msrb.mxu0 %v8500_v57  ;;  %3668 = vmatpush.bf16.msrb.mxu2 %v8597_v33 }
0x10c8   :  { %3656 = vmatpush.bf16.msrb.mxu0 %v8517_v32  ;;  %3669 = vmatpush.bf16.msrb.mxu2 %v8608_v37 }
0x1138   :  { %v3385_v16 = vpop.f32.mrf.mxu0 }
0x1139   :  { %v3404_v17 = vrot.slane %v3385_v16, 4 }
0x113b   :  { %v3408_v48 = vadd.f32 %v3404_v17, %v3366_v1 }
0x113d   :  { %v3410_v2 = vmul.f32 0.5, %v3408_v48 }
0x113e   :  { %v3398_v30 = vpop.f32.mrf.mxu2 }
0x113f   :  { %7137 = vtanh.f32 %v3410_v2  ;;  %v3405_v43 = vrot.slane %v3398_v30, 4  ;;  %v3506_v30 = vld [vmem:[#allocation3 + $0x20] sm:$0x3] }
0x1140   :  { %v3387_v3 = vpop.f32.mrf.mxu0 }
0x1141   :  { %v3409_v9 = vadd.f32 %v3405_v43, %v3367_v7 }
0x1143   :  { %7139 = vtanh.f32 %v3409_v9  ;;  %v3415_v15 = vmul.f32 0.5, %v3409_v9  ;;  %v3507_v9 = vld [vmem:[#allocation3 + $0x38] sm:$0x3] }
0x1145   :  { %v7138_v12 = vpop.eup %7137  ;;  %7141 = vtanh.f32 %v3415_v15 }
0x1146   :  { %v3412_v0 = vadd.f32 1.0, %v7138_v12  ;;  %v3400_v11 = vpop.f32.mrf.mxu2 }
0x1148   :  { %v3413_v14 = vmul.f32 0.5, %v3412_v0 }
0x1149   :  { %v7140_v25 = vpop.eup %7139 }
0x114a   :  { %v3423_v21 = vmul.f32 %v7140_v25, %v3413_v14  ;;  %v3422_v22 = vmul.f32 %v3420_v13, %v3413_v14 }
0x114b   :  { %v7142_v5 = vpop.eup %7141 }
0x114c   :  { %3425 = vrot.lane.b32.xlu2 %v3423_v21, %s7393_s26  ;;  %v3417_v26 = vadd.f32 1.0, %v7142_v5 }
0x114e   :  { %v3418_v24 = vmul.f32 0.5, %v3417_v26 }
0x11a6   :  { %v3426_v6 = vpop.permute.xlu2 %3425 }
0x11a7   :  { %v3428_v47 = vadd.f32 %v3426_v6, %v3422_v22 }
0x11a9   :  { %7143 = vtanh.f32 %v3428_v47 }
0x11af   :  { %v7144_v28 = vpop.eup %7143 }
0x11b0   :  { %v8829_v35 = vmul.f32 %v7144_v28, %v3418_v24 }
0x11b2   :  { %v3438_v36 = vpack.c.bf16 %v8829_v35, %v8829_v35 }
0x11b4   :  { %v3440_v38 = vrot.slane %v3438_v36, 2 }
0x11b6   :  { %3441 = vrot.lane.b32.xlu0 %v3440_v38, %s7393_s26 }
0x1228   :  { %v3442_v41 = vpop.permute.xlu0 %3441 }
0x1229   :  { %6575 = vmatmul.msk.bf16.vlgmr.msrb.gmra.mxu1 %vm2692_vm3, %v3442_v41  ;;  %6576 = vmatmul.msk.bf16.vlgmr.msra.gmra.mxu3 %vm2692_vm3, %v3442_v41 }
0x122a   :  { %3723 = vmatpush.bf16.msrb.mxu1 %v8458_v29  ;;  %3736 = vmatpush.bf16.msra.mxu3 %v8571_v53 }
0x122e   :  { %3724 = vmatpush.bf16.msrb.mxu1 %v8479_v62  ;;  %3737 = vmatpush.bf16.msra.mxu3 %v8582_v23 }
0x1232   :  { %3725 = vmatpush.bf16.msrb.mxu1 %v8500_v57  ;;  %3738 = vmatpush.bf16.msra.mxu3 %v8597_v33  ;;  %v3490_v33 = vrot.slane %v3428_v47, 6 }
0x1236   :  { %3726 = vmatpush.bf16.msrb.mxu1 %v8517_v32  ;;  %3739 = vmatpush.bf16.msra.mxu3 %v8608_v37 }
0x12a6   :  { %v3455_v42 = vpop.f32.mrf.mxu1 }
0x12a7   :  { %v3474_v44 = vrot.slane %v3455_v42, 2 }
0x12a9   :  { %v3478_v49 = vadd.f32 %v3474_v44, %v3436_v46 }
0x12ab   :  { %v3480_v55 = vmul.f32 0.5, %v3478_v49 }
0x12ac   :  { %v3468_v29 = vpop.f32.mrf.mxu3 }
0x12ad   :  { %7145 = vtanh.f32 %v3480_v55  ;;  %v3475_v53 = vrot.slane %v3468_v29, 2  ;;  %v3570_v29 = vld [vmem:[#allocation3 + $0x20] sm:$0xc] }
0x12ae   :  { %v3457_v62 = vpop.f32.mrf.mxu1 }
0x12af   :  { %v3479_v58 = vadd.f32 %v3475_v53, %v3437_v56 }
0x12b1   :  { %7147 = vtanh.f32 %v3479_v58  ;;  %v3485_v4 = vmul.f32 0.5, %v3479_v58 }
0x12b3   :  { %v7146_v23 = vpop.eup %7145  ;;  %7149 = vtanh.f32 %v3485_v4 }
0x12b4   :  { %v3482_v57 = vadd.f32 1.0, %v7146_v23  ;;  %v3470_v60 = vpop.f32.mrf.mxu3  ;;  %v3571_v23 = vld [vmem:[#allocation3 + $0x38] sm:$0xc] }
0x12b6   :  { %v3483_v61 = vmul.f32 0.5, %v3482_v57 }
0x12b7   :  { %v7148_v32 = vpop.eup %7147 }
0x12b8   :  { %v3493_v40 = vmul.f32 %v7148_v32, %v3483_v61  ;;  %v3492_v37 = vmul.f32 %v3490_v33, %v3483_v61 }
0x12b9   :  { %v7150_v51 = vpop.eup %7149 }
0x12ba   :  { %3495 = vrot.lane.b32.xlu1 %v3493_v40, %s7393_s26  ;;  %v3487_v63 = vadd.f32 1.0, %v7150_v51 }
0x12bc   :  { %v3488_v18 = vmul.f32 0.5, %v3487_v63 }
0x132c   :  { %v3496_v45 = vpop.permute.xlu1 %3495 }
0x132d   :  { %v3498_v39 = vadd.f32 %v3496_v45, %v3492_v37 }
0x132f   :  { %7151 = vtanh.f32 %v3498_v39  ;;  %v3554_v25 = vrot.slane %v3498_v39, 6 }
0x1335   :  { %v7152_v16 = vpop.eup %7151 }
0x1336   :  { %v8845_v17 = vmul.f32 %v7152_v16, %v3488_v18 }
0x1338   :  { %v3508_v1 = vpack.c.bf16 %v8845_v17, %v8845_v17 }
0x133a   :  { %v3510_v48 = vrot.slane %v3508_v1, 3 }
0x133c   :  { %3511 = vrot.lane.b32.xlu2 %v3510_v48, %s7393_s26 }
0x1396   :  { %v3512_v2 = vpop.permute.xlu2 %3511 }
0x1397   :  { %6577 = vmatmul.msk.bf16.vlgmr.msra.gmra.mxu0 %vm2692_vm3, %v3512_v2  ;;  %6578 = vmatmul.msk.bf16.vlgmr.msra.gmra.mxu2 %vm2692_vm3, %v3512_v2 }
0x1414   :  { %v3525_v43 = vpop.f32.mrf.mxu0 }
0x1415   :  { %v3542_v7 = vadd.f32 %v3525_v43, %v3506_v30 }
0x1417   :  { %v3544_v3 = vmul.f32 0.5, %v3542_v7 }
0x1419   :  { %7153 = vtanh.f32 %v3544_v3 }
0x141a   :  { %v3538_v12 = vpop.f32.mrf.mxu2 }
0x141b   :  { %v3543_v0 = vadd.f32 %v3538_v12, %v3507_v9 }
0x141c   :  { %v3527_v11 = vpop.f32.mrf.mxu0 }
0x141d   :  { %7155 = vtanh.f32 %v3543_v0  ;;  %v3549_v47 = vmul.f32 0.5, %v3543_v0  ;;  %v3639_v0 = vld [vmem:[#allocation3 + $0x20] sm:$0x30] }
0x141f   :  { %v7154_v13 = vpop.eup %7153  ;;  %7157 = vtanh.f32 %v3549_v47 }
0x1420   :  { %v3546_v14 = vadd.f32 1.0, %v7154_v13 }
0x1422   :  { %v3547_v21 = vmul.f32 0.5, %v3546_v14  ;;  %v3540_v22 = vpop.f32.mrf.mxu2 }
0x1423   :  { %v7156_v15 = vpop.eup %7155 }
0x1424   :  { %v3557_v6 = vmul.f32 %v7156_v15, %v3547_v21  ;;  %v3556_v5 = vmul.f32 %v3554_v25, %v3547_v21  ;;  %v3640_v21 = vld [vmem:[#allocation3 + $0x38] sm:$0x30] }
0x1425   :  { %v7158_v24 = vpop.eup %7157 }
0x1426   :  { %3559 = vrot.lane.b32.xlu0 %v3557_v6, %s7393_s26  ;;  %v3551_v36 = vadd.f32 1.0, %v7158_v24 }
0x1428   :  { %v3552_v38 = vmul.f32 0.5, %v3551_v36 }
0x1498   :  { %v3560_v26 = vpop.permute.xlu0 %3559 }
0x1499   :  { %v3562_v28 = vadd.f32 %v3560_v26, %v3556_v5 }
0x149b   :  { %7159 = vtanh.f32 %v3562_v28  ;;  %v3623_v40 = vrot.slane %v3562_v28, 6 }
0x14a1   :  { %v7160_v41 = vpop.eup %7159 }
0x14a2   :  { %v8853_v42 = vmul.f32 %v7160_v41, %v3552_v38 }
0x14a4   :  { %v3572_v44 = vpack.c.bf16 %v8853_v42, %v8853_v42 }
0x14a6   :  { %3574 = vrot.lane.b32.xlu1 %v3572_v44, %s7393_s26 }
0x1518   :  { %v3575_v46 = vpop.permute.xlu1 %3574 }
0x1519   :  { %6579 = vmatmul.msk.bf16.vlgmr.msra.gmra.mxu1 %vm2692_vm3, %v3575_v46  ;;  %6580 = vmatmul.msk.bf16.vlgmr.msrb.gmra.mxu3 %vm2692_vm3, %v3575_v46 }
0x1596   :  { %v3588_v49 = vpop.f32.mrf.mxu1 }
0x1597   :  { %v3607_v55 = vrot.slane %v3588_v49, 6 }
0x1599   :  { %v3611_v53 = vadd.f32 %v3607_v55, %v3570_v29 }
0x159b   :  { %v3613_v56 = vmul.f32 0.5, %v3611_v53 }
0x159c   :  { %v3601_v62 = vpop.f32.mrf.mxu3 }
0x159d   :  { %7161 = vtanh.f32 %v3613_v56  ;;  %v3608_v58 = vrot.slane %v3601_v62, 6 }
0x159e   :  { %v3590_v57 = vpop.f32.mrf.mxu1 }
0x159f   :  { %v3612_v60 = vadd.f32 %v3608_v58, %v3571_v23 }
0x15a1   :  { %7163 = vtanh.f32 %v3612_v60  ;;  %v3618_v39 = vmul.f32 0.5, %v3612_v60 }
0x15a3   :  { %v7162_v33 = vpop.eup %7161  ;;  %7165 = vtanh.f32 %v3618_v39 }
0x15a4   :  { %v3615_v61 = vadd.f32 1.0, %v7162_v33  ;;  %v3603_v32 = vpop.f32.mrf.mxu3 }
0x15a6   :  { %v3616_v37 = vmul.f32 0.5, %v3615_v61  ;;  %v3709_v61 = vld [vmem:[#allocation3 + $0x20] sm:$0xc0] }
0x15a7   :  { %v7164_v4 = vpop.eup %7163 }
0x15a8   :  { %v3626_v45 = vmul.f32 %v7164_v4, %v3616_v37  ;;  %v3625_v51 = vmul.f32 %v3623_v40, %v3616_v37 }
0x15a9   :  { %v7166_v18 = vpop.eup %7165 }
0x15aa   :  { %3628 = vrot.lane.b32.xlu2 %v3626_v45, %s7393_s26  ;;  %v3620_v1 = vadd.f32 1.0, %v7166_v18  ;;  %v3710_v45 = vld [vmem:[#allocation3 + $0x38] sm:$0xc0] }
0x15ac   :  { %v3621_v48 = vmul.f32 0.5, %v3620_v1 }
0x1604   :  { %v3629_v63 = vpop.permute.xlu2 %3628 }
0x1605   :  { %v3631_v16 = vadd.f32 %v3629_v63, %v3625_v51 }
0x1607   :  { %7167 = vtanh.f32 %v3631_v16  ;;  %v3693_v26 = vrot.slane %v3631_v16, 6 }
0x160d   :  { %v7168_v2 = vpop.eup %7167 }
0x160e   :  { %v3633_v30 = vmul.f32 %v7168_v2, %v3621_v48 }
0x1610   :  { %v3641_v43 = vpack.c.bf16 %v3633_v30, %v3633_v30 }
0x1612   :  { %v3643_v7 = vrot.slane %v3641_v43, 1 }
0x1614   :  { %3644 = vrot.lane.b32.xlu0 %v3643_v7, %s7393_s26 }
0x1686   :  { %v3645_v3 = vpop.permute.xlu0 %3644 }
0x1687   :  { %6581 = vmatmul.msk.bf16.vlgmr.msrb.gmra.mxu0 %vm2692_vm3, %v3645_v3  ;;  %6582 = vmatmul.msk.bf16.vlgmr.msrb.gmra.mxu2 %vm2692_vm3, %v3645_v3 }
0x1704   :  { %v3658_v9 = vpop.f32.mrf.mxu0 }
0x1705   :  { %v3677_v12 = vrot.slane %v3658_v9, 4 }
0x1707   :  { %v3681_v11 = vadd.f32 %v3677_v12, %v3639_v0 }
0x1709   :  { %v3683_v13 = vmul.f32 0.5, %v3681_v11 }
0x170a   :  { %v3671_v14 = vpop.f32.mrf.mxu2 }
0x170b   :  { %7169 = vtanh.f32 %v3683_v13  ;;  %v3678_v25 = vrot.slane %v3671_v14, 4 }
0x170c   :  { %v3660_v22 = vpop.f32.mrf.mxu0 }
0x170d   :  { %v3682_v15 = vadd.f32 %v3678_v25, %v3640_v21  ;;  %v7014_v21 = vld [vmem:[%s9445_s8 + $0x18] sm:$0xff]  ;;  %v7013_v22 = vld [vmem:[%s9445_s8 + $0x10] sm:$0xff] }
0x170e   :  { %3915 = vmatpush.bf16.msra.mxu1 %v7014_v21 }
0x170f   :  { %7171 = vtanh.f32 %v3682_v15  ;;  %v3688_v41 = vmul.f32 0.5, %v3682_v15  ;;  %v7011_v15 = vld [vmem:[%s9445_s8] sm:$0xff] }
0x1711   :  { %v7170_v6 = vpop.eup %7169  ;;  %7173 = vtanh.f32 %v3688_v41  ;;  %v7329_v41 = vld [vmem:[%s9440_s3] sm:$0xff] }
0x1712   :  { %v3673_v5 = vpop.f32.mrf.mxu2  ;;  %v3685_v47 = vadd.f32 1.0, %v7170_v6  ;;  %3916 = vmatpush.bf16.msra.mxu1 %v7013_v22 }
0x1714   :  { %v3686_v24 = vmul.f32 0.5, %v3685_v47 }
0x1715   :  { %v7172_v28 = vpop.eup %7171 }
0x1716   :  { %v3696_v36 = vmul.f32 %v7172_v28, %v3686_v24  ;;  %v3695_v38 = vmul.f32 %v3693_v26, %v3686_v24  ;;  %v7018_v24 = vld [vmem:[%s9446_s9 + $0x18] sm:$0xff] }
0x1717   :  { %v7174_v46 = vpop.eup %7173  ;;  %3866 = vmatpush.bf16.msra.mxu2 %v7018_v24  ;;  %v6677_v24 = vld [vmem:[%s9450_s13 + $0x38] sm:$0xf0] }
0x1718   :  { %3698 = vrot.lane.b32.xlu1 %v3696_v36, %s7393_s26  ;;  %v3690_v55 = vadd.f32 1.0, %v7174_v46 }
0x171a   :  { %v3691_v29 = vmul.f32 0.5, %v3690_v55  ;;  %v7332_v55 = vld [vmem:[%s9440_s3 + $0x18] sm:$0xff] }
0x1720   :  { %3566 = vrot.lane.b32.xlu1 %v8853_v42, %s7393_s26 }
0x1728   :  { %3432 = vrot.lane.b32.xlu1 %v8829_v35, %s7393_s26 }
0x1730   :  { %3089 = vrot.lane.b32.xlu1 %v8749_v10, %s7393_s26 }
0x1738   :  { %2743 = vrot.lane.b32.xlu1 %v8657_v8, %s7393_s26 }
0x178a   :  { %v3699_v44 = vpop.permute.xlu1 %3698 }
0x178b   :  { %v3701_v49 = vadd.f32 %v3699_v44, %v3695_v38  ;;  %v7330_v44 = vld [vmem:[%s9440_s3 + $0x8] sm:$0xff] }
0x178d   :  { %7175 = vtanh.f32 %v3701_v49  ;;  %v3763_v1 = vrot.slane %v3701_v49, 6  ;;  %v7331_v49 = vld [vmem:[%s9440_s3 + $0x10] sm:$0xff] }
0x1792   :  { %v3567_v53 = vpop.permute.xlu1 %3566 }
0x1793   :  { %v7176_v42 = vpop.eup %7175  ;;  %3569 = vst.msk [vmem:[#allocation4 + $0x18] sm:$0x3] %vm2746_vm4, %v3567_v53  ;;  %v7016_v53 = vld [vmem:[%s9446_s9 + $0x8] sm:$0xff] }
0x1794   :  { %v3703_v35 = vmul.f32 %v7176_v42, %v3691_v29  ;;  %v7017_v29 = vld [vmem:[%s9446_s9 + $0x10] sm:$0xff]  ;;  %v7015_v42 = vld [vmem:[%s9446_s9] sm:$0xff] }
0x1795   :  { %3867 = vmatpush.bf16.msra.mxu2 %v7017_v29  ;;  %v7023_v29 = vld [vmem:[%s9450_s13 + $0x4] sm:$0xf] }
0x1796   :  { %v3711_v56 = vpack.c.bf16 %v3703_v35, %v3703_v35 }
0x1798   :  { %v3713_v62 = vrot.slane %v3711_v56, 2 }
0x1799   :  { %3868 = vmatpush.bf16.msra.mxu2 %v7016_v53  ;;  %v6653_v53 = vld [vmem:[%s9450_s13 + $0x8] sm:$0xf0] }
0x179a   :  { %3714 = vrot.lane.b32.xlu2 %v3713_v62, %s7393_s26  ;;  %v3433_v8 = vpop.permute.xlu1 %3432 }
0x179b   :  { %3435 = vst.msk [vmem:[#allocation4 + $0x10] sm:$0x30] %vm2887_vm5, %v3433_v8 }
0x179d   :  { %3869 = vmatpush.bf16.msra.mxu2 %v7015_v42  ;;  %v9077_v42 = vor.u32 %v7023_v29, %v6653_v53 }
0x17a2   :  { %3635 = vrot.lane.b32.xlu2 %v3633_v30, %s7393_s26  ;;  %v3090_v10 = vpop.permute.xlu1 %3089 }
0x17a3   :  { %3092 = vst.msk [vmem:[#allocation4 + $0x8] sm:$0xc] %vm2816_vm6, %v3090_v10 }
0x17aa   :  { %3293 = vrot.lane.b32.xlu2 %v8797_v20, %s7393_s26  ;;  %v2744_v58 = vpop.permute.xlu1 %2743 }
0x17ab   :  { %2747 = vst.msk [vmem:[#allocation4] sm:$0x3] %vm2746_vm4, %v2744_v58 }
0x17b2   :  { %3502 = vrot.lane.b32.xlu2 %v8845_v17, %s7393_s26 }
0x17ba   :  { %3159 = vrot.lane.b32.xlu2 %v8765_v34, %s7393_s26 }
0x17c2   :  { %2813 = vrot.lane.b32.xlu2 %v8673_v50, %s7393_s26 }
0x17f4   :  { %v3715_v23 = vpop.permute.xlu2 %3714 }
0x17f5   :  { %6583 = vmatmul.msk.bf16.vlgmr.msrb.gmra.mxu1 %vm2692_vm3, %v3715_v23  ;;  %6584 = vmatmul.msk.bf16.vlgmr.msra.gmra.mxu3 %vm2692_vm3, %v3715_v23  ;;  %v6635_v23 = vld [vmem:[%s9448_s11 + $0x10] sm:$0xf] }
0x17fc   :  { %v3636_v57 = vpop.permute.xlu2 %3635 }
0x17fd   :  { %3638 = vst.msk [vmem:[#allocation4 + $0x18] sm:$0xc] %vm2816_vm6, %v3636_v57  ;;  %v7022_v57 = vld [vmem:[%s9448_s11 + $0x14] sm:$0xf0] }
0x1804   :  { %v3294_v20 = vpop.permute.xlu2 %3293 }
0x1805   :  { %3296 = vst.msk [vmem:[#allocation4 + $0x10] sm:$0x3] %vm2746_vm4, %v3294_v20  ;;  %v7021_v20 = vld [vmem:[%s9448_s11 + $0x14] sm:$0xf] }
0x180c   :  { %v3503_v60 = vpop.permute.xlu2 %3502 }
0x180d   :  { %3505 = vst.msk [vmem:[#allocation4 + $0x10] sm:$0xc0] %vm2958_vm7, %v3503_v60  ;;  %v6636_v60 = vor.u32 %v7022_v57, %v6635_v23 }
0x180f   :  { %3986 = vmatpush.bf16.msrb.mxu3 %v6636_v60 }
0x1814   :  { %v3160_v17 = vpop.permute.xlu2 %3159 }
0x1815   :  { %3162 = vst.msk [vmem:[#allocation4 + $0x8] sm:$0x30] %vm2887_vm5, %v3160_v17  ;;  %v6637_v17 = vld [vmem:[%s9448_s11 + $0x18] sm:$0xf0] }
0x181c   :  { %v2814_v34 = vpop.permute.xlu2 %2813 }
0x181d   :  { %2817 = vst.msk [vmem:[#allocation4] sm:$0xc] %vm2816_vm6, %v2814_v34  ;;  %v6640_v34 = vor.u32 %v7021_v20, %v6637_v17 }
0x1872   :  { %v3728_v50 = vpop.f32.mrf.mxu1 }
0x1873   :  { %v3747_v33 = vrot.slane %v3728_v50, 2  ;;  %v6627_v50 = vld [vmem:[%s9448_s11] sm:$0xf] }
0x1875   :  { %v3751_v32 = vadd.f32 %v3747_v33, %v3709_v61  ;;  %v7020_v33 = vld [vmem:[%s9448_s11 + $0x4] sm:$0xf0]  ;;  %v7019_v61 = vld [vmem:[%s9448_s11 + $0x4] sm:$0xf] }
0x1877   :  { %v3753_v40 = vmul.f32 0.5, %v3751_v32  ;;  %v6628_v32 = vor.u32 %v7020_v33, %v6627_v50 }
0x1878   :  { %v3741_v37 = vpop.f32.mrf.mxu3 }
0x1879   :  { %7177 = vtanh.f32 %v3753_v40  ;;  %v3748_v4 = vrot.slane %v3741_v37, 2  ;;  %v6629_v40 = vld [vmem:[%s9448_s11 + $0x8] sm:$0xf0]  ;;  %3987 = vmatpush.bf16.msrb.mxu3 %v6628_v32  ;;  %s7395_s11 = smov 128  }
0x187a   :  { %v3730_v51 = vpop.f32.mrf.mxu1  ;;  %v6632_v37 = vor.u32 %v7019_v61, %v6629_v40 }
0x187b   :  { %v3752_v39 = vadd.f32 %v3748_v4, %v3710_v45  ;;  %v6675_v4 = vld [vmem:[%s9450_s13 + $0x30] sm:$0xf]  ;;  %v7030_v45 = vld [vmem:[%s9450_s13 + $0x34] sm:$0xf0] }
0x187c   :  { %v8988_v51 = vor.u32 %v7030_v45, %v6675_v4  ;;  %v3940_v4 = vld [vmem:[%s9440_s3] sm:$0xff] }
0x187d   :  { %7179 = vtanh.f32 %v3752_v39  ;;  %v3758_v7 = vmul.f32 0.5, %v3752_v39  ;;  %v6667_v39 = vld [vmem:[%s9450_s13 + $0x20] sm:$0xf] }
0x187f   :  { %v7178_v63 = vpop.eup %7177  ;;  %7181 = vtanh.f32 %v3758_v7 }
0x1880   :  { %v3755_v18 = vadd.f32 1.0, %v7178_v63  ;;  %v3743_v16 = vpop.f32.mrf.mxu3  ;;  %v7028_v63 = vld [vmem:[%s9450_s13 + $0x24] sm:$0xf0] }
0x1881   :  { %v6659_v16 = vld [vmem:[%s9450_s13 + $0x10] sm:$0xf] }
0x1882   :  { %v3756_v48 = vmul.f32 0.5, %v3755_v18  ;;  %v8998_v18 = vor.u32 %v7028_v63, %v6667_v39 }
0x1883   :  { %v7180_v2 = vpop.eup %7179 }
0x1884   :  { %v3766_v30 = vmul.f32 %v7180_v2, %v3756_v48  ;;  %v3765_v43 = vmul.f32 %v3763_v1, %v3756_v48  ;;  %v7026_v1 = vld [vmem:[%s9450_s13 + $0x14] sm:$0xf0] }
0x1885   :  { %v7182_v9 = vpop.eup %7181  ;;  %v9008_v48 = vor.u32 %v7026_v1, %v6659_v16 }
0x1886   :  { %3768 = vrot.lane.b32.xlu0 %v3766_v30, %s7393_s26  ;;  %v3760_v0 = vadd.f32 1.0, %v7182_v9  ;;  %v6651_v30 = vld [vmem:[%s9450_s13] sm:$0xf] }
0x1888   :  { %v3761_v13 = vmul.f32 0.5, %v3760_v0  ;;  %v7055_v0 = vld [vmem:[%s9447_s10] ss:$0 sm:$0xff] }
0x188e   :  { %3705 = vrot.lane.b32.xlu0 %v3703_v35, %s7393_s26 }
0x1896   :  { %3362 = vrot.lane.b32.xlu0 %v8813_v54, %s7393_s26 }
0x189e   :  { %3020 = vrot.lane.b32.xlu0 %v8733_v52, %s7393_s26 }
0x18a6   :  { %3229 = vrot.lane.b32.xlu0 %v8781_v31, %s7393_s26 }
0x18ae   :  { %2884 = vrot.lane.b32.xlu0 %v8701_v59, %s7393_s26 }
0x18f8   :  { %v3769_v3 = vpop.permute.xlu0 %3768 }
0x18f9   :  { %v3771_v12 = vadd.f32 %v3769_v3, %v3765_v43  ;;  %v7024_v43 = vld [vmem:[%s9450_s13 + $0x4] sm:$0xf0] }
0x18fa   :  { %v9018_v7 = vor.u32 %v7024_v43, %v6651_v30 }
0x18fb   :  { %7183 = vtanh.f32 %v3771_v12 }
0x1900   :  { %v3706_v11 = vpop.permute.xlu0 %3705 }
0x1901   :  { %v7184_v14 = vpop.eup %7183  ;;  %3708 = vst.msk [vmem:[#allocation4 + $0x18] sm:$0x30] %vm2887_vm5, %v3706_v11 }
0x1902   :  { %v3773_v54 = vmul.f32 %v7184_v14, %v3761_v13 }
0x1904   :  { %3775 = vrot.lane.b32.xlu1 %v3773_v54, %s7393_s26 }
0x1908   :  { %v3363_v52 = vpop.permute.xlu0 %3362 }
0x1909   :  { %3365 = vst.msk [vmem:[#allocation4 + $0x10] sm:$0xc] %vm2816_vm6, %v3363_v52 }
0x190c   :  { %2955 = vrot.lane.b32.xlu1 %v8717_v27, %s7393_s26  ;;  %v7012_v27 = vld [vmem:[%s9445_s8 + $0x8] sm:$0xff] }
0x190d   :  { %3917 = vmatpush.bf16.msra.mxu1 %v7012_v27 }
0x1910   :  { %v3021_v59 = vpop.permute.xlu0 %3020  ;;  %v3781_v26 = vld [vmem:[#allocation4 + $0x10] sm:$0xff] }
0x1911   :  { %3023 = vst.msk [vmem:[#allocation4 + $0x8] sm:$0x3] %vm2746_vm4, %v3021_v59  ;;  %3918 = vmatpush.bf16.msra.mxu1 %v7011_v15 }
0x1915   :  { %4121 = vmatpush.bf16.msrb.mxu1 %v8988_v51 }
0x1918   :  { %v3230_v31 = vpop.permute.xlu0 %3229 }
0x1919   :  { %3232 = vst.msk [vmem:[#allocation4 + $0x8] sm:$0xc0] %vm2958_vm7, %v3230_v31  ;;  %4122 = vmatpush.bf16.msrb.mxu1 %v8998_v18 }
0x191d   :  { %4123 = vmatpush.bf16.msrb.mxu1 %v9008_v48 }
0x1920   :  { %v2885_v25 = vpop.permute.xlu0 %2884  ;;  %v3780_v28 = vld [vmem:[#allocation4 + $0x8] sm:$0xff] }
0x1921   :  { %2888 = vst.msk [vmem:[#allocation4] sm:$0x30] %vm2887_vm5, %v2885_v25  ;;  %4124 = vmatpush.bf16.msrb.mxu1 %v9018_v7 }
0x1976   :  { %v3776_v6 = vpop.permute.xlu1 %3775 }
0x1977   :  { %3778 = vst.msk [vmem:[#allocation4 + $0x18] sm:$0xc0] %vm2958_vm7, %v3776_v6 }
0x197e   :  { %v2956_v5 = vpop.permute.xlu1 %2955  ;;  %v3782_v47 = vld [vmem:[#allocation4 + $0x18] sm:$0xff] }
0x197f   :  { %2959 = vst.msk [vmem:[#allocation4] sm:$0xc0] %vm2958_vm7, %v2956_v5  ;;  %3795 = vmatpush.msra.mxu0 %v3782_v47  ;;  %v3813_v46 = vpack.c.bf16 %v3782_v47, %v3781_v26 }
0x1981   :  { %3796 = vmatpush.msra.mxu0 %v3781_v26  ;;  %v7029_v26 = vld [vmem:[%s9450_s13 + $0x34] sm:$0xf] }
0x1983   :  { %3797 = vmatpush.msra.mxu0 %v3780_v28 }
0x1986   :  { %v3779_v36 = vld [vmem:[#allocation4] sm:$0xff] }
0x1987   :  { %3798 = vmatpush.msra.mxu0 %v3779_v36  ;;  %v3812_v38 = vpack.c.bf16 %v3780_v28, %v3779_v36  ;;  %v9050_v28 = vor.u32 %v7029_v26, %v6677_v24  ;;  %v7027_v36 = vld [vmem:[%s9450_s13 + $0x24] sm:$0xf] }
0x1988   :  { %6585 = vmatmul.msk.f32.vlgmr.msra.gmra.mxu0 %vm2596_vm2, %v7329_v41 }
0x1989   :  { %6623 = vmatmul.msk.bf16.vlgmr.msra.gmra.mxu1 %vm2692_vm3, %v3812_v38  ;;  %4005 = vmatpush.bf16.msrb.mxu0 %v6640_v34  ;;  %v6669_v38 = vld [vmem:[%s9450_s13 + $0x28] sm:$0xf0] }
0x198a   :  { %4181 = vmatpush.bf16.msra.mxu1 %v8988_v51  ;;  %4134 = vmatpush.bf16.msra.mxu3 %v9050_v28  ;;  %v9059_v41 = vor.u32 %v7027_v36, %v6669_v38 }
0x198d   :  { %4006 = vmatpush.bf16.msrb.mxu0 %v6632_v37 }
0x198e   :  { %4182 = vmatpush.bf16.msra.mxu1 %v8998_v18  ;;  %4135 = vmatpush.bf16.msra.mxu3 %v9059_v41 }
0x1990   :  { %6586 = vmatmul.msk.f32.gmra.mxu0 %vm2596_vm2, %v7330_v44  ;;  %v7025_v44 = vld [vmem:[%s9450_s13 + $0x14] sm:$0xf] }
0x1991   :  { %4251 = vmatpush.bf16.msra.mxu0 %v8988_v51 }
0x1992   :  { %4183 = vmatpush.bf16.msra.mxu1 %v9008_v48 }
0x1995   :  { %4252 = vmatpush.bf16.msra.mxu0 %v8998_v18 }
0x1996   :  { %4184 = vmatpush.bf16.msra.mxu1 %v9018_v7 }
0x1998   :  { %6587 = vmatmul.msk.f32.gmra.mxu0 %vm2596_vm2, %v7331_v49 }
0x1999   :  { %6624 = vmatmul.msk.bf16.gmra.mxu1 %vm2692_vm3, %v3813_v46  ;;  %4253 = vmatpush.bf16.msra.mxu0 %v9008_v48  ;;  %v6661_v46 = vld [vmem:[%s9450_s13 + $0x18] sm:$0xf0] }
0x199d   :  { %4254 = vmatpush.bf16.msra.mxu0 %v9018_v7 }
0x19a0   :  { %6588 = vmatmul.msk.f32.gmra.mxu0 %vm2596_vm2, %v7332_v55  ;;  %v9068_v55 = vor.u32 %v7025_v44, %v6661_v46 }
0x19a2   :  { %4136 = vmatpush.bf16.msra.mxu3 %v9068_v55 }
0x19a6   :  { %4137 = vmatpush.bf16.msra.mxu3 %v9077_v42 }
0x19a9   :  { %4125 = vmatmul.bf16.vlgmr.msrb.gmra.mxu1 %v7392_v19 }
0x19aa   :  { %4321 = vmatpush.bf16.msrb.mxu1 %v8988_v51 }
0x19ae   :  { %4322 = vmatpush.bf16.msrb.mxu1 %v8998_v18 }
0x19b2   :  { %4323 = vmatpush.bf16.msrb.mxu1 %v9008_v48 }
0x19b6   :  { %4324 = vmatpush.bf16.msrb.mxu1 %v9018_v7 }
0x1a05   :  { %v3800_v35 = vpop.f32.mrf.mxu0 }
0x1a06   :  { %v3920_v2 = vpop.f32.mrf.mxu1 }
0x1a0d   :  { %v3803_v56 = vpop.f32.mrf.mxu0 }
0x1a0e   :  { %v3822_v62 = vpack.c.bf16 %v3803_v56, %v3800_v35  ;;  %v3922_v9 = vpop.f32.mrf.mxu1  ;;  %v3948_v56 = vld [vmem:[%s9449_s12] sm:$0x3] }
0x1a10   :  { %6605 = vmatmul.msk.bf16.vlgmr.msra.gmra.mxu2 %vm2692_vm3, %v3822_v62  ;;  %v3950_v62 = vperm.slane %v3948_v56, 0 }
0x1a15   :  { %v3806_v8 = vpop.f32.mrf.mxu0 }
0x1a16   :  { %v3925_v59 = vpop.f32.mrf.mxu1 }
0x1a1d   :  { %v3809_v10 = vpop.f32.mrf.mxu0 }
0x1a1e   :  { %v3823_v58 = vpack.c.bf16 %v3809_v10, %v3806_v8  ;;  %v3927_v21 = vpop.f32.mrf.mxu1 }
0x1a20   :  { %6606 = vmatmul.msk.bf16.gmra.mxu2 %vm2692_vm3, %v3823_v58 }
0x1a26   :  { %v9042_v47 = vpop.f32.mrf.mxu1 }
0x1a2e   :  { %v4128_v49 = vpop.f32.mrf.mxu1 }
0x1a93   :  { %v3871_v3 = vpop.f32.mrf.mxu2 }
0x1a94   :  { %v3921_v12 = vadd.f32 %v3920_v2, %v3871_v3 }
0x1a96   :  { %v3934_v14 = vadd.f32 %v7055_v0, %v3921_v12 }
0x1a9b   :  { %v3873_v11 = vpop.f32.mrf.mxu2 }
0x1a9c   :  { %v3923_v13 = vadd.f32 %v3922_v9, %v3873_v11 }
0x1a9e   :  { %v3935_v54 = vadd.f32 %v7055_v0, %v3923_v13 }
0x1aa0   :  { %v3938_v52 = vpack.c.bf16 %v3935_v54, %v3934_v14 }
0x1aa2   :  { %6641 = vmatmul.msk.bf16.vlgmr.msrb.gmra.mxu3 %vm2596_vm2, %v3938_v52  ;;  %6643 = vmatmul.msk.bf16.vlgmr.msrb.gmra.mxu0 %vm2596_vm2, %v3938_v52 }
0x1aa3   :  { %v3876_v31 = vpop.f32.mrf.mxu2  ;;  %4391 = vmatpush.bf16.msrb.mxu0 %v8988_v51  ;;  %4194 = vmatpush.bf16.msrb.mxu3 %v9050_v28 }
0x1aa4   :  { %v3926_v25 = vadd.f32 %v3925_v59, %v3876_v31 }
0x1aa6   :  { %v3936_v15 = vadd.f32 %v7055_v0, %v3926_v25 }
0x1aa7   :  { %4392 = vmatpush.bf16.msrb.mxu0 %v8998_v18  ;;  %4195 = vmatpush.bf16.msrb.mxu3 %v9059_v41 }
0x1aab   :  { %v3878_v22 = vpop.f32.mrf.mxu2  ;;  %4393 = vmatpush.bf16.msrb.mxu0 %v9008_v48  ;;  %4196 = vmatpush.bf16.msrb.mxu3 %v9068_v55 }
0x1aac   :  { %v3928_v27 = vadd.f32 %v3927_v21, %v3878_v22 }
0x1aae   :  { %v3937_v6 = vadd.f32 %v7055_v0, %v3928_v27 }
0x1aaf   :  { %4394 = vmatpush.bf16.msrb.mxu0 %v9018_v7  ;;  %4197 = vmatpush.bf16.msrb.mxu3 %v9077_v42 }
0x1ab0   :  { %v3939_v5 = vpack.c.bf16 %v3937_v6, %v3936_v15 }
0x1ab2   :  { %6642 = vmatmul.msk.bf16.gmra.mxu3 %vm2596_vm2, %v3939_v5  ;;  %6644 = vmatmul.msk.bf16.gmra.mxu0 %vm2596_vm2, %v3939_v5 }
0x1ac2   :  { %4138 = vmatmul.bf16.vlgmr.msra.gmra.mxu3 %v7392_v19  ;;  %v3951_v19 = vperm.slane %v3948_v56, 1 }
0x1ac3   :  { %4334 = vmatpush.bf16.msra.mxu3 %v9050_v28 }
0x1ac7   :  { %4335 = vmatpush.bf16.msra.mxu3 %v9059_v41 }
0x1acb   :  { %4336 = vmatpush.bf16.msra.mxu3 %v9068_v55 }
0x1acf   :  { %4337 = vmatpush.bf16.msra.mxu3 %v9077_v42 }
0x1b1f   :  { %v4008_v35 = vpop.f32.mrf.mxu0 }
0x1b20   :  { %v4009_v40 = vadd.f32 %v4008_v35, %v3951_v19 }
0x1b25   :  { %v3989_v8 = vpop.f32.mrf.mxu3 }
0x1b26   :  { %v3990_v10 = vadd.f32 %v3989_v8, %v3950_v62 }
0x1b27   :  { %v4010_v58 = vpop.f32.mrf.mxu0 }
0x1b28   :  { %4018 = vst [vmem:[#allocation3 + $0x28] sm:$0xff] %v3990_v10  ;;  %v4011_v61 = vadd.f32 %v4010_v58, %v3951_v19 }
0x1b2d   :  { %v3991_v23 = vpop.f32.mrf.mxu3 }
0x1b2e   :  { %v3992_v57 = vadd.f32 %v3991_v23, %v3950_v62  ;;  %v3941_v23 = vld [vmem:[%s9440_s3 + $0x8] sm:$0xff] }
0x1b2f   :  { %v4013_v20 = vpop.f32.mrf.mxu0  ;;  %v4075_v63 = vld [vmem:[#allocation3 + $0x28] sm:$0x3] }
0x1b30   :  { %4019 = vst [vmem:[#allocation3] sm:$0xff] %v3992_v57  ;;  %v4014_v33 = vadd.f32 %v4013_v20, %v3951_v19  ;;  %v4143_v16 = vadd.f32 %v9042_v47, %v4075_v63  ;;  %v4168_v47 = vld [vmem:[#allocation3 + $0x28] sm:$0xc]  ;;  %v3942_v57 = vld [vmem:[%s9440_s3 + $0x10] sm:$0xff] }
0x1b32   :  { %v4145_v1 = vmul.f32 0.5, %v4143_v16 }
0x1b34   :  { %7185 = vtanh.f32 %v4145_v1 }
0x1b35   :  { %v3994_v60 = vpop.f32.mrf.mxu3 }
0x1b36   :  { %v3995_v17 = vadd.f32 %v3994_v60, %v3950_v62  ;;  %v3943_v60 = vld [vmem:[%s9440_s3 + $0x18] sm:$0xff] }
0x1b37   :  { %v4015_v34 = vpop.f32.mrf.mxu0 }
0x1b38   :  { %4020 = vst [vmem:[#allocation3 + $0x30] sm:$0xff] %v3995_v17  ;;  %v4016_v50 = vadd.f32 %v4015_v34, %v3951_v19 }
0x1b3a   :  { %4046 = vmatpush.msrb.mxu2 %v4016_v50  ;;  %v7186_v43 = vpop.eup %7185 }
0x1b3b   :  { %v4147_v9 = vadd.f32 1.0, %v7186_v43 }
0x1b3c   :  { %4047 = vmatpush.msrb.mxu2 %v4014_v33 }
0x1b3d   :  { %v3996_v32 = vpop.f32.mrf.mxu3  ;;  %v4148_v12 = vmul.f32 0.5, %v4147_v9 }
0x1b3e   :  { %v3997_v37 = vadd.f32 %v3996_v32, %v3950_v62  ;;  %4048 = vmatpush.msrb.mxu2 %v4011_v61 }
0x1b3f   :  { %v4154_v14 = vmul.f32 0.0, %v4148_v12 }
0x1b40   :  { %4021 = vst [vmem:[#allocation3 + $0x20] sm:$0xff] %v3997_v37  ;;  %4049 = vmatpush.msrb.mxu2 %v4009_v40 }
0x1b41   :  { %6645 = vmatmul.msk.f32.vlgmr.msrb.gmra.mxu2 %vm2596_vm2, %v3940_v4 }
0x1b42   :  { %4264 = vmatpush.bf16.msra.mxu2 %v9050_v28 }
0x1b45   :  { %v4139_v45 = vpop.f32.mrf.mxu3 }
0x1b46   :  { %4265 = vmatpush.bf16.msra.mxu2 %v9059_v41 }
0x1b49   :  { %6646 = vmatmul.msk.f32.gmra.mxu2 %vm2596_vm2, %v3941_v23 }
0x1b4a   :  { %4266 = vmatpush.bf16.msra.mxu2 %v9068_v55 }
0x1b4d   :  { %v4141_v39 = vpop.f32.mrf.mxu3 }
0x1b4e   :  { %4267 = vmatpush.bf16.msra.mxu2 %v9077_v42 }
0x1b51   :  { %6647 = vmatmul.msk.f32.gmra.mxu2 %vm2596_vm2, %v3942_v57 }
0x1b52   :  { %4404 = vmatpush.bf16.msrb.mxu2 %v9050_v28 }
0x1b56   :  { %4405 = vmatpush.bf16.msrb.mxu2 %v9059_v41 }
0x1b59   :  { %6648 = vmatmul.msk.f32.gmra.mxu2 %vm2596_vm2, %v3943_v60 }
0x1b5a   :  { %4406 = vmatpush.bf16.msrb.mxu2 %v9068_v55 }
0x1b5e   :  { %4407 = vmatpush.bf16.msrb.mxu2 %v9077_v42 }
0x1bc4   :  { %v4051_v2 = vpop.f32.mrf.mxu2 }
0x1bc5   :  { %4063 = vst [vmem:[#allocation3 + $0x10] sm:$0xff] %v4051_v2  ;;  %v4237_v2 = vld [vmem:[#allocation3 + $0x28] sm:$0x30] }
0x1bcc   :  { %v4076_v30 = vld [vmem:[#allocation3 + $0x10] sm:$0x3]  ;;  %v4169_v44 = vld [vmem:[#allocation3 + $0x10] sm:$0xc] }
0x1bcd   :  { %v4144_v3 = vadd.f32 %v4139_v45, %v4076_v30  ;;  %v4054_v45 = vpop.f32.mrf.mxu2 }
0x1bce   :  { %4064 = vst [vmem:[#allocation3 + $0x8] sm:$0xff] %v4054_v45 }
0x1bcf   :  { %7187 = vtanh.f32 %v4144_v3  ;;  %v4150_v13 = vmul.f32 0.5, %v4144_v3 }
0x1bd1   :  { %7189 = vtanh.f32 %v4150_v13 }
0x1bd5   :  { %v7188_v0 = vpop.eup %7187  ;;  %v4057_v39 = vpop.f32.mrf.mxu2 }
0x1bd6   :  { %v4155_v11 = vmul.f32 %v7188_v0, %v4148_v12  ;;  %4065 = vst [vmem:[#allocation3 + $0x18] sm:$0xff] %v4057_v39  ;;  %v4238_v12 = vld [vmem:[#allocation3 + $0x10] sm:$0x30] }
0x1bd7   :  { %v7190_v52 = vpop.eup %7189 }
0x1bd8   :  { %4157 = vrot.lane.b32.xlu2 %v4155_v11, %s7393_s26  ;;  %v4152_v31 = vadd.f32 1.0, %v7190_v52 }
0x1bda   :  { %v4153_v25 = vmul.f32 0.5, %v4152_v31 }
0x1bdd   :  { %v4060_v63 = vpop.f32.mrf.mxu2 }
0x1bde   :  { %4066 = vst [vmem:[#allocation3 + $0x38] sm:$0xff] %v4060_v63 }
0x1c32   :  { %v4158_v54 = vpop.permute.xlu2 %4157 }
0x1c33   :  { %v4160_v59 = vadd.f32 %v4158_v54, %v4154_v14 }
0x1c35   :  { %7191 = vtanh.f32 %v4160_v59  ;;  %v4221_v56 = vrot.slane %v4160_v59, 6 }
0x1c3b   :  { %v7192_v21 = vpop.eup %7191 }
0x1c3c   :  { %v9106_v22 = vmul.f32 %v7192_v21, %v4153_v25 }
0x1c3e   :  { %v4170_v27 = vpack.c.bf16 %v9106_v22, %v9106_v22 }
0x1c40   :  { %4172 = vrot.lane.b32.xlu0 %v4170_v27, %s7393_s26 }
0x1cb2   :  { %v4173_v15 = vpop.permute.xlu0 %4172 }
0x1cb3   :  { %6681 = vmatmul.msk.bf16.vlgmr.msra.gmra.mxu1 %vm2692_vm3, %v4173_v15  ;;  %6682 = vmatmul.msk.bf16.vlgmr.msrb.gmra.mxu3 %vm2692_vm3, %v4173_v15 }
0x1cb4   :  { %4454 = vmatpush.bf16.msra.mxu1 %v8988_v51  ;;  %4467 = vmatpush.bf16.msrb.mxu3 %v9050_v28 }
0x1cb8   :  { %4455 = vmatpush.bf16.msra.mxu1 %v8998_v18  ;;  %4468 = vmatpush.bf16.msrb.mxu3 %v9059_v41 }
0x1cbc   :  { %4456 = vmatpush.bf16.msra.mxu1 %v9008_v48  ;;  %4469 = vmatpush.bf16.msrb.mxu3 %v9068_v55 }
0x1cc0   :  { %4457 = vmatpush.bf16.msra.mxu1 %v9018_v7  ;;  %4470 = vmatpush.bf16.msrb.mxu3 %v9077_v42 }
0x1d30   :  { %v4186_v6 = vpop.f32.mrf.mxu1 }
0x1d31   :  { %v4205_v5 = vrot.slane %v4186_v6, 6 }
0x1d33   :  { %v4209_v26 = vadd.f32 %v4205_v5, %v4168_v47 }
0x1d35   :  { %v4211_v24 = vmul.f32 0.5, %v4209_v26 }
0x1d36   :  { %v4199_v36 = vpop.f32.mrf.mxu3 }
0x1d37   :  { %7193 = vtanh.f32 %v4211_v24  ;;  %v4206_v38 = vrot.slane %v4199_v36, 6 }
0x1d38   :  { %v4188_v46 = vpop.f32.mrf.mxu1 }
0x1d39   :  { %v4210_v49 = vadd.f32 %v4206_v38, %v4169_v44 }
0x1d3b   :  { %7195 = vtanh.f32 %v4210_v49  ;;  %v4216_v20 = vmul.f32 0.5, %v4210_v49 }
0x1d3d   :  { %v7194_v29 = vpop.eup %7193  ;;  %7197 = vtanh.f32 %v4216_v20 }
0x1d3e   :  { %v4213_v53 = vadd.f32 1.0, %v7194_v29  ;;  %v4201_v35 = vpop.f32.mrf.mxu3 }
0x1d40   :  { %v4214_v62 = vmul.f32 0.5, %v4213_v53  ;;  %v4307_v53 = vld [vmem:[#allocation3 + $0x28] sm:$0xc0] }
0x1d41   :  { %v7196_v8 = vpop.eup %7195 }
0x1d42   :  { %v4224_v10 = vmul.f32 %v7196_v8, %v4214_v62  ;;  %v4223_v58 = vmul.f32 %v4221_v56, %v4214_v62 }
0x1d43   :  { %v7198_v17 = vpop.eup %7197 }
0x1d44   :  { %4226 = vrot.lane.b32.xlu1 %v4224_v10, %s7393_s26  ;;  %v4218_v50 = vadd.f32 1.0, %v7198_v17  ;;  %v4308_v10 = vld [vmem:[#allocation3 + $0x10] sm:$0xc0] }
0x1d46   :  { %v4219_v33 = vmul.f32 0.5, %v4218_v50 }
0x1db6   :  { %v4227_v19 = vpop.permute.xlu1 %4226 }
0x1db7   :  { %v4229_v34 = vadd.f32 %v4227_v19, %v4223_v58 }
0x1db9   :  { %7199 = vtanh.f32 %v4229_v34  ;;  %v4291_v52 = vrot.slane %v4229_v34, 6 }
0x1dbf   :  { %v7200_v61 = vpop.eup %7199 }
0x1dc0   :  { %v9134_v32 = vmul.f32 %v7200_v61, %v4219_v33 }
0x1dc2   :  { %v4239_v40 = vpack.c.bf16 %v9134_v32, %v9134_v32 }
0x1dc4   :  { %v4241_v37 = vrot.slane %v4239_v40, 1 }
0x1dc6   :  { %4242 = vrot.lane.b32.xlu2 %v4241_v37, %s7393_s26 }
0x1e20   :  { %v4243_v4 = vpop.permute.xlu2 %4242 }
0x1e21   :  { %6683 = vmatmul.msk.bf16.vlgmr.msra.gmra.mxu0 %vm2692_vm3, %v4243_v4  ;;  %6684 = vmatmul.msk.bf16.vlgmr.msra.gmra.mxu2 %vm2692_vm3, %v4243_v4 }
0x1e22   :  { %4524 = vmatpush.bf16.msra.mxu0 %v8988_v51  ;;  %4537 = vmatpush.bf16.msra.mxu2 %v9050_v28 }
0x1e26   :  { %4525 = vmatpush.bf16.msra.mxu0 %v8998_v18  ;;  %4538 = vmatpush.bf16.msra.mxu2 %v9059_v41 }
0x1e2a   :  { %4526 = vmatpush.bf16.msra.mxu0 %v9008_v48  ;;  %4539 = vmatpush.bf16.msra.mxu2 %v9068_v55 }
0x1e2e   :  { %4527 = vmatpush.bf16.msra.mxu0 %v9018_v7  ;;  %4540 = vmatpush.bf16.msra.mxu2 %v9077_v42 }
0x1e9e   :  { %v4256_v16 = vpop.f32.mrf.mxu0 }
0x1e9f   :  { %v4275_v1 = vrot.slane %v4256_v16, 4 }
0x1ea1   :  { %v4279_v30 = vadd.f32 %v4275_v1, %v4237_v2 }
0x1ea3   :  { %v4281_v43 = vmul.f32 0.5, %v4279_v30 }
0x1ea4   :  { %v4269_v3 = vpop.f32.mrf.mxu2 }
0x1ea5   :  { %7201 = vtanh.f32 %v4281_v43  ;;  %v4276_v9 = vrot.slane %v4269_v3, 4  ;;  %v4377_v43 = vld [vmem:[#allocation3] sm:$0x3] }
0x1ea6   :  { %v4258_v0 = vpop.f32.mrf.mxu0 }
0x1ea7   :  { %v4280_v11 = vadd.f32 %v4276_v9, %v4238_v12  ;;  %v4378_v0 = vld [vmem:[#allocation3 + $0x8] sm:$0x3] }
0x1ea9   :  { %7203 = vtanh.f32 %v4280_v11  ;;  %v4286_v27 = vmul.f32 0.5, %v4280_v11 }
0x1eab   :  { %v7202_v13 = vpop.eup %7201  ;;  %7205 = vtanh.f32 %v4286_v27 }
0x1eac   :  { %v4283_v14 = vadd.f32 1.0, %v7202_v13  ;;  %v4271_v54 = vpop.f32.mrf.mxu2 }
0x1eae   :  { %v4284_v59 = vmul.f32 0.5, %v4283_v14 }
0x1eaf   :  { %v7204_v31 = vpop.eup %7203 }
0x1eb0   :  { %v4294_v25 = vmul.f32 %v7204_v31, %v4284_v59  ;;  %v4293_v21 = vmul.f32 %v4291_v52, %v4284_v59 }
0x1eb1   :  { %v7206_v6 = vpop.eup %7205 }
0x1eb2   :  { %4296 = vrot.lane.b32.xlu0 %v4294_v25, %s7393_s26  ;;  %v4288_v47 = vadd.f32 1.0, %v7206_v6 }
0x1eb4   :  { %v4289_v26 = vmul.f32 0.5, %v4288_v47 }
0x1f24   :  { %v4297_v15 = vpop.permute.xlu0 %4296 }
0x1f25   :  { %v4299_v5 = vadd.f32 %v4297_v15, %v4293_v21 }
0x1f27   :  { %7207 = vtanh.f32 %v4299_v5  ;;  %v4361_v19 = vrot.slane %v4299_v5, 6 }
0x1f2d   :  { %v7208_v24 = vpop.eup %7207 }
0x1f2e   :  { %v9150_v36 = vmul.f32 %v7208_v24, %v4289_v26 }
0x1f30   :  { %v4309_v38 = vpack.c.bf16 %v9150_v36, %v9150_v36 }
0x1f32   :  { %v4311_v44 = vrot.slane %v4309_v38, 2 }
0x1f34   :  { %4312 = vrot.lane.b32.xlu1 %v4311_v44, %s7393_s26 }
0x1fa6   :  { %v4313_v46 = vpop.permute.xlu1 %4312 }
0x1fa7   :  { %6685 = vmatmul.msk.bf16.vlgmr.msrb.gmra.mxu1 %vm2692_vm3, %v4313_v46  ;;  %6686 = vmatmul.msk.bf16.vlgmr.msra.gmra.mxu3 %vm2692_vm3, %v4313_v46 }
0x1fa8   :  { %4594 = vmatpush.bf16.msrb.mxu1 %v8988_v51  ;;  %4607 = vmatpush.bf16.msra.mxu3 %v9050_v28 }
0x1fac   :  { %4595 = vmatpush.bf16.msrb.mxu1 %v8998_v18  ;;  %4608 = vmatpush.bf16.msra.mxu3 %v9059_v41 }
0x1fb0   :  { %4596 = vmatpush.bf16.msrb.mxu1 %v9008_v48  ;;  %4609 = vmatpush.bf16.msra.mxu3 %v9068_v55 }
0x1fb4   :  { %4597 = vmatpush.bf16.msrb.mxu1 %v9018_v7  ;;  %4610 = vmatpush.bf16.msra.mxu3 %v9077_v42 }
0x2024   :  { %v4326_v49 = vpop.f32.mrf.mxu1 }
0x2025   :  { %v4345_v29 = vrot.slane %v4326_v49, 2 }
0x2027   :  { %v4349_v35 = vadd.f32 %v4345_v29, %v4307_v53 }
0x2029   :  { %v4351_v56 = vmul.f32 0.5, %v4349_v35 }
0x202a   :  { %v4339_v62 = vpop.f32.mrf.mxu3 }
0x202b   :  { %7209 = vtanh.f32 %v4351_v56  ;;  %v4346_v8 = vrot.slane %v4339_v62, 2  ;;  %v4441_v56 = vld [vmem:[#allocation3] sm:$0xc] }
0x202c   :  { %v4328_v58 = vpop.f32.mrf.mxu1 }
0x202d   :  { %v4350_v23 = vadd.f32 %v4346_v8, %v4308_v10 }
0x202f   :  { %7211 = vtanh.f32 %v4350_v23  ;;  %v4356_v61 = vmul.f32 0.5, %v4350_v23  ;;  %v4442_v23 = vld [vmem:[#allocation3 + $0x8] sm:$0xc] }
0x2031   :  { %v7210_v57 = vpop.eup %7209  ;;  %7213 = vtanh.f32 %v4356_v61 }
0x2032   :  { %v4353_v20 = vadd.f32 1.0, %v7210_v57  ;;  %v4341_v60 = vpop.f32.mrf.mxu3 }
0x2034   :  { %v4354_v17 = vmul.f32 0.5, %v4353_v20 }
0x2035   :  { %v7212_v34 = vpop.eup %7211 }
0x2036   :  { %v4364_v50 = vmul.f32 %v7212_v34, %v4354_v17  ;;  %v4363_v33 = vmul.f32 %v4361_v19, %v4354_v17 }
0x2037   :  { %v7214_v37 = vpop.eup %7213 }
0x2038   :  { %4366 = vrot.lane.b32.xlu2 %v4364_v50, %s7393_s26  ;;  %v4358_v45 = vadd.f32 1.0, %v7214_v37 }
0x203a   :  { %v4359_v39 = vmul.f32 0.5, %v4358_v45 }
0x2092   :  { %v4367_v40 = vpop.permute.xlu2 %4366 }
0x2093   :  { %v4369_v4 = vadd.f32 %v4367_v40, %v4363_v33 }
0x2095   :  { %7215 = vtanh.f32 %v4369_v4  ;;  %v4425_v59 = vrot.slane %v4369_v4, 6 }
0x209b   :  { %v7216_v63 = vpop.eup %7215 }
0x209c   :  { %v9166_v16 = vmul.f32 %v7216_v63, %v4359_v39 }
0x209e   :  { %v4379_v1 = vpack.c.bf16 %v9166_v16, %v9166_v16 }
0x20a0   :  { %v4381_v2 = vrot.slane %v4379_v1, 3 }
0x20a2   :  { %4382 = vrot.lane.b32.xlu0 %v4381_v2, %s7393_s26 }
0x2114   :  { %v4383_v30 = vpop.permute.xlu0 %4382 }
0x2115   :  { %6687 = vmatmul.msk.bf16.vlgmr.msrb.gmra.mxu0 %vm2692_vm3, %v4383_v30  ;;  %6688 = vmatmul.msk.bf16.vlgmr.msrb.gmra.mxu2 %vm2692_vm3, %v4383_v30 }
0x2116   :  { %4664 = vmatpush.bf16.msrb.mxu0 %v8988_v51  ;;  %4677 = vmatpush.bf16.msrb.mxu2 %v9050_v28 }
0x211a   :  { %4665 = vmatpush.bf16.msrb.mxu0 %v8998_v18  ;;  %4678 = vmatpush.bf16.msrb.mxu2 %v9059_v41 }
0x211e   :  { %4666 = vmatpush.bf16.msrb.mxu0 %v9008_v48  ;;  %4679 = vmatpush.bf16.msrb.mxu2 %v9068_v55 }
0x2122   :  { %4667 = vmatpush.bf16.msrb.mxu0 %v9018_v7  ;;  %4680 = vmatpush.bf16.msrb.mxu2 %v9077_v42 }
0x2192   :  { %v4396_v3 = vpop.f32.mrf.mxu0 }
0x2193   :  { %v4413_v9 = vadd.f32 %v4396_v3, %v4377_v43 }
0x2195   :  { %v4415_v12 = vmul.f32 0.5, %v4413_v9 }
0x2197   :  { %7217 = vtanh.f32 %v4415_v12 }
0x2198   :  { %v4409_v11 = vpop.f32.mrf.mxu2 }
0x2199   :  { %v4414_v13 = vadd.f32 %v4409_v11, %v4378_v0  ;;  %v4510_v11 = vld [vmem:[#allocation3] sm:$0x30] }
0x219a   :  { %v4398_v14 = vpop.f32.mrf.mxu0 }
0x219b   :  { %7219 = vtanh.f32 %v4414_v13  ;;  %v4420_v6 = vmul.f32 0.5, %v4414_v13 }
0x219d   :  { %v7218_v54 = vpop.eup %7217  ;;  %7221 = vtanh.f32 %v4420_v6 }
0x219e   :  { %v4417_v52 = vadd.f32 1.0, %v7218_v54 }
0x21a0   :  { %v4418_v31 = vmul.f32 0.5, %v4417_v52  ;;  %v4411_v25 = vpop.f32.mrf.mxu2 }
0x21a1   :  { %v7220_v21 = vpop.eup %7219 }
0x21a2   :  { %v4428_v27 = vmul.f32 %v7220_v21, %v4418_v31  ;;  %v4427_v15 = vmul.f32 %v4425_v59, %v4418_v31  ;;  %v4511_v59 = vld [vmem:[#allocation3 + $0x8] sm:$0x30] }
0x21a3   :  { %v7222_v47 = vpop.eup %7221 }
0x21a4   :  { %4430 = vrot.lane.b32.xlu1 %v4428_v27, %s7393_s26  ;;  %v4422_v24 = vadd.f32 1.0, %v7222_v47 }
0x21a6   :  { %v4423_v38 = vmul.f32 0.5, %v4422_v24 }
0x2216   :  { %v4431_v5 = vpop.permute.xlu1 %4430 }
0x2217   :  { %v4433_v26 = vadd.f32 %v4431_v5, %v4427_v15 }
0x2219   :  { %7223 = vtanh.f32 %v4433_v26  ;;  %v4494_v34 = vrot.slane %v4433_v26, 6 }
0x221f   :  { %v7224_v44 = vpop.eup %7223 }
0x2220   :  { %v9182_v46 = vmul.f32 %v7224_v44, %v4423_v38 }
0x2222   :  { %v4443_v49 = vpack.c.bf16 %v9182_v46, %v9182_v46 }
0x2224   :  { %4445 = vrot.lane.b32.xlu2 %v4443_v49, %s7393_s26 }
0x227e   :  { %v4446_v29 = vpop.permute.xlu2 %4445 }
0x227f   :  { %6689 = vmatmul.msk.bf16.vlgmr.msra.gmra.mxu1 %vm2692_vm3, %v4446_v29  ;;  %6690 = vmatmul.msk.bf16.vlgmr.msrb.gmra.mxu3 %vm2692_vm3, %v4446_v29 }
0x2280   :  { %4727 = vmatpush.bf16.msra.mxu1 %v8988_v51  ;;  %4740 = vmatpush.bf16.msrb.mxu3 %v9050_v28 }
0x2284   :  { %4728 = vmatpush.bf16.msra.mxu1 %v8998_v18  ;;  %4741 = vmatpush.bf16.msrb.mxu3 %v9059_v41 }
0x2288   :  { %4729 = vmatpush.bf16.msra.mxu1 %v9008_v48  ;;  %4742 = vmatpush.bf16.msrb.mxu3 %v9068_v55 }
0x228c   :  { %4730 = vmatpush.bf16.msra.mxu1 %v9018_v7  ;;  %4743 = vmatpush.bf16.msrb.mxu3 %v9077_v42 }
0x22fc   :  { %v4459_v53 = vpop.f32.mrf.mxu1 }
0x22fd   :  { %v4478_v35 = vrot.slane %v4459_v53, 6 }
0x22ff   :  { %v4482_v62 = vadd.f32 %v4478_v35, %v4441_v56 }
0x2301   :  { %v4484_v8 = vmul.f32 0.5, %v4482_v62 }
0x2302   :  { %v4472_v10 = vpop.f32.mrf.mxu3 }
0x2303   :  { %7225 = vtanh.f32 %v4484_v8  ;;  %v4479_v58 = vrot.slane %v4472_v10, 6 }
0x2304   :  { %v4461_v57 = vpop.f32.mrf.mxu1 }
0x2305   :  { %v4483_v20 = vadd.f32 %v4479_v58, %v4442_v23 }
0x2307   :  { %7227 = vtanh.f32 %v4483_v20  ;;  %v4489_v37 = vmul.f32 0.5, %v4483_v20  ;;  %v4580_v20 = vld [vmem:[#allocation3] sm:$0xc0] }
0x2309   :  { %v7226_v60 = vpop.eup %7225  ;;  %7229 = vtanh.f32 %v4489_v37 }
0x230a   :  { %v4486_v19 = vadd.f32 1.0, %v7226_v60  ;;  %v4474_v17 = vpop.f32.mrf.mxu3 }
0x230c   :  { %v4487_v50 = vmul.f32 0.5, %v4486_v19 }
0x230d   :  { %v7228_v33 = vpop.eup %7227 }
0x230e   :  { %v4497_v61 = vmul.f32 %v7228_v33, %v4487_v50  ;;  %v4496_v40 = vmul.f32 %v4494_v34, %v4487_v50  ;;  %v4581_v50 = vld [vmem:[#allocation3 + $0x8] sm:$0xc0] }
0x230f   :  { %v7230_v45 = vpop.eup %7229 }
0x2310   :  { %4499 = vrot.lane.b32.xlu0 %v4497_v61, %s7393_s26  ;;  %v4491_v63 = vadd.f32 1.0, %v7230_v45 }
0x2312   :  { %v4492_v1 = vmul.f32 0.5, %v4491_v63 }
0x2382   :  { %v4500_v4 = vpop.permute.xlu0 %4499 }
0x2383   :  { %v4502_v39 = vadd.f32 %v4500_v4, %v4496_v40 }
0x2385   :  { %7231 = vtanh.f32 %v4502_v39  ;;  %v4564_v6 = vrot.slane %v4502_v39, 6 }
0x238b   :  { %v7232_v2 = vpop.eup %7231 }
0x238c   :  { %v9198_v30 = vmul.f32 %v7232_v2, %v4492_v1 }
0x238e   :  { %v4512_v43 = vpack.c.bf16 %v9198_v30, %v9198_v30 }
0x2390   :  { %v4514_v3 = vrot.slane %v4512_v43, 1 }
0x2392   :  { %4515 = vrot.lane.b32.xlu1 %v4514_v3, %s7393_s26 }
0x2404   :  { %v4516_v9 = vpop.permute.xlu1 %4515 }
0x2405   :  { %6691 = vmatmul.msk.bf16.vlgmr.msra.gmra.mxu0 %vm2692_vm3, %v4516_v9  ;;  %6692 = vmatmul.msk.bf16.vlgmr.msra.gmra.mxu2 %vm2692_vm3, %v4516_v9 }
0x2406   :  { %4797 = vmatpush.bf16.msra.mxu0 %v8988_v51  ;;  %4810 = vmatpush.bf16.msra.mxu2 %v9050_v28 }
0x240a   :  { %4798 = vmatpush.bf16.msra.mxu0 %v8998_v18  ;;  %4811 = vmatpush.bf16.msra.mxu2 %v9059_v41 }
0x240e   :  { %4799 = vmatpush.bf16.msra.mxu0 %v9008_v48  ;;  %4812 = vmatpush.bf16.msra.mxu2 %v9068_v55 }
0x2412   :  { %4800 = vmatpush.bf16.msra.mxu0 %v9018_v7  ;;  %4813 = vmatpush.bf16.msra.mxu2 %v9077_v42 }
0x2482   :  { %v4529_v12 = vpop.f32.mrf.mxu0 }
0x2483   :  { %v4548_v0 = vrot.slane %v4529_v12, 4 }
0x2485   :  { %v4552_v13 = vadd.f32 %v4548_v0, %v4510_v11 }
0x2487   :  { %v4554_v14 = vmul.f32 0.5, %v4552_v13 }
0x2488   :  { %v4542_v54 = vpop.f32.mrf.mxu2 }
0x2489   :  { %7233 = vtanh.f32 %v4554_v14  ;;  %v4549_v52 = vrot.slane %v4542_v54, 4 }
0x248a   :  { %v4531_v31 = vpop.f32.mrf.mxu0 }
0x248b   :  { %v4553_v25 = vadd.f32 %v4549_v52, %v4511_v59  ;;  %v4650_v31 = vld [vmem:[#allocation3 + $0x30] sm:$0x3] }
0x248d   :  { %7235 = vtanh.f32 %v4553_v25  ;;  %v4559_v38 = vmul.f32 0.5, %v4553_v25 }
0x248f   :  { %v7234_v21 = vpop.eup %7233  ;;  %7237 = vtanh.f32 %v4559_v38 }
0x2490   :  { %v4556_v27 = vadd.f32 1.0, %v7234_v21  ;;  %v4544_v15 = vpop.f32.mrf.mxu2 }
0x2491   :  { %v4651_v15 = vld [vmem:[#allocation3 + $0x18] sm:$0x3] }
0x2492   :  { %v4557_v5 = vmul.f32 0.5, %v4556_v27 }
0x2493   :  { %v7236_v47 = vpop.eup %7235 }
0x2494   :  { %v4567_v26 = vmul.f32 %v7236_v47, %v4557_v5  ;;  %v4566_v24 = vmul.f32 %v4564_v6, %v4557_v5 }
0x2495   :  { %v7238_v49 = vpop.eup %7237 }
0x2496   :  { %4569 = vrot.lane.b32.xlu2 %v4567_v26, %s7393_s26  ;;  %v4561_v53 = vadd.f32 1.0, %v7238_v49 }
0x2498   :  { %v4562_v35 = vmul.f32 0.5, %v4561_v53 }
0x24f0   :  { %v4570_v44 = vpop.permute.xlu2 %4569 }
0x24f1   :  { %v4572_v29 = vadd.f32 %v4570_v44, %v4566_v24 }
0x24f3   :  { %7239 = vtanh.f32 %v4572_v29  ;;  %v4634_v45 = vrot.slane %v4572_v29, 6 }
0x24f9   :  { %v7240_v56 = vpop.eup %7239 }
0x24fa   :  { %v9214_v62 = vmul.f32 %v7240_v56, %v4562_v35 }
0x24fc   :  { %v4582_v8 = vpack.c.bf16 %v9214_v62, %v9214_v62 }
0x24fe   :  { %v4584_v10 = vrot.slane %v4582_v8, 2 }
0x2500   :  { %4585 = vrot.lane.b32.xlu0 %v4584_v10, %s7393_s26 }
0x2572   :  { %v4586_v58 = vpop.permute.xlu0 %4585 }
0x2573   :  { %6693 = vmatmul.msk.bf16.vlgmr.msrb.gmra.mxu1 %vm2692_vm3, %v4586_v58  ;;  %6694 = vmatmul.msk.bf16.vlgmr.msra.gmra.mxu3 %vm2692_vm3, %v4586_v58 }
0x2574   :  { %4867 = vmatpush.bf16.msrb.mxu1 %v8988_v51  ;;  %4880 = vmatpush.bf16.msra.mxu3 %v9050_v28 }
0x2578   :  { %4868 = vmatpush.bf16.msrb.mxu1 %v8998_v18  ;;  %4881 = vmatpush.bf16.msra.mxu3 %v9059_v41 }
0x257c   :  { %4869 = vmatpush.bf16.msrb.mxu1 %v9008_v48  ;;  %4882 = vmatpush.bf16.msra.mxu3 %v9068_v55 }
0x2580   :  { %4870 = vmatpush.bf16.msrb.mxu1 %v9018_v7  ;;  %4883 = vmatpush.bf16.msra.mxu3 %v9077_v42 }
0x25f0   :  { %v4599_v23 = vpop.f32.mrf.mxu1 }
0x25f1   :  { %v4618_v57 = vrot.slane %v4599_v23, 2 }
0x25f3   :  { %v4622_v60 = vadd.f32 %v4618_v57, %v4580_v20 }
0x25f5   :  { %v4624_v19 = vmul.f32 0.5, %v4622_v60 }
0x25f6   :  { %v4612_v17 = vpop.f32.mrf.mxu3 }
0x25f7   :  { %7241 = vtanh.f32 %v4624_v19  ;;  %v4619_v34 = vrot.slane %v4612_v17, 2 }
0x25f8   :  { %v4601_v33 = vpop.f32.mrf.mxu1 }
0x25f9   :  { %v4623_v61 = vadd.f32 %v4619_v34, %v4581_v50  ;;  %v4714_v33 = vld [vmem:[#allocation3 + $0x30] sm:$0xc] }
0x25fb   :  { %7243 = vtanh.f32 %v4623_v61  ;;  %v4629_v43 = vmul.f32 0.5, %v4623_v61 }
0x25fd   :  { %v7242_v40 = vpop.eup %7241  ;;  %7245 = vtanh.f32 %v4629_v43 }
0x25fe   :  { %v4626_v37 = vadd.f32 1.0, %v7242_v40  ;;  %v4614_v4 = vpop.f32.mrf.mxu3 }
0x2600   :  { %v4627_v39 = vmul.f32 0.5, %v4626_v37 }
0x2601   :  { %v7244_v63 = vpop.eup %7243 }
0x2602   :  { %v4637_v1 = vmul.f32 %v7244_v63, %v4627_v39  ;;  %v4636_v2 = vmul.f32 %v4634_v45, %v4627_v39  ;;  %v4715_v45 = vld [vmem:[#allocation3 + $0x18] sm:$0xc] }
0x2603   :  { %v7246_v9 = vpop.eup %7245 }
0x2604   :  { %4639 = vrot.lane.b32.xlu1 %v4637_v1, %s7393_s26  ;;  %v4631_v0 = vadd.f32 1.0, %v7246_v9 }
0x2606   :  { %v4632_v11 = vmul.f32 0.5, %v4631_v0 }
0x2676   :  { %v4640_v3 = vpop.permute.xlu1 %4639 }
0x2677   :  { %v4642_v12 = vadd.f32 %v4640_v3, %v4636_v2 }
0x2679   :  { %7247 = vtanh.f32 %v4642_v12  ;;  %v4698_v38 = vrot.slane %v4642_v12, 6 }
0x267f   :  { %v7248_v13 = vpop.eup %7247 }
0x2680   :  { %v9230_v14 = vmul.f32 %v7248_v13, %v4632_v11 }
0x2682   :  { %v4652_v54 = vpack.c.bf16 %v9230_v14, %v9230_v14 }
0x2684   :  { %v4654_v52 = vrot.slane %v4652_v54, 3 }
0x2686   :  { %4655 = vrot.lane.b32.xlu2 %v4654_v52, %s7393_s26 }
0x26e0   :  { %v4656_v59 = vpop.permute.xlu2 %4655 }
0x26e1   :  { %6695 = vmatmul.msk.bf16.vlgmr.msrb.gmra.mxu0 %vm2692_vm3, %v4656_v59  ;;  %6696 = vmatmul.msk.bf16.vlgmr.msrb.gmra.mxu2 %vm2692_vm3, %v4656_v59 }
0x26e2   :  { %4937 = vmatpush.bf16.msrb.mxu0 %v8988_v51  ;;  %4950 = vmatpush.bf16.msrb.mxu2 %v9050_v28 }
0x26e6   :  { %4938 = vmatpush.bf16.msrb.mxu0 %v8998_v18  ;;  %4951 = vmatpush.bf16.msrb.mxu2 %v9059_v41 }
0x26ea   :  { %4939 = vmatpush.bf16.msrb.mxu0 %v9008_v48  ;;  %4952 = vmatpush.bf16.msrb.mxu2 %v9068_v55 }
0x26ee   :  { %4940 = vmatpush.bf16.msrb.mxu0 %v9018_v7  ;;  %4953 = vmatpush.bf16.msrb.mxu2 %v9077_v42 }
0x275e   :  { %v4669_v25 = vpop.f32.mrf.mxu0 }
0x275f   :  { %v4686_v21 = vadd.f32 %v4669_v25, %v4650_v31 }
0x2761   :  { %v4688_v27 = vmul.f32 0.5, %v4686_v21 }
0x2763   :  { %7249 = vtanh.f32 %v4688_v27 }
0x2764   :  { %v4682_v6 = vpop.f32.mrf.mxu2 }
0x2765   :  { %v4687_v5 = vadd.f32 %v4682_v6, %v4651_v15 }
0x2766   :  { %v4671_v47 = vpop.f32.mrf.mxu0 }
0x2767   :  { %7251 = vtanh.f32 %v4687_v5  ;;  %v4693_v56 = vmul.f32 0.5, %v4687_v5 }
0x2769   :  { %v7250_v26 = vpop.eup %7249  ;;  %7253 = vtanh.f32 %v4693_v56 }
0x276a   :  { %v4690_v24 = vadd.f32 1.0, %v7250_v26 }
0x276c   :  { %v4691_v44 = vmul.f32 0.5, %v4690_v24  ;;  %v4684_v49 = vpop.f32.mrf.mxu2  ;;  %v4783_v24 = vld [vmem:[#allocation3 + $0x30] sm:$0x30] }
0x276d   :  { %v7252_v29 = vpop.eup %7251 }
0x276e   :  { %v4701_v53 = vmul.f32 %v7252_v29, %v4691_v44  ;;  %v4700_v35 = vmul.f32 %v4698_v38, %v4691_v44 }
0x276f   :  { %v7254_v10 = vpop.eup %7253 }
0x2770   :  { %4703 = vrot.lane.b32.xlu0 %v4701_v53, %s7393_s26  ;;  %v4695_v23 = vadd.f32 1.0, %v7254_v10  ;;  %v4784_v53 = vld [vmem:[#allocation3 + $0x18] sm:$0x30] }
0x2772   :  { %v4696_v57 = vmul.f32 0.5, %v4695_v23 }
0x27e2   :  { %v4704_v8 = vpop.permute.xlu0 %4703 }
0x27e3   :  { %v4706_v58 = vadd.f32 %v4704_v8, %v4700_v35 }
0x27e5   :  { %7255 = vtanh.f32 %v4706_v58  ;;  %v4767_v3 = vrot.slane %v4706_v58, 6 }
0x27eb   :  { %v7256_v20 = vpop.eup %7255 }
0x27ec   :  { %v9246_v60 = vmul.f32 %v7256_v20, %v4696_v57 }
0x27ee   :  { %v4716_v19 = vpack.c.bf16 %v9246_v60, %v9246_v60 }
0x27f0   :  { %4718 = vrot.lane.b32.xlu1 %v4716_v19, %s7393_s26 }
0x2862   :  { %v4719_v17 = vpop.permute.xlu1 %4718 }
0x2863   :  { %6697 = vmatmul.msk.bf16.vlgmr.msra.gmra.mxu1 %vm2692_vm3, %v4719_v17  ;;  %6698 = vmatmul.msk.bf16.vlgmr.msrb.gmra.mxu3 %vm2692_vm3, %v4719_v17 }
0x2864   :  { %5000 = vmatpush.bf16.msra.mxu1 %v8988_v51  ;;  %5013 = vmatpush.bf16.msrb.mxu3 %v9050_v28 }
0x2868   :  { %5001 = vmatpush.bf16.msra.mxu1 %v8998_v18  ;;  %5014 = vmatpush.bf16.msrb.mxu3 %v9059_v41 }
0x286c   :  { %5002 = vmatpush.bf16.msra.mxu1 %v9008_v48  ;;  %5015 = vmatpush.bf16.msrb.mxu3 %v9068_v55 }
0x2870   :  { %5003 = vmatpush.bf16.msra.mxu1 %v9018_v7  ;;  %5016 = vmatpush.bf16.msrb.mxu3 %v9077_v42 }
0x28e0   :  { %v4732_v34 = vpop.f32.mrf.mxu1 }
0x28e1   :  { %v4751_v50 = vrot.slane %v4732_v34, 6 }
0x28e3   :  { %v4755_v61 = vadd.f32 %v4751_v50, %v4714_v33 }
0x28e5   :  { %v4757_v40 = vmul.f32 0.5, %v4755_v61 }
0x28e6   :  { %v4745_v37 = vpop.f32.mrf.mxu3 }
0x28e7   :  { %7257 = vtanh.f32 %v4757_v40  ;;  %v4752_v4 = vrot.slane %v4745_v37, 6 }
0x28e8   :  { %v4734_v39 = vpop.f32.mrf.mxu1 }
0x28e9   :  { %v4756_v63 = vadd.f32 %v4752_v4, %v4715_v45 }
0x28eb   :  { %7259 = vtanh.f32 %v4756_v63  ;;  %v4762_v13 = vmul.f32 0.5, %v4756_v63 }
0x28ed   :  { %v7258_v1 = vpop.eup %7257  ;;  %7261 = vtanh.f32 %v4762_v13 }
0x28ee   :  { %v4759_v2 = vadd.f32 1.0, %v7258_v1  ;;  %v4747_v43 = vpop.f32.mrf.mxu3 }
0x28f0   :  { %v4760_v9 = vmul.f32 0.5, %v4759_v2 }
0x28f1   :  { %v7260_v12 = vpop.eup %7259 }
0x28f2   :  { %v4770_v0 = vmul.f32 %v7260_v12, %v4760_v9  ;;  %v4769_v11 = vmul.f32 %v4767_v3, %v4760_v9  ;;  %v4853_v3 = vld [vmem:[#allocation3 + $0x30] sm:$0xc0] }
0x28f3   :  { %v7262_v52 = vpop.eup %7261 }
0x28f4   :  { %4772 = vrot.lane.b32.xlu2 %v4770_v0, %s7393_s26  ;;  %v4764_v31 = vadd.f32 1.0, %v7262_v52  ;;  %v4854_v0 = vld [vmem:[#allocation3 + $0x18] sm:$0xc0] }
0x28f6   :  { %v4765_v25 = vmul.f32 0.5, %v4764_v31 }
0x294e   :  { %v4773_v54 = vpop.permute.xlu2 %4772 }
0x294f   :  { %v4775_v59 = vadd.f32 %v4773_v54, %v4769_v11 }
0x2951   :  { %7263 = vtanh.f32 %v4775_v59  ;;  %v4837_v23 = vrot.slane %v4775_v59, 6 }
0x2957   :  { %v7264_v21 = vpop.eup %7263 }
0x2958   :  { %v9262_v27 = vmul.f32 %v7264_v21, %v4765_v25 }
0x295a   :  { %v4785_v15 = vpack.c.bf16 %v9262_v27, %v9262_v27 }
0x295c   :  { %v4787_v6 = vrot.slane %v4785_v15, 1 }
0x295e   :  { %4788 = vrot.lane.b32.xlu0 %v4787_v6, %s7393_s26 }
0x29d0   :  { %v4789_v5 = vpop.permute.xlu0 %4788 }
0x29d1   :  { %6699 = vmatmul.msk.bf16.vlgmr.msra.gmra.mxu0 %vm2692_vm3, %v4789_v5  ;;  %6700 = vmatmul.msk.bf16.vlgmr.msra.gmra.mxu2 %vm2692_vm3, %v4789_v5 }
0x29d2   :  { %5070 = vmatpush.bf16.msra.mxu0 %v8988_v51  ;;  %5083 = vmatpush.bf16.msra.mxu2 %v9050_v28 }
0x29d6   :  { %5071 = vmatpush.bf16.msra.mxu0 %v8998_v18  ;;  %5084 = vmatpush.bf16.msra.mxu2 %v9059_v41 }
0x29da   :  { %5072 = vmatpush.bf16.msra.mxu0 %v9008_v48  ;;  %5085 = vmatpush.bf16.msra.mxu2 %v9068_v55 }
0x29de   :  { %5073 = vmatpush.bf16.msra.mxu0 %v9018_v7  ;;  %5086 = vmatpush.bf16.msra.mxu2 %v9077_v42 }
0x2a4e   :  { %v4802_v47 = vpop.f32.mrf.mxu0 }
0x2a4f   :  { %v4821_v26 = vrot.slane %v4802_v47, 4 }
0x2a51   :  { %v4825_v38 = vadd.f32 %v4821_v26, %v4783_v24 }
0x2a53   :  { %v4827_v44 = vmul.f32 0.5, %v4825_v38 }
0x2a54   :  { %v4815_v49 = vpop.f32.mrf.mxu2 }
0x2a55   :  { %7265 = vtanh.f32 %v4827_v44  ;;  %v4822_v29 = vrot.slane %v4815_v49, 4  ;;  %v4923_v44 = vld [vmem:[#allocation3 + $0x20] sm:$0x3] }
0x2a56   :  { %v4804_v35 = vpop.f32.mrf.mxu0 }
0x2a57   :  { %v4826_v56 = vadd.f32 %v4822_v29, %v4784_v53  ;;  %v4924_v35 = vld [vmem:[#allocation3 + $0x38] sm:$0x3] }
0x2a59   :  { %7267 = vtanh.f32 %v4826_v56  ;;  %v4832_v34 = vmul.f32 0.5, %v4826_v56 }
0x2a5b   :  { %v7266_v8 = vpop.eup %7265  ;;  %7269 = vtanh.f32 %v4832_v34 }
0x2a5c   :  { %v4829_v10 = vadd.f32 1.0, %v7266_v8  ;;  %v4817_v58 = vpop.f32.mrf.mxu2 }
0x2a5e   :  { %v4830_v57 = vmul.f32 0.5, %v4829_v10 }
0x2a5f   :  { %v7268_v20 = vpop.eup %7267 }
0x2a60   :  { %v4840_v19 = vmul.f32 %v7268_v20, %v4830_v57  ;;  %v4839_v17 = vmul.f32 %v4837_v23, %v4830_v57 }
0x2a61   :  { %v7270_v33 = vpop.eup %7269 }
0x2a62   :  { %4842 = vrot.lane.b32.xlu1 %v4840_v19, %s7393_s26  ;;  %v4834_v40 = vadd.f32 1.0, %v7270_v33 }
0x2a64   :  { %v4835_v37 = vmul.f32 0.5, %v4834_v40 }
0x2ad4   :  { %v4843_v50 = vpop.permute.xlu1 %4842 }
0x2ad5   :  { %v4845_v61 = vadd.f32 %v4843_v50, %v4839_v17 }
0x2ad7   :  { %7271 = vtanh.f32 %v4845_v61 }
0x2add   :  { %v7272_v4 = vpop.eup %7271 }
0x2ade   :  { %v9278_v45 = vmul.f32 %v7272_v4, %v4835_v37 }
0x2ae0   :  { %v4855_v39 = vpack.c.bf16 %v9278_v45, %v9278_v45 }
0x2ae2   :  { %v4857_v63 = vrot.slane %v4855_v39, 2 }
0x2ae4   :  { %4858 = vrot.lane.b32.xlu2 %v4857_v63, %s7393_s26 }
0x2b3e   :  { %v4859_v1 = vpop.permute.xlu2 %4858 }
0x2b3f   :  { %6701 = vmatmul.msk.bf16.vlgmr.msrb.gmra.mxu1 %vm2692_vm3, %v4859_v1  ;;  %6702 = vmatmul.msk.bf16.vlgmr.msra.gmra.mxu3 %vm2692_vm3, %v4859_v1 }
0x2b40   :  { %5140 = vmatpush.bf16.msrb.mxu1 %v8988_v51  ;;  %5153 = vmatpush.bf16.msra.mxu3 %v9050_v28 }
0x2b44   :  { %5141 = vmatpush.bf16.msrb.mxu1 %v8998_v18  ;;  %5154 = vmatpush.bf16.msra.mxu3 %v9059_v41 }
0x2b48   :  { %5142 = vmatpush.bf16.msrb.mxu1 %v9008_v48  ;;  %5155 = vmatpush.bf16.msra.mxu3 %v9068_v55  ;;  %v4907_v55 = vrot.slane %v4845_v61, 6 }
0x2b4c   :  { %5143 = vmatpush.bf16.msrb.mxu1 %v9018_v7  ;;  %5156 = vmatpush.bf16.msra.mxu3 %v9077_v42 }
0x2bbc   :  { %v4872_v2 = vpop.f32.mrf.mxu1 }
0x2bbd   :  { %v4891_v43 = vrot.slane %v4872_v2, 2 }
0x2bbf   :  { %v4895_v9 = vadd.f32 %v4891_v43, %v4853_v3 }
0x2bc1   :  { %v4897_v12 = vmul.f32 0.5, %v4895_v9 }
0x2bc2   :  { %v4885_v51 = vpop.f32.mrf.mxu3 }
0x2bc3   :  { %7273 = vtanh.f32 %v4897_v12  ;;  %v4892_v28 = vrot.slane %v4885_v51, 2  ;;  %v4987_v12 = vld [vmem:[#allocation3 + $0x20] sm:$0xc] }
0x2bc4   :  { %v4874_v18 = vpop.f32.mrf.mxu1 }
0x2bc5   :  { %v4896_v11 = vadd.f32 %v4892_v28, %v4854_v0 }
0x2bc7   :  { %7275 = vtanh.f32 %v4896_v11  ;;  %v4902_v59 = vmul.f32 0.5, %v4896_v11  ;;  %v4988_v11 = vld [vmem:[#allocation3 + $0x38] sm:$0xc] }
0x2bc9   :  { %v7274_v41 = vpop.eup %7273  ;;  %7277 = vtanh.f32 %v4902_v59 }
0x2bca   :  { %v4899_v48 = vadd.f32 1.0, %v7274_v41  ;;  %v4887_v13 = vpop.f32.mrf.mxu3 }
0x2bcc   :  { %v4900_v54 = vmul.f32 0.5, %v4899_v48 }
0x2bcd   :  { %v7276_v7 = vpop.eup %7275 }
0x2bce   :  { %v4910_v52 = vmul.f32 %v7276_v7, %v4900_v54  ;;  %v4909_v42 = vmul.f32 %v4907_v55, %v4900_v54 }
0x2bcf   :  { %v7278_v25 = vpop.eup %7277 }
0x2bd0   :  { %4912 = vrot.lane.b32.xlu0 %v4910_v52, %s7393_s26  ;;  %v4904_v15 = vadd.f32 1.0, %v7278_v25 }
0x2bd2   :  { %v4905_v6 = vmul.f32 0.5, %v4904_v15 }
0x2c42   :  { %v4913_v31 = vpop.permute.xlu0 %4912 }
0x2c43   :  { %v4915_v21 = vadd.f32 %v4913_v31, %v4909_v42 }
0x2c45   :  { %7279 = vtanh.f32 %v4915_v21  ;;  %v4971_v57 = vrot.slane %v4915_v21, 6 }
0x2c4b   :  { %v7280_v5 = vpop.eup %7279 }
0x2c4c   :  { %v9294_v47 = vmul.f32 %v7280_v5, %v4905_v6 }
0x2c4e   :  { %v4925_v26 = vpack.c.bf16 %v9294_v47, %v9294_v47 }
0x2c50   :  { %v4927_v24 = vrot.slane %v4925_v26, 3 }
0x2c52   :  { %4928 = vrot.lane.b32.xlu1 %v4927_v24, %s7393_s26 }
0x2cc4   :  { %v4929_v38 = vpop.permute.xlu1 %4928 }
0x2cc5   :  { %6703 = vmatmul.msk.bf16.vlgmr.msrb.gmra.mxu0 %vm2692_vm3, %v4929_v38  ;;  %6704 = vmatmul.msk.bf16.vlgmr.msrb.gmra.mxu2 %vm2692_vm3, %v4929_v38 }
0x2d42   :  { %v4942_v49 = vpop.f32.mrf.mxu0 }
0x2d43   :  { %v4959_v29 = vadd.f32 %v4942_v49, %v4923_v44 }
0x2d45   :  { %v4961_v53 = vmul.f32 0.5, %v4959_v29 }
0x2d47   :  { %7281 = vtanh.f32 %v4961_v53 }
0x2d48   :  { %v4955_v56 = vpop.f32.mrf.mxu2 }
0x2d49   :  { %v4960_v8 = vadd.f32 %v4955_v56, %v4924_v35  ;;  %v5056_v56 = vld [vmem:[#allocation3 + $0x20] sm:$0x30] }
0x2d4a   :  { %v4944_v10 = vpop.f32.mrf.mxu0 }
0x2d4b   :  { %7283 = vtanh.f32 %v4960_v8  ;;  %v4966_v33 = vmul.f32 0.5, %v4960_v8 }
0x2d4d   :  { %v7282_v58 = vpop.eup %7281  ;;  %7285 = vtanh.f32 %v4966_v33 }
0x2d4e   :  { %v4963_v23 = vadd.f32 1.0, %v7282_v58 }
0x2d50   :  { %v4964_v20 = vmul.f32 0.5, %v4963_v23  ;;  %v4957_v19 = vpop.f32.mrf.mxu2 }
0x2d51   :  { %v7284_v17 = vpop.eup %7283 }
0x2d52   :  { %v4974_v34 = vmul.f32 %v7284_v17, %v4964_v20  ;;  %v4973_v50 = vmul.f32 %v4971_v57, %v4964_v20  ;;  %v5057_v57 = vld [vmem:[#allocation3 + $0x38] sm:$0x30] }
0x2d53   :  { %v7286_v40 = vpop.eup %7285 }
0x2d54   :  { %4976 = vrot.lane.b32.xlu2 %v4974_v34, %s7393_s26  ;;  %v4968_v4 = vadd.f32 1.0, %v7286_v40 }
0x2d56   :  { %v4969_v39 = vmul.f32 0.5, %v4968_v4 }
0x2dae   :  { %v4977_v61 = vpop.permute.xlu2 %4976 }
0x2daf   :  { %v4979_v37 = vadd.f32 %v4977_v61, %v4973_v50 }
0x2db1   :  { %7287 = vtanh.f32 %v4979_v37  ;;  %v5040_v7 = vrot.slane %v4979_v37, 6 }
0x2db7   :  { %v7288_v63 = vpop.eup %7287 }
0x2db8   :  { %v9302_v1 = vmul.f32 %v7288_v63, %v4969_v39 }
0x2dba   :  { %v4989_v2 = vpack.c.bf16 %v9302_v1, %v9302_v1 }
0x2dbc   :  { %4991 = vrot.lane.b32.xlu0 %v4989_v2, %s7393_s26 }
0x2e2e   :  { %v4992_v43 = vpop.permute.xlu0 %4991 }
0x2e2f   :  { %6705 = vmatmul.msk.bf16.vlgmr.msra.gmra.mxu1 %vm2692_vm3, %v4992_v43  ;;  %6706 = vmatmul.msk.bf16.vlgmr.msrb.gmra.mxu3 %vm2692_vm3, %v4992_v43 }
0x2eac   :  { %v5005_v3 = vpop.f32.mrf.mxu1 }
0x2ead   :  { %v5024_v9 = vrot.slane %v5005_v3, 6 }
0x2eaf   :  { %v5028_v51 = vadd.f32 %v5024_v9, %v4987_v12 }
0x2eb1   :  { %v5030_v28 = vmul.f32 0.5, %v5028_v51 }
0x2eb2   :  { %v5018_v0 = vpop.f32.mrf.mxu3 }
0x2eb3   :  { %7289 = vtanh.f32 %v5030_v28  ;;  %v5025_v18 = vrot.slane %v5018_v0, 6 }
0x2eb4   :  { %v5007_v41 = vpop.f32.mrf.mxu1 }
0x2eb5   :  { %v5029_v48 = vadd.f32 %v5025_v18, %v4988_v11 }
0x2eb7   :  { %7291 = vtanh.f32 %v5029_v48  ;;  %v5035_v25 = vmul.f32 0.5, %v5029_v48 }
0x2eb9   :  { %v7290_v13 = vpop.eup %7289  ;;  %7293 = vtanh.f32 %v5035_v25 }
0x2eba   :  { %v5032_v55 = vadd.f32 1.0, %v7290_v13  ;;  %v5020_v54 = vpop.f32.mrf.mxu3  ;;  %v5126_v13 = vld [vmem:[#allocation3 + $0x20] sm:$0xc0] }
0x2ebc   :  { %v5033_v52 = vmul.f32 0.5, %v5032_v55 }
0x2ebd   :  { %v7292_v42 = vpop.eup %7291 }
0x2ebe   :  { %v5043_v59 = vmul.f32 %v7292_v42, %v5033_v52  ;;  %v5042_v31 = vmul.f32 %v5040_v7, %v5033_v52  ;;  %v5127_v42 = vld [vmem:[#allocation3 + $0x38] sm:$0xc0] }
0x2ebf   :  { %v7294_v15 = vpop.eup %7293 }
0x2ec0   :  { %5045 = vrot.lane.b32.xlu1 %v5043_v59, %s7393_s26  ;;  %v5037_v5 = vadd.f32 1.0, %v7294_v15 }
0x2ec2   :  { %v5038_v26 = vmul.f32 0.5, %v5037_v5 }
0x2f32   :  { %v5046_v21 = vpop.permute.xlu1 %5045 }
0x2f33   :  { %v5048_v6 = vadd.f32 %v5046_v21, %v5042_v31 }
0x2f35   :  { %7295 = vtanh.f32 %v5048_v6  ;;  %v5110_v33 = vrot.slane %v5048_v6, 6 }
0x2f3b   :  { %v7296_v24 = vpop.eup %7295 }
0x2f3c   :  { %v5050_v38 = vmul.f32 %v7296_v24, %v5038_v26 }
0x2f3e   :  { %v5058_v44 = vpack.c.bf16 %v5050_v38, %v5050_v38 }
0x2f40   :  { %v5060_v49 = vrot.slane %v5058_v44, 1 }
0x2f42   :  { %5061 = vrot.lane.b32.xlu2 %v5060_v49, %s7393_s26 }
0x2f9c   :  { %v5062_v29 = vpop.permute.xlu2 %5061 }
0x2f9d   :  { %6707 = vmatmul.msk.bf16.vlgmr.msra.gmra.mxu0 %vm2692_vm3, %v5062_v29  ;;  %6708 = vmatmul.msk.bf16.vlgmr.msra.gmra.mxu2 %vm2692_vm3, %v5062_v29 }
0x301a   :  { %v5075_v53 = vpop.f32.mrf.mxu0 }
0x301b   :  { %v5094_v35 = vrot.slane %v5075_v53, 4 }
0x301d   :  { %v5098_v8 = vadd.f32 %v5094_v35, %v5056_v56 }
0x301f   :  { %v5100_v10 = vmul.f32 0.5, %v5098_v8 }
0x3020   :  { %v5088_v58 = vpop.f32.mrf.mxu2 }
0x3021   :  { %7297 = vtanh.f32 %v5100_v10  ;;  %v5095_v23 = vrot.slane %v5088_v58, 4 }
0x3022   :  { %v5077_v20 = vpop.f32.mrf.mxu0 }
0x3023   :  { %v5099_v19 = vadd.f32 %v5095_v23, %v5057_v57  ;;  %v7034_v23 = vld [vmem:[%s9451_s14 + $0x18] sm:$0xff]  ;;  %v7033_v57 = vld [vmem:[%s9451_s14 + $0x10] sm:$0xff]  ;;  %v7031_v20 = vld [vmem:[%s9451_s14] sm:$0xff] }
0x3024   :  { %5332 = vmatpush.bf16.msra.mxu1 %v7034_v23 }
0x3025   :  { %7299 = vtanh.f32 %v5099_v19  ;;  %v5105_v39 = vmul.f32 0.5, %v5099_v19 }
0x3027   :  { %v7298_v17 = vpop.eup %7297  ;;  %7301 = vtanh.f32 %v5105_v39  ;;  %v7334_v39 = vld [vmem:[%s9440_s3 + $0x8] sm:$0xff] }
0x3028   :  { %v5102_v34 = vadd.f32 1.0, %v7298_v17  ;;  %v5090_v50 = vpop.f32.mrf.mxu2  ;;  %5333 = vmatpush.bf16.msra.mxu1 %v7033_v57 }
0x302a   :  { %v5103_v61 = vmul.f32 0.5, %v5102_v34 }
0x302b   :  { %v7300_v40 = vpop.eup %7299 }
0x302c   :  { %v5113_v37 = vmul.f32 %v7300_v40, %v5103_v61  ;;  %v5112_v4 = vmul.f32 %v5110_v33, %v5103_v61  ;;  %v7038_v33 = vld [vmem:[%s9452_s15 + $0x18] sm:$0xff] }
0x302d   :  { %v7302_v2 = vpop.eup %7301  ;;  %5283 = vmatpush.bf16.msrb.mxu2 %v7038_v33 }
0x302e   :  { %5115 = vrot.lane.b32.xlu0 %v5113_v37, %s7393_s26  ;;  %v5107_v3 = vadd.f32 1.0, %v7302_v2  ;;  %v7335_v2 = vld [vmem:[%s9440_s3 + $0x10] sm:$0xff] }
0x3030   :  { %v5108_v9 = vmul.f32 0.5, %v5107_v3  ;;  %v7037_v3 = vld [vmem:[%s9452_s15 + $0x10] sm:$0xff] }
0x3031   :  { %5284 = vmatpush.bf16.msrb.mxu2 %v7037_v3 }
0x3036   :  { %4983 = vrot.lane.b32.xlu0 %v9302_v1, %s7393_s26 }
0x303e   :  { %4849 = vrot.lane.b32.xlu0 %v9278_v45, %s7393_s26 }
0x3046   :  { %4506 = vrot.lane.b32.xlu0 %v9198_v30, %s7393_s26 }
0x304e   :  { %4164 = vrot.lane.b32.xlu0 %v9106_v22, %s7393_s26 }
0x30a0   :  { %v5116_v63 = vpop.permute.xlu0 %5115 }
0x30a1   :  { %v5118_v43 = vadd.f32 %v5116_v63, %v5112_v4  ;;  %v7333_v4 = vld [vmem:[%s9440_s3] sm:$0xff] }
0x30a3   :  { %7303 = vtanh.f32 %v5118_v43  ;;  %v5180_v6 = vrot.slane %v5118_v43, 6  ;;  %v7336_v43 = vld [vmem:[%s9440_s3 + $0x18] sm:$0xff] }
0x30a8   :  { %v4984_v12 = vpop.permute.xlu0 %4983 }
0x30a9   :  { %v7304_v51 = vpop.eup %7303  ;;  %4986 = vst.msk [vmem:[#allocation4 + $0x18] sm:$0x3] %vm2746_vm4, %v4984_v12  ;;  %v7035_v12 = vld [vmem:[%s9452_s15] sm:$0xff] }
0x30aa   :  { %v5120_v1 = vmul.f32 %v7304_v51, %v5108_v9  ;;  %v7036_v9 = vld [vmem:[%s9452_s15 + $0x8] sm:$0xff] }
0x30ab   :  { %5285 = vmatpush.bf16.msrb.mxu2 %v7036_v9 }
0x30ac   :  { %v5128_v45 = vpack.c.bf16 %v5120_v1, %v5120_v1 }
0x30ae   :  { %v5130_v28 = vrot.slane %v5128_v45, 2 }
0x30af   :  { %5286 = vmatpush.bf16.msrb.mxu2 %v7035_v12 }
0x30b0   :  { %v4850_v0 = vpop.permute.xlu0 %4849  ;;  %5131 = vrot.lane.b32.xlu1 %v5130_v28, %s7393_s26 }
0x30b1   :  { %4852 = vst.msk [vmem:[#allocation4 + $0x10] sm:$0x30] %vm2887_vm5, %v4850_v0 }
0x30b8   :  { %v4507_v22 = vpop.permute.xlu0 %4506  ;;  %5052 = vrot.lane.b32.xlu1 %v5050_v38, %s7393_s26 }
0x30b9   :  { %4509 = vst.msk [vmem:[#allocation4 + $0x8] sm:$0xc] %vm2816_vm6, %v4507_v22 }
0x30c0   :  { %v4165_v30 = vpop.permute.xlu0 %4164  ;;  %4710 = vrot.lane.b32.xlu1 %v9246_v60, %s7393_s26 }
0x30c1   :  { %4167 = vst.msk [vmem:[#allocation4] sm:$0x3] %vm2746_vm4, %v4165_v30 }
0x30c8   :  { %4919 = vrot.lane.b32.xlu1 %v9294_v47, %s7393_s26 }
0x30d0   :  { %4576 = vrot.lane.b32.xlu1 %v9214_v62, %s7393_s26 }
0x30d8   :  { %4233 = vrot.lane.b32.xlu1 %v9134_v32, %s7393_s26 }
0x3122   :  { %v5132_v18 = vpop.permute.xlu1 %5131 }
0x3123   :  { %6709 = vmatmul.msk.bf16.vlgmr.msrb.gmra.mxu1 %vm2692_vm3, %v5132_v18  ;;  %6710 = vmatmul.msk.bf16.vlgmr.msra.gmra.mxu3 %vm2692_vm3, %v5132_v18 }
0x312a   :  { %v5053_v11 = vpop.permute.xlu1 %5052 }
0x312b   :  { %5055 = vst.msk [vmem:[#allocation4 + $0x18] sm:$0xc] %vm2816_vm6, %v5053_v11 }
0x3132   :  { %v4711_v60 = vpop.permute.xlu1 %4710 }
0x3133   :  { %4713 = vst.msk [vmem:[#allocation4 + $0x10] sm:$0x3] %vm2746_vm4, %v4711_v60 }
0x313a   :  { %v4920_v41 = vpop.permute.xlu1 %4919 }
0x313b   :  { %4922 = vst.msk [vmem:[#allocation4 + $0x10] sm:$0xc0] %vm2958_vm7, %v4920_v41 }
0x3142   :  { %v4577_v47 = vpop.permute.xlu1 %4576 }
0x3143   :  { %4579 = vst.msk [vmem:[#allocation4 + $0x8] sm:$0x30] %vm2887_vm5, %v4577_v47 }
0x314a   :  { %v4234_v62 = vpop.permute.xlu1 %4233 }
0x314b   :  { %4236 = vst.msk [vmem:[#allocation4] sm:$0xc] %vm2816_vm6, %v4234_v62 }
0x31a0   :  { %v5145_v32 = vpop.f32.mrf.mxu1 }
0x31a1   :  { %v5164_v48 = vrot.slane %v5145_v32, 2 }
0x31a3   :  { %v5168_v55 = vadd.f32 %v5164_v48, %v5126_v13  ;;  %v7056_v48 = vld [vmem:[%s9453_s16] ss:$0 sm:$0xff] }
0x31a5   :  { %v5170_v54 = vmul.f32 0.5, %v5168_v55 }
0x31a6   :  { %v5158_v7 = vpop.f32.mrf.mxu3 }
0x31a7   :  { %7305 = vtanh.f32 %v5170_v54  ;;  %v5165_v52 = vrot.slane %v5158_v7, 2 }
0x31a8   :  { %v5147_v59 = vpop.f32.mrf.mxu1 }
0x31a9   :  { %v5169_v31 = vadd.f32 %v5165_v52, %v5127_v42 }
0x31ab   :  { %7307 = vtanh.f32 %v5169_v31  ;;  %v5175_v44 = vmul.f32 0.5, %v5169_v31 }
0x31ad   :  { %v7306_v25 = vpop.eup %7305  ;;  %7309 = vtanh.f32 %v5175_v44 }
0x31ae   :  { %v5172_v21 = vadd.f32 1.0, %v7306_v25  ;;  %v5160_v15 = vpop.f32.mrf.mxu3  ;;  %v5355_v25 = vld [vmem:[%s9441_s4] sm:$0xff] }
0x31af   :  { %v5357_v15 = vld [vmem:[%s9441_s4 + $0x10] sm:$0xff] }
0x31b0   :  { %v5173_v5 = vmul.f32 0.5, %v5172_v21  ;;  %v5356_v21 = vld [vmem:[%s9441_s4 + $0x8] sm:$0xff] }
0x31b1   :  { %v7308_v26 = vpop.eup %7307 }
0x31b2   :  { %v5183_v24 = vmul.f32 %v7308_v26, %v5173_v5  ;;  %v5182_v38 = vmul.f32 %v5180_v6, %v5173_v5  ;;  %v5358_v6 = vld [vmem:[%s9441_s4 + $0x18] sm:$0xff]  ;;  %s7394_s4 = smov [#allocation8]  }
0x31b3   :  { %v7310_v29 = vpop.eup %7309  ;;  %s5496_s20 = sshll.u32 %s7394_s4, 4  ;;  %s5497_s20 = int_to_ptr.vmem [resolvable:$true] %s5496_s20 }
0x31b4   :  { %5185 = vrot.lane.b32.xlu2 %v5183_v24, %s7393_s26  ;;  %v5177_v35 = vadd.f32 1.0, %v7310_v29 }
0x31b6   :  { %v5178_v8 = vmul.f32 0.5, %v5177_v35 }
0x31bc   :  { %5122 = vrot.lane.b32.xlu2 %v5120_v1, %s7393_s26 }
0x31c4   :  { %4779 = vrot.lane.b32.xlu2 %v9262_v27, %s7393_s26 }
0x31cc   :  { %4437 = vrot.lane.b32.xlu2 %v9182_v46, %s7393_s26 }
0x31d4   :  { %4646 = vrot.lane.b32.xlu2 %v9230_v14, %s7393_s26 }
0x31dc   :  { %4303 = vrot.lane.b32.xlu2 %v9150_v36, %s7393_s26 }
0x320e   :  { %v5186_v49 = vpop.permute.xlu2 %5185 }
0x320f   :  { %v5188_v53 = vadd.f32 %v5186_v49, %v5182_v38 }
0x3211   :  { %7311 = vtanh.f32 %v5188_v53 }
0x3216   :  { %v5123_v56 = vpop.permute.xlu2 %5122 }
0x3217   :  { %v7312_v10 = vpop.eup %7311  ;;  %5125 = vst.msk [vmem:[#allocation4 + $0x18] sm:$0x30] %vm2887_vm5, %v5123_v56 }
0x3218   :  { %v5190_v27 = vmul.f32 %v7312_v10, %v5178_v8 }
0x321a   :  { %5192 = vrot.lane.b32.xlu0 %v5190_v27, %s7393_s26 }
0x321e   :  { %v4780_v46 = vpop.permute.xlu2 %4779 }
0x321f   :  { %4782 = vst.msk [vmem:[#allocation4 + $0x10] sm:$0xc] %vm2816_vm6, %v4780_v46 }
0x3222   :  { %4373 = vrot.lane.b32.xlu0 %v9166_v16, %s7393_s26  ;;  %v7032_v16 = vld [vmem:[%s9451_s14 + $0x8] sm:$0xff]  ;;  %s7396_s14 = smov 8  }
0x3223   :  { %5334 = vmatpush.bf16.msra.mxu1 %v7032_v16 }
0x3226   :  { %v4438_v36 = vpop.permute.xlu2 %4437  ;;  %v5198_v50 = vld [vmem:[#allocation4 + $0x10] sm:$0xff] }
0x3227   :  { %4440 = vst.msk [vmem:[#allocation4 + $0x8] sm:$0x3] %vm2746_vm4, %v4438_v36  ;;  %5335 = vmatpush.bf16.msra.mxu1 %v7031_v20 }
0x322e   :  { %v4647_v14 = vpop.permute.xlu2 %4646 }
0x322f   :  { %4649 = vst.msk [vmem:[#allocation4 + $0x8] sm:$0xc0] %vm2958_vm7, %v4647_v14 }
0x3236   :  { %v4304_v58 = vpop.permute.xlu2 %4303  ;;  %v5197_v61 = vld [vmem:[#allocation4 + $0x8] sm:$0xff] }
0x3237   :  { %4306 = vst.msk [vmem:[#allocation4] sm:$0x30] %vm2887_vm5, %v4304_v58 }
0x328c   :  { %v5193_v19 = vpop.permute.xlu0 %5192 }
0x328d   :  { %5195 = vst.msk [vmem:[#allocation4 + $0x18] sm:$0xc0] %vm2958_vm7, %v5193_v19 }
0x3294   :  { %v4374_v17 = vpop.permute.xlu0 %4373  ;;  %v5199_v34 = vld [vmem:[#allocation4 + $0x18] sm:$0xff] }
0x3295   :  { %4376 = vst.msk [vmem:[#allocation4] sm:$0xc0] %vm2958_vm7, %v4374_v17  ;;  %5212 = vmatpush.msrb.mxu0 %v5199_v34  ;;  %v5230_v63 = vpack.c.bf16 %v5199_v34, %v5198_v50 }
0x3297   :  { %5213 = vmatpush.msrb.mxu0 %v5198_v50 }
0x3299   :  { %5214 = vmatpush.msrb.mxu0 %v5197_v61 }
0x329c   :  { %v5196_v40 = vld [vmem:[#allocation4] sm:$0xff] }
0x329d   :  { %5215 = vmatpush.msrb.mxu0 %v5196_v40  ;;  %v5229_v37 = vpack.c.bf16 %v5197_v61, %v5196_v40 }
0x329e   :  { %6711 = vmatmul.msk.f32.vlgmr.msrb.gmra.mxu0 %vm2596_vm2, %v7333_v4 }
0x329f   :  { %6749 = vmatmul.msk.bf16.vlgmr.msra.gmra.mxu1 %vm2692_vm3, %v5229_v37 }
0x32a6   :  { %6712 = vmatmul.msk.f32.gmra.mxu0 %vm2596_vm2, %v7334_v39 }
0x32ae   :  { %6713 = vmatmul.msk.f32.gmra.mxu0 %vm2596_vm2, %v7335_v2 }
0x32af   :  { %6750 = vmatmul.msk.bf16.gmra.mxu1 %vm2692_vm3, %v5230_v63 }
0x32b6   :  { %6714 = vmatmul.msk.f32.gmra.mxu0 %vm2596_vm2, %v7336_v43 }
0x331b   :  { %v5217_v51 = vpop.f32.mrf.mxu0 }
0x331c   :  { %v5337_v30 = vpop.f32.mrf.mxu1 }
0x3323   :  { %v5220_v1 = vpop.f32.mrf.mxu0 }
0x3324   :  { %v5239_v45 = vpack.c.bf16 %v5220_v1, %v5217_v51  ;;  %v5339_v11 = vpop.f32.mrf.mxu1 }
0x3326   :  { %6731 = vmatmul.msk.bf16.vlgmr.msrb.gmra.mxu2 %vm2692_vm3, %v5239_v45 }
0x332b   :  { %v5223_v28 = vpop.f32.mrf.mxu0 }
0x332c   :  { %v5342_v41 = vpop.f32.mrf.mxu1 }
0x3333   :  { %v5226_v0 = vpop.f32.mrf.mxu0 }
0x3334   :  { %v5240_v22 = vpack.c.bf16 %v5226_v0, %v5223_v28  ;;  %v5344_v62 = vpop.f32.mrf.mxu1 }
0x3336   :  { %6732 = vmatmul.msk.bf16.gmra.mxu2 %vm2692_vm3, %v5240_v22 }
0x33a9   :  { %v5288_v18 = vpop.f32.mrf.mxu2 }
0x33aa   :  { %v5338_v52 = vadd.f32 %v5337_v30, %v5288_v18 }
0x33ac   :  { %v5351_v31 = vadd.f32 %v7056_v48, %v5338_v52 }
0x33b1   :  { %v5290_v60 = vpop.f32.mrf.mxu2 }
0x33b2   :  { %v5340_v54 = vadd.f32 %v5339_v11, %v5290_v60 }
0x33b4   :  { %v5352_v59 = vadd.f32 %v7056_v48, %v5340_v54 }
0x33b9   :  { %v5293_v47 = vpop.f32.mrf.mxu2 }
0x33ba   :  { %v5343_v13 = vadd.f32 %v5342_v41, %v5293_v47 }
0x33bc   :  { %v5353_v42 = vadd.f32 %v7056_v48, %v5343_v13 }
0x33c1   :  { %v5295_v32 = vpop.f32.mrf.mxu2 }
0x33c2   :  { %v5345_v55 = vadd.f32 %v5344_v62, %v5295_v32 }
0x33c4   :  { %v5354_v7 = vadd.f32 %v7056_v48, %v5345_v55 }
0x33c6   :  { %5383 = vmatpush.msrb.mxu3 %v5354_v7 }
0x33c8   :  { %5384 = vmatpush.msrb.mxu3 %v5353_v42 }
0x33ca   :  { %5385 = vmatpush.msrb.mxu3 %v5352_v59 }
0x33cc   :  { %5386 = vmatpush.msrb.mxu3 %v5351_v31 }
0x33cd   :  { %6751 = vmatmul.msk.f32.vlgmr.msrb.gmra.mxu3 %vm2596_vm2, %v5355_v25 }
0x33d5   :  { %6752 = vmatmul.msk.f32.gmra.mxu3 %vm2596_vm2, %v5356_v21 }
0x33dd   :  { %6753 = vmatmul.msk.f32.gmra.mxu3 %vm2596_vm2, %v5357_v15 }
0x33e5   :  { %6754 = vmatmul.msk.f32.gmra.mxu3 %vm2596_vm2, %v5358_v6 }
0x3450   :  { %v5388_v5 = vpop.f32.mrf.mxu3 }
0x3451   :  { %5400 = vmax.xlane.f32.xlu1 %v5388_v5 }
0x3458   :  { %v5391_v26 = vpop.f32.mrf.mxu3 }
0x3459   :  { %5402 = vmax.xlane.f32.xlu2 %v5391_v26 }
0x3460   :  { %v5394_v24 = vpop.f32.mrf.mxu3 }
0x3461   :  { %5404 = vmax.xlane.f32.xlu0 %v5394_v24 }
0x3468   :  { %v5397_v38 = vpop.f32.mrf.mxu3 }
0x3469   :  { %5406 = vmax.xlane.f32.xlu2 %v5397_v38 }
0x34c4   :  { %v5401_v44 = vpop.xlane.xlu1 %5400 }
0x34c5   :  { %v5408_v49 = vsub.f32 %v5388_v5, %v5401_v44 }
0x34c7   :  { %v5412_v29 = vmul.f32 1.442695, %v5408_v49 }
0x34c9   :  { %7313 = vpow2.f32 %v5412_v29 }
0x34cc   :  { %v5403_v53 = vpop.xlane.xlu2 %5402 }
0x34cd   :  { %v5409_v35 = vsub.f32 %v5391_v26, %v5403_v53 }
0x34cf   :  { %v7314_v56 = vpop.eup %7313  ;;  %v5414_v8 = vmul.f32 1.442695, %v5409_v35 }
0x34d0   :  { %5420 = vadd.xlane.f32.xlu1 %v7314_v56 }
0x34d1   :  { %7315 = vpow2.f32 %v5414_v8 }
0x34d4   :  { %v5405_v10 = vpop.xlane.xlu0 %5404 }
0x34d5   :  { %v5410_v27 = vsub.f32 %v5394_v24, %v5405_v10 }
0x34d7   :  { %v7316_v46 = vpop.eup %7315  ;;  %v5416_v36 = vmul.f32 1.442695, %v5410_v27 }
0x34d8   :  { %5422 = vadd.xlane.f32.xlu2 %v7316_v46 }
0x34d9   :  { %7317 = vpow2.f32 %v5416_v36 }
0x34dc   :  { %v5407_v14 = vpop.xlane.xlu2 %5406 }
0x34dd   :  { %v5411_v58 = vsub.f32 %v5397_v38, %v5407_v14 }
0x34df   :  { %v9426_v23 = vpop.eup %7317  ;;  %v5418_v57 = vmul.f32 1.442695, %v5411_v58 }
0x34e0   :  { %5424 = vadd.xlane.f32.xlu0 %v9426_v23 }
0x34e1   :  { %7319 = vpow2.f32 %v5418_v57 }
0x34e7   :  { %v9429_v16 = vpop.eup %7319 }
0x34e8   :  { %5426 = vadd.xlane.f32.xlu1 %v9429_v16 }
0x3543   :  { %v5421_v20 = vpop.xlane.xlu1 %5420 }
0x3544   :  { %7321 = vrcp.f32 %v5421_v20  ;;  %v5439_v33 = vand.u32 2147483648, %v5421_v20  ;;  %v5437_v40 = vand.u32 2147483647, %v5421_v20  ;;  %vm5433_vm9 = vweird.f32 %v5421_v20 }
0x3546   :  { %v5440_v39 = vor.u32 1.1754944e-38, %v5439_v33  ;;  %vm5438_vm11 = vcmp.eq.f32.partialorder %v5437_v40, 8.507059e+37 }
0x354a   :  { %v7322_v19 = vpop.eup %7321 }
0x354b   :  { %v5429_v17 = vmul.f32 %v7322_v19, %v5421_v20  ;;  %v5423_v34 = vpop.xlane.xlu2 %5422  ;;  %vm5434_vm8 = vweird.f32 %v7322_v19 }
0x354c   :  { %7323 = vrcp.f32 %v5423_v34  ;;  %vm5435_vm10 = vmor %vm5433_vm9, %vm5434_vm8  ;;  %v5454_v51 = vand.u32 2147483648, %v5423_v34  ;;  %v5452_v45 = vand.u32 2147483647, %v5423_v34  ;;  %vm5448_vm13 = vweird.f32 %v5423_v34 }
0x354d   :  { %v5430_v50 = vsub.f32 1.0, %v5429_v17 }
0x354e   :  { %v5455_v22 = vor.u32 1.1754944e-38, %v5454_v51  ;;  %vm5453_vm15 = vcmp.eq.f32.partialorder %v5452_v45, 8.507059e+37 }
0x354f   :  { %v5431_v61 = vmul.f32 %v7322_v19, %v5430_v50 }
0x3551   :  { %v5432_v37 = vadd.f32 %v7322_v19, %v5431_v61 }
0x3552   :  { %v7324_v4 = vpop.eup %7323 }
0x3553   :  { %v5436_v63 = vsel %vm5435_vm10, %v7322_v19, %v5432_v37  ;;  %v5444_v2 = vmul.f32 %v7324_v4, %v5423_v34  ;;  %v5425_v43 = vpop.xlane.xlu0 %5424  ;;  %vm5449_vm12 = vweird.f32 %v7324_v4 }
0x3554   :  { %v5441_v3 = vsel %vm5438_vm11, %v5440_v39, %v5436_v63  ;;  %7325 = vrcp.f32 %v5425_v43  ;;  %vm5450_vm14 = vmor %vm5448_vm13, %vm5449_vm12  ;;  %v5469_v62 = vand.u32 2147483648, %v5425_v43  ;;  %v5467_v48 = vand.u32 2147483647, %v5425_v43 }
0x3555   :  { %v5442_v9 = vmul.f32 %v7314_v56, %v5441_v3  ;;  %v5445_v12 = vsub.f32 1.0, %v5444_v2  ;;  %vm5463_vm1 = vweird.f32 %v5425_v43 }
0x3556   :  { %v5470_v54 = vor.u32 1.1754944e-38, %v5469_v62  ;;  %vm5468_vm3 = vcmp.eq.f32.partialorder %v5467_v48, 8.507059e+37 }
0x3557   :  { %5488 = vst [vmem:[#allocation8] sm:$0xff] %v5442_v9  ;;  %v5446_v1 = vmul.f32 %v7324_v4, %v5445_v12 }
0x3559   :  { %v5447_v28 = vadd.f32 %v7324_v4, %v5446_v1 }
0x355a   :  { %v7326_v0 = vpop.eup %7325 }
0x355b   :  { %v5451_v30 = vsel %vm5450_vm14, %v7324_v4, %v5447_v28  ;;  %v5459_v18 = vmul.f32 %v7326_v0, %v5425_v43  ;;  %v5427_v11 = vpop.xlane.xlu1 %5426  ;;  %vm5464_vm0 = vweird.f32 %v7326_v0 }
0x355c   :  { %v5456_v60 = vsel %vm5453_vm15, %v5455_v22, %v5451_v30  ;;  %7327 = vrcp.f32 %v5427_v11  ;;  %vm5465_vm2 = vmor %vm5463_vm1, %vm5464_vm0  ;;  %v5484_v25 = vand.u32 2147483648, %v5427_v11  ;;  %v5482_v15 = vand.u32 2147483647, %v5427_v11 }
0x355d   :  { %v5457_v41 = vmul.f32 %v7316_v46, %v5456_v60  ;;  %v5460_v47 = vsub.f32 1.0, %v5459_v18  ;;  %vm5478_vm5 = vweird.f32 %v5427_v11 }
0x355e   :  { %v5485_v5 = vor.u32 1.1754944e-38, %v5484_v25  ;;  %vm5483_vm7 = vcmp.eq.f32.partialorder %v5482_v15, 8.507059e+37 }
0x355f   :  { %5489 = vst [vmem:[#allocation8 + $0x8] sm:$0xff] %v5457_v41  ;;  %v5461_v32 = vmul.f32 %v7326_v0, %v5460_v47 }
0x3561   :  { %v5462_v13 = vadd.f32 %v7326_v0, %v5461_v32 }
0x3562   :  { %v7328_v55 = vpop.eup %7327 }
0x3563   :  { %v5466_v7 = vsel %vm5465_vm2, %v7326_v0, %v5462_v13  ;;  %v5474_v52 = vmul.f32 %v7328_v55, %v5427_v11  ;;  %vm5479_vm4 = vweird.f32 %v7328_v55 }
0x3564   :  { %v5471_v42 = vsel %vm5468_vm3, %v5470_v54, %v5466_v7  ;;  %vm5480_vm6 = vmor %vm5478_vm5, %vm5479_vm4 }
0x3565   :  { %v5472_v59 = vmul.f32 %v9426_v23, %v5471_v42  ;;  %v5475_v31 = vsub.f32 1.0, %v5474_v52 }
0x3567   :  { %5490 = vst [vmem:[#allocation8 + $0x10] sm:$0xff] %v5472_v59  ;;  %v5476_v21 = vmul.f32 %v7328_v55, %v5475_v31 }
0x3569   :  { %v5477_v6 = vadd.f32 %v7328_v55, %v5476_v21 }
0x356b   :  { %v5481_v26 = vsel %vm5480_vm6, %v7328_v55, %v5477_v6 }
0x356c   :  { %v5486_v24 = vsel %vm5483_vm7, %v5485_v5, %v5481_v26 }
0x356d   :  { %v5487_v38 = vmul.f32 %v9429_v16, %v5486_v24 }
0x356f   :  { %5491 = vst [vmem:[#allocation8 + $0x18] sm:$0xff] %v5487_v38 }
0x3570   :  { %5504 = dma.vmem_to_hbm [thread:$0]  %s5497_s20, 512, %s5499_s22, [#allocation7], %s7395_s11, %s7395_s11, %s7396_s14  }
0x3571   :  { %7387 = dma.done.wait [#allocation7], 512  }
0x3572   :  { %7388 = vsyncadd [#allocation7], 4294966784 }
0x3573   :  { %5509 = vsyncpa [#allocation6], 1 }
0x3574   :  { %5510 = vsyncpa [#allocation7], 1 }

</bundles_post_ra>
